<compile_context>
chip_gen: v5e
topology: v5e:2x2
jax: 0.10.0
libtpu: 0.0.40
codegen_flags: <defaults>
</compile_context>

<pallas_src>
import functools

import jax
import jax.numpy as jnp
from jax.experimental import pallas as pl
from jax.experimental.pallas import tpu as pltpu  # noqa: F401  (TPU backend)

# --- model hyperparameters (match BigramLanguageModel defaults) ---
N_EMBD = 32
BLOCK_SIZE = 10
VOCAB = 9          # action_size
N_HEAD = 8
DEPTH = 6
HEAD_SIZE = N_EMBD // N_HEAD
FF = 4 * N_EMBD
LN_EPS = 1e-5      # PyTorch nn.LayerNorm default
VOCAB_PAD = 128    # lane-dense logits store; sliced back to VOCAB in wrapper
NEG_INF = -1e30    # finite causal-mask fill (avoids inf - inf)


def _layernorm(x, g, b):
    mu = jnp.mean(x, axis=-1, keepdims=True)
    xc = x - mu
    var = jnp.mean(xc * xc, axis=-1, keepdims=True)
    return xc * jax.lax.rsqrt(var + LN_EPS) * g + b


# ----------------------------------------------------------------------------
# fused forward kernel: embed + DEPTH transformer blocks + ln_f + lm_head
# ----------------------------------------------------------------------------
def fused_forward_kernel(
    x_ref, pos_ref, we_ref, be_ref,
    ln1g_ref, ln1b_ref, wqkv_ref, wproj_ref, bproj_ref,
    ln2g_ref, ln2b_ref, w1_ref, b1_ref, w2_ref, b2_ref,
    lnfg_ref, lnfb_ref, wl_ref, bl_ref,
    o_ref,
):
    B, T, C = x_ref.shape
    BT = B * T
    H, HS = N_HEAD, HEAD_SIZE
    scale = C ** (-0.5)  # NOTE: reference scales by n_embd**-0.5 (x.shape[-1])

    # --- embedding: tok_emb = Linear(x); x = tok_emb + pos_emb[:T] ---
    xf = x_ref[...].reshape(BT, C)                                   # flatten batch
    tok = jnp.dot(xf, we_ref[...], preferred_element_type=jnp.float32) + be_ref[...]
    xf = (tok.reshape(B, T, C) + pos_ref[...][None, :, :]).reshape(BT, C)

    # --- causal mask built once, reused across all blocks ---
    row = jax.lax.broadcasted_iota(jnp.int32, (T, T), 0)
    col = jax.lax.broadcasted_iota(jnp.int32, (T, T), 1)
    causal = (col <= row)[None, :, :]                                # (1,T,T)

    for d in range(DEPTH):                                           # static unroll
        # ---------------- multi-head causal self-attention ----------------
        h = _layernorm(xf, ln1g_ref[d], ln1b_ref[d])                 # (BT,C)
        qkv = jnp.dot(h, wqkv_ref[d],
                      preferred_element_type=jnp.float32)            # (BT,3C) fused QKV
        q2 = qkv[:, 0 * C:1 * C]
        k2 = qkv[:, 1 * C:2 * C]
        v2 = qkv[:, 2 * C:3 * C]

        heads = []
        for hi in range(H):   # only QK^T/softmax/PV per head (MXU unrolls batches)
            sl = slice(hi * HS, (hi + 1) * HS)
            qh = q2[:, sl].reshape(B, T, HS)
            kh = k2[:, sl].reshape(B, T, HS)
            vh = v2[:, sl].reshape(B, T, HS)
            wei = jnp.einsum("btx,bux->btu", qh, kh,
                             preferred_element_type=jnp.float32) * scale  # (B,T,T)
            wei = jnp.where(causal, wei, NEG_INF)
            wei = wei - jnp.max(wei, axis=-1, keepdims=True)
            p = jnp.exp(wei)
            p = p * pl.reciprocal(jnp.sum(p, axis=-1, keepdims=True), approx=True)
            # TODO(synk): attention dropout skipped (identity / eval mode)
            oh = jnp.einsum("btu,bux->btx", p, vh,
                            preferred_element_type=jnp.float32)      # (B,T,HS)
            heads.append(oh.reshape(BT, HS))

        cat = jnp.concatenate(heads, axis=-1)                        # (BT,C) concat heads
        sa = jnp.dot(cat, wproj_ref[d],
                     preferred_element_type=jnp.float32) + bproj_ref[d]
        # TODO(synk): projection dropout skipped (identity / eval mode)
        xf = xf + sa

        # ---------------- feed-forward ----------------
        h2 = _layernorm(xf, ln2g_ref[d], ln2b_ref[d])
        ff = jnp.dot(h2, w1_ref[d], preferred_element_type=jnp.float32) + b1_ref[d]
        ff = jnp.maximum(ff, 0.0)                                    # ReLU
        ff = jnp.dot(ff, w2_ref[d], preferred_element_type=jnp.float32) + b2_ref[d]
        # TODO(synk): FF dropout skipped (identity / eval mode)
        xf = xf + ff

    # --- final LayerNorm + lm_head (lane-padded to 128 for a dense store) ---
    hf = _layernorm(xf, lnfg_ref[...], lnfb_ref[...])
    o_ref[...] = jnp.dot(hf, wl_ref[...],
                         preferred_element_type=jnp.float32) + bl_ref[...]


# ----------------------------------------------------------------------------
# parameters (deterministic synthetic init, already in kernel layout)
# ----------------------------------------------------------------------------
def init_params(key):
    std = 0.02
    C = N_EMBD

    def nrm(k, shape):
        return (std * jax.random.normal(k, shape)).astype(jnp.float32)

    ks = jax.random.split(key, 3 + DEPTH)

    wqkv, wproj, w1, w2 = [], [], [], []
    for d in range(DEPTH):
        bk = jax.random.split(ks[3 + d], 6)
        # per-head q/k/v weights stored head-major along columns, fused to (C, 3C)
        wq = nrm(bk[0], (C, C))
        wk = nrm(bk[1], (C, C))
        wv = nrm(bk[2], (C, C))
        wqkv.append(jnp.concatenate([wq, wk, wv], axis=1))
        wproj.append(nrm(bk[3], (C, C)))           # rows match head-concat order
        w1.append(nrm(bk[4], (C, FF)))
        w2.append(nrm(bk[5], (FF, C)))

    wl = nrm(ks[2], (C, VOCAB))
    wl_pad = jnp.zeros((C, VOCAB_PAD), jnp.float32).at[:, :VOCAB].set(wl)

    return {
        "we":   nrm(ks[0], (C, C)),                       # laten_embedding_table (in,out)
        "be":   jnp.zeros((1, C), jnp.float32),
        "pos":  nrm(ks[1], (BLOCK_SIZE, C)),              # position_embedding_table
        "ln1g": jnp.ones((DEPTH, 1, C), jnp.float32),
        "ln1b": jnp.zeros((DEPTH, 1, C), jnp.float32),
        "wqkv": jnp.stack(wqkv),                          # (DEPTH, C, 3C)
        "wproj": jnp.stack(wproj),                        # (DEPTH, C, C)
        "bproj": jnp.zeros((DEPTH, 1, C), jnp.float32),
        "ln2g": jnp.ones((DEPTH, 1, C), jnp.float32),
        "ln2b": jnp.zeros((DEPTH, 1, C), jnp.float32),
        "w1":   jnp.stack(w1),                            # (DEPTH, C, 4C)
        "b1":   jnp.zeros((DEPTH, 1, FF), jnp.float32),
        "w2":   jnp.stack(w2),                            # (DEPTH, 4C, C)
        "b2":   jnp.zeros((DEPTH, 1, C), jnp.float32),
        "lnfg": jnp.ones((1, C), jnp.float32),
        "lnfb": jnp.zeros((1, C), jnp.float32),
        "wl":   wl_pad,                                   # (C, 128) lane-padded
        "bl":   jnp.zeros((1, VOCAB_PAD), jnp.float32),
    }


# ----------------------------------------------------------------------------
# forward pass (targets=None path): returns logits (B, T, vocab)
# ----------------------------------------------------------------------------
@functools.partial(jax.jit, static_argnums=())
def bigram_forward(params, latent_state):
    B, T, C = latent_state.shape

    logits_pad = pl.pallas_call(
        fused_forward_kernel,
        out_shape=jax.ShapeDtypeStruct((B * T, VOCAB_PAD), jnp.float32),
    )(
        latent_state, params["pos"][:T], params["we"], params["be"],
        params["ln1g"], params["ln1b"], params["wqkv"], params["wproj"],
        params["bproj"], params["ln2g"], params["ln2b"],
        params["w1"], params["b1"], params["w2"], params["b2"],
        params["lnfg"], params["lnfb"], params["wl"], params["bl"],
    )
    return logits_pad.reshape(B, T, VOCAB_PAD)[:, :, :VOCAB]


if __name__ == "__main__":
    key = jax.random.PRNGKey(0)
    pkey, xkey = jax.random.split(key)

    B, T = 2, 8  # T <= block_size (10)
    params = init_params(pkey)
    latent_state = jax.random.normal(xkey, (B, T, N_EMBD), dtype=jnp.float32)

    logits = bigram_forward(params, latent_state)
    jax.block_until_ready(logits)
    assert logits.shape == (B, T, VOCAB), logits.shape
    assert bool(jnp.all(jnp.isfinite(logits)))
    print("KERNEL_OK")
</pallas_src>

<mosaic_0001>
module attributes {stable_mosaic.version = 11 : i64} {
  func.func @fused_forward_kernel(%arg0: memref<2x8x32xf32, #tpu.memory_space<vmem>>, %arg1: memref<8x32xf32, #tpu.memory_space<vmem>>, %arg2: memref<32x32xf32, #tpu.memory_space<vmem>>, %arg3: memref<1x32xf32, #tpu.memory_space<vmem>>, %arg4: memref<6x1x32xf32, #tpu.memory_space<vmem>>, %arg5: memref<6x1x32xf32, #tpu.memory_space<vmem>>, %arg6: memref<6x32x96xf32, #tpu.memory_space<vmem>>, %arg7: memref<6x32x32xf32, #tpu.memory_space<vmem>>, %arg8: memref<6x1x32xf32, #tpu.memory_space<vmem>>, %arg9: memref<6x1x32xf32, #tpu.memory_space<vmem>>, %arg10: memref<6x1x32xf32, #tpu.memory_space<vmem>>, %arg11: memref<6x32x128xf32, #tpu.memory_space<vmem>>, %arg12: memref<6x1x128xf32, #tpu.memory_space<vmem>>, %arg13: memref<6x128x32xf32, #tpu.memory_space<vmem>>, %arg14: memref<6x1x32xf32, #tpu.memory_space<vmem>>, %arg15: memref<1x32xf32, #tpu.memory_space<vmem>>, %arg16: memref<1x32xf32, #tpu.memory_space<vmem>>, %arg17: memref<32x128xf32, #tpu.memory_space<vmem>>, %arg18: memref<1x128xf32, #tpu.memory_space<vmem>>, %arg19: memref<16x128xf32, #tpu.memory_space<vmem>>) attributes {dimension_semantics = [], scalar_prefetch = 0 : i64, scratch_operands = 0 : i64, tpu.core_type = #tpu.core_type<tc>} {
    %c0 = arith.constant 0 : index
    %c0_0 = arith.constant 0 : index
    %c0_1 = arith.constant 0 : index
    %0 = vector.load %arg0[%c0, %c0_0, %c0_1] : memref<2x8x32xf32, #tpu.memory_space<vmem>>, vector<2x8x32xf32>
    %1 = vector.shape_cast %0 : vector<2x8x32xf32> to vector<16x32xf32>
    %c0_2 = arith.constant 0 : index
    %c0_3 = arith.constant 0 : index
    %2 = vector.load %arg2[%c0_2, %c0_3] : memref<32x32xf32, #tpu.memory_space<vmem>>, vector<32x32xf32>
    %cst = arith.constant dense<0.000000e+00> : vector<16x32xf32>
    %3 = tpu.matmul %1, %2, %cst {dimension_numbers = #tpu.dot_dimension_numbers<[1], [0], [0], [1], [0, 0, 1, 1], [], []>} : vector<16x32xf32>, vector<32x32xf32>, vector<16x32xf32> -> vector<16x32xf32>
    %c0_4 = arith.constant 0 : index
    %c0_5 = arith.constant 0 : index
    %4 = vector.load %arg3[%c0_4, %c0_5] : memref<1x32xf32, #tpu.memory_space<vmem>>, vector<1x32xf32>
    %5 = vector.broadcast %4 : vector<1x32xf32> to vector<16x32xf32>
    %6 = arith.addf %3, %5 : vector<16x32xf32>
    %7 = vector.shape_cast %6 : vector<16x32xf32> to vector<2x8x32xf32>
    %c0_6 = arith.constant 0 : index
    %c0_7 = arith.constant 0 : index
    %8 = vector.load %arg1[%c0_6, %c0_7] : memref<8x32xf32, #tpu.memory_space<vmem>>, vector<8x32xf32>
    %9 = vector.shape_cast %8 : vector<8x32xf32> to vector<1x8x32xf32>
    %10 = vector.broadcast %9 : vector<1x8x32xf32> to vector<2x8x32xf32>
    %11 = arith.addf %7, %10 : vector<2x8x32xf32>
    %12 = vector.shape_cast %11 : vector<2x8x32xf32> to vector<16x32xf32>
    %13 = tpu.iota {dimensions = array<i32: 0>} : vector<8x8xi32>
    %14 = tpu.iota {dimensions = array<i32: 1>} : vector<8x8xi32>
    %15 = arith.cmpi sle, %14, %13 : vector<8x8xi32>
    %16 = vector.shape_cast %15 : vector<8x8xi1> to vector<1x8x8xi1>
    %c0_8 = arith.constant 0 : index
    %c0_9 = arith.constant 0 : index
    %c0_10 = arith.constant 0 : index
    %17 = vector.load %arg4[%c0_8, %c0_9, %c0_10] : memref<6x1x32xf32, #tpu.memory_space<vmem>>, vector<1x1x32xf32>
    %18 = vector.shape_cast %17 : vector<1x1x32xf32> to vector<1x32xf32>
    %c0_11 = arith.constant 0 : index
    %c0_12 = arith.constant 0 : index
    %c0_13 = arith.constant 0 : index
    %19 = vector.load %arg5[%c0_11, %c0_12, %c0_13] : memref<6x1x32xf32, #tpu.memory_space<vmem>>, vector<1x1x32xf32>
    %20 = vector.shape_cast %19 : vector<1x1x32xf32> to vector<1x32xf32>
    %cst_14 = arith.constant dense<0.000000e+00> : vector<16xf32>
    %21 = vector.multi_reduction <add>, %12, %cst_14 [1] : vector<16x32xf32> to vector<16xf32>
    %22 = vector.shape_cast %21 : vector<16xf32> to vector<16x1xf32>
    %cst_15 = arith.constant 3.200000e+01 : f32
    %23 = vector.broadcast %cst_15 : f32 to vector<16x1xf32>
    %24 = arith.divf %22, %23 : vector<16x1xf32>
    %25 = vector.broadcast %24 : vector<16x1xf32> to vector<16x32xf32>
    %26 = arith.subf %12, %25 : vector<16x32xf32>
    %27 = arith.mulf %26, %26 : vector<16x32xf32>
    %cst_16 = arith.constant dense<0.000000e+00> : vector<16xf32>
    %28 = vector.multi_reduction <add>, %27, %cst_16 [1] : vector<16x32xf32> to vector<16xf32>
    %29 = vector.shape_cast %28 : vector<16xf32> to vector<16x1xf32>
    %cst_17 = arith.constant 3.200000e+01 : f32
    %30 = vector.broadcast %cst_17 : f32 to vector<16x1xf32>
    %31 = arith.divf %29, %30 : vector<16x1xf32>
    %cst_18 = arith.constant 9.99999974E-6 : f32
    %32 = vector.broadcast %cst_18 : f32 to vector<16x1xf32>
    %33 = arith.addf %31, %32 : vector<16x1xf32>
    %34 = math.rsqrt %33 : vector<16x1xf32>
    %35 = vector.broadcast %34 : vector<16x1xf32> to vector<16x32xf32>
    %36 = arith.mulf %26, %35 : vector<16x32xf32>
    %37 = vector.broadcast %18 : vector<1x32xf32> to vector<16x32xf32>
    %38 = arith.mulf %36, %37 : vector<16x32xf32>
    %39 = vector.broadcast %20 : vector<1x32xf32> to vector<16x32xf32>
    %40 = arith.addf %38, %39 : vector<16x32xf32>
    %c0_19 = arith.constant 0 : index
    %c0_20 = arith.constant 0 : index
    %c0_21 = arith.constant 0 : index
    %41 = vector.load %arg6[%c0_19, %c0_20, %c0_21] : memref<6x32x96xf32, #tpu.memory_space<vmem>>, vector<1x32x96xf32>
    %42 = vector.shape_cast %41 : vector<1x32x96xf32> to vector<32x96xf32>
    %cst_22 = arith.constant dense<0.000000e+00> : vector<16x96xf32>
    %43 = tpu.matmul %40, %42, %cst_22 {dimension_numbers = #tpu.dot_dimension_numbers<[1], [0], [0], [1], [0, 0, 1, 1], [], []>} : vector<16x32xf32>, vector<32x96xf32>, vector<16x96xf32> -> vector<16x96xf32>
    %44 = vector.extract_strided_slice %43 {offsets = [0, 0], sizes = [16, 32], strides = [1, 1]} : vector<16x96xf32> to vector<16x32xf32>
    %45 = vector.extract_strided_slice %43 {offsets = [0, 32], sizes = [16, 32], strides = [1, 1]} : vector<16x96xf32> to vector<16x32xf32>
    %46 = vector.extract_strided_slice %43 {offsets = [0, 64], sizes = [16, 32], strides = [1, 1]} : vector<16x96xf32> to vector<16x32xf32>
    %47 = vector.extract_strided_slice %44 {offsets = [0, 0], sizes = [16, 4], strides = [1, 1]} : vector<16x32xf32> to vector<16x4xf32>
    %48 = vector.shape_cast %47 : vector<16x4xf32> to vector<2x8x4xf32>
    %49 = vector.extract_strided_slice %45 {offsets = [0, 0], sizes = [16, 4], strides = [1, 1]} : vector<16x32xf32> to vector<16x4xf32>
    %50 = vector.shape_cast %49 : vector<16x4xf32> to vector<2x8x4xf32>
    %51 = vector.extract_strided_slice %46 {offsets = [0, 0], sizes = [16, 4], strides = [1, 1]} : vector<16x32xf32> to vector<16x4xf32>
    %52 = vector.shape_cast %51 : vector<16x4xf32> to vector<2x8x4xf32>
    "tpu.trace_start"() <{level = 10 : i32, message = "btx,bux->btu"}> : () -> ()
    %cst_23 = arith.constant dense<0.000000e+00> : vector<2x8x8xf32>
    %53 = tpu.matmul %48, %50, %cst_23 {dimension_numbers = #tpu.dot_dimension_numbers<[2], [2], [1], [1], [0, 0, 0, 1, 1, 1], [0], [0]>} : vector<2x8x4xf32>, vector<2x8x4xf32>, vector<2x8x8xf32> -> vector<2x8x8xf32>
    "tpu.trace_stop"() : () -> ()
    %cst_24 = arith.constant 0.176776692 : f32
    %54 = vector.broadcast %cst_24 : f32 to vector<2x8x8xf32>
    %55 = arith.mulf %53, %54 : vector<2x8x8xf32>
    %cst_25 = arith.constant -1.000000e+30 : f32
    %56 = vector.shape_cast %16 : vector<1x8x8xi1> to vector<1x8x8xi1>
    %57 = vector.broadcast %56 : vector<1x8x8xi1> to vector<2x8x8xi1>
    %58 = vector.broadcast %cst_25 : f32 to vector<2x8x8xf32>
    %59 = arith.select %57, %55, %58 : vector<2x8x8xi1>, vector<2x8x8xf32>
    %cst_26 = arith.constant dense<0xFF800000> : vector<2x8xf32>
    %60 = vector.multi_reduction <maximumf>, %59, %cst_26 [2] : vector<2x8x8xf32> to vector<2x8xf32>
    %61 = vector.shape_cast %60 : vector<2x8xf32> to vector<2x8x1xf32>
    %62 = vector.broadcast %61 : vector<2x8x1xf32> to vector<2x8x8xf32>
    %63 = arith.subf %59, %62 : vector<2x8x8xf32>
    %64 = math.exp %63 : vector<2x8x8xf32>
    %cst_27 = arith.constant dense<0.000000e+00> : vector<2x8xf32>
    %65 = vector.multi_reduction <add>, %64, %cst_27 [2] : vector<2x8x8xf32> to vector<2x8xf32>
    %66 = vector.shape_cast %65 : vector<2x8xf32> to vector<2x8x1xf32>
    %67 = tpu.reciprocal %66 {approx = true} : vector<2x8x1xf32> -> vector<2x8x1xf32>
    %68 = vector.broadcast %67 : vector<2x8x1xf32> to vector<2x8x8xf32>
    %69 = arith.mulf %64, %68 : vector<2x8x8xf32>
    "tpu.trace_start"() <{level = 10 : i32, message = "btu,bux->btx"}> : () -> ()
    %cst_28 = arith.constant dense<0.000000e+00> : vector<2x8x4xf32>
    %70 = tpu.matmul %69, %52, %cst_28 {dimension_numbers = #tpu.dot_dimension_numbers<[2], [1], [1], [2], [0, 0, 0, 1, 1, 2], [0], [0]>} : vector<2x8x8xf32>, vector<2x8x4xf32>, vector<2x8x4xf32> -> vector<2x8x4xf32>
    "tpu.trace_stop"() : () -> ()
    %71 = vector.shape_cast %70 : vector<2x8x4xf32> to vector<16x4xf32>
    %72 = vector.extract_strided_slice %44 {offsets = [0, 4], sizes = [16, 4], strides = [1, 1]} : vector<16x32xf32> to vector<16x4xf32>
    %73 = vector.shape_cast %72 : vector<16x4xf32> to vector<2x8x4xf32>
    %74 = vector.extract_strided_slice %45 {offsets = [0, 4], sizes = [16, 4], strides = [1, 1]} : vector<16x32xf32> to vector<16x4xf32>
    %75 = vector.shape_cast %74 : vector<16x4xf32> to vector<2x8x4xf32>
    %76 = vector.extract_strided_slice %46 {offsets = [0, 4], sizes = [16, 4], strides = [1, 1]} : vector<16x32xf32> to vector<16x4xf32>
    %77 = vector.shape_cast %76 : vector<16x4xf32> to vector<2x8x4xf32>
    "tpu.trace_start"() <{level = 10 : i32, message = "btx,bux->btu"}> : () -> ()
    %cst_29 = arith.constant dense<0.000000e+00> : vector<2x8x8xf32>
    %78 = tpu.matmul %73, %75, %cst_29 {dimension_numbers = #tpu.dot_dimension_numbers<[2], [2], [1], [1], [0, 0, 0, 1, 1, 1], [0], [0]>} : vector<2x8x4xf32>, vector<2x8x4xf32>, vector<2x8x8xf32> -> vector<2x8x8xf32>
    "tpu.trace_stop"() : () -> ()
    %cst_30 = arith.constant 0.176776692 : f32
    %79 = vector.broadcast %cst_30 : f32 to vector<2x8x8xf32>
    %80 = arith.mulf %78, %79 : vector<2x8x8xf32>
    %cst_31 = arith.constant -1.000000e+30 : f32
    %81 = vector.shape_cast %16 : vector<1x8x8xi1> to vector<1x8x8xi1>
    %82 = vector.broadcast %81 : vector<1x8x8xi1> to vector<2x8x8xi1>
    %83 = vector.broadcast %cst_31 : f32 to vector<2x8x8xf32>
    %84 = arith.select %82, %80, %83 : vector<2x8x8xi1>, vector<2x8x8xf32>
    %cst_32 = arith.constant dense<0xFF800000> : vector<2x8xf32>
    %85 = vector.multi_reduction <maximumf>, %84, %cst_32 [2] : vector<2x8x8xf32> to vector<2x8xf32>
    %86 = vector.shape_cast %85 : vector<2x8xf32> to vector<2x8x1xf32>
    %87 = vector.broadcast %86 : vector<2x8x1xf32> to vector<2x8x8xf32>
    %88 = arith.subf %84, %87 : vector<2x8x8xf32>
    %89 = math.exp %88 : vector<2x8x8xf32>
    %cst_33 = arith.constant dense<0.000000e+00> : vector<2x8xf32>
    %90 = vector.multi_reduction <add>, %89, %cst_33 [2] : vector<2x8x8xf32> to vector<2x8xf32>
    %91 = vector.shape_cast %90 : vector<2x8xf32> to vector<2x8x1xf32>
    %92 = tpu.reciprocal %91 {approx = true} : vector<2x8x1xf32> -> vector<2x8x1xf32>
    %93 = vector.broadcast %92 : vector<2x8x1xf32> to vector<2x8x8xf32>
    %94 = arith.mulf %89, %93 : vector<2x8x8xf32>
    "tpu.trace_start"() <{level = 10 : i32, message = "btu,bux->btx"}> : () -> ()
    %cst_34 = arith.constant dense<0.000000e+00> : vector<2x8x4xf32>
    %95 = tpu.matmul %94, %77, %cst_34 {dimension_numbers = #tpu.dot_dimension_numbers<[2], [1], [1], [2], [0, 0, 0, 1, 1, 2], [0], [0]>} : vector<2x8x8xf32>, vector<2x8x4xf32>, vector<2x8x4xf32> -> vector<2x8x4xf32>
    "tpu.trace_stop"() : () -> ()
    %96 = vector.shape_cast %95 : vector<2x8x4xf32> to vector<16x4xf32>
    %97 = vector.extract_strided_slice %44 {offsets = [0, 8], sizes = [16, 4], strides = [1, 1]} : vector<16x32xf32> to vector<16x4xf32>
    %98 = vector.shape_cast %97 : vector<16x4xf32> to vector<2x8x4xf32>
    %99 = vector.extract_strided_slice %45 {offsets = [0, 8], sizes = [16, 4], strides = [1, 1]} : vector<16x32xf32> to vector<16x4xf32>
    %100 = vector.shape_cast %99 : vector<16x4xf32> to vector<2x8x4xf32>
    %101 = vector.extract_strided_slice %46 {offsets = [0, 8], sizes = [16, 4], strides = [1, 1]} : vector<16x32xf32> to vector<16x4xf32>
    %102 = vector.shape_cast %101 : vector<16x4xf32> to vector<2x8x4xf32>
    "tpu.trace_start"() <{level = 10 : i32, message = "btx,bux->btu"}> : () -> ()
    %cst_35 = arith.constant dense<0.000000e+00> : vector<2x8x8xf32>
    %103 = tpu.matmul %98, %100, %cst_35 {dimension_numbers = #tpu.dot_dimension_numbers<[2], [2], [1], [1], [0, 0, 0, 1, 1, 1], [0], [0]>} : vector<2x8x4xf32>, vector<2x8x4xf32>, vector<2x8x8xf32> -> vector<2x8x8xf32>
    "tpu.trace_stop"() : () -> ()
    %cst_36 = arith.constant 0.176776692 : f32
    %104 = vector.broadcast %cst_36 : f32 to vector<2x8x8xf32>
    %105 = arith.mulf %103, %104 : vector<2x8x8xf32>
    %cst_37 = arith.constant -1.000000e+30 : f32
    %106 = vector.shape_cast %16 : vector<1x8x8xi1> to vector<1x8x8xi1>
    %107 = vector.broadcast %106 : vector<1x8x8xi1> to vector<2x8x8xi1>
    %108 = vector.broadcast %cst_37 : f32 to vector<2x8x8xf32>
    %109 = arith.select %107, %105, %108 : vector<2x8x8xi1>, vector<2x8x8xf32>
    %cst_38 = arith.constant dense<0xFF800000> : vector<2x8xf32>
    %110 = vector.multi_reduction <maximumf>, %109, %cst_38 [2] : vector<2x8x8xf32> to vector<2x8xf32>
    %111 = vector.shape_cast %110 : vector<2x8xf32> to vector<2x8x1xf32>
    %112 = vector.broadcast %111 : vector<2x8x1xf32> to vector<2x8x8xf32>
    %113 = arith.subf %109, %112 : vector<2x8x8xf32>
    %114 = math.exp %113 : vector<2x8x8xf32>
    %cst_39 = arith.constant dense<0.000000e+00> : vector<2x8xf32>
    %115 = vector.multi_reduction <add>, %114, %cst_39 [2] : vector<2x8x8xf32> to vector<2x8xf32>
    %116 = vector.shape_cast %115 : vector<2x8xf32> to vector<2x8x1xf32>
    %117 = tpu.reciprocal %116 {approx = true} : vector<2x8x1xf32> -> vector<2x8x1xf32>
    %118 = vector.broadcast %117 : vector<2x8x1xf32> to vector<2x8x8xf32>
    %119 = arith.mulf %114, %118 : vector<2x8x8xf32>
    "tpu.trace_start"() <{level = 10 : i32, message = "btu,bux->btx"}> : () -> ()
    %cst_40 = arith.constant dense<0.000000e+00> : vector<2x8x4xf32>
    %120 = tpu.matmul %119, %102, %cst_40 {dimension_numbers = #tpu.dot_dimension_numbers<[2], [1], [1], [2], [0, 0, 0, 1, 1, 2], [0], [0]>} : vector<2x8x8xf32>, vector<2x8x4xf32>, vector<2x8x4xf32> -> vector<2x8x4xf32>
    "tpu.trace_stop"() : () -> ()
    %121 = vector.shape_cast %120 : vector<2x8x4xf32> to vector<16x4xf32>
    %122 = vector.extract_strided_slice %44 {offsets = [0, 12], sizes = [16, 4], strides = [1, 1]} : vector<16x32xf32> to vector<16x4xf32>
    %123 = vector.shape_cast %122 : vector<16x4xf32> to vector<2x8x4xf32>
    %124 = vector.extract_strided_slice %45 {offsets = [0, 12], sizes = [16, 4], strides = [1, 1]} : vector<16x32xf32> to vector<16x4xf32>
    %125 = vector.shape_cast %124 : vector<16x4xf32> to vector<2x8x4xf32>
    %126 = vector.extract_strided_slice %46 {offsets = [0, 12], sizes = [16, 4], strides = [1, 1]} : vector<16x32xf32> to vector<16x4xf32>
    %127 = vector.shape_cast %126 : vector<16x4xf32> to vector<2x8x4xf32>
    "tpu.trace_start"() <{level = 10 : i32, message = "btx,bux->btu"}> : () -> ()
    %cst_41 = arith.constant dense<0.000000e+00> : vector<2x8x8xf32>
    %128 = tpu.matmul %123, %125, %cst_41 {dimension_numbers = #tpu.dot_dimension_numbers<[2], [2], [1], [1], [0, 0, 0, 1, 1, 1], [0], [0]>} : vector<2x8x4xf32>, vector<2x8x4xf32>, vector<2x8x8xf32> -> vector<2x8x8xf32>
    "tpu.trace_stop"() : () -> ()
    %cst_42 = arith.constant 0.176776692 : f32
    %129 = vector.broadcast %cst_42 : f32 to vector<2x8x8xf32>
    %130 = arith.mulf %128, %129 : vector<2x8x8xf32>
    %cst_43 = arith.constant -1.000000e+30 : f32
    %131 = vector.shape_cast %16 : vector<1x8x8xi1> to vector<1x8x8xi1>
    %132 = vector.broadcast %131 : vector<1x8x8xi1> to vector<2x8x8xi1>
    %133 = vector.broadcast %cst_43 : f32 to vector<2x8x8xf32>
    %134 = arith.select %132, %130, %133 : vector<2x8x8xi1>, vector<2x8x8xf32>
    %cst_44 = arith.constant dense<0xFF800000> : vector<2x8xf32>
    %135 = vector.multi_reduction <maximumf>, %134, %cst_44 [2] : vector<2x8x8xf32> to vector<2x8xf32>
    %136 = vector.shape_cast %135 : vector<2x8xf32> to vector<2x8x1xf32>
    %137 = vector.broadcast %136 : vector<2x8x1xf32> to vector<2x8x8xf32>
    %138 = arith.subf %134, %137 : vector<2x8x8xf32>
    %139 = math.exp %138 : vector<2x8x8xf32>
    %cst_45 = arith.constant dense<0.000000e+00> : vector<2x8xf32>
    %140 = vector.multi_reduction <add>, %139, %cst_45 [2] : vector<2x8x8xf32> to vector<2x8xf32>
    %141 = vector.shape_cast %140 : vector<2x8xf32> to vector<2x8x1xf32>
    %142 = tpu.reciprocal %141 {approx = true} : vector<2x8x1xf32> -> vector<2x8x1xf32>
    %143 = vector.broadcast %142 : vector<2x8x1xf32> to vector<2x8x8xf32>
    %144 = arith.mulf %139, %143 : vector<2x8x8xf32>
    "tpu.trace_start"() <{level = 10 : i32, message = "btu,bux->btx"}> : () -> ()
    %cst_46 = arith.constant dense<0.000000e+00> : vector<2x8x4xf32>
    %145 = tpu.matmul %144, %127, %cst_46 {dimension_numbers = #tpu.dot_dimension_numbers<[2], [1], [1], [2], [0, 0, 0, 1, 1, 2], [0], [0]>} : vector<2x8x8xf32>, vector<2x8x4xf32>, vector<2x8x4xf32> -> vector<2x8x4xf32>
    "tpu.trace_stop"() : () -> ()
    %146 = vector.shape_cast %145 : vector<2x8x4xf32> to vector<16x4xf32>
    %147 = vector.extract_strided_slice %44 {offsets = [0, 16], sizes = [16, 4], strides = [1, 1]} : vector<16x32xf32> to vector<16x4xf32>
    %148 = vector.shape_cast %147 : vector<16x4xf32> to vector<2x8x4xf32>
    %149 = vector.extract_strided_slice %45 {offsets = [0, 16], sizes = [16, 4], strides = [1, 1]} : vector<16x32xf32> to vector<16x4xf32>
    %150 = vector.shape_cast %149 : vector<16x4xf32> to vector<2x8x4xf32>
    %151 = vector.extract_strided_slice %46 {offsets = [0, 16], sizes = [16, 4], strides = [1, 1]} : vector<16x32xf32> to vector<16x4xf32>
    %152 = vector.shape_cast %151 : vector<16x4xf32> to vector<2x8x4xf32>
    "tpu.trace_start"() <{level = 10 : i32, message = "btx,bux->btu"}> : () -> ()
    %cst_47 = arith.constant dense<0.000000e+00> : vector<2x8x8xf32>
    %153 = tpu.matmul %148, %150, %cst_47 {dimension_numbers = #tpu.dot_dimension_numbers<[2], [2], [1], [1], [0, 0, 0, 1, 1, 1], [0], [0]>} : vector<2x8x4xf32>, vector<2x8x4xf32>, vector<2x8x8xf32> -> vector<2x8x8xf32>
    "tpu.trace_stop"() : () -> ()
    %cst_48 = arith.constant 0.176776692 : f32
    %154 = vector.broadcast %cst_48 : f32 to vector<2x8x8xf32>
    %155 = arith.mulf %153, %154 : vector<2x8x8xf32>
    %cst_49 = arith.constant -1.000000e+30 : f32
    %156 = vector.shape_cast %16 : vector<1x8x8xi1> to vector<1x8x8xi1>
    %157 = vector.broadcast %156 : vector<1x8x8xi1> to vector<2x8x8xi1>
    %158 = vector.broadcast %cst_49 : f32 to vector<2x8x8xf32>
    %159 = arith.select %157, %155, %158 : vector<2x8x8xi1>, vector<2x8x8xf32>
    %cst_50 = arith.constant dense<0xFF800000> : vector<2x8xf32>
    %160 = vector.multi_reduction <maximumf>, %159, %cst_50 [2] : vector<2x8x8xf32> to vector<2x8xf32>
    %161 = vector.shape_cast %160 : vector<2x8xf32> to vector<2x8x1xf32>
    %162 = vector.broadcast %161 : vector<2x8x1xf32> to vector<2x8x8xf32>
    %163 = arith.subf %159, %162 : vector<2x8x8xf32>
    %164 = math.exp %163 : vector<2x8x8xf32>
    %cst_51 = arith.constant dense<0.000000e+00> : vector<2x8xf32>
    %165 = vector.multi_reduction <add>, %164, %cst_51 [2] : vector<2x8x8xf32> to vector<2x8xf32>
    %166 = vector.shape_cast %165 : vector<2x8xf32> to vector<2x8x1xf32>
    %167 = tpu.reciprocal %166 {approx = true} : vector<2x8x1xf32> -> vector<2x8x1xf32>
    %168 = vector.broadcast %167 : vector<2x8x1xf32> to vector<2x8x8xf32>
    %169 = arith.mulf %164, %168 : vector<2x8x8xf32>
    "tpu.trace_start"() <{level = 10 : i32, message = "btu,bux->btx"}> : () -> ()
    %cst_52 = arith.constant dense<0.000000e+00> : vector<2x8x4xf32>
    %170 = tpu.matmul %169, %152, %cst_52 {dimension_numbers = #tpu.dot_dimension_numbers<[2], [1], [1], [2], [0, 0, 0, 1, 1, 2], [0], [0]>} : vector<2x8x8xf32>, vector<2x8x4xf32>, vector<2x8x4xf32> -> vector<2x8x4xf32>
    "tpu.trace_stop"() : () -> ()
    %171 = vector.shape_cast %170 : vector<2x8x4xf32> to vector<16x4xf32>
    %172 = vector.extract_strided_slice %44 {offsets = [0, 20], sizes = [16, 4], strides = [1, 1]} : vector<16x32xf32> to vector<16x4xf32>
    %173 = vector.shape_cast %172 : vector<16x4xf32> to vector<2x8x4xf32>
    %174 = vector.extract_strided_slice %45 {offsets = [0, 20], sizes = [16, 4], strides = [1, 1]} : vector<16x32xf32> to vector<16x4xf32>
    %175 = vector.shape_cast %174 : vector<16x4xf32> to vector<2x8x4xf32>
    %176 = vector.extract_strided_slice %46 {offsets = [0, 20], sizes = [16, 4], strides = [1, 1]} : vector<16x32xf32> to vector<16x4xf32>
    %177 = vector.shape_cast %176 : vector<16x4xf32> to vector<2x8x4xf32>
    "tpu.trace_start"() <{level = 10 : i32, message = "btx,bux->btu"}> : () -> ()
    %cst_53 = arith.constant dense<0.000000e+00> : vector<2x8x8xf32>
    %178 = tpu.matmul %173, %175, %cst_53 {dimension_numbers = #tpu.dot_dimension_numbers<[2], [2], [1], [1], [0, 0, 0, 1, 1, 1], [0], [0]>} : vector<2x8x4xf32>, vector<2x8x4xf32>, vector<2x8x8xf32> -> vector<2x8x8xf32>
    "tpu.trace_stop"() : () -> ()
    %cst_54 = arith.constant 0.176776692 : f32
    %179 = vector.broadcast %cst_54 : f32 to vector<2x8x8xf32>
    %180 = arith.mulf %178, %179 : vector<2x8x8xf32>
    %cst_55 = arith.constant -1.000000e+30 : f32
    %181 = vector.shape_cast %16 : vector<1x8x8xi1> to vector<1x8x8xi1>
    %182 = vector.broadcast %181 : vector<1x8x8xi1> to vector<2x8x8xi1>
    %183 = vector.broadcast %cst_55 : f32 to vector<2x8x8xf32>
    %184 = arith.select %182, %180, %183 : vector<2x8x8xi1>, vector<2x8x8xf32>
    %cst_56 = arith.constant dense<0xFF800000> : vector<2x8xf32>
    %185 = vector.multi_reduction <maximumf>, %184, %cst_56 [2] : vector<2x8x8xf32> to vector<2x8xf32>
    %186 = vector.shape_cast %185 : vector<2x8xf32> to vector<2x8x1xf32>
    %187 = vector.broadcast %186 : vector<2x8x1xf32> to vector<2x8x8xf32>
    %188 = arith.subf %184, %187 : vector<2x8x8xf32>
    %189 = math.exp %188 : vector<2x8x8xf32>
    %cst_57 = arith.constant dense<0.000000e+00> : vector<2x8xf32>
    %190 = vector.multi_reduction <add>, %189, %cst_57 [2] : vector<2x8x8xf32> to vector<2x8xf32>
    %191 = vector.shape_cast %190 : vector<2x8xf32> to vector<2x8x1xf32>
    %192 = tpu.reciprocal %191 {approx = true} : vector<2x8x1xf32> -> vector<2x8x1xf32>
    %193 = vector.broadcast %192 : vector<2x8x1xf32> to vector<2x8x8xf32>
    %194 = arith.mulf %189, %193 : vector<2x8x8xf32>
    "tpu.trace_start"() <{level = 10 : i32, message = "btu,bux->btx"}> : () -> ()
    %cst_58 = arith.constant dense<0.000000e+00> : vector<2x8x4xf32>
    %195 = tpu.matmul %194, %177, %cst_58 {dimension_numbers = #tpu.dot_dimension_numbers<[2], [1], [1], [2], [0, 0, 0, 1, 1, 2], [0], [0]>} : vector<2x8x8xf32>, vector<2x8x4xf32>, vector<2x8x4xf32> -> vector<2x8x4xf32>
    "tpu.trace_stop"() : () -> ()
    %196 = vector.shape_cast %195 : vector<2x8x4xf32> to vector<16x4xf32>
    %197 = vector.extract_strided_slice %44 {offsets = [0, 24], sizes = [16, 4], strides = [1, 1]} : vector<16x32xf32> to vector<16x4xf32>
    %198 = vector.shape_cast %197 : vector<16x4xf32> to vector<2x8x4xf32>
    %199 = vector.extract_strided_slice %45 {offsets = [0, 24], sizes = [16, 4], strides = [1, 1]} : vector<16x32xf32> to vector<16x4xf32>
    %200 = vector.shape_cast %199 : vector<16x4xf32> to vector<2x8x4xf32>
    %201 = vector.extract_strided_slice %46 {offsets = [0, 24], sizes = [16, 4], strides = [1, 1]} : vector<16x32xf32> to vector<16x4xf32>
    %202 = vector.shape_cast %201 : vector<16x4xf32> to vector<2x8x4xf32>
    "tpu.trace_start"() <{level = 10 : i32, message = "btx,bux->btu"}> : () -> ()
    %cst_59 = arith.constant dense<0.000000e+00> : vector<2x8x8xf32>
    %203 = tpu.matmul %198, %200, %cst_59 {dimension_numbers = #tpu.dot_dimension_numbers<[2], [2], [1], [1], [0, 0, 0, 1, 1, 1], [0], [0]>} : vector<2x8x4xf32>, vector<2x8x4xf32>, vector<2x8x8xf32> -> vector<2x8x8xf32>
    "tpu.trace_stop"() : () -> ()
    %cst_60 = arith.constant 0.176776692 : f32
    %204 = vector.broadcast %cst_60 : f32 to vector<2x8x8xf32>
    %205 = arith.mulf %203, %204 : vector<2x8x8xf32>
    %cst_61 = arith.constant -1.000000e+30 : f32
    %206 = vector.shape_cast %16 : vector<1x8x8xi1> to vector<1x8x8xi1>
    %207 = vector.broadcast %206 : vector<1x8x8xi1> to vector<2x8x8xi1>
    %208 = vector.broadcast %cst_61 : f32 to vector<2x8x8xf32>
    %209 = arith.select %207, %205, %208 : vector<2x8x8xi1>, vector<2x8x8xf32>
    %cst_62 = arith.constant dense<0xFF800000> : vector<2x8xf32>
    %210 = vector.multi_reduction <maximumf>, %209, %cst_62 [2] : vector<2x8x8xf32> to vector<2x8xf32>
    %211 = vector.shape_cast %210 : vector<2x8xf32> to vector<2x8x1xf32>
    %212 = vector.broadcast %211 : vector<2x8x1xf32> to vector<2x8x8xf32>
    %213 = arith.subf %209, %212 : vector<2x8x8xf32>
    %214 = math.exp %213 : vector<2x8x8xf32>
    %cst_63 = arith.constant dense<0.000000e+00> : vector<2x8xf32>
    %215 = vector.multi_reduction <add>, %214, %cst_63 [2] : vector<2x8x8xf32> to vector<2x8xf32>
    %216 = vector.shape_cast %215 : vector<2x8xf32> to vector<2x8x1xf32>
    %217 = tpu.reciprocal %216 {approx = true} : vector<2x8x1xf32> -> vector<2x8x1xf32>
    %218 = vector.broadcast %217 : vector<2x8x1xf32> to vector<2x8x8xf32>
    %219 = arith.mulf %214, %218 : vector<2x8x8xf32>
    "tpu.trace_start"() <{level = 10 : i32, message = "btu,bux->btx"}> : () -> ()
    %cst_64 = arith.constant dense<0.000000e+00> : vector<2x8x4xf32>
    %220 = tpu.matmul %219, %202, %cst_64 {dimension_numbers = #tpu.dot_dimension_numbers<[2], [1], [1], [2], [0, 0, 0, 1, 1, 2], [0], [0]>} : vector<2x8x8xf32>, vector<2x8x4xf32>, vector<2x8x4xf32> -> vector<2x8x4xf32>
    "tpu.trace_stop"() : () -> ()
    %221 = vector.shape_cast %220 : vector<2x8x4xf32> to vector<16x4xf32>
    %222 = vector.extract_strided_slice %44 {offsets = [0, 28], sizes = [16, 4], strides = [1, 1]} : vector<16x32xf32> to vector<16x4xf32>
    %223 = vector.shape_cast %222 : vector<16x4xf32> to vector<2x8x4xf32>
    %224 = vector.extract_strided_slice %45 {offsets = [0, 28], sizes = [16, 4], strides = [1, 1]} : vector<16x32xf32> to vector<16x4xf32>
    %225 = vector.shape_cast %224 : vector<16x4xf32> to vector<2x8x4xf32>
    %226 = vector.extract_strided_slice %46 {offsets = [0, 28], sizes = [16, 4], strides = [1, 1]} : vector<16x32xf32> to vector<16x4xf32>
    %227 = vector.shape_cast %226 : vector<16x4xf32> to vector<2x8x4xf32>
    "tpu.trace_start"() <{level = 10 : i32, message = "btx,bux->btu"}> : () -> ()
    %cst_65 = arith.constant dense<0.000000e+00> : vector<2x8x8xf32>
    %228 = tpu.matmul %223, %225, %cst_65 {dimension_numbers = #tpu.dot_dimension_numbers<[2], [2], [1], [1], [0, 0, 0, 1, 1, 1], [0], [0]>} : vector<2x8x4xf32>, vector<2x8x4xf32>, vector<2x8x8xf32> -> vector<2x8x8xf32>
    "tpu.trace_stop"() : () -> ()
    %cst_66 = arith.constant 0.176776692 : f32
    %229 = vector.broadcast %cst_66 : f32 to vector<2x8x8xf32>
    %230 = arith.mulf %228, %229 : vector<2x8x8xf32>
    %cst_67 = arith.constant -1.000000e+30 : f32
    %231 = vector.shape_cast %16 : vector<1x8x8xi1> to vector<1x8x8xi1>
    %232 = vector.broadcast %231 : vector<1x8x8xi1> to vector<2x8x8xi1>
    %233 = vector.broadcast %cst_67 : f32 to vector<2x8x8xf32>
    %234 = arith.select %232, %230, %233 : vector<2x8x8xi1>, vector<2x8x8xf32>
    %cst_68 = arith.constant dense<0xFF800000> : vector<2x8xf32>
    %235 = vector.multi_reduction <maximumf>, %234, %cst_68 [2] : vector<2x8x8xf32> to vector<2x8xf32>
    %236 = vector.shape_cast %235 : vector<2x8xf32> to vector<2x8x1xf32>
    %237 = vector.broadcast %236 : vector<2x8x1xf32> to vector<2x8x8xf32>
    %238 = arith.subf %234, %237 : vector<2x8x8xf32>
    %239 = math.exp %238 : vector<2x8x8xf32>
    %cst_69 = arith.constant dense<0.000000e+00> : vector<2x8xf32>
    %240 = vector.multi_reduction <add>, %239, %cst_69 [2] : vector<2x8x8xf32> to vector<2x8xf32>
    %241 = vector.shape_cast %240 : vector<2x8xf32> to vector<2x8x1xf32>
    %242 = tpu.reciprocal %241 {approx = true} : vector<2x8x1xf32> -> vector<2x8x1xf32>
    %243 = vector.broadcast %242 : vector<2x8x1xf32> to vector<2x8x8xf32>
    %244 = arith.mulf %239, %243 : vector<2x8x8xf32>
    "tpu.trace_start"() <{level = 10 : i32, message = "btu,bux->btx"}> : () -> ()
    %cst_70 = arith.constant dense<0.000000e+00> : vector<2x8x4xf32>
    %245 = tpu.matmul %244, %227, %cst_70 {dimension_numbers = #tpu.dot_dimension_numbers<[2], [1], [1], [2], [0, 0, 0, 1, 1, 2], [0], [0]>} : vector<2x8x8xf32>, vector<2x8x4xf32>, vector<2x8x4xf32> -> vector<2x8x4xf32>
    "tpu.trace_stop"() : () -> ()
    %246 = vector.shape_cast %245 : vector<2x8x4xf32> to vector<16x4xf32>
    %247 = tpu.concatenate %71, %96, %121, %146, %171, %196, %221, %246 in 1 : vector<16x4xf32>, vector<16x4xf32>, vector<16x4xf32>, vector<16x4xf32>, vector<16x4xf32>, vector<16x4xf32>, vector<16x4xf32>, vector<16x4xf32> -> vector<16x32xf32>
    %c0_71 = arith.constant 0 : index
    %c0_72 = arith.constant 0 : index
    %c0_73 = arith.constant 0 : index
    %248 = vector.load %arg7[%c0_71, %c0_72, %c0_73] : memref<6x32x32xf32, #tpu.memory_space<vmem>>, vector<1x32x32xf32>
    %249 = vector.shape_cast %248 : vector<1x32x32xf32> to vector<32x32xf32>
    %cst_74 = arith.constant dense<0.000000e+00> : vector<16x32xf32>
    %250 = tpu.matmul %247, %249, %cst_74 {dimension_numbers = #tpu.dot_dimension_numbers<[1], [0], [0], [1], [0, 0, 1, 1], [], []>} : vector<16x32xf32>, vector<32x32xf32>, vector<16x32xf32> -> vector<16x32xf32>
    %c0_75 = arith.constant 0 : index
    %c0_76 = arith.constant 0 : index
    %c0_77 = arith.constant 0 : index
    %251 = vector.load %arg8[%c0_75, %c0_76, %c0_77] : memref<6x1x32xf32, #tpu.memory_space<vmem>>, vector<1x1x32xf32>
    %252 = vector.shape_cast %251 : vector<1x1x32xf32> to vector<1x32xf32>
    %253 = vector.broadcast %252 : vector<1x32xf32> to vector<16x32xf32>
    %254 = arith.addf %250, %253 : vector<16x32xf32>
    %255 = arith.addf %12, %254 : vector<16x32xf32>
    %c0_78 = arith.constant 0 : index
    %c0_79 = arith.constant 0 : index
    %c0_80 = arith.constant 0 : index
    %256 = vector.load %arg9[%c0_78, %c0_79, %c0_80] : memref<6x1x32xf32, #tpu.memory_space<vmem>>, vector<1x1x32xf32>
    %257 = vector.shape_cast %256 : vector<1x1x32xf32> to vector<1x32xf32>
    %c0_81 = arith.constant 0 : index
    %c0_82 = arith.constant 0 : index
    %c0_83 = arith.constant 0 : index
    %258 = vector.load %arg10[%c0_81, %c0_82, %c0_83] : memref<6x1x32xf32, #tpu.memory_space<vmem>>, vector<1x1x32xf32>
    %259 = vector.shape_cast %258 : vector<1x1x32xf32> to vector<1x32xf32>
    %cst_84 = arith.constant dense<0.000000e+00> : vector<16xf32>
    %260 = vector.multi_reduction <add>, %255, %cst_84 [1] : vector<16x32xf32> to vector<16xf32>
    %261 = vector.shape_cast %260 : vector<16xf32> to vector<16x1xf32>
    %cst_85 = arith.constant 3.200000e+01 : f32
    %262 = vector.broadcast %cst_85 : f32 to vector<16x1xf32>
    %263 = arith.divf %261, %262 : vector<16x1xf32>
    %264 = vector.broadcast %263 : vector<16x1xf32> to vector<16x32xf32>
    %265 = arith.subf %255, %264 : vector<16x32xf32>
    %266 = arith.mulf %265, %265 : vector<16x32xf32>
    %cst_86 = arith.constant dense<0.000000e+00> : vector<16xf32>
    %267 = vector.multi_reduction <add>, %266, %cst_86 [1] : vector<16x32xf32> to vector<16xf32>
    %268 = vector.shape_cast %267 : vector<16xf32> to vector<16x1xf32>
    %cst_87 = arith.constant 3.200000e+01 : f32
    %269 = vector.broadcast %cst_87 : f32 to vector<16x1xf32>
    %270 = arith.divf %268, %269 : vector<16x1xf32>
    %cst_88 = arith.constant 9.99999974E-6 : f32
    %271 = vector.broadcast %cst_88 : f32 to vector<16x1xf32>
    %272 = arith.addf %270, %271 : vector<16x1xf32>
    %273 = math.rsqrt %272 : vector<16x1xf32>
    %274 = vector.broadcast %273 : vector<16x1xf32> to vector<16x32xf32>
    %275 = arith.mulf %265, %274 : vector<16x32xf32>
    %276 = vector.broadcast %257 : vector<1x32xf32> to vector<16x32xf32>
    %277 = arith.mulf %275, %276 : vector<16x32xf32>
    %278 = vector.broadcast %259 : vector<1x32xf32> to vector<16x32xf32>
    %279 = arith.addf %277, %278 : vector<16x32xf32>
    %c0_89 = arith.constant 0 : index
    %c0_90 = arith.constant 0 : index
    %c0_91 = arith.constant 0 : index
    %280 = vector.load %arg11[%c0_89, %c0_90, %c0_91] : memref<6x32x128xf32, #tpu.memory_space<vmem>>, vector<1x32x128xf32>
    %281 = vector.shape_cast %280 : vector<1x32x128xf32> to vector<32x128xf32>
    %cst_92 = arith.constant dense<0.000000e+00> : vector<16x128xf32>
    %282 = tpu.matmul %279, %281, %cst_92 {dimension_numbers = #tpu.dot_dimension_numbers<[1], [0], [0], [1], [0, 0, 1, 1], [], []>} : vector<16x32xf32>, vector<32x128xf32>, vector<16x128xf32> -> vector<16x128xf32>
    %c0_93 = arith.constant 0 : index
    %c0_94 = arith.constant 0 : index
    %c0_95 = arith.constant 0 : index
    %283 = vector.load %arg12[%c0_93, %c0_94, %c0_95] : memref<6x1x128xf32, #tpu.memory_space<vmem>>, vector<1x1x128xf32>
    %284 = vector.shape_cast %283 : vector<1x1x128xf32> to vector<1x128xf32>
    %285 = vector.broadcast %284 : vector<1x128xf32> to vector<16x128xf32>
    %286 = arith.addf %282, %285 : vector<16x128xf32>
    %cst_96 = arith.constant 0.000000e+00 : f32
    %287 = vector.broadcast %cst_96 : f32 to vector<16x128xf32>
    %288 = arith.maximumf %286, %287 : vector<16x128xf32>
    %c0_97 = arith.constant 0 : index
    %c0_98 = arith.constant 0 : index
    %c0_99 = arith.constant 0 : index
    %289 = vector.load %arg13[%c0_97, %c0_98, %c0_99] : memref<6x128x32xf32, #tpu.memory_space<vmem>>, vector<1x128x32xf32>
    %290 = vector.shape_cast %289 : vector<1x128x32xf32> to vector<128x32xf32>
    %cst_100 = arith.constant dense<0.000000e+00> : vector<16x32xf32>
    %291 = tpu.matmul %288, %290, %cst_100 {dimension_numbers = #tpu.dot_dimension_numbers<[1], [0], [0], [1], [0, 0, 1, 1], [], []>} : vector<16x128xf32>, vector<128x32xf32>, vector<16x32xf32> -> vector<16x32xf32>
    %c0_101 = arith.constant 0 : index
    %c0_102 = arith.constant 0 : index
    %c0_103 = arith.constant 0 : index
    %292 = vector.load %arg14[%c0_101, %c0_102, %c0_103] : memref<6x1x32xf32, #tpu.memory_space<vmem>>, vector<1x1x32xf32>
    %293 = vector.shape_cast %292 : vector<1x1x32xf32> to vector<1x32xf32>
    %294 = vector.broadcast %293 : vector<1x32xf32> to vector<16x32xf32>
    %295 = arith.addf %291, %294 : vector<16x32xf32>
    %296 = arith.addf %255, %295 : vector<16x32xf32>
    %c1 = arith.constant 1 : index
    %c0_104 = arith.constant 0 : index
    %c0_105 = arith.constant 0 : index
    %297 = vector.load %arg4[%c1, %c0_104, %c0_105] : memref<6x1x32xf32, #tpu.memory_space<vmem>>, vector<1x1x32xf32>
    %298 = vector.shape_cast %297 : vector<1x1x32xf32> to vector<1x32xf32>
    %c1_106 = arith.constant 1 : index
    %c0_107 = arith.constant 0 : index
    %c0_108 = arith.constant 0 : index
    %299 = vector.load %arg5[%c1_106, %c0_107, %c0_108] : memref<6x1x32xf32, #tpu.memory_space<vmem>>, vector<1x1x32xf32>
    %300 = vector.shape_cast %299 : vector<1x1x32xf32> to vector<1x32xf32>
    %cst_109 = arith.constant dense<0.000000e+00> : vector<16xf32>
    %301 = vector.multi_reduction <add>, %296, %cst_109 [1] : vector<16x32xf32> to vector<16xf32>
    %302 = vector.shape_cast %301 : vector<16xf32> to vector<16x1xf32>
    %cst_110 = arith.constant 3.200000e+01 : f32
    %303 = vector.broadcast %cst_110 : f32 to vector<16x1xf32>
    %304 = arith.divf %302, %303 : vector<16x1xf32>
    %305 = vector.broadcast %304 : vector<16x1xf32> to vector<16x32xf32>
    %306 = arith.subf %296, %305 : vector<16x32xf32>
    %307 = arith.mulf %306, %306 : vector<16x32xf32>
    %cst_111 = arith.constant dense<0.000000e+00> : vector<16xf32>
    %308 = vector.multi_reduction <add>, %307, %cst_111 [1] : vector<16x32xf32> to vector<16xf32>
    %309 = vector.shape_cast %308 : vector<16xf32> to vector<16x1xf32>
    %cst_112 = arith.constant 3.200000e+01 : f32
    %310 = vector.broadcast %cst_112 : f32 to vector<16x1xf32>
    %311 = arith.divf %309, %310 : vector<16x1xf32>
    %cst_113 = arith.constant 9.99999974E-6 : f32
    %312 = vector.broadcast %cst_113 : f32 to vector<16x1xf32>
    %313 = arith.addf %311, %312 : vector<16x1xf32>
    %314 = math.rsqrt %313 : vector<16x1xf32>
    %315 = vector.broadcast %314 : vector<16x1xf32> to vector<16x32xf32>
    %316 = arith.mulf %306, %315 : vector<16x32xf32>
    %317 = vector.broadcast %298 : vector<1x32xf32> to vector<16x32xf32>
    %318 = arith.mulf %316, %317 : vector<16x32xf32>
    %319 = vector.broadcast %300 : vector<1x32xf32> to vector<16x32xf32>
    %320 = arith.addf %318, %319 : vector<16x32xf32>
    %c1_114 = arith.constant 1 : index
    %c0_115 = arith.constant 0 : index
    %c0_116 = arith.constant 0 : index
    %321 = vector.load %arg6[%c1_114, %c0_115, %c0_116] : memref<6x32x96xf32, #tpu.memory_space<vmem>>, vector<1x32x96xf32>
    %322 = vector.shape_cast %321 : vector<1x32x96xf32> to vector<32x96xf32>
    %cst_117 = arith.constant dense<0.000000e+00> : vector<16x96xf32>
    %323 = tpu.matmul %320, %322, %cst_117 {dimension_numbers = #tpu.dot_dimension_numbers<[1], [0], [0], [1], [0, 0, 1, 1], [], []>} : vector<16x32xf32>, vector<32x96xf32>, vector<16x96xf32> -> vector<16x96xf32>
    %324 = vector.extract_strided_slice %323 {offsets = [0, 0], sizes = [16, 32], strides = [1, 1]} : vector<16x96xf32> to vector<16x32xf32>
    %325 = vector.extract_strided_slice %323 {offsets = [0, 32], sizes = [16, 32], strides = [1, 1]} : vector<16x96xf32> to vector<16x32xf32>
    %326 = vector.extract_strided_slice %323 {offsets = [0, 64], sizes = [16, 32], strides = [1, 1]} : vector<16x96xf32> to vector<16x32xf32>
    %327 = vector.extract_strided_slice %324 {offsets = [0, 0], sizes = [16, 4], strides = [1, 1]} : vector<16x32xf32> to vector<16x4xf32>
    %328 = vector.shape_cast %327 : vector<16x4xf32> to vector<2x8x4xf32>
    %329 = vector.extract_strided_slice %325 {offsets = [0, 0], sizes = [16, 4], strides = [1, 1]} : vector<16x32xf32> to vector<16x4xf32>
    %330 = vector.shape_cast %329 : vector<16x4xf32> to vector<2x8x4xf32>
    %331 = vector.extract_strided_slice %326 {offsets = [0, 0], sizes = [16, 4], strides = [1, 1]} : vector<16x32xf32> to vector<16x4xf32>
    %332 = vector.shape_cast %331 : vector<16x4xf32> to vector<2x8x4xf32>
    "tpu.trace_start"() <{level = 10 : i32, message = "btx,bux->btu"}> : () -> ()
    %cst_118 = arith.constant dense<0.000000e+00> : vector<2x8x8xf32>
    %333 = tpu.matmul %328, %330, %cst_118 {dimension_numbers = #tpu.dot_dimension_numbers<[2], [2], [1], [1], [0, 0, 0, 1, 1, 1], [0], [0]>} : vector<2x8x4xf32>, vector<2x8x4xf32>, vector<2x8x8xf32> -> vector<2x8x8xf32>
    "tpu.trace_stop"() : () -> ()
    %cst_119 = arith.constant 0.176776692 : f32
    %334 = vector.broadcast %cst_119 : f32 to vector<2x8x8xf32>
    %335 = arith.mulf %333, %334 : vector<2x8x8xf32>
    %cst_120 = arith.constant -1.000000e+30 : f32
    %336 = vector.shape_cast %16 : vector<1x8x8xi1> to vector<1x8x8xi1>
    %337 = vector.broadcast %336 : vector<1x8x8xi1> to vector<2x8x8xi1>
    %338 = vector.broadcast %cst_120 : f32 to vector<2x8x8xf32>
    %339 = arith.select %337, %335, %338 : vector<2x8x8xi1>, vector<2x8x8xf32>
    %cst_121 = arith.constant dense<0xFF800000> : vector<2x8xf32>
    %340 = vector.multi_reduction <maximumf>, %339, %cst_121 [2] : vector<2x8x8xf32> to vector<2x8xf32>
    %341 = vector.shape_cast %340 : vector<2x8xf32> to vector<2x8x1xf32>
    %342 = vector.broadcast %341 : vector<2x8x1xf32> to vector<2x8x8xf32>
    %343 = arith.subf %339, %342 : vector<2x8x8xf32>
    %344 = math.exp %343 : vector<2x8x8xf32>
    %cst_122 = arith.constant dense<0.000000e+00> : vector<2x8xf32>
    %345 = vector.multi_reduction <add>, %344, %cst_122 [2] : vector<2x8x8xf32> to vector<2x8xf32>
    %346 = vector.shape_cast %345 : vector<2x8xf32> to vector<2x8x1xf32>
    %347 = tpu.reciprocal %346 {approx = true} : vector<2x8x1xf32> -> vector<2x8x1xf32>
    %348 = vector.broadcast %347 : vector<2x8x1xf32> to vector<2x8x8xf32>
    %349 = arith.mulf %344, %348 : vector<2x8x8xf32>
    "tpu.trace_start"() <{level = 10 : i32, message = "btu,bux->btx"}> : () -> ()
    %cst_123 = arith.constant dense<0.000000e+00> : vector<2x8x4xf32>
    %350 = tpu.matmul %349, %332, %cst_123 {dimension_numbers = #tpu.dot_dimension_numbers<[2], [1], [1], [2], [0, 0, 0, 1, 1, 2], [0], [0]>} : vector<2x8x8xf32>, vector<2x8x4xf32>, vector<2x8x4xf32> -> vector<2x8x4xf32>
    "tpu.trace_stop"() : () -> ()
    %351 = vector.shape_cast %350 : vector<2x8x4xf32> to vector<16x4xf32>
    %352 = vector.extract_strided_slice %324 {offsets = [0, 4], sizes = [16, 4], strides = [1, 1]} : vector<16x32xf32> to vector<16x4xf32>
    %353 = vector.shape_cast %352 : vector<16x4xf32> to vector<2x8x4xf32>
    %354 = vector.extract_strided_slice %325 {offsets = [0, 4], sizes = [16, 4], strides = [1, 1]} : vector<16x32xf32> to vector<16x4xf32>
    %355 = vector.shape_cast %354 : vector<16x4xf32> to vector<2x8x4xf32>
    %356 = vector.extract_strided_slice %326 {offsets = [0, 4], sizes = [16, 4], strides = [1, 1]} : vector<16x32xf32> to vector<16x4xf32>
    %357 = vector.shape_cast %356 : vector<16x4xf32> to vector<2x8x4xf32>
    "tpu.trace_start"() <{level = 10 : i32, message = "btx,bux->btu"}> : () -> ()
    %cst_124 = arith.constant dense<0.000000e+00> : vector<2x8x8xf32>
    %358 = tpu.matmul %353, %355, %cst_124 {dimension_numbers = #tpu.dot_dimension_numbers<[2], [2], [1], [1], [0, 0, 0, 1, 1, 1], [0], [0]>} : vector<2x8x4xf32>, vector<2x8x4xf32>, vector<2x8x8xf32> -> vector<2x8x8xf32>
    "tpu.trace_stop"() : () -> ()
    %cst_125 = arith.constant 0.176776692 : f32
    %359 = vector.broadcast %cst_125 : f32 to vector<2x8x8xf32>
    %360 = arith.mulf %358, %359 : vector<2x8x8xf32>
    %cst_126 = arith.constant -1.000000e+30 : f32
    %361 = vector.shape_cast %16 : vector<1x8x8xi1> to vector<1x8x8xi1>
    %362 = vector.broadcast %361 : vector<1x8x8xi1> to vector<2x8x8xi1>
    %363 = vector.broadcast %cst_126 : f32 to vector<2x8x8xf32>
    %364 = arith.select %362, %360, %363 : vector<2x8x8xi1>, vector<2x8x8xf32>
    %cst_127 = arith.constant dense<0xFF800000> : vector<2x8xf32>
    %365 = vector.multi_reduction <maximumf>, %364, %cst_127 [2] : vector<2x8x8xf32> to vector<2x8xf32>
    %366 = vector.shape_cast %365 : vector<2x8xf32> to vector<2x8x1xf32>
    %367 = vector.broadcast %366 : vector<2x8x1xf32> to vector<2x8x8xf32>
    %368 = arith.subf %364, %367 : vector<2x8x8xf32>
    %369 = math.exp %368 : vector<2x8x8xf32>
    %cst_128 = arith.constant dense<0.000000e+00> : vector<2x8xf32>
    %370 = vector.multi_reduction <add>, %369, %cst_128 [2] : vector<2x8x8xf32> to vector<2x8xf32>
    %371 = vector.shape_cast %370 : vector<2x8xf32> to vector<2x8x1xf32>
    %372 = tpu.reciprocal %371 {approx = true} : vector<2x8x1xf32> -> vector<2x8x1xf32>
    %373 = vector.broadcast %372 : vector<2x8x1xf32> to vector<2x8x8xf32>
    %374 = arith.mulf %369, %373 : vector<2x8x8xf32>
    "tpu.trace_start"() <{level = 10 : i32, message = "btu,bux->btx"}> : () -> ()
    %cst_129 = arith.constant dense<0.000000e+00> : vector<2x8x4xf32>
    %375 = tpu.matmul %374, %357, %cst_129 {dimension_numbers = #tpu.dot_dimension_numbers<[2], [1], [1], [2], [0, 0, 0, 1, 1, 2], [0], [0]>} : vector<2x8x8xf32>, vector<2x8x4xf32>, vector<2x8x4xf32> -> vector<2x8x4xf32>
    "tpu.trace_stop"() : () -> ()
    %376 = vector.shape_cast %375 : vector<2x8x4xf32> to vector<16x4xf32>
    %377 = vector.extract_strided_slice %324 {offsets = [0, 8], sizes = [16, 4], strides = [1, 1]} : vector<16x32xf32> to vector<16x4xf32>
    %378 = vector.shape_cast %377 : vector<16x4xf32> to vector<2x8x4xf32>
    %379 = vector.extract_strided_slice %325 {offsets = [0, 8], sizes = [16, 4], strides = [1, 1]} : vector<16x32xf32> to vector<16x4xf32>
    %380 = vector.shape_cast %379 : vector<16x4xf32> to vector<2x8x4xf32>
    %381 = vector.extract_strided_slice %326 {offsets = [0, 8], sizes = [16, 4], strides = [1, 1]} : vector<16x32xf32> to vector<16x4xf32>
    %382 = vector.shape_cast %381 : vector<16x4xf32> to vector<2x8x4xf32>
    "tpu.trace_start"() <{level = 10 : i32, message = "btx,bux->btu"}> : () -> ()
    %cst_130 = arith.constant dense<0.000000e+00> : vector<2x8x8xf32>
    %383 = tpu.matmul %378, %380, %cst_130 {dimension_numbers = #tpu.dot_dimension_numbers<[2], [2], [1], [1], [0, 0, 0, 1, 1, 1], [0], [0]>} : vector<2x8x4xf32>, vector<2x8x4xf32>, vector<2x8x8xf32> -> vector<2x8x8xf32>
    "tpu.trace_stop"() : () -> ()
    %cst_131 = arith.constant 0.176776692 : f32
    %384 = vector.broadcast %cst_131 : f32 to vector<2x8x8xf32>
    %385 = arith.mulf %383, %384 : vector<2x8x8xf32>
    %cst_132 = arith.constant -1.000000e+30 : f32
    %386 = vector.shape_cast %16 : vector<1x8x8xi1> to vector<1x8x8xi1>
    %387 = vector.broadcast %386 : vector<1x8x8xi1> to vector<2x8x8xi1>
    %388 = vector.broadcast %cst_132 : f32 to vector<2x8x8xf32>
    %389 = arith.select %387, %385, %388 : vector<2x8x8xi1>, vector<2x8x8xf32>
    %cst_133 = arith.constant dense<0xFF800000> : vector<2x8xf32>
    %390 = vector.multi_reduction <maximumf>, %389, %cst_133 [2] : vector<2x8x8xf32> to vector<2x8xf32>
    %391 = vector.shape_cast %390 : vector<2x8xf32> to vector<2x8x1xf32>
    %392 = vector.broadcast %391 : vector<2x8x1xf32> to vector<2x8x8xf32>
    %393 = arith.subf %389, %392 : vector<2x8x8xf32>
    %394 = math.exp %393 : vector<2x8x8xf32>
    %cst_134 = arith.constant dense<0.000000e+00> : vector<2x8xf32>
    %395 = vector.multi_reduction <add>, %394, %cst_134 [2] : vector<2x8x8xf32> to vector<2x8xf32>
    %396 = vector.shape_cast %395 : vector<2x8xf32> to vector<2x8x1xf32>
    %397 = tpu.reciprocal %396 {approx = true} : vector<2x8x1xf32> -> vector<2x8x1xf32>
    %398 = vector.broadcast %397 : vector<2x8x1xf32> to vector<2x8x8xf32>
    %399 = arith.mulf %394, %398 : vector<2x8x8xf32>
    "tpu.trace_start"() <{level = 10 : i32, message = "btu,bux->btx"}> : () -> ()
    %cst_135 = arith.constant dense<0.000000e+00> : vector<2x8x4xf32>
    %400 = tpu.matmul %399, %382, %cst_135 {dimension_numbers = #tpu.dot_dimension_numbers<[2], [1], [1], [2], [0, 0, 0, 1, 1, 2], [0], [0]>} : vector<2x8x8xf32>, vector<2x8x4xf32>, vector<2x8x4xf32> -> vector<2x8x4xf32>
    "tpu.trace_stop"() : () -> ()
    %401 = vector.shape_cast %400 : vector<2x8x4xf32> to vector<16x4xf32>
    %402 = vector.extract_strided_slice %324 {offsets = [0, 12], sizes = [16, 4], strides = [1, 1]} : vector<16x32xf32> to vector<16x4xf32>
    %403 = vector.shape_cast %402 : vector<16x4xf32> to vector<2x8x4xf32>
    %404 = vector.extract_strided_slice %325 {offsets = [0, 12], sizes = [16, 4], strides = [1, 1]} : vector<16x32xf32> to vector<16x4xf32>
    %405 = vector.shape_cast %404 : vector<16x4xf32> to vector<2x8x4xf32>
    %406 = vector.extract_strided_slice %326 {offsets = [0, 12], sizes = [16, 4], strides = [1, 1]} : vector<16x32xf32> to vector<16x4xf32>
    %407 = vector.shape_cast %406 : vector<16x4xf32> to vector<2x8x4xf32>
    "tpu.trace_start"() <{level = 10 : i32, message = "btx,bux->btu"}> : () -> ()
    %cst_136 = arith.constant dense<0.000000e+00> : vector<2x8x8xf32>
    %408 = tpu.matmul %403, %405, %cst_136 {dimension_numbers = #tpu.dot_dimension_numbers<[2], [2], [1], [1], [0, 0, 0, 1, 1, 1], [0], [0]>} : vector<2x8x4xf32>, vector<2x8x4xf32>, vector<2x8x8xf32> -> vector<2x8x8xf32>
    "tpu.trace_stop"() : () -> ()
    %cst_137 = arith.constant 0.176776692 : f32
    %409 = vector.broadcast %cst_137 : f32 to vector<2x8x8xf32>
    %410 = arith.mulf %408, %409 : vector<2x8x8xf32>
    %cst_138 = arith.constant -1.000000e+30 : f32
    %411 = vector.shape_cast %16 : vector<1x8x8xi1> to vector<1x8x8xi1>
    %412 = vector.broadcast %411 : vector<1x8x8xi1> to vector<2x8x8xi1>
    %413 = vector.broadcast %cst_138 : f32 to vector<2x8x8xf32>
    %414 = arith.select %412, %410, %413 : vector<2x8x8xi1>, vector<2x8x8xf32>
    %cst_139 = arith.constant dense<0xFF800000> : vector<2x8xf32>
    %415 = vector.multi_reduction <maximumf>, %414, %cst_139 [2] : vector<2x8x8xf32> to vector<2x8xf32>
    %416 = vector.shape_cast %415 : vector<2x8xf32> to vector<2x8x1xf32>
    %417 = vector.broadcast %416 : vector<2x8x1xf32> to vector<2x8x8xf32>
    %418 = arith.subf %414, %417 : vector<2x8x8xf32>
    %419 = math.exp %418 : vector<2x8x8xf32>
    %cst_140 = arith.constant dense<0.000000e+00> : vector<2x8xf32>
    %420 = vector.multi_reduction <add>, %419, %cst_140 [2] : vector<2x8x8xf32> to vector<2x8xf32>
    %421 = vector.shape_cast %420 : vector<2x8xf32> to vector<2x8x1xf32>
    %422 = tpu.reciprocal %421 {approx = true} : vector<2x8x1xf32> -> vector<2x8x1xf32>
    %423 = vector.broadcast %422 : vector<2x8x1xf32> to vector<2x8x8xf32>
    %424 = arith.mulf %419, %423 : vector<2x8x8xf32>
    "tpu.trace_start"() <{level = 10 : i32, message = "btu,bux->btx"}> : () -> ()
    %cst_141 = arith.constant dense<0.000000e+00> : vector<2x8x4xf32>
    %425 = tpu.matmul %424, %407, %cst_141 {dimension_numbers = #tpu.dot_dimension_numbers<[2], [1], [1], [2], [0, 0, 0, 1, 1, 2], [0], [0]>} : vector<2x8x8xf32>, vector<2x8x4xf32>, vector<2x8x4xf32> -> vector<2x8x4xf32>
    "tpu.trace_stop"() : () -> ()
    %426 = vector.shape_cast %425 : vector<2x8x4xf32> to vector<16x4xf32>
    %427 = vector.extract_strided_slice %324 {offsets = [0, 16], sizes = [16, 4], strides = [1, 1]} : vector<16x32xf32> to vector<16x4xf32>
    %428 = vector.shape_cast %427 : vector<16x4xf32> to vector<2x8x4xf32>
    %429 = vector.extract_strided_slice %325 {offsets = [0, 16], sizes = [16, 4], strides = [1, 1]} : vector<16x32xf32> to vector<16x4xf32>
    %430 = vector.shape_cast %429 : vector<16x4xf32> to vector<2x8x4xf32>
    %431 = vector.extract_strided_slice %326 {offsets = [0, 16], sizes = [16, 4], strides = [1, 1]} : vector<16x32xf32> to vector<16x4xf32>
    %432 = vector.shape_cast %431 : vector<16x4xf32> to vector<2x8x4xf32>
    "tpu.trace_start"() <{level = 10 : i32, message = "btx,bux->btu"}> : () -> ()
    %cst_142 = arith.constant dense<0.000000e+00> : vector<2x8x8xf32>
    %433 = tpu.matmul %428, %430, %cst_142 {dimension_numbers = #tpu.dot_dimension_numbers<[2], [2], [1], [1], [0, 0, 0, 1, 1, 1], [0], [0]>} : vector<2x8x4xf32>, vector<2x8x4xf32>, vector<2x8x8xf32> -> vector<2x8x8xf32>
    "tpu.trace_stop"() : () -> ()
    %cst_143 = arith.constant 0.176776692 : f32
    %434 = vector.broadcast %cst_143 : f32 to vector<2x8x8xf32>
    %435 = arith.mulf %433, %434 : vector<2x8x8xf32>
    %cst_144 = arith.constant -1.000000e+30 : f32
    %436 = vector.shape_cast %16 : vector<1x8x8xi1> to vector<1x8x8xi1>
    %437 = vector.broadcast %436 : vector<1x8x8xi1> to vector<2x8x8xi1>
    %438 = vector.broadcast %cst_144 : f32 to vector<2x8x8xf32>
    %439 = arith.select %437, %435, %438 : vector<2x8x8xi1>, vector<2x8x8xf32>
    %cst_145 = arith.constant dense<0xFF800000> : vector<2x8xf32>
    %440 = vector.multi_reduction <maximumf>, %439, %cst_145 [2] : vector<2x8x8xf32> to vector<2x8xf32>
    %441 = vector.shape_cast %440 : vector<2x8xf32> to vector<2x8x1xf32>
    %442 = vector.broadcast %441 : vector<2x8x1xf32> to vector<2x8x8xf32>
    %443 = arith.subf %439, %442 : vector<2x8x8xf32>
    %444 = math.exp %443 : vector<2x8x8xf32>
    %cst_146 = arith.constant dense<0.000000e+00> : vector<2x8xf32>
    %445 = vector.multi_reduction <add>, %444, %cst_146 [2] : vector<2x8x8xf32> to vector<2x8xf32>
    %446 = vector.shape_cast %445 : vector<2x8xf32> to vector<2x8x1xf32>
    %447 = tpu.reciprocal %446 {approx = true} : vector<2x8x1xf32> -> vector<2x8x1xf32>
    %448 = vector.broadcast %447 : vector<2x8x1xf32> to vector<2x8x8xf32>
    %449 = arith.mulf %444, %448 : vector<2x8x8xf32>
    "tpu.trace_start"() <{level = 10 : i32, message = "btu,bux->btx"}> : () -> ()
    %cst_147 = arith.constant dense<0.000000e+00> : vector<2x8x4xf32>
    %450 = tpu.matmul %449, %432, %cst_147 {dimension_numbers = #tpu.dot_dimension_numbers<[2], [1], [1], [2], [0, 0, 0, 1, 1, 2], [0], [0]>} : vector<2x8x8xf32>, vector<2x8x4xf32>, vector<2x8x4xf32> -> vector<2x8x4xf32>
    "tpu.trace_stop"() : () -> ()
    %451 = vector.shape_cast %450 : vector<2x8x4xf32> to vector<16x4xf32>
    %452 = vector.extract_strided_slice %324 {offsets = [0, 20], sizes = [16, 4], strides = [1, 1]} : vector<16x32xf32> to vector<16x4xf32>
    %453 = vector.shape_cast %452 : vector<16x4xf32> to vector<2x8x4xf32>
    %454 = vector.extract_strided_slice %325 {offsets = [0, 20], sizes = [16, 4], strides = [1, 1]} : vector<16x32xf32> to vector<16x4xf32>
    %455 = vector.shape_cast %454 : vector<16x4xf32> to vector<2x8x4xf32>
    %456 = vector.extract_strided_slice %326 {offsets = [0, 20], sizes = [16, 4], strides = [1, 1]} : vector<16x32xf32> to vector<16x4xf32>
    %457 = vector.shape_cast %456 : vector<16x4xf32> to vector<2x8x4xf32>
    "tpu.trace_start"() <{level = 10 : i32, message = "btx,bux->btu"}> : () -> ()
    %cst_148 = arith.constant dense<0.000000e+00> : vector<2x8x8xf32>
    %458 = tpu.matmul %453, %455, %cst_148 {dimension_numbers = #tpu.dot_dimension_numbers<[2], [2], [1], [1], [0, 0, 0, 1, 1, 1], [0], [0]>} : vector<2x8x4xf32>, vector<2x8x4xf32>, vector<2x8x8xf32> -> vector<2x8x8xf32>
    "tpu.trace_stop"() : () -> ()
    %cst_149 = arith.constant 0.176776692 : f32
    %459 = vector.broadcast %cst_149 : f32 to vector<2x8x8xf32>
    %460 = arith.mulf %458, %459 : vector<2x8x8xf32>
    %cst_150 = arith.constant -1.000000e+30 : f32
    %461 = vector.shape_cast %16 : vector<1x8x8xi1> to vector<1x8x8xi1>
    %462 = vector.broadcast %461 : vector<1x8x8xi1> to vector<2x8x8xi1>
    %463 = vector.broadcast %cst_150 : f32 to vector<2x8x8xf32>
    %464 = arith.select %462, %460, %463 : vector<2x8x8xi1>, vector<2x8x8xf32>
    %cst_151 = arith.constant dense<0xFF800000> : vector<2x8xf32>
    %465 = vector.multi_reduction <maximumf>, %464, %cst_151 [2] : vector<2x8x8xf32> to vector<2x8xf32>
    %466 = vector.shape_cast %465 : vector<2x8xf32> to vector<2x8x1xf32>
    %467 = vector.broadcast %466 : vector<2x8x1xf32> to vector<2x8x8xf32>
    %468 = arith.subf %464, %467 : vector<2x8x8xf32>
    %469 = math.exp %468 : vector<2x8x8xf32>
    %cst_152 = arith.constant dense<0.000000e+00> : vector<2x8xf32>
    %470 = vector.multi_reduction <add>, %469, %cst_152 [2] : vector<2x8x8xf32> to vector<2x8xf32>
    %471 = vector.shape_cast %470 : vector<2x8xf32> to vector<2x8x1xf32>
    %472 = tpu.reciprocal %471 {approx = true} : vector<2x8x1xf32> -> vector<2x8x1xf32>
    %473 = vector.broadcast %472 : vector<2x8x1xf32> to vector<2x8x8xf32>
    %474 = arith.mulf %469, %473 : vector<2x8x8xf32>
    "tpu.trace_start"() <{level = 10 : i32, message = "btu,bux->btx"}> : () -> ()
    %cst_153 = arith.constant dense<0.000000e+00> : vector<2x8x4xf32>
    %475 = tpu.matmul %474, %457, %cst_153 {dimension_numbers = #tpu.dot_dimension_numbers<[2], [1], [1], [2], [0, 0, 0, 1, 1, 2], [0], [0]>} : vector<2x8x8xf32>, vector<2x8x4xf32>, vector<2x8x4xf32> -> vector<2x8x4xf32>
    "tpu.trace_stop"() : () -> ()
    %476 = vector.shape_cast %475 : vector<2x8x4xf32> to vector<16x4xf32>
    %477 = vector.extract_strided_slice %324 {offsets = [0, 24], sizes = [16, 4], strides = [1, 1]} : vector<16x32xf32> to vector<16x4xf32>
    %478 = vector.shape_cast %477 : vector<16x4xf32> to vector<2x8x4xf32>
    %479 = vector.extract_strided_slice %325 {offsets = [0, 24], sizes = [16, 4], strides = [1, 1]} : vector<16x32xf32> to vector<16x4xf32>
    %480 = vector.shape_cast %479 : vector<16x4xf32> to vector<2x8x4xf32>
    %481 = vector.extract_strided_slice %326 {offsets = [0, 24], sizes = [16, 4], strides = [1, 1]} : vector<16x32xf32> to vector<16x4xf32>
    %482 = vector.shape_cast %481 : vector<16x4xf32> to vector<2x8x4xf32>
    "tpu.trace_start"() <{level = 10 : i32, message = "btx,bux->btu"}> : () -> ()
    %cst_154 = arith.constant dense<0.000000e+00> : vector<2x8x8xf32>
    %483 = tpu.matmul %478, %480, %cst_154 {dimension_numbers = #tpu.dot_dimension_numbers<[2], [2], [1], [1], [0, 0, 0, 1, 1, 1], [0], [0]>} : vector<2x8x4xf32>, vector<2x8x4xf32>, vector<2x8x8xf32> -> vector<2x8x8xf32>
    "tpu.trace_stop"() : () -> ()
    %cst_155 = arith.constant 0.176776692 : f32
    %484 = vector.broadcast %cst_155 : f32 to vector<2x8x8xf32>
    %485 = arith.mulf %483, %484 : vector<2x8x8xf32>
    %cst_156 = arith.constant -1.000000e+30 : f32
    %486 = vector.shape_cast %16 : vector<1x8x8xi1> to vector<1x8x8xi1>
    %487 = vector.broadcast %486 : vector<1x8x8xi1> to vector<2x8x8xi1>
    %488 = vector.broadcast %cst_156 : f32 to vector<2x8x8xf32>
    %489 = arith.select %487, %485, %488 : vector<2x8x8xi1>, vector<2x8x8xf32>
    %cst_157 = arith.constant dense<0xFF800000> : vector<2x8xf32>
    %490 = vector.multi_reduction <maximumf>, %489, %cst_157 [2] : vector<2x8x8xf32> to vector<2x8xf32>
    %491 = vector.shape_cast %490 : vector<2x8xf32> to vector<2x8x1xf32>
    %492 = vector.broadcast %491 : vector<2x8x1xf32> to vector<2x8x8xf32>
    %493 = arith.subf %489, %492 : vector<2x8x8xf32>
    %494 = math.exp %493 : vector<2x8x8xf32>
    %cst_158 = arith.constant dense<0.000000e+00> : vector<2x8xf32>
    %495 = vector.multi_reduction <add>, %494, %cst_158 [2] : vector<2x8x8xf32> to vector<2x8xf32>
    %496 = vector.shape_cast %495 : vector<2x8xf32> to vector<2x8x1xf32>
    %497 = tpu.reciprocal %496 {approx = true} : vector<2x8x1xf32> -> vector<2x8x1xf32>
    %498 = vector.broadcast %497 : vector<2x8x1xf32> to vector<2x8x8xf32>
    %499 = arith.mulf %494, %498 : vector<2x8x8xf32>
    "tpu.trace_start"() <{level = 10 : i32, message = "btu,bux->btx"}> : () -> ()
    %cst_159 = arith.constant dense<0.000000e+00> : vector<2x8x4xf32>
    %500 = tpu.matmul %499, %482, %cst_159 {dimension_numbers = #tpu.dot_dimension_numbers<[2], [1], [1], [2], [0, 0, 0, 1, 1, 2], [0], [0]>} : vector<2x8x8xf32>, vector<2x8x4xf32>, vector<2x8x4xf32> -> vector<2x8x4xf32>
    "tpu.trace_stop"() : () -> ()
    %501 = vector.shape_cast %500 : vector<2x8x4xf32> to vector<16x4xf32>
    %502 = vector.extract_strided_slice %324 {offsets = [0, 28], sizes = [16, 4], strides = [1, 1]} : vector<16x32xf32> to vector<16x4xf32>
    %503 = vector.shape_cast %502 : vector<16x4xf32> to vector<2x8x4xf32>
    %504 = vector.extract_strided_slice %325 {offsets = [0, 28], sizes = [16, 4], strides = [1, 1]} : vector<16x32xf32> to vector<16x4xf32>
    %505 = vector.shape_cast %504 : vector<16x4xf32> to vector<2x8x4xf32>
    %506 = vector.extract_strided_slice %326 {offsets = [0, 28], sizes = [16, 4], strides = [1, 1]} : vector<16x32xf32> to vector<16x4xf32>
    %507 = vector.shape_cast %506 : vector<16x4xf32> to vector<2x8x4xf32>
    "tpu.trace_start"() <{level = 10 : i32, message = "btx,bux->btu"}> : () -> ()
    %cst_160 = arith.constant dense<0.000000e+00> : vector<2x8x8xf32>
    %508 = tpu.matmul %503, %505, %cst_160 {dimension_numbers = #tpu.dot_dimension_numbers<[2], [2], [1], [1], [0, 0, 0, 1, 1, 1], [0], [0]>} : vector<2x8x4xf32>, vector<2x8x4xf32>, vector<2x8x8xf32> -> vector<2x8x8xf32>
    "tpu.trace_stop"() : () -> ()
    %cst_161 = arith.constant 0.176776692 : f32
    %509 = vector.broadcast %cst_161 : f32 to vector<2x8x8xf32>
    %510 = arith.mulf %508, %509 : vector<2x8x8xf32>
    %cst_162 = arith.constant -1.000000e+30 : f32
    %511 = vector.shape_cast %16 : vector<1x8x8xi1> to vector<1x8x8xi1>
    %512 = vector.broadcast %511 : vector<1x8x8xi1> to vector<2x8x8xi1>
    %513 = vector.broadcast %cst_162 : f32 to vector<2x8x8xf32>
    %514 = arith.select %512, %510, %513 : vector<2x8x8xi1>, vector<2x8x8xf32>
    %cst_163 = arith.constant dense<0xFF800000> : vector<2x8xf32>
    %515 = vector.multi_reduction <maximumf>, %514, %cst_163 [2] : vector<2x8x8xf32> to vector<2x8xf32>
    %516 = vector.shape_cast %515 : vector<2x8xf32> to vector<2x8x1xf32>
    %517 = vector.broadcast %516 : vector<2x8x1xf32> to vector<2x8x8xf32>
    %518 = arith.subf %514, %517 : vector<2x8x8xf32>
    %519 = math.exp %518 : vector<2x8x8xf32>
    %cst_164 = arith.constant dense<0.000000e+00> : vector<2x8xf32>
    %520 = vector.multi_reduction <add>, %519, %cst_164 [2] : vector<2x8x8xf32> to vector<2x8xf32>
    %521 = vector.shape_cast %520 : vector<2x8xf32> to vector<2x8x1xf32>
    %522 = tpu.reciprocal %521 {approx = true} : vector<2x8x1xf32> -> vector<2x8x1xf32>
    %523 = vector.broadcast %522 : vector<2x8x1xf32> to vector<2x8x8xf32>
    %524 = arith.mulf %519, %523 : vector<2x8x8xf32>
    "tpu.trace_start"() <{level = 10 : i32, message = "btu,bux->btx"}> : () -> ()
    %cst_165 = arith.constant dense<0.000000e+00> : vector<2x8x4xf32>
    %525 = tpu.matmul %524, %507, %cst_165 {dimension_numbers = #tpu.dot_dimension_numbers<[2], [1], [1], [2], [0, 0, 0, 1, 1, 2], [0], [0]>} : vector<2x8x8xf32>, vector<2x8x4xf32>, vector<2x8x4xf32> -> vector<2x8x4xf32>
    "tpu.trace_stop"() : () -> ()
    %526 = vector.shape_cast %525 : vector<2x8x4xf32> to vector<16x4xf32>
    %527 = tpu.concatenate %351, %376, %401, %426, %451, %476, %501, %526 in 1 : vector<16x4xf32>, vector<16x4xf32>, vector<16x4xf32>, vector<16x4xf32>, vector<16x4xf32>, vector<16x4xf32>, vector<16x4xf32>, vector<16x4xf32> -> vector<16x32xf32>
    %c1_166 = arith.constant 1 : index
    %c0_167 = arith.constant 0 : index
    %c0_168 = arith.constant 0 : index
    %528 = vector.load %arg7[%c1_166, %c0_167, %c0_168] : memref<6x32x32xf32, #tpu.memory_space<vmem>>, vector<1x32x32xf32>
    %529 = vector.shape_cast %528 : vector<1x32x32xf32> to vector<32x32xf32>
    %cst_169 = arith.constant dense<0.000000e+00> : vector<16x32xf32>
    %530 = tpu.matmul %527, %529, %cst_169 {dimension_numbers = #tpu.dot_dimension_numbers<[1], [0], [0], [1], [0, 0, 1, 1], [], []>} : vector<16x32xf32>, vector<32x32xf32>, vector<16x32xf32> -> vector<16x32xf32>
    %c1_170 = arith.constant 1 : index
    %c0_171 = arith.constant 0 : index
    %c0_172 = arith.constant 0 : index
    %531 = vector.load %arg8[%c1_170, %c0_171, %c0_172] : memref<6x1x32xf32, #tpu.memory_space<vmem>>, vector<1x1x32xf32>
    %532 = vector.shape_cast %531 : vector<1x1x32xf32> to vector<1x32xf32>
    %533 = vector.broadcast %532 : vector<1x32xf32> to vector<16x32xf32>
    %534 = arith.addf %530, %533 : vector<16x32xf32>
    %535 = arith.addf %296, %534 : vector<16x32xf32>
    %c1_173 = arith.constant 1 : index
    %c0_174 = arith.constant 0 : index
    %c0_175 = arith.constant 0 : index
    %536 = vector.load %arg9[%c1_173, %c0_174, %c0_175] : memref<6x1x32xf32, #tpu.memory_space<vmem>>, vector<1x1x32xf32>
    %537 = vector.shape_cast %536 : vector<1x1x32xf32> to vector<1x32xf32>
    %c1_176 = arith.constant 1 : index
    %c0_177 = arith.constant 0 : index
    %c0_178 = arith.constant 0 : index
    %538 = vector.load %arg10[%c1_176, %c0_177, %c0_178] : memref<6x1x32xf32, #tpu.memory_space<vmem>>, vector<1x1x32xf32>
    %539 = vector.shape_cast %538 : vector<1x1x32xf32> to vector<1x32xf32>
    %cst_179 = arith.constant dense<0.000000e+00> : vector<16xf32>
    %540 = vector.multi_reduction <add>, %535, %cst_179 [1] : vector<16x32xf32> to vector<16xf32>
    %541 = vector.shape_cast %540 : vector<16xf32> to vector<16x1xf32>
    %cst_180 = arith.constant 3.200000e+01 : f32
    %542 = vector.broadcast %cst_180 : f32 to vector<16x1xf32>
    %543 = arith.divf %541, %542 : vector<16x1xf32>
    %544 = vector.broadcast %543 : vector<16x1xf32> to vector<16x32xf32>
    %545 = arith.subf %535, %544 : vector<16x32xf32>
    %546 = arith.mulf %545, %545 : vector<16x32xf32>
    %cst_181 = arith.constant dense<0.000000e+00> : vector<16xf32>
    %547 = vector.multi_reduction <add>, %546, %cst_181 [1] : vector<16x32xf32> to vector<16xf32>
    %548 = vector.shape_cast %547 : vector<16xf32> to vector<16x1xf32>
    %cst_182 = arith.constant 3.200000e+01 : f32
    %549 = vector.broadcast %cst_182 : f32 to vector<16x1xf32>
    %550 = arith.divf %548, %549 : vector<16x1xf32>
    %cst_183 = arith.constant 9.99999974E-6 : f32
    %551 = vector.broadcast %cst_183 : f32 to vector<16x1xf32>
    %552 = arith.addf %550, %551 : vector<16x1xf32>
    %553 = math.rsqrt %552 : vector<16x1xf32>
    %554 = vector.broadcast %553 : vector<16x1xf32> to vector<16x32xf32>
    %555 = arith.mulf %545, %554 : vector<16x32xf32>
    %556 = vector.broadcast %537 : vector<1x32xf32> to vector<16x32xf32>
    %557 = arith.mulf %555, %556 : vector<16x32xf32>
    %558 = vector.broadcast %539 : vector<1x32xf32> to vector<16x32xf32>
    %559 = arith.addf %557, %558 : vector<16x32xf32>
    %c1_184 = arith.constant 1 : index
    %c0_185 = arith.constant 0 : index
    %c0_186 = arith.constant 0 : index
    %560 = vector.load %arg11[%c1_184, %c0_185, %c0_186] : memref<6x32x128xf32, #tpu.memory_space<vmem>>, vector<1x32x128xf32>
    %561 = vector.shape_cast %560 : vector<1x32x128xf32> to vector<32x128xf32>
    %cst_187 = arith.constant dense<0.000000e+00> : vector<16x128xf32>
    %562 = tpu.matmul %559, %561, %cst_187 {dimension_numbers = #tpu.dot_dimension_numbers<[1], [0], [0], [1], [0, 0, 1, 1], [], []>} : vector<16x32xf32>, vector<32x128xf32>, vector<16x128xf32> -> vector<16x128xf32>
    %c1_188 = arith.constant 1 : index
    %c0_189 = arith.constant 0 : index
    %c0_190 = arith.constant 0 : index
    %563 = vector.load %arg12[%c1_188, %c0_189, %c0_190] : memref<6x1x128xf32, #tpu.memory_space<vmem>>, vector<1x1x128xf32>
    %564 = vector.shape_cast %563 : vector<1x1x128xf32> to vector<1x128xf32>
    %565 = vector.broadcast %564 : vector<1x128xf32> to vector<16x128xf32>
    %566 = arith.addf %562, %565 : vector<16x128xf32>
    %cst_191 = arith.constant 0.000000e+00 : f32
    %567 = vector.broadcast %cst_191 : f32 to vector<16x128xf32>
    %568 = arith.maximumf %566, %567 : vector<16x128xf32>
    %c1_192 = arith.constant 1 : index
    %c0_193 = arith.constant 0 : index
    %c0_194 = arith.constant 0 : index
    %569 = vector.load %arg13[%c1_192, %c0_193, %c0_194] : memref<6x128x32xf32, #tpu.memory_space<vmem>>, vector<1x128x32xf32>
    %570 = vector.shape_cast %569 : vector<1x128x32xf32> to vector<128x32xf32>
    %cst_195 = arith.constant dense<0.000000e+00> : vector<16x32xf32>
    %571 = tpu.matmul %568, %570, %cst_195 {dimension_numbers = #tpu.dot_dimension_numbers<[1], [0], [0], [1], [0, 0, 1, 1], [], []>} : vector<16x128xf32>, vector<128x32xf32>, vector<16x32xf32> -> vector<16x32xf32>
    %c1_196 = arith.constant 1 : index
    %c0_197 = arith.constant 0 : index
    %c0_198 = arith.constant 0 : index
    %572 = vector.load %arg14[%c1_196, %c0_197, %c0_198] : memref<6x1x32xf32, #tpu.memory_space<vmem>>, vector<1x1x32xf32>
    %573 = vector.shape_cast %572 : vector<1x1x32xf32> to vector<1x32xf32>
    %574 = vector.broadcast %573 : vector<1x32xf32> to vector<16x32xf32>
    %575 = arith.addf %571, %574 : vector<16x32xf32>
    %576 = arith.addf %535, %575 : vector<16x32xf32>
    %c2 = arith.constant 2 : index
    %c0_199 = arith.constant 0 : index
    %c0_200 = arith.constant 0 : index
    %577 = vector.load %arg4[%c2, %c0_199, %c0_200] : memref<6x1x32xf32, #tpu.memory_space<vmem>>, vector<1x1x32xf32>
    %578 = vector.shape_cast %577 : vector<1x1x32xf32> to vector<1x32xf32>
    %c2_201 = arith.constant 2 : index
    %c0_202 = arith.constant 0 : index
    %c0_203 = arith.constant 0 : index
    %579 = vector.load %arg5[%c2_201, %c0_202, %c0_203] : memref<6x1x32xf32, #tpu.memory_space<vmem>>, vector<1x1x32xf32>
    %580 = vector.shape_cast %579 : vector<1x1x32xf32> to vector<1x32xf32>
    %cst_204 = arith.constant dense<0.000000e+00> : vector<16xf32>
    %581 = vector.multi_reduction <add>, %576, %cst_204 [1] : vector<16x32xf32> to vector<16xf32>
    %582 = vector.shape_cast %581 : vector<16xf32> to vector<16x1xf32>
    %cst_205 = arith.constant 3.200000e+01 : f32
    %583 = vector.broadcast %cst_205 : f32 to vector<16x1xf32>
    %584 = arith.divf %582, %583 : vector<16x1xf32>
    %585 = vector.broadcast %584 : vector<16x1xf32> to vector<16x32xf32>
    %586 = arith.subf %576, %585 : vector<16x32xf32>
    %587 = arith.mulf %586, %586 : vector<16x32xf32>
    %cst_206 = arith.constant dense<0.000000e+00> : vector<16xf32>
    %588 = vector.multi_reduction <add>, %587, %cst_206 [1] : vector<16x32xf32> to vector<16xf32>
    %589 = vector.shape_cast %588 : vector<16xf32> to vector<16x1xf32>
    %cst_207 = arith.constant 3.200000e+01 : f32
    %590 = vector.broadcast %cst_207 : f32 to vector<16x1xf32>
    %591 = arith.divf %589, %590 : vector<16x1xf32>
    %cst_208 = arith.constant 9.99999974E-6 : f32
    %592 = vector.broadcast %cst_208 : f32 to vector<16x1xf32>
    %593 = arith.addf %591, %592 : vector<16x1xf32>
    %594 = math.rsqrt %593 : vector<16x1xf32>
    %595 = vector.broadcast %594 : vector<16x1xf32> to vector<16x32xf32>
    %596 = arith.mulf %586, %595 : vector<16x32xf32>
    %597 = vector.broadcast %578 : vector<1x32xf32> to vector<16x32xf32>
    %598 = arith.mulf %596, %597 : vector<16x32xf32>
    %599 = vector.broadcast %580 : vector<1x32xf32> to vector<16x32xf32>
    %600 = arith.addf %598, %599 : vector<16x32xf32>
    %c2_209 = arith.constant 2 : index
    %c0_210 = arith.constant 0 : index
    %c0_211 = arith.constant 0 : index
    %601 = vector.load %arg6[%c2_209, %c0_210, %c0_211] : memref<6x32x96xf32, #tpu.memory_space<vmem>>, vector<1x32x96xf32>
    %602 = vector.shape_cast %601 : vector<1x32x96xf32> to vector<32x96xf32>
    %cst_212 = arith.constant dense<0.000000e+00> : vector<16x96xf32>
    %603 = tpu.matmul %600, %602, %cst_212 {dimension_numbers = #tpu.dot_dimension_numbers<[1], [0], [0], [1], [0, 0, 1, 1], [], []>} : vector<16x32xf32>, vector<32x96xf32>, vector<16x96xf32> -> vector<16x96xf32>
    %604 = vector.extract_strided_slice %603 {offsets = [0, 0], sizes = [16, 32], strides = [1, 1]} : vector<16x96xf32> to vector<16x32xf32>
    %605 = vector.extract_strided_slice %603 {offsets = [0, 32], sizes = [16, 32], strides = [1, 1]} : vector<16x96xf32> to vector<16x32xf32>
    %606 = vector.extract_strided_slice %603 {offsets = [0, 64], sizes = [16, 32], strides = [1, 1]} : vector<16x96xf32> to vector<16x32xf32>
    %607 = vector.extract_strided_slice %604 {offsets = [0, 0], sizes = [16, 4], strides = [1, 1]} : vector<16x32xf32> to vector<16x4xf32>
    %608 = vector.shape_cast %607 : vector<16x4xf32> to vector<2x8x4xf32>
    %609 = vector.extract_strided_slice %605 {offsets = [0, 0], sizes = [16, 4], strides = [1, 1]} : vector<16x32xf32> to vector<16x4xf32>
    %610 = vector.shape_cast %609 : vector<16x4xf32> to vector<2x8x4xf32>
    %611 = vector.extract_strided_slice %606 {offsets = [0, 0], sizes = [16, 4], strides = [1, 1]} : vector<16x32xf32> to vector<16x4xf32>
    %612 = vector.shape_cast %611 : vector<16x4xf32> to vector<2x8x4xf32>
    "tpu.trace_start"() <{level = 10 : i32, message = "btx,bux->btu"}> : () -> ()
    %cst_213 = arith.constant dense<0.000000e+00> : vector<2x8x8xf32>
    %613 = tpu.matmul %608, %610, %cst_213 {dimension_numbers = #tpu.dot_dimension_numbers<[2], [2], [1], [1], [0, 0, 0, 1, 1, 1], [0], [0]>} : vector<2x8x4xf32>, vector<2x8x4xf32>, vector<2x8x8xf32> -> vector<2x8x8xf32>
    "tpu.trace_stop"() : () -> ()
    %cst_214 = arith.constant 0.176776692 : f32
    %614 = vector.broadcast %cst_214 : f32 to vector<2x8x8xf32>
    %615 = arith.mulf %613, %614 : vector<2x8x8xf32>
    %cst_215 = arith.constant -1.000000e+30 : f32
    %616 = vector.shape_cast %16 : vector<1x8x8xi1> to vector<1x8x8xi1>
    %617 = vector.broadcast %616 : vector<1x8x8xi1> to vector<2x8x8xi1>
    %618 = vector.broadcast %cst_215 : f32 to vector<2x8x8xf32>
    %619 = arith.select %617, %615, %618 : vector<2x8x8xi1>, vector<2x8x8xf32>
    %cst_216 = arith.constant dense<0xFF800000> : vector<2x8xf32>
    %620 = vector.multi_reduction <maximumf>, %619, %cst_216 [2] : vector<2x8x8xf32> to vector<2x8xf32>
    %621 = vector.shape_cast %620 : vector<2x8xf32> to vector<2x8x1xf32>
    %622 = vector.broadcast %621 : vector<2x8x1xf32> to vector<2x8x8xf32>
    %623 = arith.subf %619, %622 : vector<2x8x8xf32>
    %624 = math.exp %623 : vector<2x8x8xf32>
    %cst_217 = arith.constant dense<0.000000e+00> : vector<2x8xf32>
    %625 = vector.multi_reduction <add>, %624, %cst_217 [2] : vector<2x8x8xf32> to vector<2x8xf32>
    %626 = vector.shape_cast %625 : vector<2x8xf32> to vector<2x8x1xf32>
    %627 = tpu.reciprocal %626 {approx = true} : vector<2x8x1xf32> -> vector<2x8x1xf32>
    %628 = vector.broadcast %627 : vector<2x8x1xf32> to vector<2x8x8xf32>
    %629 = arith.mulf %624, %628 : vector<2x8x8xf32>
    "tpu.trace_start"() <{level = 10 : i32, message = "btu,bux->btx"}> : () -> ()
    %cst_218 = arith.constant dense<0.000000e+00> : vector<2x8x4xf32>
    %630 = tpu.matmul %629, %612, %cst_218 {dimension_numbers = #tpu.dot_dimension_numbers<[2], [1], [1], [2], [0, 0, 0, 1, 1, 2], [0], [0]>} : vector<2x8x8xf32>, vector<2x8x4xf32>, vector<2x8x4xf32> -> vector<2x8x4xf32>
    "tpu.trace_stop"() : () -> ()
    %631 = vector.shape_cast %630 : vector<2x8x4xf32> to vector<16x4xf32>
    %632 = vector.extract_strided_slice %604 {offsets = [0, 4], sizes = [16, 4], strides = [1, 1]} : vector<16x32xf32> to vector<16x4xf32>
    %633 = vector.shape_cast %632 : vector<16x4xf32> to vector<2x8x4xf32>
    %634 = vector.extract_strided_slice %605 {offsets = [0, 4], sizes = [16, 4], strides = [1, 1]} : vector<16x32xf32> to vector<16x4xf32>
    %635 = vector.shape_cast %634 : vector<16x4xf32> to vector<2x8x4xf32>
    %636 = vector.extract_strided_slice %606 {offsets = [0, 4], sizes = [16, 4], strides = [1, 1]} : vector<16x32xf32> to vector<16x4xf32>
    %637 = vector.shape_cast %636 : vector<16x4xf32> to vector<2x8x4xf32>
    "tpu.trace_start"() <{level = 10 : i32, message = "btx,bux->btu"}> : () -> ()
    %cst_219 = arith.constant dense<0.000000e+00> : vector<2x8x8xf32>
    %638 = tpu.matmul %633, %635, %cst_219 {dimension_numbers = #tpu.dot_dimension_numbers<[2], [2], [1], [1], [0, 0, 0, 1, 1, 1], [0], [0]>} : vector<2x8x4xf32>, vector<2x8x4xf32>, vector<2x8x8xf32> -> vector<2x8x8xf32>
    "tpu.trace_stop"() : () -> ()
    %cst_220 = arith.constant 0.176776692 : f32
    %639 = vector.broadcast %cst_220 : f32 to vector<2x8x8xf32>
    %640 = arith.mulf %638, %639 : vector<2x8x8xf32>
    %cst_221 = arith.constant -1.000000e+30 : f32
    %641 = vector.shape_cast %16 : vector<1x8x8xi1> to vector<1x8x8xi1>
    %642 = vector.broadcast %641 : vector<1x8x8xi1> to vector<2x8x8xi1>
    %643 = vector.broadcast %cst_221 : f32 to vector<2x8x8xf32>
    %644 = arith.select %642, %640, %643 : vector<2x8x8xi1>, vector<2x8x8xf32>
    %cst_222 = arith.constant dense<0xFF800000> : vector<2x8xf32>
    %645 = vector.multi_reduction <maximumf>, %644, %cst_222 [2] : vector<2x8x8xf32> to vector<2x8xf32>
    %646 = vector.shape_cast %645 : vector<2x8xf32> to vector<2x8x1xf32>
    %647 = vector.broadcast %646 : vector<2x8x1xf32> to vector<2x8x8xf32>
    %648 = arith.subf %644, %647 : vector<2x8x8xf32>
    %649 = math.exp %648 : vector<2x8x8xf32>
    %cst_223 = arith.constant dense<0.000000e+00> : vector<2x8xf32>
    %650 = vector.multi_reduction <add>, %649, %cst_223 [2] : vector<2x8x8xf32> to vector<2x8xf32>
    %651 = vector.shape_cast %650 : vector<2x8xf32> to vector<2x8x1xf32>
    %652 = tpu.reciprocal %651 {approx = true} : vector<2x8x1xf32> -> vector<2x8x1xf32>
    %653 = vector.broadcast %652 : vector<2x8x1xf32> to vector<2x8x8xf32>
    %654 = arith.mulf %649, %653 : vector<2x8x8xf32>
    "tpu.trace_start"() <{level = 10 : i32, message = "btu,bux->btx"}> : () -> ()
    %cst_224 = arith.constant dense<0.000000e+00> : vector<2x8x4xf32>
    %655 = tpu.matmul %654, %637, %cst_224 {dimension_numbers = #tpu.dot_dimension_numbers<[2], [1], [1], [2], [0, 0, 0, 1, 1, 2], [0], [0]>} : vector<2x8x8xf32>, vector<2x8x4xf32>, vector<2x8x4xf32> -> vector<2x8x4xf32>
    "tpu.trace_stop"() : () -> ()
    %656 = vector.shape_cast %655 : vector<2x8x4xf32> to vector<16x4xf32>
    %657 = vector.extract_strided_slice %604 {offsets = [0, 8], sizes = [16, 4], strides = [1, 1]} : vector<16x32xf32> to vector<16x4xf32>
    %658 = vector.shape_cast %657 : vector<16x4xf32> to vector<2x8x4xf32>
    %659 = vector.extract_strided_slice %605 {offsets = [0, 8], sizes = [16, 4], strides = [1, 1]} : vector<16x32xf32> to vector<16x4xf32>
    %660 = vector.shape_cast %659 : vector<16x4xf32> to vector<2x8x4xf32>
    %661 = vector.extract_strided_slice %606 {offsets = [0, 8], sizes = [16, 4], strides = [1, 1]} : vector<16x32xf32> to vector<16x4xf32>
    %662 = vector.shape_cast %661 : vector<16x4xf32> to vector<2x8x4xf32>
    "tpu.trace_start"() <{level = 10 : i32, message = "btx,bux->btu"}> : () -> ()
    %cst_225 = arith.constant dense<0.000000e+00> : vector<2x8x8xf32>
    %663 = tpu.matmul %658, %660, %cst_225 {dimension_numbers = #tpu.dot_dimension_numbers<[2], [2], [1], [1], [0, 0, 0, 1, 1, 1], [0], [0]>} : vector<2x8x4xf32>, vector<2x8x4xf32>, vector<2x8x8xf32> -> vector<2x8x8xf32>
    "tpu.trace_stop"() : () -> ()
    %cst_226 = arith.constant 0.176776692 : f32
    %664 = vector.broadcast %cst_226 : f32 to vector<2x8x8xf32>
    %665 = arith.mulf %663, %664 : vector<2x8x8xf32>
    %cst_227 = arith.constant -1.000000e+30 : f32
    %666 = vector.shape_cast %16 : vector<1x8x8xi1> to vector<1x8x8xi1>
    %667 = vector.broadcast %666 : vector<1x8x8xi1> to vector<2x8x8xi1>
    %668 = vector.broadcast %cst_227 : f32 to vector<2x8x8xf32>
    %669 = arith.select %667, %665, %668 : vector<2x8x8xi1>, vector<2x8x8xf32>
    %cst_228 = arith.constant dense<0xFF800000> : vector<2x8xf32>
    %670 = vector.multi_reduction <maximumf>, %669, %cst_228 [2] : vector<2x8x8xf32> to vector<2x8xf32>
    %671 = vector.shape_cast %670 : vector<2x8xf32> to vector<2x8x1xf32>
    %672 = vector.broadcast %671 : vector<2x8x1xf32> to vector<2x8x8xf32>
    %673 = arith.subf %669, %672 : vector<2x8x8xf32>
    %674 = math.exp %673 : vector<2x8x8xf32>
    %cst_229 = arith.constant dense<0.000000e+00> : vector<2x8xf32>
    %675 = vector.multi_reduction <add>, %674, %cst_229 [2] : vector<2x8x8xf32> to vector<2x8xf32>
    %676 = vector.shape_cast %675 : vector<2x8xf32> to vector<2x8x1xf32>
    %677 = tpu.reciprocal %676 {approx = true} : vector<2x8x1xf32> -> vector<2x8x1xf32>
    %678 = vector.broadcast %677 : vector<2x8x1xf32> to vector<2x8x8xf32>
    %679 = arith.mulf %674, %678 : vector<2x8x8xf32>
    "tpu.trace_start"() <{level = 10 : i32, message = "btu,bux->btx"}> : () -> ()
    %cst_230 = arith.constant dense<0.000000e+00> : vector<2x8x4xf32>
    %680 = tpu.matmul %679, %662, %cst_230 {dimension_numbers = #tpu.dot_dimension_numbers<[2], [1], [1], [2], [0, 0, 0, 1, 1, 2], [0], [0]>} : vector<2x8x8xf32>, vector<2x8x4xf32>, vector<2x8x4xf32> -> vector<2x8x4xf32>
    "tpu.trace_stop"() : () -> ()
    %681 = vector.shape_cast %680 : vector<2x8x4xf32> to vector<16x4xf32>
    %682 = vector.extract_strided_slice %604 {offsets = [0, 12], sizes = [16, 4], strides = [1, 1]} : vector<16x32xf32> to vector<16x4xf32>
    %683 = vector.shape_cast %682 : vector<16x4xf32> to vector<2x8x4xf32>
    %684 = vector.extract_strided_slice %605 {offsets = [0, 12], sizes = [16, 4], strides = [1, 1]} : vector<16x32xf32> to vector<16x4xf32>
    %685 = vector.shape_cast %684 : vector<16x4xf32> to vector<2x8x4xf32>
    %686 = vector.extract_strided_slice %606 {offsets = [0, 12], sizes = [16, 4], strides = [1, 1]} : vector<16x32xf32> to vector<16x4xf32>
    %687 = vector.shape_cast %686 : vector<16x4xf32> to vector<2x8x4xf32>
    "tpu.trace_start"() <{level = 10 : i32, message = "btx,bux->btu"}> : () -> ()
    %cst_231 = arith.constant dense<0.000000e+00> : vector<2x8x8xf32>
    %688 = tpu.matmul %683, %685, %cst_231 {dimension_numbers = #tpu.dot_dimension_numbers<[2], [2], [1], [1], [0, 0, 0, 1, 1, 1], [0], [0]>} : vector<2x8x4xf32>, vector<2x8x4xf32>, vector<2x8x8xf32> -> vector<2x8x8xf32>
    "tpu.trace_stop"() : () -> ()
    %cst_232 = arith.constant 0.176776692 : f32
    %689 = vector.broadcast %cst_232 : f32 to vector<2x8x8xf32>
    %690 = arith.mulf %688, %689 : vector<2x8x8xf32>
    %cst_233 = arith.constant -1.000000e+30 : f32
    %691 = vector.shape_cast %16 : vector<1x8x8xi1> to vector<1x8x8xi1>
    %692 = vector.broadcast %691 : vector<1x8x8xi1> to vector<2x8x8xi1>
    %693 = vector.broadcast %cst_233 : f32 to vector<2x8x8xf32>
    %694 = arith.select %692, %690, %693 : vector<2x8x8xi1>, vector<2x8x8xf32>
    %cst_234 = arith.constant dense<0xFF800000> : vector<2x8xf32>
    %695 = vector.multi_reduction <maximumf>, %694, %cst_234 [2] : vector<2x8x8xf32> to vector<2x8xf32>
    %696 = vector.shape_cast %695 : vector<2x8xf32> to vector<2x8x1xf32>
    %697 = vector.broadcast %696 : vector<2x8x1xf32> to vector<2x8x8xf32>
    %698 = arith.subf %694, %697 : vector<2x8x8xf32>
    %699 = math.exp %698 : vector<2x8x8xf32>
    %cst_235 = arith.constant dense<0.000000e+00> : vector<2x8xf32>
    %700 = vector.multi_reduction <add>, %699, %cst_235 [2] : vector<2x8x8xf32> to vector<2x8xf32>
    %701 = vector.shape_cast %700 : vector<2x8xf32> to vector<2x8x1xf32>
    %702 = tpu.reciprocal %701 {approx = true} : vector<2x8x1xf32> -> vector<2x8x1xf32>
    %703 = vector.broadcast %702 : vector<2x8x1xf32> to vector<2x8x8xf32>
    %704 = arith.mulf %699, %703 : vector<2x8x8xf32>
    "tpu.trace_start"() <{level = 10 : i32, message = "btu,bux->btx"}> : () -> ()
    %cst_236 = arith.constant dense<0.000000e+00> : vector<2x8x4xf32>
    %705 = tpu.matmul %704, %687, %cst_236 {dimension_numbers = #tpu.dot_dimension_numbers<[2], [1], [1], [2], [0, 0, 0, 1, 1, 2], [0], [0]>} : vector<2x8x8xf32>, vector<2x8x4xf32>, vector<2x8x4xf32> -> vector<2x8x4xf32>
    "tpu.trace_stop"() : () -> ()
    %706 = vector.shape_cast %705 : vector<2x8x4xf32> to vector<16x4xf32>
    %707 = vector.extract_strided_slice %604 {offsets = [0, 16], sizes = [16, 4], strides = [1, 1]} : vector<16x32xf32> to vector<16x4xf32>
    %708 = vector.shape_cast %707 : vector<16x4xf32> to vector<2x8x4xf32>
    %709 = vector.extract_strided_slice %605 {offsets = [0, 16], sizes = [16, 4], strides = [1, 1]} : vector<16x32xf32> to vector<16x4xf32>
    %710 = vector.shape_cast %709 : vector<16x4xf32> to vector<2x8x4xf32>
    %711 = vector.extract_strided_slice %606 {offsets = [0, 16], sizes = [16, 4], strides = [1, 1]} : vector<16x32xf32> to vector<16x4xf32>
    %712 = vector.shape_cast %711 : vector<16x4xf32> to vector<2x8x4xf32>
    "tpu.trace_start"() <{level = 10 : i32, message = "btx,bux->btu"}> : () -> ()
    %cst_237 = arith.constant dense<0.000000e+00> : vector<2x8x8xf32>
    %713 = tpu.matmul %708, %710, %cst_237 {dimension_numbers = #tpu.dot_dimension_numbers<[2], [2], [1], [1], [0, 0, 0, 1, 1, 1], [0], [0]>} : vector<2x8x4xf32>, vector<2x8x4xf32>, vector<2x8x8xf32> -> vector<2x8x8xf32>
    "tpu.trace_stop"() : () -> ()
    %cst_238 = arith.constant 0.176776692 : f32
    %714 = vector.broadcast %cst_238 : f32 to vector<2x8x8xf32>
    %715 = arith.mulf %713, %714 : vector<2x8x8xf32>
    %cst_239 = arith.constant -1.000000e+30 : f32
    %716 = vector.shape_cast %16 : vector<1x8x8xi1> to vector<1x8x8xi1>
    %717 = vector.broadcast %716 : vector<1x8x8xi1> to vector<2x8x8xi1>
    %718 = vector.broadcast %cst_239 : f32 to vector<2x8x8xf32>
    %719 = arith.select %717, %715, %718 : vector<2x8x8xi1>, vector<2x8x8xf32>
    %cst_240 = arith.constant dense<0xFF800000> : vector<2x8xf32>
    %720 = vector.multi_reduction <maximumf>, %719, %cst_240 [2] : vector<2x8x8xf32> to vector<2x8xf32>
    %721 = vector.shape_cast %720 : vector<2x8xf32> to vector<2x8x1xf32>
    %722 = vector.broadcast %721 : vector<2x8x1xf32> to vector<2x8x8xf32>
    %723 = arith.subf %719, %722 : vector<2x8x8xf32>
    %724 = math.exp %723 : vector<2x8x8xf32>
    %cst_241 = arith.constant dense<0.000000e+00> : vector<2x8xf32>
    %725 = vector.multi_reduction <add>, %724, %cst_241 [2] : vector<2x8x8xf32> to vector<2x8xf32>
    %726 = vector.shape_cast %725 : vector<2x8xf32> to vector<2x8x1xf32>
    %727 = tpu.reciprocal %726 {approx = true} : vector<2x8x1xf32> -> vector<2x8x1xf32>
    %728 = vector.broadcast %727 : vector<2x8x1xf32> to vector<2x8x8xf32>
    %729 = arith.mulf %724, %728 : vector<2x8x8xf32>
    "tpu.trace_start"() <{level = 10 : i32, message = "btu,bux->btx"}> : () -> ()
    %cst_242 = arith.constant dense<0.000000e+00> : vector<2x8x4xf32>
    %730 = tpu.matmul %729, %712, %cst_242 {dimension_numbers = #tpu.dot_dimension_numbers<[2], [1], [1], [2], [0, 0, 0, 1, 1, 2], [0], [0]>} : vector<2x8x8xf32>, vector<2x8x4xf32>, vector<2x8x4xf32> -> vector<2x8x4xf32>
    "tpu.trace_stop"() : () -> ()
    %731 = vector.shape_cast %730 : vector<2x8x4xf32> to vector<16x4xf32>
    %732 = vector.extract_strided_slice %604 {offsets = [0, 20], sizes = [16, 4], strides = [1, 1]} : vector<16x32xf32> to vector<16x4xf32>
    %733 = vector.shape_cast %732 : vector<16x4xf32> to vector<2x8x4xf32>
    %734 = vector.extract_strided_slice %605 {offsets = [0, 20], sizes = [16, 4], strides = [1, 1]} : vector<16x32xf32> to vector<16x4xf32>
    %735 = vector.shape_cast %734 : vector<16x4xf32> to vector<2x8x4xf32>
    %736 = vector.extract_strided_slice %606 {offsets = [0, 20], sizes = [16, 4], strides = [1, 1]} : vector<16x32xf32> to vector<16x4xf32>
    %737 = vector.shape_cast %736 : vector<16x4xf32> to vector<2x8x4xf32>
    "tpu.trace_start"() <{level = 10 : i32, message = "btx,bux->btu"}> : () -> ()
    %cst_243 = arith.constant dense<0.000000e+00> : vector<2x8x8xf32>
    %738 = tpu.matmul %733, %735, %cst_243 {dimension_numbers = #tpu.dot_dimension_numbers<[2], [2], [1], [1], [0, 0, 0, 1, 1, 1], [0], [0]>} : vector<2x8x4xf32>, vector<2x8x4xf32>, vector<2x8x8xf32> -> vector<2x8x8xf32>
    "tpu.trace_stop"() : () -> ()
    %cst_244 = arith.constant 0.176776692 : f32
    %739 = vector.broadcast %cst_244 : f32 to vector<2x8x8xf32>
    %740 = arith.mulf %738, %739 : vector<2x8x8xf32>
    %cst_245 = arith.constant -1.000000e+30 : f32
    %741 = vector.shape_cast %16 : vector<1x8x8xi1> to vector<1x8x8xi1>
    %742 = vector.broadcast %741 : vector<1x8x8xi1> to vector<2x8x8xi1>
    %743 = vector.broadcast %cst_245 : f32 to vector<2x8x8xf32>
    %744 = arith.select %742, %740, %743 : vector<2x8x8xi1>, vector<2x8x8xf32>
    %cst_246 = arith.constant dense<0xFF800000> : vector<2x8xf32>
    %745 = vector.multi_reduction <maximumf>, %744, %cst_246 [2] : vector<2x8x8xf32> to vector<2x8xf32>
    %746 = vector.shape_cast %745 : vector<2x8xf32> to vector<2x8x1xf32>
    %747 = vector.broadcast %746 : vector<2x8x1xf32> to vector<2x8x8xf32>
    %748 = arith.subf %744, %747 : vector<2x8x8xf32>
    %749 = math.exp %748 : vector<2x8x8xf32>
    %cst_247 = arith.constant dense<0.000000e+00> : vector<2x8xf32>
    %750 = vector.multi_reduction <add>, %749, %cst_247 [2] : vector<2x8x8xf32> to vector<2x8xf32>
    %751 = vector.shape_cast %750 : vector<2x8xf32> to vector<2x8x1xf32>
    %752 = tpu.reciprocal %751 {approx = true} : vector<2x8x1xf32> -> vector<2x8x1xf32>
    %753 = vector.broadcast %752 : vector<2x8x1xf32> to vector<2x8x8xf32>
    %754 = arith.mulf %749, %753 : vector<2x8x8xf32>
    "tpu.trace_start"() <{level = 10 : i32, message = "btu,bux->btx"}> : () -> ()
    %cst_248 = arith.constant dense<0.000000e+00> : vector<2x8x4xf32>
    %755 = tpu.matmul %754, %737, %cst_248 {dimension_numbers = #tpu.dot_dimension_numbers<[2], [1], [1], [2], [0, 0, 0, 1, 1, 2], [0], [0]>} : vector<2x8x8xf32>, vector<2x8x4xf32>, vector<2x8x4xf32> -> vector<2x8x4xf32>
    "tpu.trace_stop"() : () -> ()
    %756 = vector.shape_cast %755 : vector<2x8x4xf32> to vector<16x4xf32>
    %757 = vector.extract_strided_slice %604 {offsets = [0, 24], sizes = [16, 4], strides = [1, 1]} : vector<16x32xf32> to vector<16x4xf32>
    %758 = vector.shape_cast %757 : vector<16x4xf32> to vector<2x8x4xf32>
    %759 = vector.extract_strided_slice %605 {offsets = [0, 24], sizes = [16, 4], strides = [1, 1]} : vector<16x32xf32> to vector<16x4xf32>
    %760 = vector.shape_cast %759 : vector<16x4xf32> to vector<2x8x4xf32>
    %761 = vector.extract_strided_slice %606 {offsets = [0, 24], sizes = [16, 4], strides = [1, 1]} : vector<16x32xf32> to vector<16x4xf32>
    %762 = vector.shape_cast %761 : vector<16x4xf32> to vector<2x8x4xf32>
    "tpu.trace_start"() <{level = 10 : i32, message = "btx,bux->btu"}> : () -> ()
    %cst_249 = arith.constant dense<0.000000e+00> : vector<2x8x8xf32>
    %763 = tpu.matmul %758, %760, %cst_249 {dimension_numbers = #tpu.dot_dimension_numbers<[2], [2], [1], [1], [0, 0, 0, 1, 1, 1], [0], [0]>} : vector<2x8x4xf32>, vector<2x8x4xf32>, vector<2x8x8xf32> -> vector<2x8x8xf32>
    "tpu.trace_stop"() : () -> ()
    %cst_250 = arith.constant 0.176776692 : f32
    %764 = vector.broadcast %cst_250 : f32 to vector<2x8x8xf32>
    %765 = arith.mulf %763, %764 : vector<2x8x8xf32>
    %cst_251 = arith.constant -1.000000e+30 : f32
    %766 = vector.shape_cast %16 : vector<1x8x8xi1> to vector<1x8x8xi1>
    %767 = vector.broadcast %766 : vector<1x8x8xi1> to vector<2x8x8xi1>
    %768 = vector.broadcast %cst_251 : f32 to vector<2x8x8xf32>
    %769 = arith.select %767, %765, %768 : vector<2x8x8xi1>, vector<2x8x8xf32>
    %cst_252 = arith.constant dense<0xFF800000> : vector<2x8xf32>
    %770 = vector.multi_reduction <maximumf>, %769, %cst_252 [2] : vector<2x8x8xf32> to vector<2x8xf32>
    %771 = vector.shape_cast %770 : vector<2x8xf32> to vector<2x8x1xf32>
    %772 = vector.broadcast %771 : vector<2x8x1xf32> to vector<2x8x8xf32>
    %773 = arith.subf %769, %772 : vector<2x8x8xf32>
    %774 = math.exp %773 : vector<2x8x8xf32>
    %cst_253 = arith.constant dense<0.000000e+00> : vector<2x8xf32>
    %775 = vector.multi_reduction <add>, %774, %cst_253 [2] : vector<2x8x8xf32> to vector<2x8xf32>
    %776 = vector.shape_cast %775 : vector<2x8xf32> to vector<2x8x1xf32>
    %777 = tpu.reciprocal %776 {approx = true} : vector<2x8x1xf32> -> vector<2x8x1xf32>
    %778 = vector.broadcast %777 : vector<2x8x1xf32> to vector<2x8x8xf32>
    %779 = arith.mulf %774, %778 : vector<2x8x8xf32>
    "tpu.trace_start"() <{level = 10 : i32, message = "btu,bux->btx"}> : () -> ()
    %cst_254 = arith.constant dense<0.000000e+00> : vector<2x8x4xf32>
    %780 = tpu.matmul %779, %762, %cst_254 {dimension_numbers = #tpu.dot_dimension_numbers<[2], [1], [1], [2], [0, 0, 0, 1, 1, 2], [0], [0]>} : vector<2x8x8xf32>, vector<2x8x4xf32>, vector<2x8x4xf32> -> vector<2x8x4xf32>
    "tpu.trace_stop"() : () -> ()
    %781 = vector.shape_cast %780 : vector<2x8x4xf32> to vector<16x4xf32>
    %782 = vector.extract_strided_slice %604 {offsets = [0, 28], sizes = [16, 4], strides = [1, 1]} : vector<16x32xf32> to vector<16x4xf32>
    %783 = vector.shape_cast %782 : vector<16x4xf32> to vector<2x8x4xf32>
    %784 = vector.extract_strided_slice %605 {offsets = [0, 28], sizes = [16, 4], strides = [1, 1]} : vector<16x32xf32> to vector<16x4xf32>
    %785 = vector.shape_cast %784 : vector<16x4xf32> to vector<2x8x4xf32>
    %786 = vector.extract_strided_slice %606 {offsets = [0, 28], sizes = [16, 4], strides = [1, 1]} : vector<16x32xf32> to vector<16x4xf32>
    %787 = vector.shape_cast %786 : vector<16x4xf32> to vector<2x8x4xf32>
    "tpu.trace_start"() <{level = 10 : i32, message = "btx,bux->btu"}> : () -> ()
    %cst_255 = arith.constant dense<0.000000e+00> : vector<2x8x8xf32>
    %788 = tpu.matmul %783, %785, %cst_255 {dimension_numbers = #tpu.dot_dimension_numbers<[2], [2], [1], [1], [0, 0, 0, 1, 1, 1], [0], [0]>} : vector<2x8x4xf32>, vector<2x8x4xf32>, vector<2x8x8xf32> -> vector<2x8x8xf32>
    "tpu.trace_stop"() : () -> ()
    %cst_256 = arith.constant 0.176776692 : f32
    %789 = vector.broadcast %cst_256 : f32 to vector<2x8x8xf32>
    %790 = arith.mulf %788, %789 : vector<2x8x8xf32>
    %cst_257 = arith.constant -1.000000e+30 : f32
    %791 = vector.shape_cast %16 : vector<1x8x8xi1> to vector<1x8x8xi1>
    %792 = vector.broadcast %791 : vector<1x8x8xi1> to vector<2x8x8xi1>
    %793 = vector.broadcast %cst_257 : f32 to vector<2x8x8xf32>
    %794 = arith.select %792, %790, %793 : vector<2x8x8xi1>, vector<2x8x8xf32>
    %cst_258 = arith.constant dense<0xFF800000> : vector<2x8xf32>
    %795 = vector.multi_reduction <maximumf>, %794, %cst_258 [2] : vector<2x8x8xf32> to vector<2x8xf32>
    %796 = vector.shape_cast %795 : vector<2x8xf32> to vector<2x8x1xf32>
    %797 = vector.broadcast %796 : vector<2x8x1xf32> to vector<2x8x8xf32>
    %798 = arith.subf %794, %797 : vector<2x8x8xf32>
    %799 = math.exp %798 : vector<2x8x8xf32>
    %cst_259 = arith.constant dense<0.000000e+00> : vector<2x8xf32>
    %800 = vector.multi_reduction <add>, %799, %cst_259 [2] : vector<2x8x8xf32> to vector<2x8xf32>
    %801 = vector.shape_cast %800 : vector<2x8xf32> to vector<2x8x1xf32>
    %802 = tpu.reciprocal %801 {approx = true} : vector<2x8x1xf32> -> vector<2x8x1xf32>
    %803 = vector.broadcast %802 : vector<2x8x1xf32> to vector<2x8x8xf32>
    %804 = arith.mulf %799, %803 : vector<2x8x8xf32>
    "tpu.trace_start"() <{level = 10 : i32, message = "btu,bux->btx"}> : () -> ()
    %cst_260 = arith.constant dense<0.000000e+00> : vector<2x8x4xf32>
    %805 = tpu.matmul %804, %787, %cst_260 {dimension_numbers = #tpu.dot_dimension_numbers<[2], [1], [1], [2], [0, 0, 0, 1, 1, 2], [0], [0]>} : vector<2x8x8xf32>, vector<2x8x4xf32>, vector<2x8x4xf32> -> vector<2x8x4xf32>
    "tpu.trace_stop"() : () -> ()
    %806 = vector.shape_cast %805 : vector<2x8x4xf32> to vector<16x4xf32>
    %807 = tpu.concatenate %631, %656, %681, %706, %731, %756, %781, %806 in 1 : vector<16x4xf32>, vector<16x4xf32>, vector<16x4xf32>, vector<16x4xf32>, vector<16x4xf32>, vector<16x4xf32>, vector<16x4xf32>, vector<16x4xf32> -> vector<16x32xf32>
    %c2_261 = arith.constant 2 : index
    %c0_262 = arith.constant 0 : index
    %c0_263 = arith.constant 0 : index
    %808 = vector.load %arg7[%c2_261, %c0_262, %c0_263] : memref<6x32x32xf32, #tpu.memory_space<vmem>>, vector<1x32x32xf32>
    %809 = vector.shape_cast %808 : vector<1x32x32xf32> to vector<32x32xf32>
    %cst_264 = arith.constant dense<0.000000e+00> : vector<16x32xf32>
    %810 = tpu.matmul %807, %809, %cst_264 {dimension_numbers = #tpu.dot_dimension_numbers<[1], [0], [0], [1], [0, 0, 1, 1], [], []>} : vector<16x32xf32>, vector<32x32xf32>, vector<16x32xf32> -> vector<16x32xf32>
    %c2_265 = arith.constant 2 : index
    %c0_266 = arith.constant 0 : index
    %c0_267 = arith.constant 0 : index
    %811 = vector.load %arg8[%c2_265, %c0_266, %c0_267] : memref<6x1x32xf32, #tpu.memory_space<vmem>>, vector<1x1x32xf32>
    %812 = vector.shape_cast %811 : vector<1x1x32xf32> to vector<1x32xf32>
    %813 = vector.broadcast %812 : vector<1x32xf32> to vector<16x32xf32>
    %814 = arith.addf %810, %813 : vector<16x32xf32>
    %815 = arith.addf %576, %814 : vector<16x32xf32>
    %c2_268 = arith.constant 2 : index
    %c0_269 = arith.constant 0 : index
    %c0_270 = arith.constant 0 : index
    %816 = vector.load %arg9[%c2_268, %c0_269, %c0_270] : memref<6x1x32xf32, #tpu.memory_space<vmem>>, vector<1x1x32xf32>
    %817 = vector.shape_cast %816 : vector<1x1x32xf32> to vector<1x32xf32>
    %c2_271 = arith.constant 2 : index
    %c0_272 = arith.constant 0 : index
    %c0_273 = arith.constant 0 : index
    %818 = vector.load %arg10[%c2_271, %c0_272, %c0_273] : memref<6x1x32xf32, #tpu.memory_space<vmem>>, vector<1x1x32xf32>
    %819 = vector.shape_cast %818 : vector<1x1x32xf32> to vector<1x32xf32>
    %cst_274 = arith.constant dense<0.000000e+00> : vector<16xf32>
    %820 = vector.multi_reduction <add>, %815, %cst_274 [1] : vector<16x32xf32> to vector<16xf32>
    %821 = vector.shape_cast %820 : vector<16xf32> to vector<16x1xf32>
    %cst_275 = arith.constant 3.200000e+01 : f32
    %822 = vector.broadcast %cst_275 : f32 to vector<16x1xf32>
    %823 = arith.divf %821, %822 : vector<16x1xf32>
    %824 = vector.broadcast %823 : vector<16x1xf32> to vector<16x32xf32>
    %825 = arith.subf %815, %824 : vector<16x32xf32>
    %826 = arith.mulf %825, %825 : vector<16x32xf32>
    %cst_276 = arith.constant dense<0.000000e+00> : vector<16xf32>
    %827 = vector.multi_reduction <add>, %826, %cst_276 [1] : vector<16x32xf32> to vector<16xf32>
    %828 = vector.shape_cast %827 : vector<16xf32> to vector<16x1xf32>
    %cst_277 = arith.constant 3.200000e+01 : f32
    %829 = vector.broadcast %cst_277 : f32 to vector<16x1xf32>
    %830 = arith.divf %828, %829 : vector<16x1xf32>
    %cst_278 = arith.constant 9.99999974E-6 : f32
    %831 = vector.broadcast %cst_278 : f32 to vector<16x1xf32>
    %832 = arith.addf %830, %831 : vector<16x1xf32>
    %833 = math.rsqrt %832 : vector<16x1xf32>
    %834 = vector.broadcast %833 : vector<16x1xf32> to vector<16x32xf32>
    %835 = arith.mulf %825, %834 : vector<16x32xf32>
    %836 = vector.broadcast %817 : vector<1x32xf32> to vector<16x32xf32>
    %837 = arith.mulf %835, %836 : vector<16x32xf32>
    %838 = vector.broadcast %819 : vector<1x32xf32> to vector<16x32xf32>
    %839 = arith.addf %837, %838 : vector<16x32xf32>
    %c2_279 = arith.constant 2 : index
    %c0_280 = arith.constant 0 : index
    %c0_281 = arith.constant 0 : index
    %840 = vector.load %arg11[%c2_279, %c0_280, %c0_281] : memref<6x32x128xf32, #tpu.memory_space<vmem>>, vector<1x32x128xf32>
    %841 = vector.shape_cast %840 : vector<1x32x128xf32> to vector<32x128xf32>
    %cst_282 = arith.constant dense<0.000000e+00> : vector<16x128xf32>
    %842 = tpu.matmul %839, %841, %cst_282 {dimension_numbers = #tpu.dot_dimension_numbers<[1], [0], [0], [1], [0, 0, 1, 1], [], []>} : vector<16x32xf32>, vector<32x128xf32>, vector<16x128xf32> -> vector<16x128xf32>
    %c2_283 = arith.constant 2 : index
    %c0_284 = arith.constant 0 : index
    %c0_285 = arith.constant 0 : index
    %843 = vector.load %arg12[%c2_283, %c0_284, %c0_285] : memref<6x1x128xf32, #tpu.memory_space<vmem>>, vector<1x1x128xf32>
    %844 = vector.shape_cast %843 : vector<1x1x128xf32> to vector<1x128xf32>
    %845 = vector.broadcast %844 : vector<1x128xf32> to vector<16x128xf32>
    %846 = arith.addf %842, %845 : vector<16x128xf32>
    %cst_286 = arith.constant 0.000000e+00 : f32
    %847 = vector.broadcast %cst_286 : f32 to vector<16x128xf32>
    %848 = arith.maximumf %846, %847 : vector<16x128xf32>
    %c2_287 = arith.constant 2 : index
    %c0_288 = arith.constant 0 : index
    %c0_289 = arith.constant 0 : index
    %849 = vector.load %arg13[%c2_287, %c0_288, %c0_289] : memref<6x128x32xf32, #tpu.memory_space<vmem>>, vector<1x128x32xf32>
    %850 = vector.shape_cast %849 : vector<1x128x32xf32> to vector<128x32xf32>
    %cst_290 = arith.constant dense<0.000000e+00> : vector<16x32xf32>
    %851 = tpu.matmul %848, %850, %cst_290 {dimension_numbers = #tpu.dot_dimension_numbers<[1], [0], [0], [1], [0, 0, 1, 1], [], []>} : vector<16x128xf32>, vector<128x32xf32>, vector<16x32xf32> -> vector<16x32xf32>
    %c2_291 = arith.constant 2 : index
    %c0_292 = arith.constant 0 : index
    %c0_293 = arith.constant 0 : index
    %852 = vector.load %arg14[%c2_291, %c0_292, %c0_293] : memref<6x1x32xf32, #tpu.memory_space<vmem>>, vector<1x1x32xf32>
    %853 = vector.shape_cast %852 : vector<1x1x32xf32> to vector<1x32xf32>
    %854 = vector.broadcast %853 : vector<1x32xf32> to vector<16x32xf32>
    %855 = arith.addf %851, %854 : vector<16x32xf32>
    %856 = arith.addf %815, %855 : vector<16x32xf32>
    %c3 = arith.constant 3 : index
    %c0_294 = arith.constant 0 : index
    %c0_295 = arith.constant 0 : index
    %857 = vector.load %arg4[%c3, %c0_294, %c0_295] : memref<6x1x32xf32, #tpu.memory_space<vmem>>, vector<1x1x32xf32>
    %858 = vector.shape_cast %857 : vector<1x1x32xf32> to vector<1x32xf32>
    %c3_296 = arith.constant 3 : index
    %c0_297 = arith.constant 0 : index
    %c0_298 = arith.constant 0 : index
    %859 = vector.load %arg5[%c3_296, %c0_297, %c0_298] : memref<6x1x32xf32, #tpu.memory_space<vmem>>, vector<1x1x32xf32>
    %860 = vector.shape_cast %859 : vector<1x1x32xf32> to vector<1x32xf32>
    %cst_299 = arith.constant dense<0.000000e+00> : vector<16xf32>
    %861 = vector.multi_reduction <add>, %856, %cst_299 [1] : vector<16x32xf32> to vector<16xf32>
    %862 = vector.shape_cast %861 : vector<16xf32> to vector<16x1xf32>
    %cst_300 = arith.constant 3.200000e+01 : f32
    %863 = vector.broadcast %cst_300 : f32 to vector<16x1xf32>
    %864 = arith.divf %862, %863 : vector<16x1xf32>
    %865 = vector.broadcast %864 : vector<16x1xf32> to vector<16x32xf32>
    %866 = arith.subf %856, %865 : vector<16x32xf32>
    %867 = arith.mulf %866, %866 : vector<16x32xf32>
    %cst_301 = arith.constant dense<0.000000e+00> : vector<16xf32>
    %868 = vector.multi_reduction <add>, %867, %cst_301 [1] : vector<16x32xf32> to vector<16xf32>
    %869 = vector.shape_cast %868 : vector<16xf32> to vector<16x1xf32>
    %cst_302 = arith.constant 3.200000e+01 : f32
    %870 = vector.broadcast %cst_302 : f32 to vector<16x1xf32>
    %871 = arith.divf %869, %870 : vector<16x1xf32>
    %cst_303 = arith.constant 9.99999974E-6 : f32
    %872 = vector.broadcast %cst_303 : f32 to vector<16x1xf32>
    %873 = arith.addf %871, %872 : vector<16x1xf32>
    %874 = math.rsqrt %873 : vector<16x1xf32>
    %875 = vector.broadcast %874 : vector<16x1xf32> to vector<16x32xf32>
    %876 = arith.mulf %866, %875 : vector<16x32xf32>
    %877 = vector.broadcast %858 : vector<1x32xf32> to vector<16x32xf32>
    %878 = arith.mulf %876, %877 : vector<16x32xf32>
    %879 = vector.broadcast %860 : vector<1x32xf32> to vector<16x32xf32>
    %880 = arith.addf %878, %879 : vector<16x32xf32>
    %c3_304 = arith.constant 3 : index
    %c0_305 = arith.constant 0 : index
    %c0_306 = arith.constant 0 : index
    %881 = vector.load %arg6[%c3_304, %c0_305, %c0_306] : memref<6x32x96xf32, #tpu.memory_space<vmem>>, vector<1x32x96xf32>
    %882 = vector.shape_cast %881 : vector<1x32x96xf32> to vector<32x96xf32>
    %cst_307 = arith.constant dense<0.000000e+00> : vector<16x96xf32>
    %883 = tpu.matmul %880, %882, %cst_307 {dimension_numbers = #tpu.dot_dimension_numbers<[1], [0], [0], [1], [0, 0, 1, 1], [], []>} : vector<16x32xf32>, vector<32x96xf32>, vector<16x96xf32> -> vector<16x96xf32>
    %884 = vector.extract_strided_slice %883 {offsets = [0, 0], sizes = [16, 32], strides = [1, 1]} : vector<16x96xf32> to vector<16x32xf32>
    %885 = vector.extract_strided_slice %883 {offsets = [0, 32], sizes = [16, 32], strides = [1, 1]} : vector<16x96xf32> to vector<16x32xf32>
    %886 = vector.extract_strided_slice %883 {offsets = [0, 64], sizes = [16, 32], strides = [1, 1]} : vector<16x96xf32> to vector<16x32xf32>
    %887 = vector.extract_strided_slice %884 {offsets = [0, 0], sizes = [16, 4], strides = [1, 1]} : vector<16x32xf32> to vector<16x4xf32>
    %888 = vector.shape_cast %887 : vector<16x4xf32> to vector<2x8x4xf32>
    %889 = vector.extract_strided_slice %885 {offsets = [0, 0], sizes = [16, 4], strides = [1, 1]} : vector<16x32xf32> to vector<16x4xf32>
    %890 = vector.shape_cast %889 : vector<16x4xf32> to vector<2x8x4xf32>
    %891 = vector.extract_strided_slice %886 {offsets = [0, 0], sizes = [16, 4], strides = [1, 1]} : vector<16x32xf32> to vector<16x4xf32>
    %892 = vector.shape_cast %891 : vector<16x4xf32> to vector<2x8x4xf32>
    "tpu.trace_start"() <{level = 10 : i32, message = "btx,bux->btu"}> : () -> ()
    %cst_308 = arith.constant dense<0.000000e+00> : vector<2x8x8xf32>
    %893 = tpu.matmul %888, %890, %cst_308 {dimension_numbers = #tpu.dot_dimension_numbers<[2], [2], [1], [1], [0, 0, 0, 1, 1, 1], [0], [0]>} : vector<2x8x4xf32>, vector<2x8x4xf32>, vector<2x8x8xf32> -> vector<2x8x8xf32>
    "tpu.trace_stop"() : () -> ()
    %cst_309 = arith.constant 0.176776692 : f32
    %894 = vector.broadcast %cst_309 : f32 to vector<2x8x8xf32>
    %895 = arith.mulf %893, %894 : vector<2x8x8xf32>
    %cst_310 = arith.constant -1.000000e+30 : f32
    %896 = vector.shape_cast %16 : vector<1x8x8xi1> to vector<1x8x8xi1>
    %897 = vector.broadcast %896 : vector<1x8x8xi1> to vector<2x8x8xi1>
    %898 = vector.broadcast %cst_310 : f32 to vector<2x8x8xf32>
    %899 = arith.select %897, %895, %898 : vector<2x8x8xi1>, vector<2x8x8xf32>
    %cst_311 = arith.constant dense<0xFF800000> : vector<2x8xf32>
    %900 = vector.multi_reduction <maximumf>, %899, %cst_311 [2] : vector<2x8x8xf32> to vector<2x8xf32>
    %901 = vector.shape_cast %900 : vector<2x8xf32> to vector<2x8x1xf32>
    %902 = vector.broadcast %901 : vector<2x8x1xf32> to vector<2x8x8xf32>
    %903 = arith.subf %899, %902 : vector<2x8x8xf32>
    %904 = math.exp %903 : vector<2x8x8xf32>
    %cst_312 = arith.constant dense<0.000000e+00> : vector<2x8xf32>
    %905 = vector.multi_reduction <add>, %904, %cst_312 [2] : vector<2x8x8xf32> to vector<2x8xf32>
    %906 = vector.shape_cast %905 : vector<2x8xf32> to vector<2x8x1xf32>
    %907 = tpu.reciprocal %906 {approx = true} : vector<2x8x1xf32> -> vector<2x8x1xf32>
    %908 = vector.broadcast %907 : vector<2x8x1xf32> to vector<2x8x8xf32>
    %909 = arith.mulf %904, %908 : vector<2x8x8xf32>
    "tpu.trace_start"() <{level = 10 : i32, message = "btu,bux->btx"}> : () -> ()
    %cst_313 = arith.constant dense<0.000000e+00> : vector<2x8x4xf32>
    %910 = tpu.matmul %909, %892, %cst_313 {dimension_numbers = #tpu.dot_dimension_numbers<[2], [1], [1], [2], [0, 0, 0, 1, 1, 2], [0], [0]>} : vector<2x8x8xf32>, vector<2x8x4xf32>, vector<2x8x4xf32> -> vector<2x8x4xf32>
    "tpu.trace_stop"() : () -> ()
    %911 = vector.shape_cast %910 : vector<2x8x4xf32> to vector<16x4xf32>
    %912 = vector.extract_strided_slice %884 {offsets = [0, 4], sizes = [16, 4], strides = [1, 1]} : vector<16x32xf32> to vector<16x4xf32>
    %913 = vector.shape_cast %912 : vector<16x4xf32> to vector<2x8x4xf32>
    %914 = vector.extract_strided_slice %885 {offsets = [0, 4], sizes = [16, 4], strides = [1, 1]} : vector<16x32xf32> to vector<16x4xf32>
    %915 = vector.shape_cast %914 : vector<16x4xf32> to vector<2x8x4xf32>
    %916 = vector.extract_strided_slice %886 {offsets = [0, 4], sizes = [16, 4], strides = [1, 1]} : vector<16x32xf32> to vector<16x4xf32>
    %917 = vector.shape_cast %916 : vector<16x4xf32> to vector<2x8x4xf32>
    "tpu.trace_start"() <{level = 10 : i32, message = "btx,bux->btu"}> : () -> ()
    %cst_314 = arith.constant dense<0.000000e+00> : vector<2x8x8xf32>
    %918 = tpu.matmul %913, %915, %cst_314 {dimension_numbers = #tpu.dot_dimension_numbers<[2], [2], [1], [1], [0, 0, 0, 1, 1, 1], [0], [0]>} : vector<2x8x4xf32>, vector<2x8x4xf32>, vector<2x8x8xf32> -> vector<2x8x8xf32>
    "tpu.trace_stop"() : () -> ()
    %cst_315 = arith.constant 0.176776692 : f32
    %919 = vector.broadcast %cst_315 : f32 to vector<2x8x8xf32>
    %920 = arith.mulf %918, %919 : vector<2x8x8xf32>
    %cst_316 = arith.constant -1.000000e+30 : f32
    %921 = vector.shape_cast %16 : vector<1x8x8xi1> to vector<1x8x8xi1>
    %922 = vector.broadcast %921 : vector<1x8x8xi1> to vector<2x8x8xi1>
    %923 = vector.broadcast %cst_316 : f32 to vector<2x8x8xf32>
    %924 = arith.select %922, %920, %923 : vector<2x8x8xi1>, vector<2x8x8xf32>
    %cst_317 = arith.constant dense<0xFF800000> : vector<2x8xf32>
    %925 = vector.multi_reduction <maximumf>, %924, %cst_317 [2] : vector<2x8x8xf32> to vector<2x8xf32>
    %926 = vector.shape_cast %925 : vector<2x8xf32> to vector<2x8x1xf32>
    %927 = vector.broadcast %926 : vector<2x8x1xf32> to vector<2x8x8xf32>
    %928 = arith.subf %924, %927 : vector<2x8x8xf32>
    %929 = math.exp %928 : vector<2x8x8xf32>
    %cst_318 = arith.constant dense<0.000000e+00> : vector<2x8xf32>
    %930 = vector.multi_reduction <add>, %929, %cst_318 [2] : vector<2x8x8xf32> to vector<2x8xf32>
    %931 = vector.shape_cast %930 : vector<2x8xf32> to vector<2x8x1xf32>
    %932 = tpu.reciprocal %931 {approx = true} : vector<2x8x1xf32> -> vector<2x8x1xf32>
    %933 = vector.broadcast %932 : vector<2x8x1xf32> to vector<2x8x8xf32>
    %934 = arith.mulf %929, %933 : vector<2x8x8xf32>
    "tpu.trace_start"() <{level = 10 : i32, message = "btu,bux->btx"}> : () -> ()
    %cst_319 = arith.constant dense<0.000000e+00> : vector<2x8x4xf32>
    %935 = tpu.matmul %934, %917, %cst_319 {dimension_numbers = #tpu.dot_dimension_numbers<[2], [1], [1], [2], [0, 0, 0, 1, 1, 2], [0], [0]>} : vector<2x8x8xf32>, vector<2x8x4xf32>, vector<2x8x4xf32> -> vector<2x8x4xf32>
    "tpu.trace_stop"() : () -> ()
    %936 = vector.shape_cast %935 : vector<2x8x4xf32> to vector<16x4xf32>
    %937 = vector.extract_strided_slice %884 {offsets = [0, 8], sizes = [16, 4], strides = [1, 1]} : vector<16x32xf32> to vector<16x4xf32>
    %938 = vector.shape_cast %937 : vector<16x4xf32> to vector<2x8x4xf32>
    %939 = vector.extract_strided_slice %885 {offsets = [0, 8], sizes = [16, 4], strides = [1, 1]} : vector<16x32xf32> to vector<16x4xf32>
    %940 = vector.shape_cast %939 : vector<16x4xf32> to vector<2x8x4xf32>
    %941 = vector.extract_strided_slice %886 {offsets = [0, 8], sizes = [16, 4], strides = [1, 1]} : vector<16x32xf32> to vector<16x4xf32>
    %942 = vector.shape_cast %941 : vector<16x4xf32> to vector<2x8x4xf32>
    "tpu.trace_start"() <{level = 10 : i32, message = "btx,bux->btu"}> : () -> ()
    %cst_320 = arith.constant dense<0.000000e+00> : vector<2x8x8xf32>
    %943 = tpu.matmul %938, %940, %cst_320 {dimension_numbers = #tpu.dot_dimension_numbers<[2], [2], [1], [1], [0, 0, 0, 1, 1, 1], [0], [0]>} : vector<2x8x4xf32>, vector<2x8x4xf32>, vector<2x8x8xf32> -> vector<2x8x8xf32>
    "tpu.trace_stop"() : () -> ()
    %cst_321 = arith.constant 0.176776692 : f32
    %944 = vector.broadcast %cst_321 : f32 to vector<2x8x8xf32>
    %945 = arith.mulf %943, %944 : vector<2x8x8xf32>
    %cst_322 = arith.constant -1.000000e+30 : f32
    %946 = vector.shape_cast %16 : vector<1x8x8xi1> to vector<1x8x8xi1>
    %947 = vector.broadcast %946 : vector<1x8x8xi1> to vector<2x8x8xi1>
    %948 = vector.broadcast %cst_322 : f32 to vector<2x8x8xf32>
    %949 = arith.select %947, %945, %948 : vector<2x8x8xi1>, vector<2x8x8xf32>
    %cst_323 = arith.constant dense<0xFF800000> : vector<2x8xf32>
    %950 = vector.multi_reduction <maximumf>, %949, %cst_323 [2] : vector<2x8x8xf32> to vector<2x8xf32>
    %951 = vector.shape_cast %950 : vector<2x8xf32> to vector<2x8x1xf32>
    %952 = vector.broadcast %951 : vector<2x8x1xf32> to vector<2x8x8xf32>
    %953 = arith.subf %949, %952 : vector<2x8x8xf32>
    %954 = math.exp %953 : vector<2x8x8xf32>
    %cst_324 = arith.constant dense<0.000000e+00> : vector<2x8xf32>
    %955 = vector.multi_reduction <add>, %954, %cst_324 [2] : vector<2x8x8xf32> to vector<2x8xf32>
    %956 = vector.shape_cast %955 : vector<2x8xf32> to vector<2x8x1xf32>
    %957 = tpu.reciprocal %956 {approx = true} : vector<2x8x1xf32> -> vector<2x8x1xf32>
    %958 = vector.broadcast %957 : vector<2x8x1xf32> to vector<2x8x8xf32>
    %959 = arith.mulf %954, %958 : vector<2x8x8xf32>
    "tpu.trace_start"() <{level = 10 : i32, message = "btu,bux->btx"}> : () -> ()
    %cst_325 = arith.constant dense<0.000000e+00> : vector<2x8x4xf32>
    %960 = tpu.matmul %959, %942, %cst_325 {dimension_numbers = #tpu.dot_dimension_numbers<[2], [1], [1], [2], [0, 0, 0, 1, 1, 2], [0], [0]>} : vector<2x8x8xf32>, vector<2x8x4xf32>, vector<2x8x4xf32> -> vector<2x8x4xf32>
    "tpu.trace_stop"() : () -> ()
    %961 = vector.shape_cast %960 : vector<2x8x4xf32> to vector<16x4xf32>
    %962 = vector.extract_strided_slice %884 {offsets = [0, 12], sizes = [16, 4], strides = [1, 1]} : vector<16x32xf32> to vector<16x4xf32>
    %963 = vector.shape_cast %962 : vector<16x4xf32> to vector<2x8x4xf32>
    %964 = vector.extract_strided_slice %885 {offsets = [0, 12], sizes = [16, 4], strides = [1, 1]} : vector<16x32xf32> to vector<16x4xf32>
    %965 = vector.shape_cast %964 : vector<16x4xf32> to vector<2x8x4xf32>
    %966 = vector.extract_strided_slice %886 {offsets = [0, 12], sizes = [16, 4], strides = [1, 1]} : vector<16x32xf32> to vector<16x4xf32>
    %967 = vector.shape_cast %966 : vector<16x4xf32> to vector<2x8x4xf32>
    "tpu.trace_start"() <{level = 10 : i32, message = "btx,bux->btu"}> : () -> ()
    %cst_326 = arith.constant dense<0.000000e+00> : vector<2x8x8xf32>
    %968 = tpu.matmul %963, %965, %cst_326 {dimension_numbers = #tpu.dot_dimension_numbers<[2], [2], [1], [1], [0, 0, 0, 1, 1, 1], [0], [0]>} : vector<2x8x4xf32>, vector<2x8x4xf32>, vector<2x8x8xf32> -> vector<2x8x8xf32>
    "tpu.trace_stop"() : () -> ()
    %cst_327 = arith.constant 0.176776692 : f32
    %969 = vector.broadcast %cst_327 : f32 to vector<2x8x8xf32>
    %970 = arith.mulf %968, %969 : vector<2x8x8xf32>
    %cst_328 = arith.constant -1.000000e+30 : f32
    %971 = vector.shape_cast %16 : vector<1x8x8xi1> to vector<1x8x8xi1>
    %972 = vector.broadcast %971 : vector<1x8x8xi1> to vector<2x8x8xi1>
    %973 = vector.broadcast %cst_328 : f32 to vector<2x8x8xf32>
    %974 = arith.select %972, %970, %973 : vector<2x8x8xi1>, vector<2x8x8xf32>
    %cst_329 = arith.constant dense<0xFF800000> : vector<2x8xf32>
    %975 = vector.multi_reduction <maximumf>, %974, %cst_329 [2] : vector<2x8x8xf32> to vector<2x8xf32>
    %976 = vector.shape_cast %975 : vector<2x8xf32> to vector<2x8x1xf32>
    %977 = vector.broadcast %976 : vector<2x8x1xf32> to vector<2x8x8xf32>
    %978 = arith.subf %974, %977 : vector<2x8x8xf32>
    %979 = math.exp %978 : vector<2x8x8xf32>
    %cst_330 = arith.constant dense<0.000000e+00> : vector<2x8xf32>
    %980 = vector.multi_reduction <add>, %979, %cst_330 [2] : vector<2x8x8xf32> to vector<2x8xf32>
    %981 = vector.shape_cast %980 : vector<2x8xf32> to vector<2x8x1xf32>
    %982 = tpu.reciprocal %981 {approx = true} : vector<2x8x1xf32> -> vector<2x8x1xf32>
    %983 = vector.broadcast %982 : vector<2x8x1xf32> to vector<2x8x8xf32>
    %984 = arith.mulf %979, %983 : vector<2x8x8xf32>
    "tpu.trace_start"() <{level = 10 : i32, message = "btu,bux->btx"}> : () -> ()
    %cst_331 = arith.constant dense<0.000000e+00> : vector<2x8x4xf32>
    %985 = tpu.matmul %984, %967, %cst_331 {dimension_numbers = #tpu.dot_dimension_numbers<[2], [1], [1], [2], [0, 0, 0, 1, 1, 2], [0], [0]>} : vector<2x8x8xf32>, vector<2x8x4xf32>, vector<2x8x4xf32> -> vector<2x8x4xf32>
    "tpu.trace_stop"() : () -> ()
    %986 = vector.shape_cast %985 : vector<2x8x4xf32> to vector<16x4xf32>
    %987 = vector.extract_strided_slice %884 {offsets = [0, 16], sizes = [16, 4], strides = [1, 1]} : vector<16x32xf32> to vector<16x4xf32>
    %988 = vector.shape_cast %987 : vector<16x4xf32> to vector<2x8x4xf32>
    %989 = vector.extract_strided_slice %885 {offsets = [0, 16], sizes = [16, 4], strides = [1, 1]} : vector<16x32xf32> to vector<16x4xf32>
    %990 = vector.shape_cast %989 : vector<16x4xf32> to vector<2x8x4xf32>
    %991 = vector.extract_strided_slice %886 {offsets = [0, 16], sizes = [16, 4], strides = [1, 1]} : vector<16x32xf32> to vector<16x4xf32>
    %992 = vector.shape_cast %991 : vector<16x4xf32> to vector<2x8x4xf32>
    "tpu.trace_start"() <{level = 10 : i32, message = "btx,bux->btu"}> : () -> ()
    %cst_332 = arith.constant dense<0.000000e+00> : vector<2x8x8xf32>
    %993 = tpu.matmul %988, %990, %cst_332 {dimension_numbers = #tpu.dot_dimension_numbers<[2], [2], [1], [1], [0, 0, 0, 1, 1, 1], [0], [0]>} : vector<2x8x4xf32>, vector<2x8x4xf32>, vector<2x8x8xf32> -> vector<2x8x8xf32>
    "tpu.trace_stop"() : () -> ()
    %cst_333 = arith.constant 0.176776692 : f32
    %994 = vector.broadcast %cst_333 : f32 to vector<2x8x8xf32>
    %995 = arith.mulf %993, %994 : vector<2x8x8xf32>
    %cst_334 = arith.constant -1.000000e+30 : f32
    %996 = vector.shape_cast %16 : vector<1x8x8xi1> to vector<1x8x8xi1>
    %997 = vector.broadcast %996 : vector<1x8x8xi1> to vector<2x8x8xi1>
    %998 = vector.broadcast %cst_334 : f32 to vector<2x8x8xf32>
    %999 = arith.select %997, %995, %998 : vector<2x8x8xi1>, vector<2x8x8xf32>
    %cst_335 = arith.constant dense<0xFF800000> : vector<2x8xf32>
    %1000 = vector.multi_reduction <maximumf>, %999, %cst_335 [2] : vector<2x8x8xf32> to vector<2x8xf32>
    %1001 = vector.shape_cast %1000 : vector<2x8xf32> to vector<2x8x1xf32>
    %1002 = vector.broadcast %1001 : vector<2x8x1xf32> to vector<2x8x8xf32>
    %1003 = arith.subf %999, %1002 : vector<2x8x8xf32>
    %1004 = math.exp %1003 : vector<2x8x8xf32>
    %cst_336 = arith.constant dense<0.000000e+00> : vector<2x8xf32>
    %1005 = vector.multi_reduction <add>, %1004, %cst_336 [2] : vector<2x8x8xf32> to vector<2x8xf32>
    %1006 = vector.shape_cast %1005 : vector<2x8xf32> to vector<2x8x1xf32>
    %1007 = tpu.reciprocal %1006 {approx = true} : vector<2x8x1xf32> -> vector<2x8x1xf32>
    %1008 = vector.broadcast %1007 : vector<2x8x1xf32> to vector<2x8x8xf32>
    %1009 = arith.mulf %1004, %1008 : vector<2x8x8xf32>
    "tpu.trace_start"() <{level = 10 : i32, message = "btu,bux->btx"}> : () -> ()
    %cst_337 = arith.constant dense<0.000000e+00> : vector<2x8x4xf32>
    %1010 = tpu.matmul %1009, %992, %cst_337 {dimension_numbers = #tpu.dot_dimension_numbers<[2], [1], [1], [2], [0, 0, 0, 1, 1, 2], [0], [0]>} : vector<2x8x8xf32>, vector<2x8x4xf32>, vector<2x8x4xf32> -> vector<2x8x4xf32>
    "tpu.trace_stop"() : () -> ()
    %1011 = vector.shape_cast %1010 : vector<2x8x4xf32> to vector<16x4xf32>
    %1012 = vector.extract_strided_slice %884 {offsets = [0, 20], sizes = [16, 4], strides = [1, 1]} : vector<16x32xf32> to vector<16x4xf32>
    %1013 = vector.shape_cast %1012 : vector<16x4xf32> to vector<2x8x4xf32>
    %1014 = vector.extract_strided_slice %885 {offsets = [0, 20], sizes = [16, 4], strides = [1, 1]} : vector<16x32xf32> to vector<16x4xf32>
    %1015 = vector.shape_cast %1014 : vector<16x4xf32> to vector<2x8x4xf32>
    %1016 = vector.extract_strided_slice %886 {offsets = [0, 20], sizes = [16, 4], strides = [1, 1]} : vector<16x32xf32> to vector<16x4xf32>
    %1017 = vector.shape_cast %1016 : vector<16x4xf32> to vector<2x8x4xf32>
    "tpu.trace_start"() <{level = 10 : i32, message = "btx,bux->btu"}> : () -> ()
    %cst_338 = arith.constant dense<0.000000e+00> : vector<2x8x8xf32>
    %1018 = tpu.matmul %1013, %1015, %cst_338 {dimension_numbers = #tpu.dot_dimension_numbers<[2], [2], [1], [1], [0, 0, 0, 1, 1, 1], [0], [0]>} : vector<2x8x4xf32>, vector<2x8x4xf32>, vector<2x8x8xf32> -> vector<2x8x8xf32>
    "tpu.trace_stop"() : () -> ()
    %cst_339 = arith.constant 0.176776692 : f32
    %1019 = vector.broadcast %cst_339 : f32 to vector<2x8x8xf32>
    %1020 = arith.mulf %1018, %1019 : vector<2x8x8xf32>
    %cst_340 = arith.constant -1.000000e+30 : f32
    %1021 = vector.shape_cast %16 : vector<1x8x8xi1> to vector<1x8x8xi1>
    %1022 = vector.broadcast %1021 : vector<1x8x8xi1> to vector<2x8x8xi1>
    %1023 = vector.broadcast %cst_340 : f32 to vector<2x8x8xf32>
    %1024 = arith.select %1022, %1020, %1023 : vector<2x8x8xi1>, vector<2x8x8xf32>
    %cst_341 = arith.constant dense<0xFF800000> : vector<2x8xf32>
    %1025 = vector.multi_reduction <maximumf>, %1024, %cst_341 [2] : vector<2x8x8xf32> to vector<2x8xf32>
    %1026 = vector.shape_cast %1025 : vector<2x8xf32> to vector<2x8x1xf32>
    %1027 = vector.broadcast %1026 : vector<2x8x1xf32> to vector<2x8x8xf32>
    %1028 = arith.subf %1024, %1027 : vector<2x8x8xf32>
    %1029 = math.exp %1028 : vector<2x8x8xf32>
    %cst_342 = arith.constant dense<0.000000e+00> : vector<2x8xf32>
    %1030 = vector.multi_reduction <add>, %1029, %cst_342 [2] : vector<2x8x8xf32> to vector<2x8xf32>
    %1031 = vector.shape_cast %1030 : vector<2x8xf32> to vector<2x8x1xf32>
    %1032 = tpu.reciprocal %1031 {approx = true} : vector<2x8x1xf32> -> vector<2x8x1xf32>
    %1033 = vector.broadcast %1032 : vector<2x8x1xf32> to vector<2x8x8xf32>
    %1034 = arith.mulf %1029, %1033 : vector<2x8x8xf32>
    "tpu.trace_start"() <{level = 10 : i32, message = "btu,bux->btx"}> : () -> ()
    %cst_343 = arith.constant dense<0.000000e+00> : vector<2x8x4xf32>
    %1035 = tpu.matmul %1034, %1017, %cst_343 {dimension_numbers = #tpu.dot_dimension_numbers<[2], [1], [1], [2], [0, 0, 0, 1, 1, 2], [0], [0]>} : vector<2x8x8xf32>, vector<2x8x4xf32>, vector<2x8x4xf32> -> vector<2x8x4xf32>
    "tpu.trace_stop"() : () -> ()
    %1036 = vector.shape_cast %1035 : vector<2x8x4xf32> to vector<16x4xf32>
    %1037 = vector.extract_strided_slice %884 {offsets = [0, 24], sizes = [16, 4], strides = [1, 1]} : vector<16x32xf32> to vector<16x4xf32>
    %1038 = vector.shape_cast %1037 : vector<16x4xf32> to vector<2x8x4xf32>
    %1039 = vector.extract_strided_slice %885 {offsets = [0, 24], sizes = [16, 4], strides = [1, 1]} : vector<16x32xf32> to vector<16x4xf32>
    %1040 = vector.shape_cast %1039 : vector<16x4xf32> to vector<2x8x4xf32>
    %1041 = vector.extract_strided_slice %886 {offsets = [0, 24], sizes = [16, 4], strides = [1, 1]} : vector<16x32xf32> to vector<16x4xf32>
    %1042 = vector.shape_cast %1041 : vector<16x4xf32> to vector<2x8x4xf32>
    "tpu.trace_start"() <{level = 10 : i32, message = "btx,bux->btu"}> : () -> ()
    %cst_344 = arith.constant dense<0.000000e+00> : vector<2x8x8xf32>
    %1043 = tpu.matmul %1038, %1040, %cst_344 {dimension_numbers = #tpu.dot_dimension_numbers<[2], [2], [1], [1], [0, 0, 0, 1, 1, 1], [0], [0]>} : vector<2x8x4xf32>, vector<2x8x4xf32>, vector<2x8x8xf32> -> vector<2x8x8xf32>
    "tpu.trace_stop"() : () -> ()
    %cst_345 = arith.constant 0.176776692 : f32
    %1044 = vector.broadcast %cst_345 : f32 to vector<2x8x8xf32>
    %1045 = arith.mulf %1043, %1044 : vector<2x8x8xf32>
    %cst_346 = arith.constant -1.000000e+30 : f32
    %1046 = vector.shape_cast %16 : vector<1x8x8xi1> to vector<1x8x8xi1>
    %1047 = vector.broadcast %1046 : vector<1x8x8xi1> to vector<2x8x8xi1>
    %1048 = vector.broadcast %cst_346 : f32 to vector<2x8x8xf32>
    %1049 = arith.select %1047, %1045, %1048 : vector<2x8x8xi1>, vector<2x8x8xf32>
    %cst_347 = arith.constant dense<0xFF800000> : vector<2x8xf32>
    %1050 = vector.multi_reduction <maximumf>, %1049, %cst_347 [2] : vector<2x8x8xf32> to vector<2x8xf32>
    %1051 = vector.shape_cast %1050 : vector<2x8xf32> to vector<2x8x1xf32>
    %1052 = vector.broadcast %1051 : vector<2x8x1xf32> to vector<2x8x8xf32>
    %1053 = arith.subf %1049, %1052 : vector<2x8x8xf32>
    %1054 = math.exp %1053 : vector<2x8x8xf32>
    %cst_348 = arith.constant dense<0.000000e+00> : vector<2x8xf32>
    %1055 = vector.multi_reduction <add>, %1054, %cst_348 [2] : vector<2x8x8xf32> to vector<2x8xf32>
    %1056 = vector.shape_cast %1055 : vector<2x8xf32> to vector<2x8x1xf32>
    %1057 = tpu.reciprocal %1056 {approx = true} : vector<2x8x1xf32> -> vector<2x8x1xf32>
    %1058 = vector.broadcast %1057 : vector<2x8x1xf32> to vector<2x8x8xf32>
    %1059 = arith.mulf %1054, %1058 : vector<2x8x8xf32>
    "tpu.trace_start"() <{level = 10 : i32, message = "btu,bux->btx"}> : () -> ()
    %cst_349 = arith.constant dense<0.000000e+00> : vector<2x8x4xf32>
    %1060 = tpu.matmul %1059, %1042, %cst_349 {dimension_numbers = #tpu.dot_dimension_numbers<[2], [1], [1], [2], [0, 0, 0, 1, 1, 2], [0], [0]>} : vector<2x8x8xf32>, vector<2x8x4xf32>, vector<2x8x4xf32> -> vector<2x8x4xf32>
    "tpu.trace_stop"() : () -> ()
    %1061 = vector.shape_cast %1060 : vector<2x8x4xf32> to vector<16x4xf32>
    %1062 = vector.extract_strided_slice %884 {offsets = [0, 28], sizes = [16, 4], strides = [1, 1]} : vector<16x32xf32> to vector<16x4xf32>
    %1063 = vector.shape_cast %1062 : vector<16x4xf32> to vector<2x8x4xf32>
    %1064 = vector.extract_strided_slice %885 {offsets = [0, 28], sizes = [16, 4], strides = [1, 1]} : vector<16x32xf32> to vector<16x4xf32>
    %1065 = vector.shape_cast %1064 : vector<16x4xf32> to vector<2x8x4xf32>
    %1066 = vector.extract_strided_slice %886 {offsets = [0, 28], sizes = [16, 4], strides = [1, 1]} : vector<16x32xf32> to vector<16x4xf32>
    %1067 = vector.shape_cast %1066 : vector<16x4xf32> to vector<2x8x4xf32>
    "tpu.trace_start"() <{level = 10 : i32, message = "btx,bux->btu"}> : () -> ()
    %cst_350 = arith.constant dense<0.000000e+00> : vector<2x8x8xf32>
    %1068 = tpu.matmul %1063, %1065, %cst_350 {dimension_numbers = #tpu.dot_dimension_numbers<[2], [2], [1], [1], [0, 0, 0, 1, 1, 1], [0], [0]>} : vector<2x8x4xf32>, vector<2x8x4xf32>, vector<2x8x8xf32> -> vector<2x8x8xf32>
    "tpu.trace_stop"() : () -> ()
    %cst_351 = arith.constant 0.176776692 : f32
    %1069 = vector.broadcast %cst_351 : f32 to vector<2x8x8xf32>
    %1070 = arith.mulf %1068, %1069 : vector<2x8x8xf32>
    %cst_352 = arith.constant -1.000000e+30 : f32
    %1071 = vector.shape_cast %16 : vector<1x8x8xi1> to vector<1x8x8xi1>
    %1072 = vector.broadcast %1071 : vector<1x8x8xi1> to vector<2x8x8xi1>
    %1073 = vector.broadcast %cst_352 : f32 to vector<2x8x8xf32>
    %1074 = arith.select %1072, %1070, %1073 : vector<2x8x8xi1>, vector<2x8x8xf32>
    %cst_353 = arith.constant dense<0xFF800000> : vector<2x8xf32>
    %1075 = vector.multi_reduction <maximumf>, %1074, %cst_353 [2] : vector<2x8x8xf32> to vector<2x8xf32>
    %1076 = vector.shape_cast %1075 : vector<2x8xf32> to vector<2x8x1xf32>
    %1077 = vector.broadcast %1076 : vector<2x8x1xf32> to vector<2x8x8xf32>
    %1078 = arith.subf %1074, %1077 : vector<2x8x8xf32>
    %1079 = math.exp %1078 : vector<2x8x8xf32>
    %cst_354 = arith.constant dense<0.000000e+00> : vector<2x8xf32>
    %1080 = vector.multi_reduction <add>, %1079, %cst_354 [2] : vector<2x8x8xf32> to vector<2x8xf32>
    %1081 = vector.shape_cast %1080 : vector<2x8xf32> to vector<2x8x1xf32>
    %1082 = tpu.reciprocal %1081 {approx = true} : vector<2x8x1xf32> -> vector<2x8x1xf32>
    %1083 = vector.broadcast %1082 : vector<2x8x1xf32> to vector<2x8x8xf32>
    %1084 = arith.mulf %1079, %1083 : vector<2x8x8xf32>
    "tpu.trace_start"() <{level = 10 : i32, message = "btu,bux->btx"}> : () -> ()
    %cst_355 = arith.constant dense<0.000000e+00> : vector<2x8x4xf32>
    %1085 = tpu.matmul %1084, %1067, %cst_355 {dimension_numbers = #tpu.dot_dimension_numbers<[2], [1], [1], [2], [0, 0, 0, 1, 1, 2], [0], [0]>} : vector<2x8x8xf32>, vector<2x8x4xf32>, vector<2x8x4xf32> -> vector<2x8x4xf32>
    "tpu.trace_stop"() : () -> ()
    %1086 = vector.shape_cast %1085 : vector<2x8x4xf32> to vector<16x4xf32>
    %1087 = tpu.concatenate %911, %936, %961, %986, %1011, %1036, %1061, %1086 in 1 : vector<16x4xf32>, vector<16x4xf32>, vector<16x4xf32>, vector<16x4xf32>, vector<16x4xf32>, vector<16x4xf32>, vector<16x4xf32>, vector<16x4xf32> -> vector<16x32xf32>
    %c3_356 = arith.constant 3 : index
    %c0_357 = arith.constant 0 : index
    %c0_358 = arith.constant 0 : index
    %1088 = vector.load %arg7[%c3_356, %c0_357, %c0_358] : memref<6x32x32xf32, #tpu.memory_space<vmem>>, vector<1x32x32xf32>
    %1089 = vector.shape_cast %1088 : vector<1x32x32xf32> to vector<32x32xf32>
    %cst_359 = arith.constant dense<0.000000e+00> : vector<16x32xf32>
    %1090 = tpu.matmul %1087, %1089, %cst_359 {dimension_numbers = #tpu.dot_dimension_numbers<[1], [0], [0], [1], [0, 0, 1, 1], [], []>} : vector<16x32xf32>, vector<32x32xf32>, vector<16x32xf32> -> vector<16x32xf32>
    %c3_360 = arith.constant 3 : index
    %c0_361 = arith.constant 0 : index
    %c0_362 = arith.constant 0 : index
    %1091 = vector.load %arg8[%c3_360, %c0_361, %c0_362] : memref<6x1x32xf32, #tpu.memory_space<vmem>>, vector<1x1x32xf32>
    %1092 = vector.shape_cast %1091 : vector<1x1x32xf32> to vector<1x32xf32>
    %1093 = vector.broadcast %1092 : vector<1x32xf32> to vector<16x32xf32>
    %1094 = arith.addf %1090, %1093 : vector<16x32xf32>
    %1095 = arith.addf %856, %1094 : vector<16x32xf32>
    %c3_363 = arith.constant 3 : index
    %c0_364 = arith.constant 0 : index
    %c0_365 = arith.constant 0 : index
    %1096 = vector.load %arg9[%c3_363, %c0_364, %c0_365] : memref<6x1x32xf32, #tpu.memory_space<vmem>>, vector<1x1x32xf32>
    %1097 = vector.shape_cast %1096 : vector<1x1x32xf32> to vector<1x32xf32>
    %c3_366 = arith.constant 3 : index
    %c0_367 = arith.constant 0 : index
    %c0_368 = arith.constant 0 : index
    %1098 = vector.load %arg10[%c3_366, %c0_367, %c0_368] : memref<6x1x32xf32, #tpu.memory_space<vmem>>, vector<1x1x32xf32>
    %1099 = vector.shape_cast %1098 : vector<1x1x32xf32> to vector<1x32xf32>
    %cst_369 = arith.constant dense<0.000000e+00> : vector<16xf32>
    %1100 = vector.multi_reduction <add>, %1095, %cst_369 [1] : vector<16x32xf32> to vector<16xf32>
    %1101 = vector.shape_cast %1100 : vector<16xf32> to vector<16x1xf32>
    %cst_370 = arith.constant 3.200000e+01 : f32
    %1102 = vector.broadcast %cst_370 : f32 to vector<16x1xf32>
    %1103 = arith.divf %1101, %1102 : vector<16x1xf32>
    %1104 = vector.broadcast %1103 : vector<16x1xf32> to vector<16x32xf32>
    %1105 = arith.subf %1095, %1104 : vector<16x32xf32>
    %1106 = arith.mulf %1105, %1105 : vector<16x32xf32>
    %cst_371 = arith.constant dense<0.000000e+00> : vector<16xf32>
    %1107 = vector.multi_reduction <add>, %1106, %cst_371 [1] : vector<16x32xf32> to vector<16xf32>
    %1108 = vector.shape_cast %1107 : vector<16xf32> to vector<16x1xf32>
    %cst_372 = arith.constant 3.200000e+01 : f32
    %1109 = vector.broadcast %cst_372 : f32 to vector<16x1xf32>
    %1110 = arith.divf %1108, %1109 : vector<16x1xf32>
    %cst_373 = arith.constant 9.99999974E-6 : f32
    %1111 = vector.broadcast %cst_373 : f32 to vector<16x1xf32>
    %1112 = arith.addf %1110, %1111 : vector<16x1xf32>
    %1113 = math.rsqrt %1112 : vector<16x1xf32>
    %1114 = vector.broadcast %1113 : vector<16x1xf32> to vector<16x32xf32>
    %1115 = arith.mulf %1105, %1114 : vector<16x32xf32>
    %1116 = vector.broadcast %1097 : vector<1x32xf32> to vector<16x32xf32>
    %1117 = arith.mulf %1115, %1116 : vector<16x32xf32>
    %1118 = vector.broadcast %1099 : vector<1x32xf32> to vector<16x32xf32>
    %1119 = arith.addf %1117, %1118 : vector<16x32xf32>
    %c3_374 = arith.constant 3 : index
    %c0_375 = arith.constant 0 : index
    %c0_376 = arith.constant 0 : index
    %1120 = vector.load %arg11[%c3_374, %c0_375, %c0_376] : memref<6x32x128xf32, #tpu.memory_space<vmem>>, vector<1x32x128xf32>
    %1121 = vector.shape_cast %1120 : vector<1x32x128xf32> to vector<32x128xf32>
    %cst_377 = arith.constant dense<0.000000e+00> : vector<16x128xf32>
    %1122 = tpu.matmul %1119, %1121, %cst_377 {dimension_numbers = #tpu.dot_dimension_numbers<[1], [0], [0], [1], [0, 0, 1, 1], [], []>} : vector<16x32xf32>, vector<32x128xf32>, vector<16x128xf32> -> vector<16x128xf32>
    %c3_378 = arith.constant 3 : index
    %c0_379 = arith.constant 0 : index
    %c0_380 = arith.constant 0 : index
    %1123 = vector.load %arg12[%c3_378, %c0_379, %c0_380] : memref<6x1x128xf32, #tpu.memory_space<vmem>>, vector<1x1x128xf32>
    %1124 = vector.shape_cast %1123 : vector<1x1x128xf32> to vector<1x128xf32>
    %1125 = vector.broadcast %1124 : vector<1x128xf32> to vector<16x128xf32>
    %1126 = arith.addf %1122, %1125 : vector<16x128xf32>
    %cst_381 = arith.constant 0.000000e+00 : f32
    %1127 = vector.broadcast %cst_381 : f32 to vector<16x128xf32>
    %1128 = arith.maximumf %1126, %1127 : vector<16x128xf32>
    %c3_382 = arith.constant 3 : index
    %c0_383 = arith.constant 0 : index
    %c0_384 = arith.constant 0 : index
    %1129 = vector.load %arg13[%c3_382, %c0_383, %c0_384] : memref<6x128x32xf32, #tpu.memory_space<vmem>>, vector<1x128x32xf32>
    %1130 = vector.shape_cast %1129 : vector<1x128x32xf32> to vector<128x32xf32>
    %cst_385 = arith.constant dense<0.000000e+00> : vector<16x32xf32>
    %1131 = tpu.matmul %1128, %1130, %cst_385 {dimension_numbers = #tpu.dot_dimension_numbers<[1], [0], [0], [1], [0, 0, 1, 1], [], []>} : vector<16x128xf32>, vector<128x32xf32>, vector<16x32xf32> -> vector<16x32xf32>
    %c3_386 = arith.constant 3 : index
    %c0_387 = arith.constant 0 : index
    %c0_388 = arith.constant 0 : index
    %1132 = vector.load %arg14[%c3_386, %c0_387, %c0_388] : memref<6x1x32xf32, #tpu.memory_space<vmem>>, vector<1x1x32xf32>
    %1133 = vector.shape_cast %1132 : vector<1x1x32xf32> to vector<1x32xf32>
    %1134 = vector.broadcast %1133 : vector<1x32xf32> to vector<16x32xf32>
    %1135 = arith.addf %1131, %1134 : vector<16x32xf32>
    %1136 = arith.addf %1095, %1135 : vector<16x32xf32>
    %c4 = arith.constant 4 : index
    %c0_389 = arith.constant 0 : index
    %c0_390 = arith.constant 0 : index
    %1137 = vector.load %arg4[%c4, %c0_389, %c0_390] : memref<6x1x32xf32, #tpu.memory_space<vmem>>, vector<1x1x32xf32>
    %1138 = vector.shape_cast %1137 : vector<1x1x32xf32> to vector<1x32xf32>
    %c4_391 = arith.constant 4 : index
    %c0_392 = arith.constant 0 : index
    %c0_393 = arith.constant 0 : index
    %1139 = vector.load %arg5[%c4_391, %c0_392, %c0_393] : memref<6x1x32xf32, #tpu.memory_space<vmem>>, vector<1x1x32xf32>
    %1140 = vector.shape_cast %1139 : vector<1x1x32xf32> to vector<1x32xf32>
    %cst_394 = arith.constant dense<0.000000e+00> : vector<16xf32>
    %1141 = vector.multi_reduction <add>, %1136, %cst_394 [1] : vector<16x32xf32> to vector<16xf32>
    %1142 = vector.shape_cast %1141 : vector<16xf32> to vector<16x1xf32>
    %cst_395 = arith.constant 3.200000e+01 : f32
    %1143 = vector.broadcast %cst_395 : f32 to vector<16x1xf32>
    %1144 = arith.divf %1142, %1143 : vector<16x1xf32>
    %1145 = vector.broadcast %1144 : vector<16x1xf32> to vector<16x32xf32>
    %1146 = arith.subf %1136, %1145 : vector<16x32xf32>
    %1147 = arith.mulf %1146, %1146 : vector<16x32xf32>
    %cst_396 = arith.constant dense<0.000000e+00> : vector<16xf32>
    %1148 = vector.multi_reduction <add>, %1147, %cst_396 [1] : vector<16x32xf32> to vector<16xf32>
    %1149 = vector.shape_cast %1148 : vector<16xf32> to vector<16x1xf32>
    %cst_397 = arith.constant 3.200000e+01 : f32
    %1150 = vector.broadcast %cst_397 : f32 to vector<16x1xf32>
    %1151 = arith.divf %1149, %1150 : vector<16x1xf32>
    %cst_398 = arith.constant 9.99999974E-6 : f32
    %1152 = vector.broadcast %cst_398 : f32 to vector<16x1xf32>
    %1153 = arith.addf %1151, %1152 : vector<16x1xf32>
    %1154 = math.rsqrt %1153 : vector<16x1xf32>
    %1155 = vector.broadcast %1154 : vector<16x1xf32> to vector<16x32xf32>
    %1156 = arith.mulf %1146, %1155 : vector<16x32xf32>
    %1157 = vector.broadcast %1138 : vector<1x32xf32> to vector<16x32xf32>
    %1158 = arith.mulf %1156, %1157 : vector<16x32xf32>
    %1159 = vector.broadcast %1140 : vector<1x32xf32> to vector<16x32xf32>
    %1160 = arith.addf %1158, %1159 : vector<16x32xf32>
    %c4_399 = arith.constant 4 : index
    %c0_400 = arith.constant 0 : index
    %c0_401 = arith.constant 0 : index
    %1161 = vector.load %arg6[%c4_399, %c0_400, %c0_401] : memref<6x32x96xf32, #tpu.memory_space<vmem>>, vector<1x32x96xf32>
    %1162 = vector.shape_cast %1161 : vector<1x32x96xf32> to vector<32x96xf32>
    %cst_402 = arith.constant dense<0.000000e+00> : vector<16x96xf32>
    %1163 = tpu.matmul %1160, %1162, %cst_402 {dimension_numbers = #tpu.dot_dimension_numbers<[1], [0], [0], [1], [0, 0, 1, 1], [], []>} : vector<16x32xf32>, vector<32x96xf32>, vector<16x96xf32> -> vector<16x96xf32>
    %1164 = vector.extract_strided_slice %1163 {offsets = [0, 0], sizes = [16, 32], strides = [1, 1]} : vector<16x96xf32> to vector<16x32xf32>
    %1165 = vector.extract_strided_slice %1163 {offsets = [0, 32], sizes = [16, 32], strides = [1, 1]} : vector<16x96xf32> to vector<16x32xf32>
    %1166 = vector.extract_strided_slice %1163 {offsets = [0, 64], sizes = [16, 32], strides = [1, 1]} : vector<16x96xf32> to vector<16x32xf32>
    %1167 = vector.extract_strided_slice %1164 {offsets = [0, 0], sizes = [16, 4], strides = [1, 1]} : vector<16x32xf32> to vector<16x4xf32>
    %1168 = vector.shape_cast %1167 : vector<16x4xf32> to vector<2x8x4xf32>
    %1169 = vector.extract_strided_slice %1165 {offsets = [0, 0], sizes = [16, 4], strides = [1, 1]} : vector<16x32xf32> to vector<16x4xf32>
    %1170 = vector.shape_cast %1169 : vector<16x4xf32> to vector<2x8x4xf32>
    %1171 = vector.extract_strided_slice %1166 {offsets = [0, 0], sizes = [16, 4], strides = [1, 1]} : vector<16x32xf32> to vector<16x4xf32>
    %1172 = vector.shape_cast %1171 : vector<16x4xf32> to vector<2x8x4xf32>
    "tpu.trace_start"() <{level = 10 : i32, message = "btx,bux->btu"}> : () -> ()
    %cst_403 = arith.constant dense<0.000000e+00> : vector<2x8x8xf32>
    %1173 = tpu.matmul %1168, %1170, %cst_403 {dimension_numbers = #tpu.dot_dimension_numbers<[2], [2], [1], [1], [0, 0, 0, 1, 1, 1], [0], [0]>} : vector<2x8x4xf32>, vector<2x8x4xf32>, vector<2x8x8xf32> -> vector<2x8x8xf32>
    "tpu.trace_stop"() : () -> ()
    %cst_404 = arith.constant 0.176776692 : f32
    %1174 = vector.broadcast %cst_404 : f32 to vector<2x8x8xf32>
    %1175 = arith.mulf %1173, %1174 : vector<2x8x8xf32>
    %cst_405 = arith.constant -1.000000e+30 : f32
    %1176 = vector.shape_cast %16 : vector<1x8x8xi1> to vector<1x8x8xi1>
    %1177 = vector.broadcast %1176 : vector<1x8x8xi1> to vector<2x8x8xi1>
    %1178 = vector.broadcast %cst_405 : f32 to vector<2x8x8xf32>
    %1179 = arith.select %1177, %1175, %1178 : vector<2x8x8xi1>, vector<2x8x8xf32>
    %cst_406 = arith.constant dense<0xFF800000> : vector<2x8xf32>
    %1180 = vector.multi_reduction <maximumf>, %1179, %cst_406 [2] : vector<2x8x8xf32> to vector<2x8xf32>
    %1181 = vector.shape_cast %1180 : vector<2x8xf32> to vector<2x8x1xf32>
    %1182 = vector.broadcast %1181 : vector<2x8x1xf32> to vector<2x8x8xf32>
    %1183 = arith.subf %1179, %1182 : vector<2x8x8xf32>
    %1184 = math.exp %1183 : vector<2x8x8xf32>
    %cst_407 = arith.constant dense<0.000000e+00> : vector<2x8xf32>
    %1185 = vector.multi_reduction <add>, %1184, %cst_407 [2] : vector<2x8x8xf32> to vector<2x8xf32>
    %1186 = vector.shape_cast %1185 : vector<2x8xf32> to vector<2x8x1xf32>
    %1187 = tpu.reciprocal %1186 {approx = true} : vector<2x8x1xf32> -> vector<2x8x1xf32>
    %1188 = vector.broadcast %1187 : vector<2x8x1xf32> to vector<2x8x8xf32>
    %1189 = arith.mulf %1184, %1188 : vector<2x8x8xf32>
    "tpu.trace_start"() <{level = 10 : i32, message = "btu,bux->btx"}> : () -> ()
    %cst_408 = arith.constant dense<0.000000e+00> : vector<2x8x4xf32>
    %1190 = tpu.matmul %1189, %1172, %cst_408 {dimension_numbers = #tpu.dot_dimension_numbers<[2], [1], [1], [2], [0, 0, 0, 1, 1, 2], [0], [0]>} : vector<2x8x8xf32>, vector<2x8x4xf32>, vector<2x8x4xf32> -> vector<2x8x4xf32>
    "tpu.trace_stop"() : () -> ()
    %1191 = vector.shape_cast %1190 : vector<2x8x4xf32> to vector<16x4xf32>
    %1192 = vector.extract_strided_slice %1164 {offsets = [0, 4], sizes = [16, 4], strides = [1, 1]} : vector<16x32xf32> to vector<16x4xf32>
    %1193 = vector.shape_cast %1192 : vector<16x4xf32> to vector<2x8x4xf32>
    %1194 = vector.extract_strided_slice %1165 {offsets = [0, 4], sizes = [16, 4], strides = [1, 1]} : vector<16x32xf32> to vector<16x4xf32>
    %1195 = vector.shape_cast %1194 : vector<16x4xf32> to vector<2x8x4xf32>
    %1196 = vector.extract_strided_slice %1166 {offsets = [0, 4], sizes = [16, 4], strides = [1, 1]} : vector<16x32xf32> to vector<16x4xf32>
    %1197 = vector.shape_cast %1196 : vector<16x4xf32> to vector<2x8x4xf32>
    "tpu.trace_start"() <{level = 10 : i32, message = "btx,bux->btu"}> : () -> ()
    %cst_409 = arith.constant dense<0.000000e+00> : vector<2x8x8xf32>
    %1198 = tpu.matmul %1193, %1195, %cst_409 {dimension_numbers = #tpu.dot_dimension_numbers<[2], [2], [1], [1], [0, 0, 0, 1, 1, 1], [0], [0]>} : vector<2x8x4xf32>, vector<2x8x4xf32>, vector<2x8x8xf32> -> vector<2x8x8xf32>
    "tpu.trace_stop"() : () -> ()
    %cst_410 = arith.constant 0.176776692 : f32
    %1199 = vector.broadcast %cst_410 : f32 to vector<2x8x8xf32>
    %1200 = arith.mulf %1198, %1199 : vector<2x8x8xf32>
    %cst_411 = arith.constant -1.000000e+30 : f32
    %1201 = vector.shape_cast %16 : vector<1x8x8xi1> to vector<1x8x8xi1>
    %1202 = vector.broadcast %1201 : vector<1x8x8xi1> to vector<2x8x8xi1>
    %1203 = vector.broadcast %cst_411 : f32 to vector<2x8x8xf32>
    %1204 = arith.select %1202, %1200, %1203 : vector<2x8x8xi1>, vector<2x8x8xf32>
    %cst_412 = arith.constant dense<0xFF800000> : vector<2x8xf32>
    %1205 = vector.multi_reduction <maximumf>, %1204, %cst_412 [2] : vector<2x8x8xf32> to vector<2x8xf32>
    %1206 = vector.shape_cast %1205 : vector<2x8xf32> to vector<2x8x1xf32>
    %1207 = vector.broadcast %1206 : vector<2x8x1xf32> to vector<2x8x8xf32>
    %1208 = arith.subf %1204, %1207 : vector<2x8x8xf32>
    %1209 = math.exp %1208 : vector<2x8x8xf32>
    %cst_413 = arith.constant dense<0.000000e+00> : vector<2x8xf32>
    %1210 = vector.multi_reduction <add>, %1209, %cst_413 [2] : vector<2x8x8xf32> to vector<2x8xf32>
    %1211 = vector.shape_cast %1210 : vector<2x8xf32> to vector<2x8x1xf32>
    %1212 = tpu.reciprocal %1211 {approx = true} : vector<2x8x1xf32> -> vector<2x8x1xf32>
    %1213 = vector.broadcast %1212 : vector<2x8x1xf32> to vector<2x8x8xf32>
    %1214 = arith.mulf %1209, %1213 : vector<2x8x8xf32>
    "tpu.trace_start"() <{level = 10 : i32, message = "btu,bux->btx"}> : () -> ()
    %cst_414 = arith.constant dense<0.000000e+00> : vector<2x8x4xf32>
    %1215 = tpu.matmul %1214, %1197, %cst_414 {dimension_numbers = #tpu.dot_dimension_numbers<[2], [1], [1], [2], [0, 0, 0, 1, 1, 2], [0], [0]>} : vector<2x8x8xf32>, vector<2x8x4xf32>, vector<2x8x4xf32> -> vector<2x8x4xf32>
    "tpu.trace_stop"() : () -> ()
    %1216 = vector.shape_cast %1215 : vector<2x8x4xf32> to vector<16x4xf32>
    %1217 = vector.extract_strided_slice %1164 {offsets = [0, 8], sizes = [16, 4], strides = [1, 1]} : vector<16x32xf32> to vector<16x4xf32>
    %1218 = vector.shape_cast %1217 : vector<16x4xf32> to vector<2x8x4xf32>
    %1219 = vector.extract_strided_slice %1165 {offsets = [0, 8], sizes = [16, 4], strides = [1, 1]} : vector<16x32xf32> to vector<16x4xf32>
    %1220 = vector.shape_cast %1219 : vector<16x4xf32> to vector<2x8x4xf32>
    %1221 = vector.extract_strided_slice %1166 {offsets = [0, 8], sizes = [16, 4], strides = [1, 1]} : vector<16x32xf32> to vector<16x4xf32>
    %1222 = vector.shape_cast %1221 : vector<16x4xf32> to vector<2x8x4xf32>
    "tpu.trace_start"() <{level = 10 : i32, message = "btx,bux->btu"}> : () -> ()
    %cst_415 = arith.constant dense<0.000000e+00> : vector<2x8x8xf32>
    %1223 = tpu.matmul %1218, %1220, %cst_415 {dimension_numbers = #tpu.dot_dimension_numbers<[2], [2], [1], [1], [0, 0, 0, 1, 1, 1], [0], [0]>} : vector<2x8x4xf32>, vector<2x8x4xf32>, vector<2x8x8xf32> -> vector<2x8x8xf32>
    "tpu.trace_stop"() : () -> ()
    %cst_416 = arith.constant 0.176776692 : f32
    %1224 = vector.broadcast %cst_416 : f32 to vector<2x8x8xf32>
    %1225 = arith.mulf %1223, %1224 : vector<2x8x8xf32>
    %cst_417 = arith.constant -1.000000e+30 : f32
    %1226 = vector.shape_cast %16 : vector<1x8x8xi1> to vector<1x8x8xi1>
    %1227 = vector.broadcast %1226 : vector<1x8x8xi1> to vector<2x8x8xi1>
    %1228 = vector.broadcast %cst_417 : f32 to vector<2x8x8xf32>
    %1229 = arith.select %1227, %1225, %1228 : vector<2x8x8xi1>, vector<2x8x8xf32>
    %cst_418 = arith.constant dense<0xFF800000> : vector<2x8xf32>
    %1230 = vector.multi_reduction <maximumf>, %1229, %cst_418 [2] : vector<2x8x8xf32> to vector<2x8xf32>
    %1231 = vector.shape_cast %1230 : vector<2x8xf32> to vector<2x8x1xf32>
    %1232 = vector.broadcast %1231 : vector<2x8x1xf32> to vector<2x8x8xf32>
    %1233 = arith.subf %1229, %1232 : vector<2x8x8xf32>
    %1234 = math.exp %1233 : vector<2x8x8xf32>
    %cst_419 = arith.constant dense<0.000000e+00> : vector<2x8xf32>
    %1235 = vector.multi_reduction <add>, %1234, %cst_419 [2] : vector<2x8x8xf32> to vector<2x8xf32>
    %1236 = vector.shape_cast %1235 : vector<2x8xf32> to vector<2x8x1xf32>
    %1237 = tpu.reciprocal %1236 {approx = true} : vector<2x8x1xf32> -> vector<2x8x1xf32>
    %1238 = vector.broadcast %1237 : vector<2x8x1xf32> to vector<2x8x8xf32>
    %1239 = arith.mulf %1234, %1238 : vector<2x8x8xf32>
    "tpu.trace_start"() <{level = 10 : i32, message = "btu,bux->btx"}> : () -> ()
    %cst_420 = arith.constant dense<0.000000e+00> : vector<2x8x4xf32>
    %1240 = tpu.matmul %1239, %1222, %cst_420 {dimension_numbers = #tpu.dot_dimension_numbers<[2], [1], [1], [2], [0, 0, 0, 1, 1, 2], [0], [0]>} : vector<2x8x8xf32>, vector<2x8x4xf32>, vector<2x8x4xf32> -> vector<2x8x4xf32>
    "tpu.trace_stop"() : () -> ()
    %1241 = vector.shape_cast %1240 : vector<2x8x4xf32> to vector<16x4xf32>
    %1242 = vector.extract_strided_slice %1164 {offsets = [0, 12], sizes = [16, 4], strides = [1, 1]} : vector<16x32xf32> to vector<16x4xf32>
    %1243 = vector.shape_cast %1242 : vector<16x4xf32> to vector<2x8x4xf32>
    %1244 = vector.extract_strided_slice %1165 {offsets = [0, 12], sizes = [16, 4], strides = [1, 1]} : vector<16x32xf32> to vector<16x4xf32>
    %1245 = vector.shape_cast %1244 : vector<16x4xf32> to vector<2x8x4xf32>
    %1246 = vector.extract_strided_slice %1166 {offsets = [0, 12], sizes = [16, 4], strides = [1, 1]} : vector<16x32xf32> to vector<16x4xf32>
    %1247 = vector.shape_cast %1246 : vector<16x4xf32> to vector<2x8x4xf32>
    "tpu.trace_start"() <{level = 10 : i32, message = "btx,bux->btu"}> : () -> ()
    %cst_421 = arith.constant dense<0.000000e+00> : vector<2x8x8xf32>
    %1248 = tpu.matmul %1243, %1245, %cst_421 {dimension_numbers = #tpu.dot_dimension_numbers<[2], [2], [1], [1], [0, 0, 0, 1, 1, 1], [0], [0]>} : vector<2x8x4xf32>, vector<2x8x4xf32>, vector<2x8x8xf32> -> vector<2x8x8xf32>
    "tpu.trace_stop"() : () -> ()
    %cst_422 = arith.constant 0.176776692 : f32
    %1249 = vector.broadcast %cst_422 : f32 to vector<2x8x8xf32>
    %1250 = arith.mulf %1248, %1249 : vector<2x8x8xf32>
    %cst_423 = arith.constant -1.000000e+30 : f32
    %1251 = vector.shape_cast %16 : vector<1x8x8xi1> to vector<1x8x8xi1>
    %1252 = vector.broadcast %1251 : vector<1x8x8xi1> to vector<2x8x8xi1>
    %1253 = vector.broadcast %cst_423 : f32 to vector<2x8x8xf32>
    %1254 = arith.select %1252, %1250, %1253 : vector<2x8x8xi1>, vector<2x8x8xf32>
    %cst_424 = arith.constant dense<0xFF800000> : vector<2x8xf32>
    %1255 = vector.multi_reduction <maximumf>, %1254, %cst_424 [2] : vector<2x8x8xf32> to vector<2x8xf32>
    %1256 = vector.shape_cast %1255 : vector<2x8xf32> to vector<2x8x1xf32>
    %1257 = vector.broadcast %1256 : vector<2x8x1xf32> to vector<2x8x8xf32>
    %1258 = arith.subf %1254, %1257 : vector<2x8x8xf32>
    %1259 = math.exp %1258 : vector<2x8x8xf32>
    %cst_425 = arith.constant dense<0.000000e+00> : vector<2x8xf32>
    %1260 = vector.multi_reduction <add>, %1259, %cst_425 [2] : vector<2x8x8xf32> to vector<2x8xf32>
    %1261 = vector.shape_cast %1260 : vector<2x8xf32> to vector<2x8x1xf32>
    %1262 = tpu.reciprocal %1261 {approx = true} : vector<2x8x1xf32> -> vector<2x8x1xf32>
    %1263 = vector.broadcast %1262 : vector<2x8x1xf32> to vector<2x8x8xf32>
    %1264 = arith.mulf %1259, %1263 : vector<2x8x8xf32>
    "tpu.trace_start"() <{level = 10 : i32, message = "btu,bux->btx"}> : () -> ()
    %cst_426 = arith.constant dense<0.000000e+00> : vector<2x8x4xf32>
    %1265 = tpu.matmul %1264, %1247, %cst_426 {dimension_numbers = #tpu.dot_dimension_numbers<[2], [1], [1], [2], [0, 0, 0, 1, 1, 2], [0], [0]>} : vector<2x8x8xf32>, vector<2x8x4xf32>, vector<2x8x4xf32> -> vector<2x8x4xf32>
    "tpu.trace_stop"() : () -> ()
    %1266 = vector.shape_cast %1265 : vector<2x8x4xf32> to vector<16x4xf32>
    %1267 = vector.extract_strided_slice %1164 {offsets = [0, 16], sizes = [16, 4], strides = [1, 1]} : vector<16x32xf32> to vector<16x4xf32>
    %1268 = vector.shape_cast %1267 : vector<16x4xf32> to vector<2x8x4xf32>
    %1269 = vector.extract_strided_slice %1165 {offsets = [0, 16], sizes = [16, 4], strides = [1, 1]} : vector<16x32xf32> to vector<16x4xf32>
    %1270 = vector.shape_cast %1269 : vector<16x4xf32> to vector<2x8x4xf32>
    %1271 = vector.extract_strided_slice %1166 {offsets = [0, 16], sizes = [16, 4], strides = [1, 1]} : vector<16x32xf32> to vector<16x4xf32>
    %1272 = vector.shape_cast %1271 : vector<16x4xf32> to vector<2x8x4xf32>
    "tpu.trace_start"() <{level = 10 : i32, message = "btx,bux->btu"}> : () -> ()
    %cst_427 = arith.constant dense<0.000000e+00> : vector<2x8x8xf32>
    %1273 = tpu.matmul %1268, %1270, %cst_427 {dimension_numbers = #tpu.dot_dimension_numbers<[2], [2], [1], [1], [0, 0, 0, 1, 1, 1], [0], [0]>} : vector<2x8x4xf32>, vector<2x8x4xf32>, vector<2x8x8xf32> -> vector<2x8x8xf32>
    "tpu.trace_stop"() : () -> ()
    %cst_428 = arith.constant 0.176776692 : f32
    %1274 = vector.broadcast %cst_428 : f32 to vector<2x8x8xf32>
    %1275 = arith.mulf %1273, %1274 : vector<2x8x8xf32>
    %cst_429 = arith.constant -1.000000e+30 : f32
    %1276 = vector.shape_cast %16 : vector<1x8x8xi1> to vector<1x8x8xi1>
    %1277 = vector.broadcast %1276 : vector<1x8x8xi1> to vector<2x8x8xi1>
    %1278 = vector.broadcast %cst_429 : f32 to vector<2x8x8xf32>
    %1279 = arith.select %1277, %1275, %1278 : vector<2x8x8xi1>, vector<2x8x8xf32>
    %cst_430 = arith.constant dense<0xFF800000> : vector<2x8xf32>
    %1280 = vector.multi_reduction <maximumf>, %1279, %cst_430 [2] : vector<2x8x8xf32> to vector<2x8xf32>
    %1281 = vector.shape_cast %1280 : vector<2x8xf32> to vector<2x8x1xf32>
    %1282 = vector.broadcast %1281 : vector<2x8x1xf32> to vector<2x8x8xf32>
    %1283 = arith.subf %1279, %1282 : vector<2x8x8xf32>
    %1284 = math.exp %1283 : vector<2x8x8xf32>
    %cst_431 = arith.constant dense<0.000000e+00> : vector<2x8xf32>
    %1285 = vector.multi_reduction <add>, %1284, %cst_431 [2] : vector<2x8x8xf32> to vector<2x8xf32>
    %1286 = vector.shape_cast %1285 : vector<2x8xf32> to vector<2x8x1xf32>
    %1287 = tpu.reciprocal %1286 {approx = true} : vector<2x8x1xf32> -> vector<2x8x1xf32>
    %1288 = vector.broadcast %1287 : vector<2x8x1xf32> to vector<2x8x8xf32>
    %1289 = arith.mulf %1284, %1288 : vector<2x8x8xf32>
    "tpu.trace_start"() <{level = 10 : i32, message = "btu,bux->btx"}> : () -> ()
    %cst_432 = arith.constant dense<0.000000e+00> : vector<2x8x4xf32>
    %1290 = tpu.matmul %1289, %1272, %cst_432 {dimension_numbers = #tpu.dot_dimension_numbers<[2], [1], [1], [2], [0, 0, 0, 1, 1, 2], [0], [0]>} : vector<2x8x8xf32>, vector<2x8x4xf32>, vector<2x8x4xf32> -> vector<2x8x4xf32>
    "tpu.trace_stop"() : () -> ()
    %1291 = vector.shape_cast %1290 : vector<2x8x4xf32> to vector<16x4xf32>
    %1292 = vector.extract_strided_slice %1164 {offsets = [0, 20], sizes = [16, 4], strides = [1, 1]} : vector<16x32xf32> to vector<16x4xf32>
    %1293 = vector.shape_cast %1292 : vector<16x4xf32> to vector<2x8x4xf32>
    %1294 = vector.extract_strided_slice %1165 {offsets = [0, 20], sizes = [16, 4], strides = [1, 1]} : vector<16x32xf32> to vector<16x4xf32>
    %1295 = vector.shape_cast %1294 : vector<16x4xf32> to vector<2x8x4xf32>
    %1296 = vector.extract_strided_slice %1166 {offsets = [0, 20], sizes = [16, 4], strides = [1, 1]} : vector<16x32xf32> to vector<16x4xf32>
    %1297 = vector.shape_cast %1296 : vector<16x4xf32> to vector<2x8x4xf32>
    "tpu.trace_start"() <{level = 10 : i32, message = "btx,bux->btu"}> : () -> ()
    %cst_433 = arith.constant dense<0.000000e+00> : vector<2x8x8xf32>
    %1298 = tpu.matmul %1293, %1295, %cst_433 {dimension_numbers = #tpu.dot_dimension_numbers<[2], [2], [1], [1], [0, 0, 0, 1, 1, 1], [0], [0]>} : vector<2x8x4xf32>, vector<2x8x4xf32>, vector<2x8x8xf32> -> vector<2x8x8xf32>
    "tpu.trace_stop"() : () -> ()
    %cst_434 = arith.constant 0.176776692 : f32
    %1299 = vector.broadcast %cst_434 : f32 to vector<2x8x8xf32>
    %1300 = arith.mulf %1298, %1299 : vector<2x8x8xf32>
    %cst_435 = arith.constant -1.000000e+30 : f32
    %1301 = vector.shape_cast %16 : vector<1x8x8xi1> to vector<1x8x8xi1>
    %1302 = vector.broadcast %1301 : vector<1x8x8xi1> to vector<2x8x8xi1>
    %1303 = vector.broadcast %cst_435 : f32 to vector<2x8x8xf32>
    %1304 = arith.select %1302, %1300, %1303 : vector<2x8x8xi1>, vector<2x8x8xf32>
    %cst_436 = arith.constant dense<0xFF800000> : vector<2x8xf32>
    %1305 = vector.multi_reduction <maximumf>, %1304, %cst_436 [2] : vector<2x8x8xf32> to vector<2x8xf32>
    %1306 = vector.shape_cast %1305 : vector<2x8xf32> to vector<2x8x1xf32>
    %1307 = vector.broadcast %1306 : vector<2x8x1xf32> to vector<2x8x8xf32>
    %1308 = arith.subf %1304, %1307 : vector<2x8x8xf32>
    %1309 = math.exp %1308 : vector<2x8x8xf32>
    %cst_437 = arith.constant dense<0.000000e+00> : vector<2x8xf32>
    %1310 = vector.multi_reduction <add>, %1309, %cst_437 [2] : vector<2x8x8xf32> to vector<2x8xf32>
    %1311 = vector.shape_cast %1310 : vector<2x8xf32> to vector<2x8x1xf32>
    %1312 = tpu.reciprocal %1311 {approx = true} : vector<2x8x1xf32> -> vector<2x8x1xf32>
    %1313 = vector.broadcast %1312 : vector<2x8x1xf32> to vector<2x8x8xf32>
    %1314 = arith.mulf %1309, %1313 : vector<2x8x8xf32>
    "tpu.trace_start"() <{level = 10 : i32, message = "btu,bux->btx"}> : () -> ()
    %cst_438 = arith.constant dense<0.000000e+00> : vector<2x8x4xf32>
    %1315 = tpu.matmul %1314, %1297, %cst_438 {dimension_numbers = #tpu.dot_dimension_numbers<[2], [1], [1], [2], [0, 0, 0, 1, 1, 2], [0], [0]>} : vector<2x8x8xf32>, vector<2x8x4xf32>, vector<2x8x4xf32> -> vector<2x8x4xf32>
    "tpu.trace_stop"() : () -> ()
    %1316 = vector.shape_cast %1315 : vector<2x8x4xf32> to vector<16x4xf32>
    %1317 = vector.extract_strided_slice %1164 {offsets = [0, 24], sizes = [16, 4], strides = [1, 1]} : vector<16x32xf32> to vector<16x4xf32>
    %1318 = vector.shape_cast %1317 : vector<16x4xf32> to vector<2x8x4xf32>
    %1319 = vector.extract_strided_slice %1165 {offsets = [0, 24], sizes = [16, 4], strides = [1, 1]} : vector<16x32xf32> to vector<16x4xf32>
    %1320 = vector.shape_cast %1319 : vector<16x4xf32> to vector<2x8x4xf32>
    %1321 = vector.extract_strided_slice %1166 {offsets = [0, 24], sizes = [16, 4], strides = [1, 1]} : vector<16x32xf32> to vector<16x4xf32>
    %1322 = vector.shape_cast %1321 : vector<16x4xf32> to vector<2x8x4xf32>
    "tpu.trace_start"() <{level = 10 : i32, message = "btx,bux->btu"}> : () -> ()
    %cst_439 = arith.constant dense<0.000000e+00> : vector<2x8x8xf32>
    %1323 = tpu.matmul %1318, %1320, %cst_439 {dimension_numbers = #tpu.dot_dimension_numbers<[2], [2], [1], [1], [0, 0, 0, 1, 1, 1], [0], [0]>} : vector<2x8x4xf32>, vector<2x8x4xf32>, vector<2x8x8xf32> -> vector<2x8x8xf32>
    "tpu.trace_stop"() : () -> ()
    %cst_440 = arith.constant 0.176776692 : f32
    %1324 = vector.broadcast %cst_440 : f32 to vector<2x8x8xf32>
    %1325 = arith.mulf %1323, %1324 : vector<2x8x8xf32>
    %cst_441 = arith.constant -1.000000e+30 : f32
    %1326 = vector.shape_cast %16 : vector<1x8x8xi1> to vector<1x8x8xi1>
    %1327 = vector.broadcast %1326 : vector<1x8x8xi1> to vector<2x8x8xi1>
    %1328 = vector.broadcast %cst_441 : f32 to vector<2x8x8xf32>
    %1329 = arith.select %1327, %1325, %1328 : vector<2x8x8xi1>, vector<2x8x8xf32>
    %cst_442 = arith.constant dense<0xFF800000> : vector<2x8xf32>
    %1330 = vector.multi_reduction <maximumf>, %1329, %cst_442 [2] : vector<2x8x8xf32> to vector<2x8xf32>
    %1331 = vector.shape_cast %1330 : vector<2x8xf32> to vector<2x8x1xf32>
    %1332 = vector.broadcast %1331 : vector<2x8x1xf32> to vector<2x8x8xf32>
    %1333 = arith.subf %1329, %1332 : vector<2x8x8xf32>
    %1334 = math.exp %1333 : vector<2x8x8xf32>
    %cst_443 = arith.constant dense<0.000000e+00> : vector<2x8xf32>
    %1335 = vector.multi_reduction <add>, %1334, %cst_443 [2] : vector<2x8x8xf32> to vector<2x8xf32>
    %1336 = vector.shape_cast %1335 : vector<2x8xf32> to vector<2x8x1xf32>
    %1337 = tpu.reciprocal %1336 {approx = true} : vector<2x8x1xf32> -> vector<2x8x1xf32>
    %1338 = vector.broadcast %1337 : vector<2x8x1xf32> to vector<2x8x8xf32>
    %1339 = arith.mulf %1334, %1338 : vector<2x8x8xf32>
    "tpu.trace_start"() <{level = 10 : i32, message = "btu,bux->btx"}> : () -> ()
    %cst_444 = arith.constant dense<0.000000e+00> : vector<2x8x4xf32>
    %1340 = tpu.matmul %1339, %1322, %cst_444 {dimension_numbers = #tpu.dot_dimension_numbers<[2], [1], [1], [2], [0, 0, 0, 1, 1, 2], [0], [0]>} : vector<2x8x8xf32>, vector<2x8x4xf32>, vector<2x8x4xf32> -> vector<2x8x4xf32>
    "tpu.trace_stop"() : () -> ()
    %1341 = vector.shape_cast %1340 : vector<2x8x4xf32> to vector<16x4xf32>
    %1342 = vector.extract_strided_slice %1164 {offsets = [0, 28], sizes = [16, 4], strides = [1, 1]} : vector<16x32xf32> to vector<16x4xf32>
    %1343 = vector.shape_cast %1342 : vector<16x4xf32> to vector<2x8x4xf32>
    %1344 = vector.extract_strided_slice %1165 {offsets = [0, 28], sizes = [16, 4], strides = [1, 1]} : vector<16x32xf32> to vector<16x4xf32>
    %1345 = vector.shape_cast %1344 : vector<16x4xf32> to vector<2x8x4xf32>
    %1346 = vector.extract_strided_slice %1166 {offsets = [0, 28], sizes = [16, 4], strides = [1, 1]} : vector<16x32xf32> to vector<16x4xf32>
    %1347 = vector.shape_cast %1346 : vector<16x4xf32> to vector<2x8x4xf32>
    "tpu.trace_start"() <{level = 10 : i32, message = "btx,bux->btu"}> : () -> ()
    %cst_445 = arith.constant dense<0.000000e+00> : vector<2x8x8xf32>
    %1348 = tpu.matmul %1343, %1345, %cst_445 {dimension_numbers = #tpu.dot_dimension_numbers<[2], [2], [1], [1], [0, 0, 0, 1, 1, 1], [0], [0]>} : vector<2x8x4xf32>, vector<2x8x4xf32>, vector<2x8x8xf32> -> vector<2x8x8xf32>
    "tpu.trace_stop"() : () -> ()
    %cst_446 = arith.constant 0.176776692 : f32
    %1349 = vector.broadcast %cst_446 : f32 to vector<2x8x8xf32>
    %1350 = arith.mulf %1348, %1349 : vector<2x8x8xf32>
    %cst_447 = arith.constant -1.000000e+30 : f32
    %1351 = vector.shape_cast %16 : vector<1x8x8xi1> to vector<1x8x8xi1>
    %1352 = vector.broadcast %1351 : vector<1x8x8xi1> to vector<2x8x8xi1>
    %1353 = vector.broadcast %cst_447 : f32 to vector<2x8x8xf32>
    %1354 = arith.select %1352, %1350, %1353 : vector<2x8x8xi1>, vector<2x8x8xf32>
    %cst_448 = arith.constant dense<0xFF800000> : vector<2x8xf32>
    %1355 = vector.multi_reduction <maximumf>, %1354, %cst_448 [2] : vector<2x8x8xf32> to vector<2x8xf32>
    %1356 = vector.shape_cast %1355 : vector<2x8xf32> to vector<2x8x1xf32>
    %1357 = vector.broadcast %1356 : vector<2x8x1xf32> to vector<2x8x8xf32>
    %1358 = arith.subf %1354, %1357 : vector<2x8x8xf32>
    %1359 = math.exp %1358 : vector<2x8x8xf32>
    %cst_449 = arith.constant dense<0.000000e+00> : vector<2x8xf32>
    %1360 = vector.multi_reduction <add>, %1359, %cst_449 [2] : vector<2x8x8xf32> to vector<2x8xf32>
    %1361 = vector.shape_cast %1360 : vector<2x8xf32> to vector<2x8x1xf32>
    %1362 = tpu.reciprocal %1361 {approx = true} : vector<2x8x1xf32> -> vector<2x8x1xf32>
    %1363 = vector.broadcast %1362 : vector<2x8x1xf32> to vector<2x8x8xf32>
    %1364 = arith.mulf %1359, %1363 : vector<2x8x8xf32>
    "tpu.trace_start"() <{level = 10 : i32, message = "btu,bux->btx"}> : () -> ()
    %cst_450 = arith.constant dense<0.000000e+00> : vector<2x8x4xf32>
    %1365 = tpu.matmul %1364, %1347, %cst_450 {dimension_numbers = #tpu.dot_dimension_numbers<[2], [1], [1], [2], [0, 0, 0, 1, 1, 2], [0], [0]>} : vector<2x8x8xf32>, vector<2x8x4xf32>, vector<2x8x4xf32> -> vector<2x8x4xf32>
    "tpu.trace_stop"() : () -> ()
    %1366 = vector.shape_cast %1365 : vector<2x8x4xf32> to vector<16x4xf32>
    %1367 = tpu.concatenate %1191, %1216, %1241, %1266, %1291, %1316, %1341, %1366 in 1 : vector<16x4xf32>, vector<16x4xf32>, vector<16x4xf32>, vector<16x4xf32>, vector<16x4xf32>, vector<16x4xf32>, vector<16x4xf32>, vector<16x4xf32> -> vector<16x32xf32>
    %c4_451 = arith.constant 4 : index
    %c0_452 = arith.constant 0 : index
    %c0_453 = arith.constant 0 : index
    %1368 = vector.load %arg7[%c4_451, %c0_452, %c0_453] : memref<6x32x32xf32, #tpu.memory_space<vmem>>, vector<1x32x32xf32>
    %1369 = vector.shape_cast %1368 : vector<1x32x32xf32> to vector<32x32xf32>
    %cst_454 = arith.constant dense<0.000000e+00> : vector<16x32xf32>
    %1370 = tpu.matmul %1367, %1369, %cst_454 {dimension_numbers = #tpu.dot_dimension_numbers<[1], [0], [0], [1], [0, 0, 1, 1], [], []>} : vector<16x32xf32>, vector<32x32xf32>, vector<16x32xf32> -> vector<16x32xf32>
    %c4_455 = arith.constant 4 : index
    %c0_456 = arith.constant 0 : index
    %c0_457 = arith.constant 0 : index
    %1371 = vector.load %arg8[%c4_455, %c0_456, %c0_457] : memref<6x1x32xf32, #tpu.memory_space<vmem>>, vector<1x1x32xf32>
    %1372 = vector.shape_cast %1371 : vector<1x1x32xf32> to vector<1x32xf32>
    %1373 = vector.broadcast %1372 : vector<1x32xf32> to vector<16x32xf32>
    %1374 = arith.addf %1370, %1373 : vector<16x32xf32>
    %1375 = arith.addf %1136, %1374 : vector<16x32xf32>
    %c4_458 = arith.constant 4 : index
    %c0_459 = arith.constant 0 : index
    %c0_460 = arith.constant 0 : index
    %1376 = vector.load %arg9[%c4_458, %c0_459, %c0_460] : memref<6x1x32xf32, #tpu.memory_space<vmem>>, vector<1x1x32xf32>
    %1377 = vector.shape_cast %1376 : vector<1x1x32xf32> to vector<1x32xf32>
    %c4_461 = arith.constant 4 : index
    %c0_462 = arith.constant 0 : index
    %c0_463 = arith.constant 0 : index
    %1378 = vector.load %arg10[%c4_461, %c0_462, %c0_463] : memref<6x1x32xf32, #tpu.memory_space<vmem>>, vector<1x1x32xf32>
    %1379 = vector.shape_cast %1378 : vector<1x1x32xf32> to vector<1x32xf32>
    %cst_464 = arith.constant dense<0.000000e+00> : vector<16xf32>
    %1380 = vector.multi_reduction <add>, %1375, %cst_464 [1] : vector<16x32xf32> to vector<16xf32>
    %1381 = vector.shape_cast %1380 : vector<16xf32> to vector<16x1xf32>
    %cst_465 = arith.constant 3.200000e+01 : f32
    %1382 = vector.broadcast %cst_465 : f32 to vector<16x1xf32>
    %1383 = arith.divf %1381, %1382 : vector<16x1xf32>
    %1384 = vector.broadcast %1383 : vector<16x1xf32> to vector<16x32xf32>
    %1385 = arith.subf %1375, %1384 : vector<16x32xf32>
    %1386 = arith.mulf %1385, %1385 : vector<16x32xf32>
    %cst_466 = arith.constant dense<0.000000e+00> : vector<16xf32>
    %1387 = vector.multi_reduction <add>, %1386, %cst_466 [1] : vector<16x32xf32> to vector<16xf32>
    %1388 = vector.shape_cast %1387 : vector<16xf32> to vector<16x1xf32>
    %cst_467 = arith.constant 3.200000e+01 : f32
    %1389 = vector.broadcast %cst_467 : f32 to vector<16x1xf32>
    %1390 = arith.divf %1388, %1389 : vector<16x1xf32>
    %cst_468 = arith.constant 9.99999974E-6 : f32
    %1391 = vector.broadcast %cst_468 : f32 to vector<16x1xf32>
    %1392 = arith.addf %1390, %1391 : vector<16x1xf32>
    %1393 = math.rsqrt %1392 : vector<16x1xf32>
    %1394 = vector.broadcast %1393 : vector<16x1xf32> to vector<16x32xf32>
    %1395 = arith.mulf %1385, %1394 : vector<16x32xf32>
    %1396 = vector.broadcast %1377 : vector<1x32xf32> to vector<16x32xf32>
    %1397 = arith.mulf %1395, %1396 : vector<16x32xf32>
    %1398 = vector.broadcast %1379 : vector<1x32xf32> to vector<16x32xf32>
    %1399 = arith.addf %1397, %1398 : vector<16x32xf32>
    %c4_469 = arith.constant 4 : index
    %c0_470 = arith.constant 0 : index
    %c0_471 = arith.constant 0 : index
    %1400 = vector.load %arg11[%c4_469, %c0_470, %c0_471] : memref<6x32x128xf32, #tpu.memory_space<vmem>>, vector<1x32x128xf32>
    %1401 = vector.shape_cast %1400 : vector<1x32x128xf32> to vector<32x128xf32>
    %cst_472 = arith.constant dense<0.000000e+00> : vector<16x128xf32>
    %1402 = tpu.matmul %1399, %1401, %cst_472 {dimension_numbers = #tpu.dot_dimension_numbers<[1], [0], [0], [1], [0, 0, 1, 1], [], []>} : vector<16x32xf32>, vector<32x128xf32>, vector<16x128xf32> -> vector<16x128xf32>
    %c4_473 = arith.constant 4 : index
    %c0_474 = arith.constant 0 : index
    %c0_475 = arith.constant 0 : index
    %1403 = vector.load %arg12[%c4_473, %c0_474, %c0_475] : memref<6x1x128xf32, #tpu.memory_space<vmem>>, vector<1x1x128xf32>
    %1404 = vector.shape_cast %1403 : vector<1x1x128xf32> to vector<1x128xf32>
    %1405 = vector.broadcast %1404 : vector<1x128xf32> to vector<16x128xf32>
    %1406 = arith.addf %1402, %1405 : vector<16x128xf32>
    %cst_476 = arith.constant 0.000000e+00 : f32
    %1407 = vector.broadcast %cst_476 : f32 to vector<16x128xf32>
    %1408 = arith.maximumf %1406, %1407 : vector<16x128xf32>
    %c4_477 = arith.constant 4 : index
    %c0_478 = arith.constant 0 : index
    %c0_479 = arith.constant 0 : index
    %1409 = vector.load %arg13[%c4_477, %c0_478, %c0_479] : memref<6x128x32xf32, #tpu.memory_space<vmem>>, vector<1x128x32xf32>
    %1410 = vector.shape_cast %1409 : vector<1x128x32xf32> to vector<128x32xf32>
    %cst_480 = arith.constant dense<0.000000e+00> : vector<16x32xf32>
    %1411 = tpu.matmul %1408, %1410, %cst_480 {dimension_numbers = #tpu.dot_dimension_numbers<[1], [0], [0], [1], [0, 0, 1, 1], [], []>} : vector<16x128xf32>, vector<128x32xf32>, vector<16x32xf32> -> vector<16x32xf32>
    %c4_481 = arith.constant 4 : index
    %c0_482 = arith.constant 0 : index
    %c0_483 = arith.constant 0 : index
    %1412 = vector.load %arg14[%c4_481, %c0_482, %c0_483] : memref<6x1x32xf32, #tpu.memory_space<vmem>>, vector<1x1x32xf32>
    %1413 = vector.shape_cast %1412 : vector<1x1x32xf32> to vector<1x32xf32>
    %1414 = vector.broadcast %1413 : vector<1x32xf32> to vector<16x32xf32>
    %1415 = arith.addf %1411, %1414 : vector<16x32xf32>
    %1416 = arith.addf %1375, %1415 : vector<16x32xf32>
    %c5 = arith.constant 5 : index
    %c0_484 = arith.constant 0 : index
    %c0_485 = arith.constant 0 : index
    %1417 = vector.load %arg4[%c5, %c0_484, %c0_485] : memref<6x1x32xf32, #tpu.memory_space<vmem>>, vector<1x1x32xf32>
    %1418 = vector.shape_cast %1417 : vector<1x1x32xf32> to vector<1x32xf32>
    %c5_486 = arith.constant 5 : index
    %c0_487 = arith.constant 0 : index
    %c0_488 = arith.constant 0 : index
    %1419 = vector.load %arg5[%c5_486, %c0_487, %c0_488] : memref<6x1x32xf32, #tpu.memory_space<vmem>>, vector<1x1x32xf32>
    %1420 = vector.shape_cast %1419 : vector<1x1x32xf32> to vector<1x32xf32>
    %cst_489 = arith.constant dense<0.000000e+00> : vector<16xf32>
    %1421 = vector.multi_reduction <add>, %1416, %cst_489 [1] : vector<16x32xf32> to vector<16xf32>
    %1422 = vector.shape_cast %1421 : vector<16xf32> to vector<16x1xf32>
    %cst_490 = arith.constant 3.200000e+01 : f32
    %1423 = vector.broadcast %cst_490 : f32 to vector<16x1xf32>
    %1424 = arith.divf %1422, %1423 : vector<16x1xf32>
    %1425 = vector.broadcast %1424 : vector<16x1xf32> to vector<16x32xf32>
    %1426 = arith.subf %1416, %1425 : vector<16x32xf32>
    %1427 = arith.mulf %1426, %1426 : vector<16x32xf32>
    %cst_491 = arith.constant dense<0.000000e+00> : vector<16xf32>
    %1428 = vector.multi_reduction <add>, %1427, %cst_491 [1] : vector<16x32xf32> to vector<16xf32>
    %1429 = vector.shape_cast %1428 : vector<16xf32> to vector<16x1xf32>
    %cst_492 = arith.constant 3.200000e+01 : f32
    %1430 = vector.broadcast %cst_492 : f32 to vector<16x1xf32>
    %1431 = arith.divf %1429, %1430 : vector<16x1xf32>
    %cst_493 = arith.constant 9.99999974E-6 : f32
    %1432 = vector.broadcast %cst_493 : f32 to vector<16x1xf32>
    %1433 = arith.addf %1431, %1432 : vector<16x1xf32>
    %1434 = math.rsqrt %1433 : vector<16x1xf32>
    %1435 = vector.broadcast %1434 : vector<16x1xf32> to vector<16x32xf32>
    %1436 = arith.mulf %1426, %1435 : vector<16x32xf32>
    %1437 = vector.broadcast %1418 : vector<1x32xf32> to vector<16x32xf32>
    %1438 = arith.mulf %1436, %1437 : vector<16x32xf32>
    %1439 = vector.broadcast %1420 : vector<1x32xf32> to vector<16x32xf32>
    %1440 = arith.addf %1438, %1439 : vector<16x32xf32>
    %c5_494 = arith.constant 5 : index
    %c0_495 = arith.constant 0 : index
    %c0_496 = arith.constant 0 : index
    %1441 = vector.load %arg6[%c5_494, %c0_495, %c0_496] : memref<6x32x96xf32, #tpu.memory_space<vmem>>, vector<1x32x96xf32>
    %1442 = vector.shape_cast %1441 : vector<1x32x96xf32> to vector<32x96xf32>
    %cst_497 = arith.constant dense<0.000000e+00> : vector<16x96xf32>
    %1443 = tpu.matmul %1440, %1442, %cst_497 {dimension_numbers = #tpu.dot_dimension_numbers<[1], [0], [0], [1], [0, 0, 1, 1], [], []>} : vector<16x32xf32>, vector<32x96xf32>, vector<16x96xf32> -> vector<16x96xf32>
    %1444 = vector.extract_strided_slice %1443 {offsets = [0, 0], sizes = [16, 32], strides = [1, 1]} : vector<16x96xf32> to vector<16x32xf32>
    %1445 = vector.extract_strided_slice %1443 {offsets = [0, 32], sizes = [16, 32], strides = [1, 1]} : vector<16x96xf32> to vector<16x32xf32>
    %1446 = vector.extract_strided_slice %1443 {offsets = [0, 64], sizes = [16, 32], strides = [1, 1]} : vector<16x96xf32> to vector<16x32xf32>
    %1447 = vector.extract_strided_slice %1444 {offsets = [0, 0], sizes = [16, 4], strides = [1, 1]} : vector<16x32xf32> to vector<16x4xf32>
    %1448 = vector.shape_cast %1447 : vector<16x4xf32> to vector<2x8x4xf32>
    %1449 = vector.extract_strided_slice %1445 {offsets = [0, 0], sizes = [16, 4], strides = [1, 1]} : vector<16x32xf32> to vector<16x4xf32>
    %1450 = vector.shape_cast %1449 : vector<16x4xf32> to vector<2x8x4xf32>
    %1451 = vector.extract_strided_slice %1446 {offsets = [0, 0], sizes = [16, 4], strides = [1, 1]} : vector<16x32xf32> to vector<16x4xf32>
    %1452 = vector.shape_cast %1451 : vector<16x4xf32> to vector<2x8x4xf32>
    "tpu.trace_start"() <{level = 10 : i32, message = "btx,bux->btu"}> : () -> ()
    %cst_498 = arith.constant dense<0.000000e+00> : vector<2x8x8xf32>
    %1453 = tpu.matmul %1448, %1450, %cst_498 {dimension_numbers = #tpu.dot_dimension_numbers<[2], [2], [1], [1], [0, 0, 0, 1, 1, 1], [0], [0]>} : vector<2x8x4xf32>, vector<2x8x4xf32>, vector<2x8x8xf32> -> vector<2x8x8xf32>
    "tpu.trace_stop"() : () -> ()
    %cst_499 = arith.constant 0.176776692 : f32
    %1454 = vector.broadcast %cst_499 : f32 to vector<2x8x8xf32>
    %1455 = arith.mulf %1453, %1454 : vector<2x8x8xf32>
    %cst_500 = arith.constant -1.000000e+30 : f32
    %1456 = vector.shape_cast %16 : vector<1x8x8xi1> to vector<1x8x8xi1>
    %1457 = vector.broadcast %1456 : vector<1x8x8xi1> to vector<2x8x8xi1>
    %1458 = vector.broadcast %cst_500 : f32 to vector<2x8x8xf32>
    %1459 = arith.select %1457, %1455, %1458 : vector<2x8x8xi1>, vector<2x8x8xf32>
    %cst_501 = arith.constant dense<0xFF800000> : vector<2x8xf32>
    %1460 = vector.multi_reduction <maximumf>, %1459, %cst_501 [2] : vector<2x8x8xf32> to vector<2x8xf32>
    %1461 = vector.shape_cast %1460 : vector<2x8xf32> to vector<2x8x1xf32>
    %1462 = vector.broadcast %1461 : vector<2x8x1xf32> to vector<2x8x8xf32>
    %1463 = arith.subf %1459, %1462 : vector<2x8x8xf32>
    %1464 = math.exp %1463 : vector<2x8x8xf32>
    %cst_502 = arith.constant dense<0.000000e+00> : vector<2x8xf32>
    %1465 = vector.multi_reduction <add>, %1464, %cst_502 [2] : vector<2x8x8xf32> to vector<2x8xf32>
    %1466 = vector.shape_cast %1465 : vector<2x8xf32> to vector<2x8x1xf32>
    %1467 = tpu.reciprocal %1466 {approx = true} : vector<2x8x1xf32> -> vector<2x8x1xf32>
    %1468 = vector.broadcast %1467 : vector<2x8x1xf32> to vector<2x8x8xf32>
    %1469 = arith.mulf %1464, %1468 : vector<2x8x8xf32>
    "tpu.trace_start"() <{level = 10 : i32, message = "btu,bux->btx"}> : () -> ()
    %cst_503 = arith.constant dense<0.000000e+00> : vector<2x8x4xf32>
    %1470 = tpu.matmul %1469, %1452, %cst_503 {dimension_numbers = #tpu.dot_dimension_numbers<[2], [1], [1], [2], [0, 0, 0, 1, 1, 2], [0], [0]>} : vector<2x8x8xf32>, vector<2x8x4xf32>, vector<2x8x4xf32> -> vector<2x8x4xf32>
    "tpu.trace_stop"() : () -> ()
    %1471 = vector.shape_cast %1470 : vector<2x8x4xf32> to vector<16x4xf32>
    %1472 = vector.extract_strided_slice %1444 {offsets = [0, 4], sizes = [16, 4], strides = [1, 1]} : vector<16x32xf32> to vector<16x4xf32>
    %1473 = vector.shape_cast %1472 : vector<16x4xf32> to vector<2x8x4xf32>
    %1474 = vector.extract_strided_slice %1445 {offsets = [0, 4], sizes = [16, 4], strides = [1, 1]} : vector<16x32xf32> to vector<16x4xf32>
    %1475 = vector.shape_cast %1474 : vector<16x4xf32> to vector<2x8x4xf32>
    %1476 = vector.extract_strided_slice %1446 {offsets = [0, 4], sizes = [16, 4], strides = [1, 1]} : vector<16x32xf32> to vector<16x4xf32>
    %1477 = vector.shape_cast %1476 : vector<16x4xf32> to vector<2x8x4xf32>
    "tpu.trace_start"() <{level = 10 : i32, message = "btx,bux->btu"}> : () -> ()
    %cst_504 = arith.constant dense<0.000000e+00> : vector<2x8x8xf32>
    %1478 = tpu.matmul %1473, %1475, %cst_504 {dimension_numbers = #tpu.dot_dimension_numbers<[2], [2], [1], [1], [0, 0, 0, 1, 1, 1], [0], [0]>} : vector<2x8x4xf32>, vector<2x8x4xf32>, vector<2x8x8xf32> -> vector<2x8x8xf32>
    "tpu.trace_stop"() : () -> ()
    %cst_505 = arith.constant 0.176776692 : f32
    %1479 = vector.broadcast %cst_505 : f32 to vector<2x8x8xf32>
    %1480 = arith.mulf %1478, %1479 : vector<2x8x8xf32>
    %cst_506 = arith.constant -1.000000e+30 : f32
    %1481 = vector.shape_cast %16 : vector<1x8x8xi1> to vector<1x8x8xi1>
    %1482 = vector.broadcast %1481 : vector<1x8x8xi1> to vector<2x8x8xi1>
    %1483 = vector.broadcast %cst_506 : f32 to vector<2x8x8xf32>
    %1484 = arith.select %1482, %1480, %1483 : vector<2x8x8xi1>, vector<2x8x8xf32>
    %cst_507 = arith.constant dense<0xFF800000> : vector<2x8xf32>
    %1485 = vector.multi_reduction <maximumf>, %1484, %cst_507 [2] : vector<2x8x8xf32> to vector<2x8xf32>
    %1486 = vector.shape_cast %1485 : vector<2x8xf32> to vector<2x8x1xf32>
    %1487 = vector.broadcast %1486 : vector<2x8x1xf32> to vector<2x8x8xf32>
    %1488 = arith.subf %1484, %1487 : vector<2x8x8xf32>
    %1489 = math.exp %1488 : vector<2x8x8xf32>
    %cst_508 = arith.constant dense<0.000000e+00> : vector<2x8xf32>
    %1490 = vector.multi_reduction <add>, %1489, %cst_508 [2] : vector<2x8x8xf32> to vector<2x8xf32>
    %1491 = vector.shape_cast %1490 : vector<2x8xf32> to vector<2x8x1xf32>
    %1492 = tpu.reciprocal %1491 {approx = true} : vector<2x8x1xf32> -> vector<2x8x1xf32>
    %1493 = vector.broadcast %1492 : vector<2x8x1xf32> to vector<2x8x8xf32>
    %1494 = arith.mulf %1489, %1493 : vector<2x8x8xf32>
    "tpu.trace_start"() <{level = 10 : i32, message = "btu,bux->btx"}> : () -> ()
    %cst_509 = arith.constant dense<0.000000e+00> : vector<2x8x4xf32>
    %1495 = tpu.matmul %1494, %1477, %cst_509 {dimension_numbers = #tpu.dot_dimension_numbers<[2], [1], [1], [2], [0, 0, 0, 1, 1, 2], [0], [0]>} : vector<2x8x8xf32>, vector<2x8x4xf32>, vector<2x8x4xf32> -> vector<2x8x4xf32>
    "tpu.trace_stop"() : () -> ()
    %1496 = vector.shape_cast %1495 : vector<2x8x4xf32> to vector<16x4xf32>
    %1497 = vector.extract_strided_slice %1444 {offsets = [0, 8], sizes = [16, 4], strides = [1, 1]} : vector<16x32xf32> to vector<16x4xf32>
    %1498 = vector.shape_cast %1497 : vector<16x4xf32> to vector<2x8x4xf32>
    %1499 = vector.extract_strided_slice %1445 {offsets = [0, 8], sizes = [16, 4], strides = [1, 1]} : vector<16x32xf32> to vector<16x4xf32>
    %1500 = vector.shape_cast %1499 : vector<16x4xf32> to vector<2x8x4xf32>
    %1501 = vector.extract_strided_slice %1446 {offsets = [0, 8], sizes = [16, 4], strides = [1, 1]} : vector<16x32xf32> to vector<16x4xf32>
    %1502 = vector.shape_cast %1501 : vector<16x4xf32> to vector<2x8x4xf32>
    "tpu.trace_start"() <{level = 10 : i32, message = "btx,bux->btu"}> : () -> ()
    %cst_510 = arith.constant dense<0.000000e+00> : vector<2x8x8xf32>
    %1503 = tpu.matmul %1498, %1500, %cst_510 {dimension_numbers = #tpu.dot_dimension_numbers<[2], [2], [1], [1], [0, 0, 0, 1, 1, 1], [0], [0]>} : vector<2x8x4xf32>, vector<2x8x4xf32>, vector<2x8x8xf32> -> vector<2x8x8xf32>
    "tpu.trace_stop"() : () -> ()
    %cst_511 = arith.constant 0.176776692 : f32
    %1504 = vector.broadcast %cst_511 : f32 to vector<2x8x8xf32>
    %1505 = arith.mulf %1503, %1504 : vector<2x8x8xf32>
    %cst_512 = arith.constant -1.000000e+30 : f32
    %1506 = vector.shape_cast %16 : vector<1x8x8xi1> to vector<1x8x8xi1>
    %1507 = vector.broadcast %1506 : vector<1x8x8xi1> to vector<2x8x8xi1>
    %1508 = vector.broadcast %cst_512 : f32 to vector<2x8x8xf32>
    %1509 = arith.select %1507, %1505, %1508 : vector<2x8x8xi1>, vector<2x8x8xf32>
    %cst_513 = arith.constant dense<0xFF800000> : vector<2x8xf32>
    %1510 = vector.multi_reduction <maximumf>, %1509, %cst_513 [2] : vector<2x8x8xf32> to vector<2x8xf32>
    %1511 = vector.shape_cast %1510 : vector<2x8xf32> to vector<2x8x1xf32>
    %1512 = vector.broadcast %1511 : vector<2x8x1xf32> to vector<2x8x8xf32>
    %1513 = arith.subf %1509, %1512 : vector<2x8x8xf32>
    %1514 = math.exp %1513 : vector<2x8x8xf32>
    %cst_514 = arith.constant dense<0.000000e+00> : vector<2x8xf32>
    %1515 = vector.multi_reduction <add>, %1514, %cst_514 [2] : vector<2x8x8xf32> to vector<2x8xf32>
    %1516 = vector.shape_cast %1515 : vector<2x8xf32> to vector<2x8x1xf32>
    %1517 = tpu.reciprocal %1516 {approx = true} : vector<2x8x1xf32> -> vector<2x8x1xf32>
    %1518 = vector.broadcast %1517 : vector<2x8x1xf32> to vector<2x8x8xf32>
    %1519 = arith.mulf %1514, %1518 : vector<2x8x8xf32>
    "tpu.trace_start"() <{level = 10 : i32, message = "btu,bux->btx"}> : () -> ()
    %cst_515 = arith.constant dense<0.000000e+00> : vector<2x8x4xf32>
    %1520 = tpu.matmul %1519, %1502, %cst_515 {dimension_numbers = #tpu.dot_dimension_numbers<[2], [1], [1], [2], [0, 0, 0, 1, 1, 2], [0], [0]>} : vector<2x8x8xf32>, vector<2x8x4xf32>, vector<2x8x4xf32> -> vector<2x8x4xf32>
    "tpu.trace_stop"() : () -> ()
    %1521 = vector.shape_cast %1520 : vector<2x8x4xf32> to vector<16x4xf32>
    %1522 = vector.extract_strided_slice %1444 {offsets = [0, 12], sizes = [16, 4], strides = [1, 1]} : vector<16x32xf32> to vector<16x4xf32>
    %1523 = vector.shape_cast %1522 : vector<16x4xf32> to vector<2x8x4xf32>
    %1524 = vector.extract_strided_slice %1445 {offsets = [0, 12], sizes = [16, 4], strides = [1, 1]} : vector<16x32xf32> to vector<16x4xf32>
    %1525 = vector.shape_cast %1524 : vector<16x4xf32> to vector<2x8x4xf32>
    %1526 = vector.extract_strided_slice %1446 {offsets = [0, 12], sizes = [16, 4], strides = [1, 1]} : vector<16x32xf32> to vector<16x4xf32>
    %1527 = vector.shape_cast %1526 : vector<16x4xf32> to vector<2x8x4xf32>
    "tpu.trace_start"() <{level = 10 : i32, message = "btx,bux->btu"}> : () -> ()
    %cst_516 = arith.constant dense<0.000000e+00> : vector<2x8x8xf32>
    %1528 = tpu.matmul %1523, %1525, %cst_516 {dimension_numbers = #tpu.dot_dimension_numbers<[2], [2], [1], [1], [0, 0, 0, 1, 1, 1], [0], [0]>} : vector<2x8x4xf32>, vector<2x8x4xf32>, vector<2x8x8xf32> -> vector<2x8x8xf32>
    "tpu.trace_stop"() : () -> ()
    %cst_517 = arith.constant 0.176776692 : f32
    %1529 = vector.broadcast %cst_517 : f32 to vector<2x8x8xf32>
    %1530 = arith.mulf %1528, %1529 : vector<2x8x8xf32>
    %cst_518 = arith.constant -1.000000e+30 : f32
    %1531 = vector.shape_cast %16 : vector<1x8x8xi1> to vector<1x8x8xi1>
    %1532 = vector.broadcast %1531 : vector<1x8x8xi1> to vector<2x8x8xi1>
    %1533 = vector.broadcast %cst_518 : f32 to vector<2x8x8xf32>
    %1534 = arith.select %1532, %1530, %1533 : vector<2x8x8xi1>, vector<2x8x8xf32>
    %cst_519 = arith.constant dense<0xFF800000> : vector<2x8xf32>
    %1535 = vector.multi_reduction <maximumf>, %1534, %cst_519 [2] : vector<2x8x8xf32> to vector<2x8xf32>
    %1536 = vector.shape_cast %1535 : vector<2x8xf32> to vector<2x8x1xf32>
    %1537 = vector.broadcast %1536 : vector<2x8x1xf32> to vector<2x8x8xf32>
    %1538 = arith.subf %1534, %1537 : vector<2x8x8xf32>
    %1539 = math.exp %1538 : vector<2x8x8xf32>
    %cst_520 = arith.constant dense<0.000000e+00> : vector<2x8xf32>
    %1540 = vector.multi_reduction <add>, %1539, %cst_520 [2] : vector<2x8x8xf32> to vector<2x8xf32>
    %1541 = vector.shape_cast %1540 : vector<2x8xf32> to vector<2x8x1xf32>
    %1542 = tpu.reciprocal %1541 {approx = true} : vector<2x8x1xf32> -> vector<2x8x1xf32>
    %1543 = vector.broadcast %1542 : vector<2x8x1xf32> to vector<2x8x8xf32>
    %1544 = arith.mulf %1539, %1543 : vector<2x8x8xf32>
    "tpu.trace_start"() <{level = 10 : i32, message = "btu,bux->btx"}> : () -> ()
    %cst_521 = arith.constant dense<0.000000e+00> : vector<2x8x4xf32>
    %1545 = tpu.matmul %1544, %1527, %cst_521 {dimension_numbers = #tpu.dot_dimension_numbers<[2], [1], [1], [2], [0, 0, 0, 1, 1, 2], [0], [0]>} : vector<2x8x8xf32>, vector<2x8x4xf32>, vector<2x8x4xf32> -> vector<2x8x4xf32>
    "tpu.trace_stop"() : () -> ()
    %1546 = vector.shape_cast %1545 : vector<2x8x4xf32> to vector<16x4xf32>
    %1547 = vector.extract_strided_slice %1444 {offsets = [0, 16], sizes = [16, 4], strides = [1, 1]} : vector<16x32xf32> to vector<16x4xf32>
    %1548 = vector.shape_cast %1547 : vector<16x4xf32> to vector<2x8x4xf32>
    %1549 = vector.extract_strided_slice %1445 {offsets = [0, 16], sizes = [16, 4], strides = [1, 1]} : vector<16x32xf32> to vector<16x4xf32>
    %1550 = vector.shape_cast %1549 : vector<16x4xf32> to vector<2x8x4xf32>
    %1551 = vector.extract_strided_slice %1446 {offsets = [0, 16], sizes = [16, 4], strides = [1, 1]} : vector<16x32xf32> to vector<16x4xf32>
    %1552 = vector.shape_cast %1551 : vector<16x4xf32> to vector<2x8x4xf32>
    "tpu.trace_start"() <{level = 10 : i32, message = "btx,bux->btu"}> : () -> ()
    %cst_522 = arith.constant dense<0.000000e+00> : vector<2x8x8xf32>
    %1553 = tpu.matmul %1548, %1550, %cst_522 {dimension_numbers = #tpu.dot_dimension_numbers<[2], [2], [1], [1], [0, 0, 0, 1, 1, 1], [0], [0]>} : vector<2x8x4xf32>, vector<2x8x4xf32>, vector<2x8x8xf32> -> vector<2x8x8xf32>
    "tpu.trace_stop"() : () -> ()
    %cst_523 = arith.constant 0.176776692 : f32
    %1554 = vector.broadcast %cst_523 : f32 to vector<2x8x8xf32>
    %1555 = arith.mulf %1553, %1554 : vector<2x8x8xf32>
    %cst_524 = arith.constant -1.000000e+30 : f32
    %1556 = vector.shape_cast %16 : vector<1x8x8xi1> to vector<1x8x8xi1>
    %1557 = vector.broadcast %1556 : vector<1x8x8xi1> to vector<2x8x8xi1>
    %1558 = vector.broadcast %cst_524 : f32 to vector<2x8x8xf32>
    %1559 = arith.select %1557, %1555, %1558 : vector<2x8x8xi1>, vector<2x8x8xf32>
    %cst_525 = arith.constant dense<0xFF800000> : vector<2x8xf32>
    %1560 = vector.multi_reduction <maximumf>, %1559, %cst_525 [2] : vector<2x8x8xf32> to vector<2x8xf32>
    %1561 = vector.shape_cast %1560 : vector<2x8xf32> to vector<2x8x1xf32>
    %1562 = vector.broadcast %1561 : vector<2x8x1xf32> to vector<2x8x8xf32>
    %1563 = arith.subf %1559, %1562 : vector<2x8x8xf32>
    %1564 = math.exp %1563 : vector<2x8x8xf32>
    %cst_526 = arith.constant dense<0.000000e+00> : vector<2x8xf32>
    %1565 = vector.multi_reduction <add>, %1564, %cst_526 [2] : vector<2x8x8xf32> to vector<2x8xf32>
    %1566 = vector.shape_cast %1565 : vector<2x8xf32> to vector<2x8x1xf32>
    %1567 = tpu.reciprocal %1566 {approx = true} : vector<2x8x1xf32> -> vector<2x8x1xf32>
    %1568 = vector.broadcast %1567 : vector<2x8x1xf32> to vector<2x8x8xf32>
    %1569 = arith.mulf %1564, %1568 : vector<2x8x8xf32>
    "tpu.trace_start"() <{level = 10 : i32, message = "btu,bux->btx"}> : () -> ()
    %cst_527 = arith.constant dense<0.000000e+00> : vector<2x8x4xf32>
    %1570 = tpu.matmul %1569, %1552, %cst_527 {dimension_numbers = #tpu.dot_dimension_numbers<[2], [1], [1], [2], [0, 0, 0, 1, 1, 2], [0], [0]>} : vector<2x8x8xf32>, vector<2x8x4xf32>, vector<2x8x4xf32> -> vector<2x8x4xf32>
    "tpu.trace_stop"() : () -> ()
    %1571 = vector.shape_cast %1570 : vector<2x8x4xf32> to vector<16x4xf32>
    %1572 = vector.extract_strided_slice %1444 {offsets = [0, 20], sizes = [16, 4], strides = [1, 1]} : vector<16x32xf32> to vector<16x4xf32>
    %1573 = vector.shape_cast %1572 : vector<16x4xf32> to vector<2x8x4xf32>
    %1574 = vector.extract_strided_slice %1445 {offsets = [0, 20], sizes = [16, 4], strides = [1, 1]} : vector<16x32xf32> to vector<16x4xf32>
    %1575 = vector.shape_cast %1574 : vector<16x4xf32> to vector<2x8x4xf32>
    %1576 = vector.extract_strided_slice %1446 {offsets = [0, 20], sizes = [16, 4], strides = [1, 1]} : vector<16x32xf32> to vector<16x4xf32>
    %1577 = vector.shape_cast %1576 : vector<16x4xf32> to vector<2x8x4xf32>
    "tpu.trace_start"() <{level = 10 : i32, message = "btx,bux->btu"}> : () -> ()
    %cst_528 = arith.constant dense<0.000000e+00> : vector<2x8x8xf32>
    %1578 = tpu.matmul %1573, %1575, %cst_528 {dimension_numbers = #tpu.dot_dimension_numbers<[2], [2], [1], [1], [0, 0, 0, 1, 1, 1], [0], [0]>} : vector<2x8x4xf32>, vector<2x8x4xf32>, vector<2x8x8xf32> -> vector<2x8x8xf32>
    "tpu.trace_stop"() : () -> ()
    %cst_529 = arith.constant 0.176776692 : f32
    %1579 = vector.broadcast %cst_529 : f32 to vector<2x8x8xf32>
    %1580 = arith.mulf %1578, %1579 : vector<2x8x8xf32>
    %cst_530 = arith.constant -1.000000e+30 : f32
    %1581 = vector.shape_cast %16 : vector<1x8x8xi1> to vector<1x8x8xi1>
    %1582 = vector.broadcast %1581 : vector<1x8x8xi1> to vector<2x8x8xi1>
    %1583 = vector.broadcast %cst_530 : f32 to vector<2x8x8xf32>
    %1584 = arith.select %1582, %1580, %1583 : vector<2x8x8xi1>, vector<2x8x8xf32>
    %cst_531 = arith.constant dense<0xFF800000> : vector<2x8xf32>
    %1585 = vector.multi_reduction <maximumf>, %1584, %cst_531 [2] : vector<2x8x8xf32> to vector<2x8xf32>
    %1586 = vector.shape_cast %1585 : vector<2x8xf32> to vector<2x8x1xf32>
    %1587 = vector.broadcast %1586 : vector<2x8x1xf32> to vector<2x8x8xf32>
    %1588 = arith.subf %1584, %1587 : vector<2x8x8xf32>
    %1589 = math.exp %1588 : vector<2x8x8xf32>
    %cst_532 = arith.constant dense<0.000000e+00> : vector<2x8xf32>
    %1590 = vector.multi_reduction <add>, %1589, %cst_532 [2] : vector<2x8x8xf32> to vector<2x8xf32>
    %1591 = vector.shape_cast %1590 : vector<2x8xf32> to vector<2x8x1xf32>
    %1592 = tpu.reciprocal %1591 {approx = true} : vector<2x8x1xf32> -> vector<2x8x1xf32>
    %1593 = vector.broadcast %1592 : vector<2x8x1xf32> to vector<2x8x8xf32>
    %1594 = arith.mulf %1589, %1593 : vector<2x8x8xf32>
    "tpu.trace_start"() <{level = 10 : i32, message = "btu,bux->btx"}> : () -> ()
    %cst_533 = arith.constant dense<0.000000e+00> : vector<2x8x4xf32>
    %1595 = tpu.matmul %1594, %1577, %cst_533 {dimension_numbers = #tpu.dot_dimension_numbers<[2], [1], [1], [2], [0, 0, 0, 1, 1, 2], [0], [0]>} : vector<2x8x8xf32>, vector<2x8x4xf32>, vector<2x8x4xf32> -> vector<2x8x4xf32>
    "tpu.trace_stop"() : () -> ()
    %1596 = vector.shape_cast %1595 : vector<2x8x4xf32> to vector<16x4xf32>
    %1597 = vector.extract_strided_slice %1444 {offsets = [0, 24], sizes = [16, 4], strides = [1, 1]} : vector<16x32xf32> to vector<16x4xf32>
    %1598 = vector.shape_cast %1597 : vector<16x4xf32> to vector<2x8x4xf32>
    %1599 = vector.extract_strided_slice %1445 {offsets = [0, 24], sizes = [16, 4], strides = [1, 1]} : vector<16x32xf32> to vector<16x4xf32>
    %1600 = vector.shape_cast %1599 : vector<16x4xf32> to vector<2x8x4xf32>
    %1601 = vector.extract_strided_slice %1446 {offsets = [0, 24], sizes = [16, 4], strides = [1, 1]} : vector<16x32xf32> to vector<16x4xf32>
    %1602 = vector.shape_cast %1601 : vector<16x4xf32> to vector<2x8x4xf32>
    "tpu.trace_start"() <{level = 10 : i32, message = "btx,bux->btu"}> : () -> ()
    %cst_534 = arith.constant dense<0.000000e+00> : vector<2x8x8xf32>
    %1603 = tpu.matmul %1598, %1600, %cst_534 {dimension_numbers = #tpu.dot_dimension_numbers<[2], [2], [1], [1], [0, 0, 0, 1, 1, 1], [0], [0]>} : vector<2x8x4xf32>, vector<2x8x4xf32>, vector<2x8x8xf32> -> vector<2x8x8xf32>
    "tpu.trace_stop"() : () -> ()
    %cst_535 = arith.constant 0.176776692 : f32
    %1604 = vector.broadcast %cst_535 : f32 to vector<2x8x8xf32>
    %1605 = arith.mulf %1603, %1604 : vector<2x8x8xf32>
    %cst_536 = arith.constant -1.000000e+30 : f32
    %1606 = vector.shape_cast %16 : vector<1x8x8xi1> to vector<1x8x8xi1>
    %1607 = vector.broadcast %1606 : vector<1x8x8xi1> to vector<2x8x8xi1>
    %1608 = vector.broadcast %cst_536 : f32 to vector<2x8x8xf32>
    %1609 = arith.select %1607, %1605, %1608 : vector<2x8x8xi1>, vector<2x8x8xf32>
    %cst_537 = arith.constant dense<0xFF800000> : vector<2x8xf32>
    %1610 = vector.multi_reduction <maximumf>, %1609, %cst_537 [2] : vector<2x8x8xf32> to vector<2x8xf32>
    %1611 = vector.shape_cast %1610 : vector<2x8xf32> to vector<2x8x1xf32>
    %1612 = vector.broadcast %1611 : vector<2x8x1xf32> to vector<2x8x8xf32>
    %1613 = arith.subf %1609, %1612 : vector<2x8x8xf32>
    %1614 = math.exp %1613 : vector<2x8x8xf32>
    %cst_538 = arith.constant dense<0.000000e+00> : vector<2x8xf32>
    %1615 = vector.multi_reduction <add>, %1614, %cst_538 [2] : vector<2x8x8xf32> to vector<2x8xf32>
    %1616 = vector.shape_cast %1615 : vector<2x8xf32> to vector<2x8x1xf32>
    %1617 = tpu.reciprocal %1616 {approx = true} : vector<2x8x1xf32> -> vector<2x8x1xf32>
    %1618 = vector.broadcast %1617 : vector<2x8x1xf32> to vector<2x8x8xf32>
    %1619 = arith.mulf %1614, %1618 : vector<2x8x8xf32>
    "tpu.trace_start"() <{level = 10 : i32, message = "btu,bux->btx"}> : () -> ()
    %cst_539 = arith.constant dense<0.000000e+00> : vector<2x8x4xf32>
    %1620 = tpu.matmul %1619, %1602, %cst_539 {dimension_numbers = #tpu.dot_dimension_numbers<[2], [1], [1], [2], [0, 0, 0, 1, 1, 2], [0], [0]>} : vector<2x8x8xf32>, vector<2x8x4xf32>, vector<2x8x4xf32> -> vector<2x8x4xf32>
    "tpu.trace_stop"() : () -> ()
    %1621 = vector.shape_cast %1620 : vector<2x8x4xf32> to vector<16x4xf32>
    %1622 = vector.extract_strided_slice %1444 {offsets = [0, 28], sizes = [16, 4], strides = [1, 1]} : vector<16x32xf32> to vector<16x4xf32>
    %1623 = vector.shape_cast %1622 : vector<16x4xf32> to vector<2x8x4xf32>
    %1624 = vector.extract_strided_slice %1445 {offsets = [0, 28], sizes = [16, 4], strides = [1, 1]} : vector<16x32xf32> to vector<16x4xf32>
    %1625 = vector.shape_cast %1624 : vector<16x4xf32> to vector<2x8x4xf32>
    %1626 = vector.extract_strided_slice %1446 {offsets = [0, 28], sizes = [16, 4], strides = [1, 1]} : vector<16x32xf32> to vector<16x4xf32>
    %1627 = vector.shape_cast %1626 : vector<16x4xf32> to vector<2x8x4xf32>
    "tpu.trace_start"() <{level = 10 : i32, message = "btx,bux->btu"}> : () -> ()
    %cst_540 = arith.constant dense<0.000000e+00> : vector<2x8x8xf32>
    %1628 = tpu.matmul %1623, %1625, %cst_540 {dimension_numbers = #tpu.dot_dimension_numbers<[2], [2], [1], [1], [0, 0, 0, 1, 1, 1], [0], [0]>} : vector<2x8x4xf32>, vector<2x8x4xf32>, vector<2x8x8xf32> -> vector<2x8x8xf32>
    "tpu.trace_stop"() : () -> ()
    %cst_541 = arith.constant 0.176776692 : f32
    %1629 = vector.broadcast %cst_541 : f32 to vector<2x8x8xf32>
    %1630 = arith.mulf %1628, %1629 : vector<2x8x8xf32>
    %cst_542 = arith.constant -1.000000e+30 : f32
    %1631 = vector.shape_cast %16 : vector<1x8x8xi1> to vector<1x8x8xi1>
    %1632 = vector.broadcast %1631 : vector<1x8x8xi1> to vector<2x8x8xi1>
    %1633 = vector.broadcast %cst_542 : f32 to vector<2x8x8xf32>
    %1634 = arith.select %1632, %1630, %1633 : vector<2x8x8xi1>, vector<2x8x8xf32>
    %cst_543 = arith.constant dense<0xFF800000> : vector<2x8xf32>
    %1635 = vector.multi_reduction <maximumf>, %1634, %cst_543 [2] : vector<2x8x8xf32> to vector<2x8xf32>
    %1636 = vector.shape_cast %1635 : vector<2x8xf32> to vector<2x8x1xf32>
    %1637 = vector.broadcast %1636 : vector<2x8x1xf32> to vector<2x8x8xf32>
    %1638 = arith.subf %1634, %1637 : vector<2x8x8xf32>
    %1639 = math.exp %1638 : vector<2x8x8xf32>
    %cst_544 = arith.constant dense<0.000000e+00> : vector<2x8xf32>
    %1640 = vector.multi_reduction <add>, %1639, %cst_544 [2] : vector<2x8x8xf32> to vector<2x8xf32>
    %1641 = vector.shape_cast %1640 : vector<2x8xf32> to vector<2x8x1xf32>
    %1642 = tpu.reciprocal %1641 {approx = true} : vector<2x8x1xf32> -> vector<2x8x1xf32>
    %1643 = vector.broadcast %1642 : vector<2x8x1xf32> to vector<2x8x8xf32>
    %1644 = arith.mulf %1639, %1643 : vector<2x8x8xf32>
    "tpu.trace_start"() <{level = 10 : i32, message = "btu,bux->btx"}> : () -> ()
    %cst_545 = arith.constant dense<0.000000e+00> : vector<2x8x4xf32>
    %1645 = tpu.matmul %1644, %1627, %cst_545 {dimension_numbers = #tpu.dot_dimension_numbers<[2], [1], [1], [2], [0, 0, 0, 1, 1, 2], [0], [0]>} : vector<2x8x8xf32>, vector<2x8x4xf32>, vector<2x8x4xf32> -> vector<2x8x4xf32>
    "tpu.trace_stop"() : () -> ()
    %1646 = vector.shape_cast %1645 : vector<2x8x4xf32> to vector<16x4xf32>
    %1647 = tpu.concatenate %1471, %1496, %1521, %1546, %1571, %1596, %1621, %1646 in 1 : vector<16x4xf32>, vector<16x4xf32>, vector<16x4xf32>, vector<16x4xf32>, vector<16x4xf32>, vector<16x4xf32>, vector<16x4xf32>, vector<16x4xf32> -> vector<16x32xf32>
    %c5_546 = arith.constant 5 : index
    %c0_547 = arith.constant 0 : index
    %c0_548 = arith.constant 0 : index
    %1648 = vector.load %arg7[%c5_546, %c0_547, %c0_548] : memref<6x32x32xf32, #tpu.memory_space<vmem>>, vector<1x32x32xf32>
    %1649 = vector.shape_cast %1648 : vector<1x32x32xf32> to vector<32x32xf32>
    %cst_549 = arith.constant dense<0.000000e+00> : vector<16x32xf32>
    %1650 = tpu.matmul %1647, %1649, %cst_549 {dimension_numbers = #tpu.dot_dimension_numbers<[1], [0], [0], [1], [0, 0, 1, 1], [], []>} : vector<16x32xf32>, vector<32x32xf32>, vector<16x32xf32> -> vector<16x32xf32>
    %c5_550 = arith.constant 5 : index
    %c0_551 = arith.constant 0 : index
    %c0_552 = arith.constant 0 : index
    %1651 = vector.load %arg8[%c5_550, %c0_551, %c0_552] : memref<6x1x32xf32, #tpu.memory_space<vmem>>, vector<1x1x32xf32>
    %1652 = vector.shape_cast %1651 : vector<1x1x32xf32> to vector<1x32xf32>
    %1653 = vector.broadcast %1652 : vector<1x32xf32> to vector<16x32xf32>
    %1654 = arith.addf %1650, %1653 : vector<16x32xf32>
    %1655 = arith.addf %1416, %1654 : vector<16x32xf32>
    %c5_553 = arith.constant 5 : index
    %c0_554 = arith.constant 0 : index
    %c0_555 = arith.constant 0 : index
    %1656 = vector.load %arg9[%c5_553, %c0_554, %c0_555] : memref<6x1x32xf32, #tpu.memory_space<vmem>>, vector<1x1x32xf32>
    %1657 = vector.shape_cast %1656 : vector<1x1x32xf32> to vector<1x32xf32>
    %c5_556 = arith.constant 5 : index
    %c0_557 = arith.constant 0 : index
    %c0_558 = arith.constant 0 : index
    %1658 = vector.load %arg10[%c5_556, %c0_557, %c0_558] : memref<6x1x32xf32, #tpu.memory_space<vmem>>, vector<1x1x32xf32>
    %1659 = vector.shape_cast %1658 : vector<1x1x32xf32> to vector<1x32xf32>
    %cst_559 = arith.constant dense<0.000000e+00> : vector<16xf32>
    %1660 = vector.multi_reduction <add>, %1655, %cst_559 [1] : vector<16x32xf32> to vector<16xf32>
    %1661 = vector.shape_cast %1660 : vector<16xf32> to vector<16x1xf32>
    %cst_560 = arith.constant 3.200000e+01 : f32
    %1662 = vector.broadcast %cst_560 : f32 to vector<16x1xf32>
    %1663 = arith.divf %1661, %1662 : vector<16x1xf32>
    %1664 = vector.broadcast %1663 : vector<16x1xf32> to vector<16x32xf32>
    %1665 = arith.subf %1655, %1664 : vector<16x32xf32>
    %1666 = arith.mulf %1665, %1665 : vector<16x32xf32>
    %cst_561 = arith.constant dense<0.000000e+00> : vector<16xf32>
    %1667 = vector.multi_reduction <add>, %1666, %cst_561 [1] : vector<16x32xf32> to vector<16xf32>
    %1668 = vector.shape_cast %1667 : vector<16xf32> to vector<16x1xf32>
    %cst_562 = arith.constant 3.200000e+01 : f32
    %1669 = vector.broadcast %cst_562 : f32 to vector<16x1xf32>
    %1670 = arith.divf %1668, %1669 : vector<16x1xf32>
    %cst_563 = arith.constant 9.99999974E-6 : f32
    %1671 = vector.broadcast %cst_563 : f32 to vector<16x1xf32>
    %1672 = arith.addf %1670, %1671 : vector<16x1xf32>
    %1673 = math.rsqrt %1672 : vector<16x1xf32>
    %1674 = vector.broadcast %1673 : vector<16x1xf32> to vector<16x32xf32>
    %1675 = arith.mulf %1665, %1674 : vector<16x32xf32>
    %1676 = vector.broadcast %1657 : vector<1x32xf32> to vector<16x32xf32>
    %1677 = arith.mulf %1675, %1676 : vector<16x32xf32>
    %1678 = vector.broadcast %1659 : vector<1x32xf32> to vector<16x32xf32>
    %1679 = arith.addf %1677, %1678 : vector<16x32xf32>
    %c5_564 = arith.constant 5 : index
    %c0_565 = arith.constant 0 : index
    %c0_566 = arith.constant 0 : index
    %1680 = vector.load %arg11[%c5_564, %c0_565, %c0_566] : memref<6x32x128xf32, #tpu.memory_space<vmem>>, vector<1x32x128xf32>
    %1681 = vector.shape_cast %1680 : vector<1x32x128xf32> to vector<32x128xf32>
    %cst_567 = arith.constant dense<0.000000e+00> : vector<16x128xf32>
    %1682 = tpu.matmul %1679, %1681, %cst_567 {dimension_numbers = #tpu.dot_dimension_numbers<[1], [0], [0], [1], [0, 0, 1, 1], [], []>} : vector<16x32xf32>, vector<32x128xf32>, vector<16x128xf32> -> vector<16x128xf32>
    %c5_568 = arith.constant 5 : index
    %c0_569 = arith.constant 0 : index
    %c0_570 = arith.constant 0 : index
    %1683 = vector.load %arg12[%c5_568, %c0_569, %c0_570] : memref<6x1x128xf32, #tpu.memory_space<vmem>>, vector<1x1x128xf32>
    %1684 = vector.shape_cast %1683 : vector<1x1x128xf32> to vector<1x128xf32>
    %1685 = vector.broadcast %1684 : vector<1x128xf32> to vector<16x128xf32>
    %1686 = arith.addf %1682, %1685 : vector<16x128xf32>
    %cst_571 = arith.constant 0.000000e+00 : f32
    %1687 = vector.broadcast %cst_571 : f32 to vector<16x128xf32>
    %1688 = arith.maximumf %1686, %1687 : vector<16x128xf32>
    %c5_572 = arith.constant 5 : index
    %c0_573 = arith.constant 0 : index
    %c0_574 = arith.constant 0 : index
    %1689 = vector.load %arg13[%c5_572, %c0_573, %c0_574] : memref<6x128x32xf32, #tpu.memory_space<vmem>>, vector<1x128x32xf32>
    %1690 = vector.shape_cast %1689 : vector<1x128x32xf32> to vector<128x32xf32>
    %cst_575 = arith.constant dense<0.000000e+00> : vector<16x32xf32>
    %1691 = tpu.matmul %1688, %1690, %cst_575 {dimension_numbers = #tpu.dot_dimension_numbers<[1], [0], [0], [1], [0, 0, 1, 1], [], []>} : vector<16x128xf32>, vector<128x32xf32>, vector<16x32xf32> -> vector<16x32xf32>
    %c5_576 = arith.constant 5 : index
    %c0_577 = arith.constant 0 : index
    %c0_578 = arith.constant 0 : index
    %1692 = vector.load %arg14[%c5_576, %c0_577, %c0_578] : memref<6x1x32xf32, #tpu.memory_space<vmem>>, vector<1x1x32xf32>
    %1693 = vector.shape_cast %1692 : vector<1x1x32xf32> to vector<1x32xf32>
    %1694 = vector.broadcast %1693 : vector<1x32xf32> to vector<16x32xf32>
    %1695 = arith.addf %1691, %1694 : vector<16x32xf32>
    %1696 = arith.addf %1655, %1695 : vector<16x32xf32>
    %c0_579 = arith.constant 0 : index
    %c0_580 = arith.constant 0 : index
    %1697 = vector.load %arg15[%c0_579, %c0_580] : memref<1x32xf32, #tpu.memory_space<vmem>>, vector<1x32xf32>
    %c0_581 = arith.constant 0 : index
    %c0_582 = arith.constant 0 : index
    %1698 = vector.load %arg16[%c0_581, %c0_582] : memref<1x32xf32, #tpu.memory_space<vmem>>, vector<1x32xf32>
    %cst_583 = arith.constant dense<0.000000e+00> : vector<16xf32>
    %1699 = vector.multi_reduction <add>, %1696, %cst_583 [1] : vector<16x32xf32> to vector<16xf32>
    %1700 = vector.shape_cast %1699 : vector<16xf32> to vector<16x1xf32>
    %cst_584 = arith.constant 3.200000e+01 : f32
    %1701 = vector.broadcast %cst_584 : f32 to vector<16x1xf32>
    %1702 = arith.divf %1700, %1701 : vector<16x1xf32>
    %1703 = vector.broadcast %1702 : vector<16x1xf32> to vector<16x32xf32>
    %1704 = arith.subf %1696, %1703 : vector<16x32xf32>
    %1705 = arith.mulf %1704, %1704 : vector<16x32xf32>
    %cst_585 = arith.constant dense<0.000000e+00> : vector<16xf32>
    %1706 = vector.multi_reduction <add>, %1705, %cst_585 [1] : vector<16x32xf32> to vector<16xf32>
    %1707 = vector.shape_cast %1706 : vector<16xf32> to vector<16x1xf32>
    %cst_586 = arith.constant 3.200000e+01 : f32
    %1708 = vector.broadcast %cst_586 : f32 to vector<16x1xf32>
    %1709 = arith.divf %1707, %1708 : vector<16x1xf32>
    %cst_587 = arith.constant 9.99999974E-6 : f32
    %1710 = vector.broadcast %cst_587 : f32 to vector<16x1xf32>
    %1711 = arith.addf %1709, %1710 : vector<16x1xf32>
    %1712 = math.rsqrt %1711 : vector<16x1xf32>
    %1713 = vector.broadcast %1712 : vector<16x1xf32> to vector<16x32xf32>
    %1714 = arith.mulf %1704, %1713 : vector<16x32xf32>
    %1715 = vector.broadcast %1697 : vector<1x32xf32> to vector<16x32xf32>
    %1716 = arith.mulf %1714, %1715 : vector<16x32xf32>
    %1717 = vector.broadcast %1698 : vector<1x32xf32> to vector<16x32xf32>
    %1718 = arith.addf %1716, %1717 : vector<16x32xf32>
    %c0_588 = arith.constant 0 : index
    %c0_589 = arith.constant 0 : index
    %1719 = vector.load %arg17[%c0_588, %c0_589] : memref<32x128xf32, #tpu.memory_space<vmem>>, vector<32x128xf32>
    %cst_590 = arith.constant dense<0.000000e+00> : vector<16x128xf32>
    %1720 = tpu.matmul %1718, %1719, %cst_590 {dimension_numbers = #tpu.dot_dimension_numbers<[1], [0], [0], [1], [0, 0, 1, 1], [], []>} : vector<16x32xf32>, vector<32x128xf32>, vector<16x128xf32> -> vector<16x128xf32>
    %c0_591 = arith.constant 0 : index
    %c0_592 = arith.constant 0 : index
    %1721 = vector.load %arg18[%c0_591, %c0_592] : memref<1x128xf32, #tpu.memory_space<vmem>>, vector<1x128xf32>
    %1722 = vector.broadcast %1721 : vector<1x128xf32> to vector<16x128xf32>
    %1723 = arith.addf %1720, %1722 : vector<16x128xf32>
    %c0_593 = arith.constant 0 : index
    %c0_594 = arith.constant 0 : index
    %1724 = vector.load %arg19[%c0_593, %c0_594] : memref<16x128xf32, #tpu.memory_space<vmem>>, vector<16x128xf32>
    tpu.vector_store %arg19[%c0_593, %c0_594], %1723 {strides = array<i32>} : memref<16x128xf32, #tpu.memory_space<vmem>>, vector<16x128xf32>,
    return
  }
}

</mosaic_0001>

<bundles_post_ra>
// kernel: bigram_forward.1
= control target key start
LH: loop header
LB: loop body
LE: loop exit
PB: predicated region body
PF: predicated region fallthrough
CT: control target
= control target key end

     0   :  { %s13232_s0 = inlined_call_operand.vmem [shape: f32[2,8,32], index: 0, kind: input, shape index: {}]   ;;  %s13233_s1 = inlined_call_operand.vmem [shape: f32[8,32], index: 1, kind: input, shape index: {}]   ;;  %s13234_s2 = inlined_call_operand.vmem [shape: f32[32,32], index: 2, kind: input, shape index: {}]   ;;  %s13235_s3 = inlined_call_operand.vmem [shape: f32[1,32], index: 3, kind: input, shape index: {}]   ;;  %s13236_s4 = inlined_call_operand.vmem [shape: f32[6,1,32], index: 4, kind: input, shape index: {}]   ;;  %s13237_s5 = inlined_call_operand.vmem [shape: f32[6,1,32], index: 5, kind: input, shape index: {}]   ;;  %s13238_s6 = inlined_call_operand.vmem [shape: f32[6,32,96], index: 6, kind: input, shape index: {}]   ;;  %s13239_s7 = inlined_call_operand.vmem [shape: f32[6,32,32], index: 7, kind: input, shape index: {}]   ;;  %s13240_s8 = inlined_call_operand.vmem [shape: f32[6,1,32], index: 8, kind: input, shape index: {}]   ;;  %s13241_s9 = inlined_call_operand.vmem [shape: f32[6,1,32], index: 9, kind: input, shape index: {}]   ;;  %s13242_s10 = inlined_call_operand.vmem [shape: f32[6,1,32], index: 10, kind: input, shape index: {}]   ;;  %s13243_s11 = inlined_call_operand.vmem [shape: f32[6,32,128], index: 11, kind: input, shape index: {}]   ;;  %s13244_s12 = inlined_call_operand.vmem [shape: f32[6,1,128], index: 12, kind: input, shape index: {}]   ;;  %s13245_s13 = inlined_call_operand.vmem [shape: f32[6,128,32], index: 13, kind: input, shape index: {}]   ;;  %s13246_s14 = inlined_call_operand.vmem [shape: f32[6,1,32], index: 14, kind: input, shape index: {}]   ;;  %s13247_s15 = inlined_call_operand.vmem [shape: f32[1,32], index: 15, kind: input, shape index: {}]   ;;  %s13248_s16 = inlined_call_operand.vmem [shape: f32[1,32], index: 16, kind: input, shape index: {}]   ;;  %s13249_s17 = inlined_call_operand.vmem [shape: f32[32,128], index: 17, kind: input, shape index: {}]   ;;  %s13250_s18 = inlined_call_operand.vmem [shape: f32[1,128], index: 18, kind: input, shape index: {}]   ;;  %s13251_s19 = inlined_call_operand.hbm [shape: f32[16,128], index: 19, kind: output, shape index: {}]  }
   0x1   :  { %13365 = sst [smem:[#allocation5_spill]] %s13232_s0 }
   0x2   :  { %13366 = sst [smem:[#allocation6_spill]] %s13233_s1 }
   0x3   :  { %13367 = sst [smem:[#allocation7_spill]] %s13234_s2 }
   0x4   :  { %13368 = sst [smem:[#allocation8_spill]] %s13235_s3 }
   0x5   :  { %13369 = sst [smem:[#allocation9_spill]] %s13247_s15 }
   0x6   :  { %13370 = sst [smem:[#allocation10_spill]] %s13248_s16 }
   0x7   :  { %13371 = sst [smem:[#allocation11_spill]] %s13249_s17 }
   0x8   :  { %13372 = sst [smem:[#allocation12_spill]] %s13250_s18 }
   0x9   :  { %13373 = sst [smem:[#allocation13_spill]] %s13251_s19 }
   0xa   :  { %s13374_s20 = sld [smem:[#allocation7_spill]]  ;;  %vm73_vm0 = vcmask 261120  }
   0xb   :  { %s13375_s26 = sld [smem:[#allocation5_spill]] }
  0x10   :  { %v68_v0 = vld [vmem:[%s13374_s20 + $0x18] sm:$0xff]  ;;  %v67_v1 = vld [vmem:[%s13374_s20 + $0x10] sm:$0xff]  ;;  %v66_v2 = vld [vmem:[%s13374_s20 + $0x8] sm:$0xff] }
  0x11   :  { %92 = vmatpush.msra.mxu0 %v68_v0  ;;  %v65_v3 = vld [vmem:[%s13374_s20] sm:$0xff]  ;;  %v64_v5 = vld [vmem:[%s13375_s26 + $0x8] sm:$0xff] }
  0x12   :  { %v63_v4 = vld [vmem:[%s13375_s26] sm:$0xff] }
  0x13   :  { %93 = vmatpush.msra.mxu0 %v67_v1 }
  0x15   :  { %94 = vmatpush.msra.mxu0 %v66_v2 }
  0x17   :  { %95 = vmatpush.msra.mxu0 %v65_v3 }
  0x18   :  { %8743 = vmatmul.msk.f32.vlgmr.msra.gmra.mxu0 %vm73_vm0, %v63_v4 }
  0x20   :  { %8744 = vmatmul.msk.f32.gmra.mxu0 %vm73_vm0, %v64_v5 }
  0x21   :  { %24 = vsyncpa [#allocation3], 0  ;;  %s13376_s30 = sld [smem:[#allocation8_spill]]  ;;  %v9959_v16 = vmov 32.0   ;;  %v177_v33 = vld [vmem:[%s13238_s6 + $0x18] sm:$0xff]  ;;  %v176_v34 = vld [vmem:[%s13238_s6 + $0x10] sm:$0xff] }
  0x22   :  { %s13377_s1 = sld [smem:[#allocation6_spill]]  ;;  %9495 = vrcp.f32 %v9959_v16  ;;  %196 = vmatpush.msra.mxu1 %v177_v33  ;;  %v175_v35 = vld [vmem:[%s13238_s6 + $0x8] sm:$0xff]  ;;  %v174_v36 = vld [vmem:[%s13238_s6] sm:$0xff]  ;;  %s13308_s20 = smov 92   ;;  %vm210_vm8 = vcmask 31744   ;;  %vm268_vm10 = vcmask 64512  }
  0x23   :  { %v9450_v51 = vld [vmem:[%s13236_s4] ss:$0 sm:$0xff]  ;;  %s13306_s21 = smov 96   ;;  %s13300_s22 = smov 124   ;;  %vm1341_vm11 = vcmask 97280   ;;  %vm1344_vm12 = vcmask 130048  }
  0x24   :  { %197 = vmatpush.msra.mxu1 %v176_v34  ;;  %v9451_v55 = vld [vmem:[%s13237_s5] ss:$0 sm:$0xff]  ;;  %s13290_s2 = smov 80   ;;  %s13294_s23 = smov 120   ;;  %vm1347_vm13 = vcmask 162816   ;;  %vm1350_vm14 = vcmask 195584  }
  0x25   :  { %s13288_s24 = smov 84   ;;  %s13304_s25 = smov 88   ;;  %vm1353_vm15 = vcmask 228352  }
  0x26   :  { %198 = vmatpush.msra.mxu1 %v175_v35  ;;  %s13298_s3 = smov 116   ;;  %s13258_s26 = smov 76  }
  0x27   :  { %v9449_v6 = vld [vmem:[%s13376_s30] ss:$0 sm:$0xff]  ;;  %s13260_s27 = smov 112   ;;  %s13256_s28 = smov 72  }
  0x28   :  { %v103_v8 = vld [vmem:[%s13377_s1] sm:$0xff]  ;;  %v9496_v17 = vpop.eup %9495  ;;  %199 = vmatpush.msra.mxu1 %v174_v36  ;;  %s13302_s1 = smov 64   ;;  %s13276_s29 = smov 100  }
  0x29   :  { %v120_v18 = vmul.f32 32.0, %v9496_v17  ;;  %vm124_vm1 = vweird.f32 %v9496_v17  ;;  %s13254_s0 = smov 52   ;;  %s13280_s30 = smov 108  }
  0x2a   :  { %s13394_s19 = smov 44   ;;  %s13396_s18 = smov 40  }
  0x2b   :  { %v121_v19 = vsub.f32 1.0, %v120_v18  ;;  %s13397_s16 = smov 4   ;;  %s13398_s15 = smov 8  }
  0x2c   :  { %s13399_s17 = smov 12  }
  0x2d   :  { %v122_v20 = vmul.f32 %v9496_v17, %v121_v19 }
  0x2f   :  { %v123_v21 = vadd.f32 %v9496_v17, %v122_v20 }
  0x31   :  { %v10126_v22 = vsel %vm124_vm1, %v9496_v17, %v123_v21 }
  0x95   :  { %v97_v7 = vpop.f32.mrf.mxu0 }
  0x96   :  { %v98_v9 = vadd.f32 %v9449_v6, %v97_v7 }
  0x98   :  { %v10118_v10 = vadd.f32 %v103_v8, %v98_v9 }
  0x9a   :  { %v113_v11 = vsel %vm73_vm0, %v10118_v10, 0.0 }
  0x9b   :  { %114 = vadd.xlane.f32.xlu0 %v113_v11  ;;  %v106_v11 = vlaneseq }
  0x9d   :  { %v100_v12 = vpop.f32.mrf.mxu0 }
  0x9e   :  { %v101_v13 = vadd.f32 %v9449_v6, %v100_v12  ;;  %v107_v12 = vshrl.u32 %v106_v11, 7 }
  0xa0   :  { %v10122_v14 = vadd.f32 %v103_v8, %v101_v13  ;;  %v109_v13 = vand.u32 127, %v106_v11 }
  0xa2   :  { %v116_v15 = vsel %vm73_vm0, %v10122_v14, 0.0  ;;  %vm10183_vm9 = vcmp.le.s32.totalorder %v109_v13, %v107_v12 }
  0xa3   :  { %117 = vadd.xlane.f32.xlu0 %v116_v15 }
 0x10e   :  { %v115_v23 = vpop.xlane.xlu0 %114 }
 0x10f   :  { %v126_v24 = vmul.f32 %v10126_v22, %v115_v23 }
 0x111   :  { %v128_v25 = vsub.f32 %v10118_v10, %v126_v24 }
 0x113   :  { %v130_v26 = vmul.f32 %v128_v25, %v128_v25 }
 0x115   :  { %v132_v27 = vsel %vm73_vm0, %v130_v26, 0.0 }
 0x116   :  { %133 = vadd.xlane.f32.xlu1 %v132_v27  ;;  %v118_v28 = vpop.xlane.xlu0 %117 }
 0x117   :  { %v127_v29 = vmul.f32 %v10126_v22, %v118_v28 }
 0x119   :  { %v129_v30 = vsub.f32 %v10122_v14, %v127_v29 }
 0x11b   :  { %v131_v31 = vmul.f32 %v129_v30, %v129_v30 }
 0x11d   :  { %v135_v32 = vsel %vm73_vm0, %v131_v31, 0.0 }
 0x11e   :  { %136 = vadd.xlane.f32.xlu1 %v135_v32 }
 0x189   :  { %v134_v37 = vpop.xlane.xlu1 %133 }
 0x18a   :  { %v138_v38 = vmul.f32 %v134_v37, %v10126_v22 }
 0x18c   :  { %v140_v39 = vadd.f32 1e-05, %v138_v38 }
 0x18e   :  { %9497 = vrsqrt.f32 %v140_v39  ;;  %vm148_vm3 = vweird.f32 %v140_v39 }
 0x191   :  { %v137_v40 = vpop.xlane.xlu1 %136 }
 0x192   :  { %v139_v41 = vmul.f32 %v137_v40, %v10126_v22 }
 0x194   :  { %v9498_v42 = vpop.eup %9497  ;;  %v141_v43 = vadd.f32 1e-05, %v139_v41 }
 0x195   :  { %v143_v44 = vmul.f32 %v9498_v42, %v140_v39  ;;  %vm149_vm2 = vweird.f32 %v9498_v42 }
 0x196   :  { %9499 = vrsqrt.f32 %v141_v43  ;;  %vm150_vm4 = vmor %vm148_vm3, %vm149_vm2  ;;  %vm158_vm6 = vweird.f32 %v141_v43 }
 0x197   :  { %v144_v45 = vmul.f32 %v9498_v42, %v143_v44 }
 0x199   :  { %v145_v46 = vmul.f32 0.5, %v144_v45 }
 0x19b   :  { %v146_v47 = vsub.f32 1.5, %v145_v46 }
 0x19c   :  { %v9500_v48 = vpop.eup %9499 }
 0x19d   :  { %v147_v49 = vmul.f32 %v9498_v42, %v146_v47  ;;  %v153_v50 = vmul.f32 %v9500_v48, %v141_v43  ;;  %vm159_vm5 = vweird.f32 %v9500_v48 }
 0x19e   :  { %vm160_vm7 = vmor %vm158_vm6, %vm159_vm5 }
 0x19f   :  { %v154_v52 = vmul.f32 %v9500_v48, %v153_v50  ;;  %v151_v53 = vsel %vm150_vm4, %v9498_v42, %v147_v49 }
 0x1a0   :  { %v162_v54 = vmul.f32 %v151_v53, %v128_v25 }
 0x1a1   :  { %v155_v56 = vmul.f32 0.5, %v154_v52 }
 0x1a2   :  { %v167_v57 = vmul.f32 %v9450_v51, %v162_v54 }
 0x1a3   :  { %v156_v58 = vsub.f32 1.5, %v155_v56 }
 0x1a4   :  { %v172_v59 = vadd.f32 %v9451_v55, %v167_v57 }
 0x1a5   :  { %v157_v60 = vmul.f32 %v9500_v48, %v156_v58 }
 0x1a6   :  { %8745 = vmatmul.msk.f32.vlgmr.msra.gmra.mxu1 %vm73_vm0, %v172_v59 }
 0x1a7   :  { %v161_v61 = vsel %vm160_vm7, %v9500_v48, %v157_v60 }
 0x1a8   :  { %v163_v62 = vmul.f32 %v161_v61, %v129_v30 }
 0x1aa   :  { %v168_v63 = vmul.f32 %v9450_v51, %v163_v62 }
 0x1ac   :  { %v173_v0 = vadd.f32 %v9451_v55, %v168_v63 }
 0x1ae   :  { %8746 = vmatmul.msk.f32.gmra.mxu1 %vm73_vm0, %v173_v0 }
 0x223   :  { %v10156_v1 = vpop.f32.mrf.mxu1 }
 0x224   :  { %345 = vrot.lane.b32.xlu0 %v10156_v1, %s13308_s20  ;;  %208 = vrot.lane.b32.xlu2 %v10156_v1, %s13306_s21 }
 0x22b   :  { %v10162_v2 = vpop.f32.mrf.mxu1 }
 0x22c   :  { %236 = vrot.lane.b32.xlu2 %v10162_v2, %s13306_s21  ;;  %v10168_v3 = vpack.i.bf16 %v10162_v2, %v10156_v1 }
 0x22e   :  { %9280 = vrot.lane.b32.xlu1 %v10168_v3, %s13302_s1 }
 0x234   :  { %371 = vrot.lane.b32.xlu2 %v10162_v2, %s13300_s22 }
 0x23c   :  { %747 = vrot.lane.b32.xlu2 %v10156_v1, %s13290_s2 }
 0x27e   :  { %v209_v4 = vpop.permute.xlu2 %208 }
 0x27f   :  { %8747 = vmatpush.xpose.msk.msra.mxu2 %vm210_vm8, %v209_v4 }
 0x282   :  { %8748 = vmatmul.msk.f32.vlgmr.msra.gmra.mxu2 %vm210_vm8, %v10156_v1 }
 0x286   :  { %v237_v5 = vpop.permute.xlu2 %236 }
 0x287   :  { %8749 = vmatpush.xpose.msk.msra.mxu3 %vm210_vm8, %v237_v5 }
 0x28a   :  { %8750 = vmatmul.msk.f32.vlgmr.msra.gmra.mxu3 %vm210_vm8, %v10162_v2 }
 0x28e   :  { %v372_v41 = vpop.permute.xlu2 %371 }
 0x296   :  { %v346_v9 = vpop.permute.xlu0 %345  ;;  %v748_v44 = vpop.permute.xlu2 %747 }
 0x2a0   :  { %v9281_v6 = vpop.permute.xlu1 %9280 }
 0x2a1   :  { %v9282_v7 = vunpack.i.l.bf16 %v9281_v6  ;;  %v9283_v8 = vunpack.i.h.bf16 %v9281_v6 }
 0x2a3   :  { %312 = vmatpush.msrb.mxu2 %v9282_v7  ;;  %338 = vmatpush.msrb.mxu3 %v9283_v8 }
 0x2a5   :  { %8753 = vmatpush.xpose.msk.msra.mxu2 %vm210_vm8, %v346_v9 }
 0x305   :  { %v232_v15 = vpop.f32.mrf.mxu2 }
 0x306   :  { %v262_v17 = vmul.f32 0.17677669, %v232_v15 }
 0x308   :  { %v266_v18 = vsel %vm10183_vm9, %v262_v17, -1e+30 }
 0x309   :  { %v269_v19 = vsel %vm268_vm10, %v266_v18, -inf }
 0x30a   :  { %270 = vmax.xlane.f32.xlu0 %v269_v19 }
 0x30d   :  { %v259_v20 = vpop.f32.mrf.mxu3 }
 0x30e   :  { %v263_v21 = vmul.f32 0.17677669, %v259_v20 }
 0x310   :  { %v267_v23 = vsel %vm10183_vm9, %v263_v21, -1e+30 }
 0x311   :  { %v272_v24 = vsel %vm268_vm10, %v267_v23, -inf }
 0x312   :  { %273 = vmax.xlane.f32.xlu1 %v272_v24 }
 0x31e   :  { %373 = vrot.lane.b32.xlu0 %v10162_v2, %s13308_s20 }
 0x326   :  { %477 = vrot.lane.b32.xlu0 %v10156_v1, %s13294_s23 }
 0x32b   :  { %343 = vrot.lane.b32.xlu1 %v10156_v1, %s13300_s22 }
 0x32e   :  { %613 = vrot.lane.b32.xlu0 %v10156_v1, %s13288_s24 }
 0x333   :  { %479 = vrot.lane.b32.xlu1 %v10156_v1, %s13304_s25 }
 0x336   :  { %611 = vrot.lane.b32.xlu0 %v10156_v1, %s13298_s3 }
 0x33b   :  { %507 = vrot.lane.b32.xlu1 %v10162_v2, %s13304_s25 }
 0x33e   :  { %639 = vrot.lane.b32.xlu0 %v10162_v2, %s13298_s3  ;;  %s13385_s3 = smov 112  }
 0x343   :  { %505 = vrot.lane.b32.xlu1 %v10162_v2, %s13294_s23  ;;  %s13383_s23 = smov 84  }
 0x346   :  { %881 = vrot.lane.b32.xlu0 %v10156_v1, %s13258_s26 }
 0x34b   :  { %641 = vrot.lane.b32.xlu1 %v10162_v2, %s13288_s24  ;;  %s13384_s24 = smov 108  }
 0x353   :  { %745 = vrot.lane.b32.xlu1 %v10156_v1, %s13260_s27 }
 0x35b   :  { %773 = vrot.lane.b32.xlu1 %v10162_v2, %s13260_s27  ;;  %s13268_s27 = smov 56  }
 0x363   :  { %1015 = vrot.lane.b32.xlu1 %v10156_v1, %s13256_s28 }
 0x36b   :  { %1043 = vrot.lane.b32.xlu1 %v10162_v2, %s13256_s28  ;;  %s13262_s28 = smov 68  }
 0x373   :  { %1147 = vrot.lane.b32.xlu1 %v10156_v1, %s13276_s29 }
 0x37b   :  { %9295 = vrot.lane.b32.xlu1 %v10168_v3, %s13254_s0  ;;  %s13264_s0 = smov 104  }
 0x37d   :  { %v271_v25 = vpop.xlane.xlu0 %270 }
 0x37e   :  { %v275_v26 = vsub.f32 %v266_v18, %v271_v25 }
 0x380   :  { %v277_v27 = vmul.f32 1.442695, %v275_v26 }
 0x382   :  { %9501 = vpow2.f32 %v277_v27 }
 0x385   :  { %v274_v28 = vpop.xlane.xlu1 %273 }
 0x386   :  { %v276_v29 = vsub.f32 %v267_v23, %v274_v28 }
 0x388   :  { %v9502_v30 = vpop.eup %9501  ;;  %v279_v31 = vmul.f32 1.442695, %v276_v29 }
 0x389   :  { %v281_v32 = vsel %vm268_vm10, %v9502_v30, 0.0 }
 0x38a   :  { %9503 = vpow2.f32 %v279_v31  ;;  %282 = vadd.xlane.f32.xlu2 %v281_v32 }
 0x390   :  { %v9504_v33 = vpop.eup %9503  ;;  %v374_v34 = vpop.permute.xlu0 %373 }
 0x391   :  { %8755 = vmatpush.xpose.msk.msra.mxu3 %vm210_vm8, %v374_v34  ;;  %v284_v35 = vsel %vm268_vm10, %v9504_v33, 0.0 }
 0x392   :  { %285 = vadd.xlane.f32.xlu0 %v284_v35 }
 0x398   :  { %v478_v36 = vpop.permute.xlu0 %477 }
 0x39d   :  { %v344_v37 = vpop.permute.xlu1 %343 }
 0x3a0   :  { %v614_v38 = vpop.permute.xlu0 %613 }
 0x3a2   :  { %775 = vrot.lane.b32.xlu2 %v10162_v2, %s13290_s2  ;;  %s13382_s2 = smov 80  }
 0x3a5   :  { %v480_v39 = vpop.permute.xlu1 %479 }
 0x3a6   :  { %909 = vrot.lane.b32.xlu0 %v10162_v2, %s13258_s26  ;;  %s13312_s26 = smov 60  }
 0x3a8   :  { %v612_v40 = vpop.permute.xlu0 %611 }
 0x3aa   :  { %879 = vrot.lane.b32.xlu2 %v10156_v1, %s13280_s30 }
 0x3ad   :  { %v508_v42 = vpop.permute.xlu1 %507 }
 0x3ae   :  { %1013 = vrot.lane.b32.xlu0 %v10156_v1, %s13264_s0 }
 0x3b0   :  { %v640_v43 = vpop.permute.xlu0 %639 }
 0x3b2   :  { %907 = vrot.lane.b32.xlu2 %v10162_v2, %s13280_s30  ;;  %s13292_s30 = smov 24  }
 0x3b5   :  { %v506_v45 = vpop.permute.xlu1 %505 }
 0x3b6   :  { %1041 = vrot.lane.b32.xlu0 %v10162_v2, %s13264_s0  ;;  %s13270_s0 = smov 40  }
 0x3b8   :  { %v882_v46 = vpop.permute.xlu0 %881 }
 0x3ba   :  { %1149 = vrot.lane.b32.xlu2 %v10156_v1, %s13262_s28 }
 0x3bd   :  { %v642_v52 = vpop.permute.xlu1 %641 }
 0x3be   :  { %1175 = vrot.lane.b32.xlu0 %v10162_v2, %s13276_s29  ;;  %s13284_s29 = smov 16  }
 0x3c2   :  { %1177 = vrot.lane.b32.xlu2 %v10162_v2, %s13262_s28  ;;  %s13266_s28 = smov 48  }
 0x3c5   :  { %v746_v56 = vpop.permute.xlu1 %745 }
 0x3c6   :  { %9285 = vrot.lane.b32.xlu0 %v10168_v3, %s13312_s26 }
 0x3ca   :  { %9290 = vrot.lane.b32.xlu2 %v10168_v3, %s13268_s27  ;;  %s13274_s27 = smov 44  }
 0x3cd   :  { %v774_v59 = vpop.permute.xlu1 %773 }
 0x3d5   :  { %v1016_v62 = vpop.permute.xlu1 %1015 }
 0x3dd   :  { %v1044_v4 = vpop.permute.xlu1 %1043 }
 0x3e5   :  { %v1148_v13 = vpop.permute.xlu1 %1147 }
 0x3fd   :  { %v283_v47 = vpop.xlane.xlu2 %282 }
 0x3fe   :  { %9505 = vrcp.f32 %v283_v47 }
 0x404   :  { %v9506_v48 = vpop.eup %9505 }
 0x405   :  { %v776_v49 = vpop.permute.xlu2 %775  ;;  %v286_v50 = vpop.xlane.xlu0 %285  ;;  %v289_v51 = vmul.f32 %v9506_v48, %v9502_v30 }
 0x406   :  { %9507 = vrcp.f32 %v286_v50 }
 0x407   :  { %8751 = vmatmul.msk.f32.vlgmr.msrb.gmra.mxu2 %vm268_vm10, %v289_v51 }
 0x408   :  { %8759 = vmatpush.xpose.msk.msrb.mxu2 %vm210_vm8, %v480_v39 }
 0x40c   :  { %v9508_v53 = vpop.eup %9507 }
 0x40d   :  { %v290_v54 = vmul.f32 %v9508_v53, %v9504_v33  ;;  %v880_v55 = vpop.permute.xlu2 %879 }
 0x40f   :  { %8752 = vmatmul.msk.f32.vlgmr.msrb.gmra.mxu3 %vm268_vm10, %v290_v54  ;;  %8754 = vmatmul.msk.f32.vlgmr.msra.gmra.mxu2 %vm210_vm8, %v344_v37 }
 0x410   :  { %8761 = vmatpush.xpose.msk.msrb.mxu3 %vm210_vm8, %v508_v42  ;;  %8765 = vmatpush.xpose.msk.msra.mxu2 %vm210_vm8, %v614_v38 }
 0x415   :  { %v908_v58 = vpop.permute.xlu2 %907 }
 0x417   :  { %8756 = vmatmul.msk.f32.vlgmr.msra.gmra.mxu3 %vm210_vm8, %v372_v41  ;;  %8760 = vmatmul.msk.f32.vlgmr.msrb.gmra.mxu2 %vm210_vm8, %v478_v36 }
 0x418   :  { %8767 = vmatpush.xpose.msk.msra.mxu3 %vm210_vm8, %v642_v52  ;;  %8771 = vmatpush.xpose.msk.msrb.mxu2 %vm210_vm8, %v748_v44  ;;  %v910_v57 = vpop.permute.xlu0 %909 }
 0x41d   :  { %v1150_v61 = vpop.permute.xlu2 %1149 }
 0x41f   :  { %8762 = vmatmul.msk.f32.vlgmr.msrb.gmra.mxu3 %vm210_vm8, %v506_v45  ;;  %8766 = vmatmul.msk.f32.vlgmr.msra.gmra.mxu2 %vm210_vm8, %v612_v40 }
 0x420   :  { %8773 = vmatpush.xpose.msk.msrb.mxu3 %vm210_vm8, %v776_v49  ;;  %8777 = vmatpush.xpose.msk.msra.mxu2 %vm210_vm8, %v882_v46  ;;  %v1014_v60 = vpop.permute.xlu0 %1013 }
 0x425   :  { %v1178_v0 = vpop.permute.xlu2 %1177 }
 0x427   :  { %8768 = vmatmul.msk.f32.vlgmr.msra.gmra.mxu3 %vm210_vm8, %v640_v43  ;;  %8772 = vmatmul.msk.f32.vlgmr.msrb.gmra.mxu2 %vm210_vm8, %v746_v56 }
 0x428   :  { %8779 = vmatpush.xpose.msk.msra.mxu3 %vm210_vm8, %v910_v57  ;;  %8783 = vmatpush.xpose.msk.msrb.mxu2 %vm210_vm8, %v1016_v62  ;;  %v1042_v63 = vpop.permute.xlu0 %1041 }
 0x42d   :  { %v9291_v6 = vpop.permute.xlu2 %9290 }
 0x42e   :  { %v9293_v11 = vunpack.i.h.bf16 %v9291_v6  ;;  %v9292_v12 = vunpack.i.l.bf16 %v9291_v6 }
 0x42f   :  { %8774 = vmatmul.msk.f32.vlgmr.msrb.gmra.mxu3 %vm210_vm8, %v774_v59  ;;  %8778 = vmatmul.msk.f32.vlgmr.msra.gmra.mxu2 %vm210_vm8, %v880_v55 }
 0x430   :  { %8785 = vmatpush.xpose.msk.msrb.mxu3 %vm210_vm8, %v1044_v4  ;;  %8789 = vmatpush.xpose.msk.msra.mxu2 %vm210_vm8, %v1150_v61  ;;  %v1176_v5 = vpop.permute.xlu0 %1175 }
 0x437   :  { %8780 = vmatmul.msk.f32.vlgmr.msra.gmra.mxu3 %vm210_vm8, %v908_v58  ;;  %8784 = vmatmul.msk.f32.vlgmr.msrb.gmra.mxu2 %vm210_vm8, %v1014_v60 }
 0x438   :  { %8791 = vmatpush.xpose.msk.msra.mxu3 %vm210_vm8, %v1178_v0  ;;  %v9286_v7 = vpop.permute.xlu0 %9285 }
 0x439   :  { %v9287_v8 = vunpack.i.l.bf16 %v9286_v7  ;;  %v9288_v9 = vunpack.i.h.bf16 %v9286_v7 }
 0x43b   :  { %446 = vmatpush.msrb.mxu0 %v9287_v8  ;;  %472 = vmatpush.msrb.mxu1 %v9288_v9 }
 0x43d   :  { %580 = vmatpush.msra.mxu0 %v9292_v12  ;;  %606 = vmatpush.msra.mxu1 %v9293_v11 }
 0x43f   :  { %8786 = vmatmul.msk.f32.vlgmr.msrb.gmra.mxu3 %vm210_vm8, %v1042_v63  ;;  %8790 = vmatmul.msk.f32.vlgmr.msra.gmra.mxu2 %vm210_vm8, %v1148_v13 }
 0x447   :  { %8792 = vmatmul.msk.f32.vlgmr.msra.gmra.mxu3 %vm210_vm8, %v1176_v5 }
 0x48a   :  { %v10280_v15 = vpop.f32.mrf.mxu2 }
 0x492   :  { %v10282_v17 = vpop.f32.mrf.mxu3  ;;  %v368_v18 = vpop.f32.mrf.mxu2 }
 0x493   :  { %v399_v19 = vmul.f32 0.17677669, %v368_v18 }
 0x495   :  { %v10286_v20 = vsel %vm10183_vm9, %v399_v19, -1e+30  ;;  %v10370_v19 = vpop.permute.xlu1 %9295 }
 0x496   :  { %v403_v21 = vsel %vm268_vm10, %v10286_v20, -inf }
 0x497   :  { %404 = vmax.xlane.f32.xlu1 %v403_v21 }
 0x49a   :  { %v396_v23 = vpop.f32.mrf.mxu3  ;;  %v502_v24 = vpop.f32.mrf.mxu2 }
 0x49b   :  { %v400_v25 = vmul.f32 0.17677669, %v396_v23  ;;  %v533_v26 = vmul.f32 0.17677669, %v502_v24 }
 0x49d   :  { %v10292_v27 = vsel %vm10183_vm9, %v533_v26, -1e+30  ;;  %v10296_v28 = vsel %vm10183_vm9, %v400_v25, -1e+30 }
 0x49e   :  { %v537_v29 = vsel %vm268_vm10, %v10292_v27, -inf  ;;  %v406_v30 = vsel %vm268_vm10, %v10296_v28, -inf }
 0x49f   :  { %538 = vmax.xlane.f32.xlu0 %v537_v29  ;;  %407 = vmax.xlane.f32.xlu2 %v406_v30 }
 0x4a2   :  { %v530_v31 = vpop.f32.mrf.mxu3  ;;  %v636_v32 = vpop.f32.mrf.mxu2 }
 0x4a3   :  { %v534_v33 = vmul.f32 0.17677669, %v530_v31  ;;  %v667_v34 = vmul.f32 0.17677669, %v636_v32 }
 0x4a5   :  { %v10304_v35 = vsel %vm10183_vm9, %v667_v34, -1e+30  ;;  %v10308_v36 = vsel %vm10183_vm9, %v534_v33, -1e+30 }
 0x4a6   :  { %v671_v37 = vsel %vm268_vm10, %v10304_v35, -inf  ;;  %v540_v38 = vsel %vm268_vm10, %v10308_v36, -inf }
 0x4a7   :  { %672 = vmax.xlane.f32.xlu1 %v671_v37  ;;  %541 = vmax.xlane.f32.xlu2 %v540_v38 }
 0x4aa   :  { %v664_v39 = vpop.f32.mrf.mxu3  ;;  %v770_v40 = vpop.f32.mrf.mxu2 }
 0x4ab   :  { %v668_v41 = vmul.f32 0.17677669, %v664_v39  ;;  %v801_v42 = vmul.f32 0.17677669, %v770_v40 }
 0x4ad   :  { %v10316_v43 = vsel %vm10183_vm9, %v668_v41, -1e+30  ;;  %v10320_v44 = vsel %vm10183_vm9, %v801_v42, -1e+30 }
 0x4ae   :  { %v674_v45 = vsel %vm268_vm10, %v10316_v43, -inf  ;;  %v805_v46 = vsel %vm268_vm10, %v10320_v44, -inf }
 0x4af   :  { %675 = vmax.xlane.f32.xlu0 %v674_v45  ;;  %806 = vmax.xlane.f32.xlu2 %v805_v46 }
 0x4b2   :  { %v798_v47 = vpop.f32.mrf.mxu3  ;;  %v904_v48 = vpop.f32.mrf.mxu2 }
 0x4b3   :  { %v802_v49 = vmul.f32 0.17677669, %v798_v47  ;;  %v935_v50 = vmul.f32 0.17677669, %v904_v48 }
 0x4b5   :  { %v10328_v51 = vsel %vm10183_vm9, %v802_v49, -1e+30  ;;  %v10332_v52 = vsel %vm10183_vm9, %v935_v50, -1e+30 }
 0x4b6   :  { %v808_v53 = vsel %vm268_vm10, %v10328_v51, -inf  ;;  %v939_v54 = vsel %vm268_vm10, %v10332_v52, -inf }
 0x4b7   :  { %809 = vmax.xlane.f32.xlu1 %v808_v53  ;;  %940 = vmax.xlane.f32.xlu0 %v939_v54 }
 0x4ba   :  { %v932_v55 = vpop.f32.mrf.mxu3  ;;  %v1038_v56 = vpop.f32.mrf.mxu2 }
 0x4bb   :  { %v936_v57 = vmul.f32 0.17677669, %v932_v55  ;;  %v1069_v58 = vmul.f32 0.17677669, %v1038_v56 }
 0x4bd   :  { %v10340_v59 = vsel %vm10183_vm9, %v936_v57, -1e+30  ;;  %v10344_v60 = vsel %vm10183_vm9, %v1069_v58, -1e+30 }
 0x4be   :  { %v942_v61 = vsel %vm268_vm10, %v10340_v59, -inf  ;;  %v1073_v62 = vsel %vm268_vm10, %v10344_v60, -inf }
 0x4bf   :  { %943 = vmax.xlane.f32.xlu2 %v942_v61  ;;  %1074 = vmax.xlane.f32.xlu1 %v1073_v62 }
 0x4c2   :  { %v1172_v63 = vpop.f32.mrf.mxu2  ;;  %v1066_v6 = vpop.f32.mrf.mxu3 }
 0x4c3   :  { %v1203_v0 = vmul.f32 0.17677669, %v1172_v63  ;;  %v1070_v7 = vmul.f32 0.17677669, %v1066_v6 }
 0x4c5   :  { %v10352_v4 = vsel %vm10183_vm9, %v1203_v0, -1e+30  ;;  %v10360_v8 = vsel %vm10183_vm9, %v1070_v7, -1e+30 }
 0x4c6   :  { %v1207_v5 = vsel %vm268_vm10, %v10352_v4, -inf  ;;  %v1076_v11 = vsel %vm268_vm10, %v10360_v8, -inf }
 0x4c7   :  { %1208 = vmax.xlane.f32.xlu2 %v1207_v5 }
 0x4ca   :  { %v1200_v9 = vpop.f32.mrf.mxu3 }
 0x4cb   :  { %9300 = vrot.lane.b32.xlu0 %v10168_v3, %s13266_s28  ;;  %v1204_v12 = vmul.f32 0.17677669, %v1200_v9  ;;  %s13272_s28 = smov 36  }
 0x4cd   :  { %v10366_v13 = vsel %vm10183_vm9, %v1204_v12, -1e+30 }
 0x4ce   :  { %v1210_v18 = vsel %vm268_vm10, %v10366_v13, -inf }
 0x4f5   :  { %1077 = vmax.xlane.f32.xlu0 %v1076_v11 }
 0x4fd   :  { %1211 = vmax.xlane.f32.xlu0 %v1210_v18 }
 0x50a   :  { %v405_v21 = vpop.xlane.xlu1 %404 }
 0x50b   :  { %v409_v23 = vsub.f32 %v10286_v20, %v405_v21 }
 0x50d   :  { %v411_v24 = vmul.f32 1.442695, %v409_v23 }
 0x50f   :  { %9509 = vpow2.f32 %v411_v24 }
 0x512   :  { %v408_v25 = vpop.xlane.xlu2 %407  ;;  %v539_v26 = vpop.xlane.xlu0 %538 }
 0x513   :  { %v410_v29 = vsub.f32 %v10296_v28, %v408_v25  ;;  %v543_v30 = vsub.f32 %v10292_v27, %v539_v26 }
 0x515   :  { %v10375_v31 = vpop.eup %9509  ;;  %v413_v32 = vmul.f32 1.442695, %v410_v29  ;;  %v545_v33 = vmul.f32 1.442695, %v543_v30 }
 0x516   :  { %v415_v34 = vsel %vm268_vm10, %v10375_v31, 0.0 }
 0x517   :  { %9511 = vpow2.f32 %v413_v32  ;;  %416 = vadd.xlane.f32.xlu1 %v415_v34 }
 0x518   :  { %9513 = vpow2.f32 %v545_v33 }
 0x51a   :  { %v673_v37 = vpop.xlane.xlu1 %672  ;;  %v542_v20 = vpop.xlane.xlu2 %541 }
 0x51b   :  { %v677_v38 = vsub.f32 %v10304_v35, %v673_v37  ;;  %v544_v39 = vsub.f32 %v10308_v36, %v542_v20 }
 0x51d   :  { %v10381_v40 = vpop.eup %9511  ;;  %v679_v28 = vmul.f32 1.442695, %v677_v38  ;;  %v547_v27 = vmul.f32 1.442695, %v544_v39 }
 0x51e   :  { %v10383_v41 = vpop.eup %9513  ;;  %v418_v42 = vsel %vm268_vm10, %v10381_v40, 0.0 }
 0x51f   :  { %9515 = vpow2.f32 %v679_v28  ;;  %419 = vadd.xlane.f32.xlu2 %v418_v42  ;;  %v549_v45 = vsel %vm268_vm10, %v10383_v41, 0.0 }
 0x520   :  { %9517 = vpow2.f32 %v547_v27  ;;  %550 = vadd.xlane.f32.xlu1 %v549_v45 }
 0x522   :  { %v807_v46 = vpop.xlane.xlu2 %806  ;;  %v676_v35 = vpop.xlane.xlu0 %675 }
 0x523   :  { %v811_v36 = vsub.f32 %v10320_v44, %v807_v46  ;;  %v678_v47 = vsub.f32 %v10316_v43, %v676_v35  ;;  %v9297_v35 = vunpack.i.l.bf16 %v10370_v19 }
 0x525   :  { %v10391_v48 = vpop.eup %9515  ;;  %v813_v49 = vmul.f32 1.442695, %v811_v36  ;;  %v681_v50 = vmul.f32 1.442695, %v678_v47 }
 0x526   :  { %v10393_v53 = vpop.eup %9517  ;;  %v683_v54 = vsel %vm268_vm10, %v10391_v48, 0.0 }
 0x527   :  { %9519 = vpow2.f32 %v813_v49  ;;  %v552_v55 = vsel %vm268_vm10, %v10393_v53, 0.0 }
 0x528   :  { %9521 = vpow2.f32 %v681_v50  ;;  %553 = vadd.xlane.f32.xlu2 %v552_v55  ;;  %684 = vadd.xlane.f32.xlu1 %v683_v54  ;;  %v9298_v54 = vunpack.i.h.bf16 %v10370_v19 }
 0x52a   :  { %v810_v56 = vpop.xlane.xlu1 %809  ;;  %v941_v44 = vpop.xlane.xlu0 %940 }
 0x52b   :  { %v812_v43 = vsub.f32 %v10328_v51, %v810_v56  ;;  %v945_v57 = vsub.f32 %v10332_v52, %v941_v44 }
 0x52d   :  { %v10401_v58 = vpop.eup %9519  ;;  %v815_v61 = vmul.f32 1.442695, %v812_v43  ;;  %v947_v62 = vmul.f32 1.442695, %v945_v57 }
 0x52e   :  { %v10403_v63 = vpop.eup %9521  ;;  %v817_v0 = vsel %vm268_vm10, %v10401_v58, 0.0 }
 0x52f   :  { %9523 = vpow2.f32 %v815_v61  ;;  %818 = vadd.xlane.f32.xlu0 %v817_v0  ;;  %v686_v5 = vsel %vm268_vm10, %v10403_v63, 0.0 }
 0x530   :  { %9525 = vpow2.f32 %v947_v62  ;;  %687 = vadd.xlane.f32.xlu1 %v686_v5 }
 0x532   :  { %v944_v6 = vpop.xlane.xlu2 %943  ;;  %v1075_v51 = vpop.xlane.xlu1 %1074 }
 0x533   :  { %v946_v52 = vsub.f32 %v10340_v59, %v944_v6  ;;  %v1079_v7 = vsub.f32 %v10344_v60, %v1075_v51 }
 0x535   :  { %v10411_v9 = vpop.eup %9523  ;;  %v949_v11 = vmul.f32 1.442695, %v946_v52  ;;  %v1081_v12 = vmul.f32 1.442695, %v1079_v7 }
 0x536   :  { %v10413_v18 = vpop.eup %9525  ;;  %v820_v21 = vsel %vm268_vm10, %v10411_v9, 0.0 }
 0x537   :  { %9527 = vpow2.f32 %v949_v11  ;;  %821 = vadd.xlane.f32.xlu2 %v820_v21  ;;  %v951_v23 = vsel %vm268_vm10, %v10413_v18, 0.0 }
 0x538   :  { %9529 = vpow2.f32 %v1081_v12  ;;  %952 = vadd.xlane.f32.xlu1 %v951_v23 }
 0x53a   :  { %v1209_v33 = vpop.xlane.xlu2 %1208 }
 0x53b   :  { %v1213_v37 = vsub.f32 %v10352_v4, %v1209_v33 }
 0x53d   :  { %v10419_v24 = vpop.eup %9527  ;;  %v9301_v26 = vpop.permute.xlu0 %9300  ;;  %v1215_v39 = vmul.f32 1.442695, %v1213_v37 }
 0x53e   :  { %v10421_v59 = vpop.eup %9529  ;;  %v954_v60 = vsel %vm268_vm10, %v10419_v24, 0.0  ;;  %v9302_v43 = vunpack.i.l.bf16 %v9301_v26  ;;  %v9303_v61 = vunpack.i.h.bf16 %v9301_v26 }
 0x53f   :  { %955 = vadd.xlane.f32.xlu2 %v954_v60  ;;  %v1085_v25 = vsel %vm268_vm10, %v10421_v59, 0.0 }
 0x540   :  { %1086 = vadd.xlane.f32.xlu0 %v1085_v25 }
 0x551   :  { %9310 = vrot.lane.b32.xlu1 %v10168_v3, %s13270_s0  ;;  %s13278_s0 = smov 4  }
 0x554   :  { %1229 = vrot.lane.b32.xlu0 %v10156_v1, %s13272_s28 }
 0x557   :  { %9305 = vrot.lane.b32.xlu2 %v10168_v3, %s13274_s27  ;;  %s13282_s27 = smov 12  }
 0x568   :  { %v1078_v29 = vpop.xlane.xlu0 %1077 }
 0x569   :  { %v1080_v30 = vsub.f32 %v10360_v8, %v1078_v29 }
 0x56b   :  { %v1083_v32 = vmul.f32 1.442695, %v1080_v30 }
 0x56d   :  { %9531 = vpow2.f32 %v1083_v32 }
 0x570   :  { %v1212_v34 = vpop.xlane.xlu0 %1211 }
 0x571   :  { %v1214_v20 = vsub.f32 %v10366_v13, %v1212_v34 }
 0x573   :  { %v1217_v38 = vmul.f32 1.442695, %v1214_v20  ;;  %v10436_v1 = vpop.eup %9531 }
 0x574   :  { %v1088_v3 = vsel %vm268_vm10, %v10436_v1, 0.0 }
 0x575   :  { %9533 = vpow2.f32 %v1217_v38 }
 0x576   :  { %9535 = vpow2.f32 %v1215_v39 }
 0x57b   :  { %1089 = vadd.xlane.f32.xlu1 %v1088_v3  ;;  %v10440_v28 = vpop.eup %9533 }
 0x57c   :  { %v10442_v8 = vpop.eup %9535  ;;  %v1222_v4 = vsel %vm268_vm10, %v10440_v28, 0.0 }
 0x57d   :  { %v1219_v13 = vsel %vm268_vm10, %v10442_v8, 0.0 }
 0x580   :  { %1223 = vadd.xlane.f32.xlu2 %v1222_v4 }
 0x583   :  { %1220 = vadd.xlane.f32.xlu1 %v1219_v13 }
 0x58a   :  { %v417_v27 = vpop.xlane.xlu1 %416 }
 0x58b   :  { %9537 = vrcp.f32 %v417_v27 }
 0x591   :  { %v9538_v42 = vpop.eup %9537 }
 0x592   :  { %v420_v45 = vpop.xlane.xlu2 %419  ;;  %v423_v46 = vmul.f32 %v9538_v42, %v10375_v31 }
 0x593   :  { %9539 = vrcp.f32 %v420_v45  ;;  %v551_v36 = vpop.xlane.xlu1 %550 }
 0x594   :  { %9541 = vrcp.f32 %v551_v36  ;;  %8757 = vmatmul.msk.f32.vlgmr.msrb.gmra.mxu0 %vm268_vm10, %v423_v46 }
 0x595   :  { %714 = vmatpush.msrb.mxu0 %v9297_v35 }
 0x599   :  { %v9540_v47 = vpop.eup %9539 }
 0x59a   :  { %v9542_v49 = vpop.eup %9541  ;;  %v424_v50 = vmul.f32 %v9540_v47, %v10381_v40 }
 0x59b   :  { %v557_v55 = vmul.f32 %v9542_v49, %v10383_v41  ;;  %v554_v56 = vpop.xlane.xlu2 %553  ;;  %v685_v44 = vpop.xlane.xlu1 %684 }
 0x59c   :  { %9543 = vrcp.f32 %v554_v56  ;;  %1255 = vrot.lane.b32.xlu1 %v10162_v2, %s13272_s28  ;;  %8758 = vmatmul.msk.f32.vlgmr.msrb.gmra.mxu1 %vm268_vm10, %v424_v50  ;;  %s13286_s28 = smov 8   ;;  %v1359_v56 = vld [vmem:[%s13239_s7 + $0x18] sm:$0xff] }
 0x59d   :  { %9545 = vrcp.f32 %v685_v44  ;;  %8763 = vmatmul.msk.f32.vlgmr.msra.gmra.mxu0 %vm268_vm10, %v557_v55  ;;  %740 = vmatpush.msrb.mxu1 %v9298_v54  ;;  %v1358_v44 = vld [vmem:[%s13239_s7 + $0x10] sm:$0xff] }
 0x59e   :  { %848 = vmatpush.msra.mxu0 %v9302_v43  ;;  %1382 = vmatpush.msrb.mxu2 %v1359_v56  ;;  %v1357_v43 = vld [vmem:[%s13239_s7 + $0x8] sm:$0xff] }
 0x5a0   :  { %1383 = vmatpush.msrb.mxu2 %v1358_v44  ;;  %v1502_v44 = vld [vmem:[%s13245_s13 + $0x60] sm:$0xff] }
 0x5a2   :  { %v9544_v31 = vpop.eup %9543  ;;  %v819_v40 = vpop.xlane.xlu0 %818  ;;  %1384 = vmatpush.msrb.mxu2 %v1357_v43 }
 0x5a3   :  { %v9546_v57 = vpop.eup %9545  ;;  %v558_v19 = vmul.f32 %v9544_v31, %v10393_v53  ;;  %v688_v41 = vpop.xlane.xlu1 %687  ;;  %9547 = vrcp.f32 %v819_v40  ;;  %v1356_v40 = vld [vmem:[%s13239_s7] sm:$0xff] }
 0x5a4   :  { %v691_v62 = vmul.f32 %v9546_v57, %v10391_v48  ;;  %9549 = vrcp.f32 %v688_v41  ;;  %1385 = vmatpush.msrb.mxu2 %v1356_v40  ;;  %v1501_v40 = vld [vmem:[%s13245_s13 + $0x58] sm:$0xff] }
 0x5a5   :  { %8764 = vmatmul.msk.f32.vlgmr.msra.gmra.mxu1 %vm268_vm10, %v558_v19 }
 0x5a6   :  { %8769 = vmatmul.msk.f32.vlgmr.msrb.gmra.mxu0 %vm268_vm10, %v691_v62  ;;  %874 = vmatpush.msra.mxu1 %v9303_v61 }
 0x5a9   :  { %v9548_v2 = vpop.eup %9547 }
 0x5aa   :  { %v9550_v0 = vpop.eup %9549  ;;  %v825_v5 = vmul.f32 %v9548_v2, %v10401_v58  ;;  %v822_v6 = vpop.xlane.xlu2 %821 }
 0x5ab   :  { %v692_v51 = vmul.f32 %v9550_v0, %v10403_v63  ;;  %9551 = vrcp.f32 %v822_v6  ;;  %v953_v53 = vpop.xlane.xlu1 %952 }
 0x5ac   :  { %9553 = vrcp.f32 %v953_v53 }
 0x5ad   :  { %8770 = vmatmul.msk.f32.vlgmr.msrb.gmra.mxu1 %vm268_vm10, %v692_v51 }
 0x5ae   :  { %8775 = vmatmul.msk.f32.vlgmr.msra.gmra.mxu0 %vm268_vm10, %v825_v5 }
 0x5b1   :  { %v9552_v48 = vpop.eup %9551 }
 0x5b2   :  { %v826_v52 = vmul.f32 %v9552_v48, %v10411_v9  ;;  %v956_v7 = vpop.xlane.xlu2 %955  ;;  %v9554_v11 = vpop.eup %9553 }
 0x5b3   :  { %9555 = vrcp.f32 %v956_v7  ;;  %v1087_v58 = vpop.xlane.xlu0 %1086  ;;  %v959_v60 = vmul.f32 %v9554_v11, %v10413_v18 }
 0x5b4   :  { %9557 = vrcp.f32 %v1087_v58 }
 0x5b5   :  { %8776 = vmatmul.msk.f32.vlgmr.msra.gmra.mxu1 %vm268_vm10, %v826_v52 }
 0x5b9   :  { %v9556_v12 = vpop.eup %9555 }
 0x5ba   :  { %v9306_v21 = vpop.permute.xlu2 %9305  ;;  %v960_v25 = vmul.f32 %v9556_v12, %v10419_v24  ;;  %v9558_v9 = vpop.eup %9557 }
 0x5bb   :  { %v9308_v23 = vunpack.i.h.bf16 %v9306_v21  ;;  %v9307_v63 = vunpack.i.l.bf16 %v9306_v21  ;;  %v1093_v32 = vmul.f32 %v9558_v9, %v10421_v59 }
 0x5bd   :  { %982 = vmatpush.msrb.mxu0 %v9307_v63  ;;  %1008 = vmatpush.msrb.mxu1 %v9308_v23 }
 0x5be   :  { %8781 = vmatmul.msk.f32.vlgmr.msrb.gmra.mxu0 %vm268_vm10, %v959_v60  ;;  %8782 = vmatmul.msk.f32.vlgmr.msrb.gmra.mxu1 %vm268_vm10, %v960_v25 }
 0x5c3   :  { %v9311_v26 = vpop.permute.xlu1 %9310 }
 0x5c4   :  { %v9313_v29 = vunpack.i.h.bf16 %v9311_v26  ;;  %v9312_v30 = vunpack.i.l.bf16 %v9311_v26 }
 0x5c6   :  { %v1230_v33 = vpop.permute.xlu0 %1229  ;;  %1116 = vmatpush.msra.mxu0 %v9312_v30  ;;  %1142 = vmatpush.msra.mxu1 %v9313_v29 }
 0x5c7   :  { %8787 = vmatmul.msk.f32.vlgmr.msra.gmra.mxu0 %vm268_vm10, %v1093_v32 }
 0x5c8   :  { %1250 = vmatpush.msrb.mxu0 %v1230_v33 }
 0x5ee   :  { %v1090_v18 = vpop.xlane.xlu1 %1089 }
 0x5ef   :  { %9559 = vrcp.f32 %v1090_v18 }
 0x5f3   :  { %v1224_v59 = vpop.xlane.xlu2 %1223 }
 0x5f5   :  { %v9560_v24 = vpop.eup %9559 }
 0x5f6   :  { %v1094_v34 = vmul.f32 %v9560_v24, %v10436_v1  ;;  %v1221_v37 = vpop.xlane.xlu1 %1220 }
 0x5f7   :  { %9561 = vrcp.f32 %v1221_v37 }
 0x5f8   :  { %8788 = vmatmul.msk.f32.vlgmr.msra.gmra.mxu1 %vm268_vm10, %v1094_v34  ;;  %9563 = vrcp.f32 %v1224_v59 }
 0x5fd   :  { %v9562_v20 = vpop.eup %9561 }
 0x5fe   :  { %v1227_v38 = vmul.f32 %v9562_v20, %v10442_v8  ;;  %v9564_v39 = vpop.eup %9563 }
 0x5ff   :  { %v1228_v3 = vmul.f32 %v9564_v39, %v10440_v28 }
 0x600   :  { %8793 = vmatmul.msk.f32.vlgmr.msrb.gmra.mxu0 %vm268_vm10, %v1227_v38 }
 0x60e   :  { %v1256_v4 = vpop.permute.xlu1 %1255 }
 0x60f   :  { %1276 = vmatpush.msrb.mxu1 %v1256_v4 }
 0x610   :  { %8794 = vmatmul.msk.f32.vlgmr.msrb.gmra.mxu1 %vm268_vm10, %v1228_v3 }
 0x611   :  { %v448_v13 = vpop.f32.mrf.mxu0 }
 0x612   :  { %1283 = vrot.lane.b32.xlu1 %v448_v13, %s13278_s0 }
 0x619   :  { %v474_v1 = vpop.f32.mrf.mxu1 }
 0x61a   :  { %v582_v27 = vpop.f32.mrf.mxu0  ;;  %1285 = vrot.lane.b32.xlu1 %v474_v1, %s13278_s0  ;;  %s13296_s0 = smov 20  }
 0x61b   :  { %1291 = vrot.lane.b32.xlu0 %v582_v27, %s13286_s28 }
 0x622   :  { %v608_v8 = vpop.f32.mrf.mxu1 }
 0x623   :  { %v716_v42 = vpop.f32.mrf.mxu0  ;;  %1293 = vrot.lane.b32.xlu0 %v608_v8, %s13286_s28  ;;  %v1454_v8 = vld [vmem:[%s13243_s11 + $0x18] sm:$0xff]  ;;  %s13386_s28 = smov 72  }
 0x624   :  { %1299 = vrot.lane.b32.xlu1 %v716_v42, %s13282_s27  ;;  %1477 = vmatpush.msrb.mxu3 %v1454_v8  ;;  %v1453_v42 = vld [vmem:[%s13243_s11 + $0x10] sm:$0xff] }
 0x626   :  { %1478 = vmatpush.msrb.mxu3 %v1453_v42 }
 0x62a   :  { %v742_v28 = vpop.f32.mrf.mxu1 }
 0x62b   :  { %v850_v45 = vpop.f32.mrf.mxu0 }
 0x62c   :  { %1301 = vrot.lane.b32.xlu1 %v742_v28, %s13282_s27  ;;  %1307 = vrot.lane.b32.xlu2 %v850_v45, %s13284_s29  ;;  %s13310_s27 = smov 28   ;;  %v1452_v28 = vld [vmem:[%s13243_s11 + $0x8] sm:$0xff]  ;;  %v1451_v45 = vld [vmem:[%s13243_s11] sm:$0xff] }
 0x62d   :  { %1479 = vmatpush.msrb.mxu3 %v1452_v28 }
 0x62f   :  { %1480 = vmatpush.msrb.mxu3 %v1451_v45 }
 0x632   :  { %v876_v46 = vpop.f32.mrf.mxu1 }
 0x634   :  { %1309 = vrot.lane.b32.xlu2 %v876_v46, %s13284_s29  ;;  %s13387_s29 = smov 100  }
 0x63b   :  { %v984_v35 = vpop.f32.mrf.mxu0  ;;  %v1010_v47 = vpop.f32.mrf.mxu1 }
 0x63c   :  { %1315 = vrot.lane.b32.xlu0 %v984_v35, %s13296_s0 }
 0x644   :  { %v1118_v36 = vpop.f32.mrf.mxu0 }
 0x645   :  { %1323 = vrot.lane.b32.xlu1 %v1118_v36, %s13292_s30 }
 0x675   :  { %v1144_v49 = vpop.f32.mrf.mxu1 }
 0x676   :  { %1325 = vrot.lane.b32.xlu1 %v1144_v49, %s13292_s30  ;;  %v1504_v49 = vld [vmem:[%s13245_s13 + $0x70] sm:$0xff]  ;;  %s13381_s30 = smov 120  }
 0x67d   :  { %v1252_v50 = vpop.f32.mrf.mxu0 }
 0x67e   :  { %1331 = vrot.lane.b32.xlu0 %v1252_v50, %s13310_s27  ;;  %v1503_v50 = vld [vmem:[%s13245_s13 + $0x68] sm:$0xff] }
 0x684   :  { %v1284_v55 = vpop.permute.xlu1 %1283 }
 0x685   :  { %v1337_v0 = vsel %vm210_vm8, %v10280_v15, %v1284_v55 }
 0x686   :  { %1317 = vrot.lane.b32.xlu0 %v1010_v47, %s13296_s0  ;;  %v1308_v62 = vpop.permute.xlu2 %1307  ;;  %v1505_v47 = vld [vmem:[%s13245_s13 + $0x78] sm:$0xff]  ;;  %s13380_s0 = smov 116  }
 0x687   :  { %1510 = vmatpush.msra.mxu0 %v1505_v47 }
 0x689   :  { %1511 = vmatpush.msra.mxu0 %v1504_v49 }
 0x68b   :  { %1512 = vmatpush.msra.mxu0 %v1503_v50 }
 0x68c   :  { %v1286_v31 = vpop.permute.xlu1 %1285 }
 0x68d   :  { %v1278_v54 = vpop.f32.mrf.mxu1  ;;  %v1292_v57 = vpop.permute.xlu0 %1291  ;;  %v1338_v15 = vsel %vm210_vm8, %v10282_v17, %v1286_v31  ;;  %v9452_v17 = vld [vmem:[%s13240_s8] ss:$0 sm:$0xff]  ;;  %1513 = vmatpush.msra.mxu0 %v1502_v44  ;;  %v8803_v44 = vld [vmem:[%s13238_s6 + $0x30] sm:$0xff] }
 0x68e   :  { %1333 = vrot.lane.b32.xlu2 %v1278_v54, %s13310_s27  ;;  %v1339_v5 = vsel %vm268_vm10, %v1337_v0, %v1292_v57  ;;  %v1310_v12 = vpop.permute.xlu2 %1309  ;;  %s13393_s27 = smov 52  }
 0x68f   :  { %1514 = vmatpush.msra.mxu0 %v1501_v40 }
 0x695   :  { %v1294_v41 = vpop.permute.xlu0 %1293 }
 0x696   :  { %v1300_v19 = vpop.permute.xlu1 %1299  ;;  %v1340_v58 = vsel %vm268_vm10, %v1338_v15, %v1294_v41 }
 0x697   :  { %v1342_v6 = vsel %vm1341_vm11, %v1339_v5, %v1300_v19  ;;  %v1500_v19 = vld [vmem:[%s13245_s13 + $0x50] sm:$0xff] }
 0x698   :  { %v1345_v53 = vsel %vm1344_vm12, %v1342_v6, %v1308_v62  ;;  %1515 = vmatpush.msra.mxu0 %v1500_v19  ;;  %v9453_v6 = vld [vmem:[%s13241_s9] ss:$0 sm:$0xff] }
 0x69e   :  { %v1302_v61 = vpop.permute.xlu1 %1301 }
 0x69f   :  { %v1343_v21 = vsel %vm1341_vm11, %v1340_v58, %v1302_v61  ;;  %v1499_v61 = vld [vmem:[%s13245_s13 + $0x48] sm:$0xff] }
 0x6a0   :  { %v1346_v23 = vsel %vm1344_vm12, %v1343_v21, %v1310_v12  ;;  %1516 = vmatpush.msra.mxu0 %v1499_v61  ;;  %v1495_v58 = vld [vmem:[%s13245_s13 + $0x28] sm:$0xff] }
 0x6ae   :  { %v1316_v2 = vpop.permute.xlu0 %1315 }
 0x6af   :  { %v1348_v48 = vsel %vm1347_vm13, %v1345_v53, %v1316_v2  ;;  %v1498_v2 = vld [vmem:[%s13245_s13 + $0x40] sm:$0xff] }
 0x6b0   :  { %1517 = vmatpush.msra.mxu0 %v1498_v2 }
 0x6b7   :  { %v1324_v51 = vpop.permute.xlu1 %1323 }
 0x6b8   :  { %v1351_v52 = vsel %vm1350_vm14, %v1348_v48, %v1324_v51  ;;  %v1497_v51 = vld [vmem:[%s13245_s13 + $0x38] sm:$0xff] }
 0x6b9   :  { %1518 = vmatpush.msra.mxu0 %v1497_v51 }
 0x6e8   :  { %v1326_v60 = vpop.permute.xlu1 %1325  ;;  %v1334_v9 = vpop.permute.xlu2 %1333 }
 0x6f0   :  { %v1332_v7 = vpop.permute.xlu0 %1331 }
 0x6f1   :  { %v1354_v11 = vsel %vm1353_vm15, %v1351_v52, %v1332_v7  ;;  %v9454_v7 = vld [vmem:[%s13242_s10] ss:$0 sm:$0xff] }
 0x6f2   :  { %8795 = vmatmul.msk.f32.vlgmr.msrb.gmra.mxu2 %vm73_vm0, %v1354_v11  ;;  %v1496_v11 = vld [vmem:[%s13245_s13 + $0x30] sm:$0xff] }
 0x6f3   :  { %1519 = vmatpush.msra.mxu0 %v1496_v11 }
 0x6f5   :  { %1520 = vmatpush.msra.mxu0 %v1495_v58 }
 0x6f8   :  { %v1318_v63 = vpop.permute.xlu0 %1317 }
 0x6f9   :  { %v1349_v25 = vsel %vm1347_vm13, %v1346_v23, %v1318_v63  ;;  %v1494_v63 = vld [vmem:[%s13245_s13 + $0x20] sm:$0xff] }
 0x6fa   :  { %v1352_v26 = vsel %vm1350_vm14, %v1349_v25, %v1326_v60  ;;  %v1493_v25 = vld [vmem:[%s13245_s13 + $0x18] sm:$0xff]  ;;  %1521 = vmatpush.msra.mxu0 %v1494_v63 }
 0x6fb   :  { %v1355_v29 = vsel %vm1353_vm15, %v1352_v26, %v1334_v9 }
 0x6fc   :  { %8796 = vmatmul.msk.f32.gmra.mxu2 %vm73_vm0, %v1355_v29  ;;  %1522 = vmatpush.msra.mxu0 %v1493_v25 }
 0x775   :  { %v1387_v30 = vpop.f32.mrf.mxu2 }
 0x776   :  { %v1388_v32 = vadd.f32 %v9452_v17, %v1387_v30 }
 0x778   :  { %v10528_v33 = vadd.f32 %v1388_v32, %v10118_v10  ;;  %v1492_v32 = vld [vmem:[%s13245_s13 + $0x10] sm:$0xff] }
 0x779   :  { %1523 = vmatpush.msra.mxu0 %v1492_v32 }
 0x77a   :  { %v1397_v18 = vsel %vm73_vm0, %v10528_v33, 0.0 }
 0x77b   :  { %1398 = vadd.xlane.f32.xlu0 %v1397_v18  ;;  %v1491_v18 = vld [vmem:[%s13245_s13 + $0x8] sm:$0xff] }
 0x77c   :  { %1524 = vmatpush.msra.mxu0 %v1491_v18 }
 0x77f   :  { %v1390_v24 = vpop.f32.mrf.mxu2 }
 0x780   :  { %v1391_v34 = vadd.f32 %v9452_v17, %v1390_v24  ;;  %v1490_v24 = vld [vmem:[%s13245_s13] sm:$0xff] }
 0x781   :  { %1525 = vmatpush.msra.mxu0 %v1490_v24 }
 0x782   :  { %v10533_v37 = vadd.f32 %v1391_v34, %v10122_v14  ;;  %v9455_v34 = vld [vmem:[%s13244_s12] ss:$0 sm:$0xff] }
 0x784   :  { %v1400_v20 = vsel %vm73_vm0, %v10533_v37, 0.0 }
 0x785   :  { %1401 = vadd.xlane.f32.xlu1 %v1400_v20 }
 0x7ee   :  { %v1399_v38 = vpop.xlane.xlu0 %1398 }
 0x7ef   :  { %v1403_v59 = vmul.f32 %v1399_v38, %v10126_v22 }
 0x7f1   :  { %v1405_v39 = vsub.f32 %v10528_v33, %v1403_v59 }
 0x7f3   :  { %v1407_v10 = vmul.f32 %v1405_v39, %v1405_v39 }
 0x7f5   :  { %v1409_v3 = vsel %vm73_vm0, %v1407_v10, 0.0 }
 0x7f6   :  { %1410 = vadd.xlane.f32.xlu2 %v1409_v3 }
 0x7f8   :  { %v1402_v4 = vpop.xlane.xlu1 %1401 }
 0x7f9   :  { %v1404_v13 = vmul.f32 %v1402_v4, %v10126_v22  ;;  %v9456_v4 = vld [vmem:[%s13246_s14] ss:$0 sm:$0xff] }
 0x7fb   :  { %v10542_v1 = vsub.f32 %v10533_v37, %v1404_v13 }
 0x7fd   :  { %v1408_v14 = vmul.f32 %v10542_v1, %v10542_v1 }
 0x7ff   :  { %v1412_v27 = vsel %vm73_vm0, %v1408_v14, 0.0 }
 0x800   :  { %1413 = vadd.xlane.f32.xlu0 %v1412_v27 }
 0x869   :  { %v1411_v46 = vpop.xlane.xlu2 %1410 }
 0x86a   :  { %v1415_v35 = vmul.f32 %v1411_v46, %v10126_v22 }
 0x86c   :  { %v1417_v36 = vadd.f32 1e-05, %v1415_v35 }
 0x86e   :  { %9565 = vrsqrt.f32 %v1417_v36  ;;  %vm1425_vm2 = vweird.f32 %v1417_v36 }
 0x873   :  { %v1414_v54 = vpop.xlane.xlu0 %1413 }
 0x874   :  { %v9566_v55 = vpop.eup %9565  ;;  %v1416_v56 = vmul.f32 %v1414_v54, %v10126_v22 }
 0x875   :  { %v1420_v43 = vmul.f32 %v9566_v55, %v1417_v36  ;;  %vm1426_vm1 = vweird.f32 %v9566_v55 }
 0x876   :  { %v1418_v31 = vadd.f32 1e-05, %v1416_v56  ;;  %vm1427_vm3 = vmor %vm1425_vm2, %vm1426_vm1  ;;  %v8804_v56 = vld [vmem:[%s13238_s6 + $0x38] sm:$0xff] }
 0x877   :  { %v1421_v57 = vmul.f32 %v9566_v55, %v1420_v43  ;;  %1616 = vmatpush.msra.mxu1 %v8804_v56  ;;  %v8802_v43 = vld [vmem:[%s13238_s6 + $0x28] sm:$0xff] }
 0x878   :  { %9567 = vrsqrt.f32 %v1418_v31  ;;  %vm1435_vm5 = vweird.f32 %v1418_v31 }
 0x879   :  { %v1422_v41 = vmul.f32 0.5, %v1421_v57  ;;  %1617 = vmatpush.msra.mxu1 %v8803_v44 }
 0x87b   :  { %v1423_v62 = vsub.f32 1.5, %v1422_v41  ;;  %1618 = vmatpush.msra.mxu1 %v8802_v43 }
 0x87d   :  { %v1424_v0 = vmul.f32 %v9566_v55, %v1423_v62 }
 0x87e   :  { %v9568_v5 = vpop.eup %9567 }
 0x87f   :  { %v1428_v53 = vsel %vm1427_vm3, %v9566_v55, %v1424_v0  ;;  %v1430_v48 = vmul.f32 %v9568_v5, %v1418_v31  ;;  %vm1436_vm4 = vweird.f32 %v9568_v5  ;;  %v8801_v31 = vld [vmem:[%s13238_s6 + $0x20] sm:$0xff] }
 0x880   :  { %v1439_v52 = vmul.f32 %v1428_v53, %v1405_v39  ;;  %vm1437_vm6 = vmor %vm1435_vm5, %vm1436_vm4  ;;  %1619 = vmatpush.msra.mxu1 %v8801_v31 }
 0x881   :  { %v1431_v12 = vmul.f32 %v9568_v5, %v1430_v48 }
 0x882   :  { %v1444_v15 = vmul.f32 %v9453_v6, %v1439_v52  ;;  %v9457_v52 = vld [vmem:[%s13236_s4 + $0x1] ss:$0 sm:$0xff] }
 0x883   :  { %v1432_v21 = vmul.f32 0.5, %v1431_v12 }
 0x884   :  { %v1449_v23 = vadd.f32 %v9454_v7, %v1444_v15  ;;  %v9458_v15 = vld [vmem:[%s13237_s5 + $0x1] ss:$0 sm:$0xff] }
 0x885   :  { %v1433_v60 = vsub.f32 1.5, %v1432_v21 }
 0x886   :  { %8797 = vmatmul.msk.f32.vlgmr.msrb.gmra.mxu3 %vm73_vm0, %v1449_v23 }
 0x887   :  { %v1434_v9 = vmul.f32 %v9568_v5, %v1433_v60 }
 0x889   :  { %v1438_v26 = vsel %vm1437_vm6, %v9568_v5, %v1434_v9 }
 0x88a   :  { %v1440_v29 = vmul.f32 %v1438_v26, %v10542_v1 }
 0x88c   :  { %v1445_v17 = vmul.f32 %v9453_v6, %v1440_v29 }
 0x88e   :  { %v1450_v30 = vadd.f32 %v9454_v7, %v1445_v17 }
 0x890   :  { %8798 = vmatmul.msk.f32.gmra.mxu3 %vm73_vm0, %v1450_v30 }
 0x909   :  { %v1482_v20 = vpop.f32.mrf.mxu3 }
 0x90a   :  { %v1483_v38 = vadd.f32 %v9455_v34, %v1482_v20 }
 0x90c   :  { %v1488_v59 = vmax.f32 %v1483_v38, 0.0 }
 0x90e   :  { %1526 = vmatmul.f32.vlgmr.msra.gmra.mxu0 %v1488_v59 }
 0x913   :  { %v1485_v39 = vpop.f32.mrf.mxu3 }
 0x914   :  { %v1486_v10 = vadd.f32 %v9455_v34, %v1485_v39 }
 0x916   :  { %v1489_v3 = vmax.f32 %v1486_v10, 0.0 }
 0x918   :  { %1529 = vmatmul.f32.gmra.mxu0 %v1489_v3 }
 0x98b   :  { %v1527_v13 = vpop.f32.mrf.mxu0 }
 0x98c   :  { %v1528_v1 = vadd.f32 %v9456_v4, %v1527_v13 }
 0x98e   :  { %v10625_v14 = vadd.f32 %v1528_v1, %v10528_v33 }
 0x990   :  { %v1539_v27 = vsel %vm73_vm0, %v10625_v14, 0.0 }
 0x991   :  { %1540 = vadd.xlane.f32.xlu1 %v1539_v27 }
 0x995   :  { %v1530_v8 = vpop.f32.mrf.mxu0 }
 0x996   :  { %v1531_v42 = vadd.f32 %v9456_v4, %v1530_v8 }
 0x998   :  { %v10630_v28 = vadd.f32 %v1531_v42, %v10533_v37 }
 0x99a   :  { %v1542_v45 = vsel %vm73_vm0, %v10630_v28, 0.0 }
 0x99b   :  { %1543 = vadd.xlane.f32.xlu2 %v1542_v45 }
 0xa04   :  { %v1541_v46 = vpop.xlane.xlu1 %1540 }
 0xa05   :  { %v1545_v35 = vmul.f32 %v1541_v46, %v10126_v22 }
 0xa07   :  { %v1547_v36 = vsub.f32 %v10625_v14, %v1545_v35 }
 0xa09   :  { %v1549_v33 = vmul.f32 %v1547_v36, %v1547_v36 }
 0xa0b   :  { %v1551_v47 = vsel %vm73_vm0, %v1549_v33, 0.0 }
 0xa0c   :  { %1552 = vadd.xlane.f32.xlu0 %v1551_v47 }
 0xa0e   :  { %v1544_v49 = vpop.xlane.xlu2 %1543 }
 0xa0f   :  { %v1546_v50 = vmul.f32 %v1544_v49, %v10126_v22 }
 0xa11   :  { %v1548_v54 = vsub.f32 %v10630_v28, %v1546_v50 }
 0xa13   :  { %v1550_v37 = vmul.f32 %v1548_v54, %v1548_v54 }
 0xa15   :  { %v1554_v55 = vsel %vm73_vm0, %v1550_v37, 0.0 }
 0xa16   :  { %1555 = vadd.xlane.f32.xlu1 %v1554_v55 }
 0xa7f   :  { %v1553_v40 = vpop.xlane.xlu0 %1552 }
 0xa80   :  { %v1557_v57 = vmul.f32 %v1553_v40, %v10126_v22 }
 0xa82   :  { %v1559_v19 = vadd.f32 1e-05, %v1557_v57 }
 0xa84   :  { %9569 = vrsqrt.f32 %v1559_v19  ;;  %vm1567_vm1 = vweird.f32 %v1559_v19 }
 0xa89   :  { %v1556_v41 = vpop.xlane.xlu1 %1555 }
 0xa8a   :  { %v9570_v61 = vpop.eup %9569  ;;  %v1558_v62 = vmul.f32 %v1556_v41, %v10126_v22 }
 0xa8b   :  { %v1562_v2 = vmul.f32 %v9570_v61, %v1559_v19  ;;  %vm1568_vm7 = vweird.f32 %v9570_v61 }
 0xa8c   :  { %v1560_v0 = vadd.f32 1e-05, %v1558_v62  ;;  %vm1569_vm2 = vmor %vm1567_vm1, %vm1568_vm7 }
 0xa8d   :  { %v1563_v5 = vmul.f32 %v9570_v61, %v1562_v2 }
 0xa8e   :  { %9571 = vrsqrt.f32 %v1560_v0  ;;  %vm1577_vm4 = vweird.f32 %v1560_v0 }
 0xa8f   :  { %v1564_v6 = vmul.f32 0.5, %v1563_v5 }
 0xa91   :  { %v1565_v51 = vsub.f32 1.5, %v1564_v6 }
 0xa93   :  { %v1566_v53 = vmul.f32 %v9570_v61, %v1565_v51 }
 0xa94   :  { %v9572_v48 = vpop.eup %9571 }
 0xa95   :  { %v1570_v7 = vsel %vm1569_vm2, %v9570_v61, %v1566_v53  ;;  %v1572_v11 = vmul.f32 %v9572_v48, %v1560_v0  ;;  %vm1578_vm3 = vweird.f32 %v9572_v48 }
 0xa96   :  { %v1581_v12 = vmul.f32 %v1570_v7, %v1547_v36  ;;  %vm1579_vm5 = vmor %vm1577_vm4, %vm1578_vm3 }
 0xa97   :  { %v1573_v58 = vmul.f32 %v9572_v48, %v1572_v11 }
 0xa98   :  { %v1586_v21 = vmul.f32 %v9457_v52, %v1581_v12 }
 0xa99   :  { %v1574_v23 = vmul.f32 0.5, %v1573_v58 }
 0xa9a   :  { %v1591_v63 = vadd.f32 %v9458_v15, %v1586_v21 }
 0xa9b   :  { %v1575_v60 = vsub.f32 1.5, %v1574_v23 }
 0xa9c   :  { %8805 = vmatmul.msk.f32.vlgmr.msra.gmra.mxu1 %vm73_vm0, %v1591_v63 }
 0xa9d   :  { %v1576_v25 = vmul.f32 %v9572_v48, %v1575_v60 }
 0xa9f   :  { %v1580_v9 = vsel %vm1579_vm5, %v9572_v48, %v1576_v25 }
 0xaa0   :  { %v1582_v26 = vmul.f32 %v1580_v9, %v1548_v54 }
 0xaa2   :  { %v1587_v29 = vmul.f32 %v9457_v52, %v1582_v26 }
 0xaa4   :  { %v1592_v17 = vadd.f32 %v9458_v15, %v1587_v29 }
 0xaa6   :  { %8806 = vmatmul.msk.f32.gmra.mxu1 %vm73_vm0, %v1592_v17 }
 0xb19   :  { %v10662_v30 = vpop.f32.mrf.mxu1 }
 0xb1a   :  { %1761 = vrot.lane.b32.xlu1 %v10662_v30, %s13308_s20  ;;  %1628 = vrot.lane.b32.xlu2 %v10662_v30, %s13306_s21 }
 0xb23   :  { %v10668_v32 = vpop.f32.mrf.mxu1 }
 0xb24   :  { %1787 = vrot.lane.b32.xlu1 %v10668_v32, %s13300_s22  ;;  %1789 = vrot.lane.b32.xlu2 %v10668_v32, %s13308_s20  ;;  %v10680_v18 = vpack.i.bf16 %v10668_v32, %v10662_v30  ;;  %s13392_s20 = smov 68  }
 0xb25   :  { %1655 = vrot.lane.b32.xlu0 %v10668_v32, %s13306_s21  ;;  %s13391_s21 = smov 104  }
 0xb2d   :  { %1759 = vrot.lane.b32.xlu0 %v10662_v30, %s13300_s22  ;;  %s13388_s22 = smov 56  }
 0xb35   :  { %9315 = vrot.lane.b32.xlu0 %v10680_v18, %s13302_s1  ;;  %s13389_s1 = smov 48  }
 0xb74   :  { %v1629_v24 = vpop.permute.xlu2 %1628 }
 0xb75   :  { %8807 = vmatpush.xpose.msk.msra.mxu2 %vm210_vm8, %v1629_v24 }
 0xb78   :  { %8808 = vmatmul.msk.f32.vlgmr.msra.gmra.mxu2 %vm210_vm8, %v10662_v30 }
 0xb7e   :  { %v1790_v3 = vpop.permute.xlu2 %1789 }
 0xb8c   :  { %v1762_v20 = vpop.permute.xlu1 %1761 }
 0xb96   :  { %v1788_v44 = vpop.permute.xlu1 %1787 }
 0xb97   :  { %v1656_v34 = vpop.permute.xlu0 %1655 }
 0xb98   :  { %8809 = vmatpush.xpose.msk.msra.mxu3 %vm210_vm8, %v1656_v34 }
 0xb9b   :  { %8810 = vmatmul.msk.f32.vlgmr.msra.gmra.mxu3 %vm210_vm8, %v10668_v32 }
 0xb9c   :  { %8813 = vmatpush.xpose.msk.msrb.mxu3 %vm210_vm8, %v1762_v20 }
 0xb9f   :  { %v1760_v38 = vpop.permute.xlu0 %1759 }
 0xba3   :  { %8814 = vmatmul.msk.f32.vlgmr.msrb.gmra.mxu3 %vm210_vm8, %v1760_v38 }
 0xba7   :  { %v9316_v59 = vpop.permute.xlu0 %9315 }
 0xba8   :  { %v9318_v39 = vunpack.i.h.bf16 %v9316_v59  ;;  %v9317_v10 = vunpack.i.l.bf16 %v9316_v59 }
 0xbaa   :  { %1728 = vmatpush.msrb.mxu1 %v9317_v10  ;;  %1754 = vmatpush.msrb.mxu2 %v9318_v39 }
 0xbac   :  { %8815 = vmatpush.xpose.msk.msra.mxu1 %vm210_vm8, %v1790_v3 }
 0xbfb   :  { %v1651_v4 = vpop.f32.mrf.mxu2 }
 0xbfc   :  { %v1681_v13 = vmul.f32 0.17677669, %v1651_v4 }
 0xbfe   :  { %v1683_v1 = vsel %vm10183_vm9, %v1681_v13, -1e+30 }
 0xbff   :  { %v1685_v27 = vsel %vm268_vm10, %v1683_v1, -inf }
 0xc00   :  { %1686 = vmax.xlane.f32.xlu2 %v1685_v27 }
 0xc18   :  { %1841 = vrot.lane.b32.xlu2 %v10662_v30, %s13312_s26 }
 0xc1e   :  { %v1678_v8 = vpop.f32.mrf.mxu3 }
 0xc1f   :  { %v1682_v42 = vmul.f32 0.17677669, %v1678_v8 }
 0xc20   :  { %1923 = vrot.lane.b32.xlu2 %v10668_v32, %s13304_s25 }
 0xc21   :  { %v1684_v45 = vsel %vm10183_vm9, %v1682_v42, -1e+30 }
 0xc22   :  { %v1688_v46 = vsel %vm268_vm10, %v1684_v45, -inf }
 0xc23   :  { %1689 = vmax.xlane.f32.xlu1 %v1688_v46 }
 0xc26   :  { %v1784_v35 = vpop.f32.mrf.mxu3 }
 0xc27   :  { %v1815_v36 = vmul.f32 0.17677669, %v1784_v35 }
 0xc28   :  { %2027 = vrot.lane.b32.xlu2 %v10662_v30, %s13380_s0 }
 0xc29   :  { %v1817_v33 = vsel %vm10183_vm9, %v1815_v36, -1e+30 }
 0xc2a   :  { %v1819_v47 = vsel %vm268_vm10, %v1817_v33, -inf }
 0xc2b   :  { %1820 = vmax.xlane.f32.xlu0 %v1819_v47 }
 0xc3c   :  { %1921 = vrot.lane.b32.xlu1 %v10668_v32, %s13381_s30 }
 0xc3f   :  { %1895 = vrot.lane.b32.xlu0 %v10662_v30, %s13304_s25  ;;  %s13390_s25 = smov 76  }
 0xc44   :  { %2163 = vrot.lane.b32.xlu1 %v10662_v30, %s13382_s2 }
 0xc47   :  { %1893 = vrot.lane.b32.xlu0 %v10662_v30, %s13381_s30 }
 0xc4c   :  { %2191 = vrot.lane.b32.xlu1 %v10668_v32, %s13382_s2 }
 0xc4f   :  { %2029 = vrot.lane.b32.xlu0 %v10662_v30, %s13383_s23 }
 0xc54   :  { %2295 = vrot.lane.b32.xlu1 %v10662_v30, %s13384_s24 }
 0xc57   :  { %2057 = vrot.lane.b32.xlu0 %v10668_v32, %s13383_s23 }
 0xc5f   :  { %2161 = vrot.lane.b32.xlu0 %v10662_v30, %s13385_s3 }
 0xc67   :  { %2189 = vrot.lane.b32.xlu0 %v10668_v32, %s13385_s3 }
 0xc6f   :  { %2431 = vrot.lane.b32.xlu0 %v10662_v30, %s13386_s28 }
 0xc73   :  { %v1687_v49 = vpop.xlane.xlu2 %1686 }
 0xc74   :  { %v1691_v50 = vsub.f32 %v1683_v1, %v1687_v49 }
 0xc76   :  { %v1693_v54 = vmul.f32 1.442695, %v1691_v50 }
 0xc77   :  { %2459 = vrot.lane.b32.xlu0 %v10668_v32, %s13386_s28 }
 0xc78   :  { %9573 = vpow2.f32 %v1693_v54 }
 0xc7b   :  { %v1842_v37 = vpop.permute.xlu2 %1841 }
 0xc7c   :  { %1862 = vmatpush.msra.mxu2 %v1842_v37 }
 0xc7e   :  { %v9574_v55 = vpop.eup %9573 }
 0xc7f   :  { %2563 = vrot.lane.b32.xlu0 %v10662_v30, %s13387_s29  ;;  %v1697_v56 = vsel %vm268_vm10, %v9574_v55, 0.0 }
 0xc80   :  { %1698 = vadd.xlane.f32.xlu2 %v1697_v56 }
 0xc83   :  { %v1924_v7 = vpop.permute.xlu2 %1923 }
 0xc87   :  { %9320 = vrot.lane.b32.xlu0 %v10680_v18, %s13388_s22  ;;  %s13404_s22 = smov 92  }
 0xc8b   :  { %v2028_v15 = vpop.permute.xlu2 %2027 }
 0xc8f   :  { %9330 = vrot.lane.b32.xlu0 %v10680_v18, %s13389_s1  ;;  %s13411_s1 = smov 56  }
 0xc96   :  { %v1690_v43 = vpop.xlane.xlu1 %1689 }
 0xc97   :  { %v1692_v31 = vsub.f32 %v1684_v45, %v1690_v43 }
 0xc98   :  { %2055 = vrot.lane.b32.xlu2 %v10668_v32, %s13380_s0 }
 0xc99   :  { %v1695_v40 = vmul.f32 1.442695, %v1692_v31 }
 0xc9b   :  { %9575 = vpow2.f32 %v1695_v40 }
 0xc9e   :  { %v1821_v57 = vpop.xlane.xlu0 %1820 }
 0xc9f   :  { %v1825_v19 = vsub.f32 %v1817_v33, %v1821_v57 }
 0xca0   :  { %2297 = vrot.lane.b32.xlu2 %v10662_v30, %s13390_s25 }
 0xca1   :  { %v9576_v41 = vpop.eup %9575  ;;  %v1827_v61 = vmul.f32 1.442695, %v1825_v19 }
 0xca2   :  { %v1700_v62 = vsel %vm268_vm10, %v9576_v41, 0.0 }
 0xca3   :  { %9577 = vpow2.f32 %v1827_v61  ;;  %1701 = vadd.xlane.f32.xlu1 %v1700_v62 }
 0xca8   :  { %2325 = vrot.lane.b32.xlu2 %v10668_v32, %s13390_s25 }
 0xca9   :  { %v9578_v2 = vpop.eup %9577 }
 0xcaa   :  { %v1831_v0 = vsel %vm268_vm10, %v9578_v2, 0.0 }
 0xcab   :  { %1832 = vadd.xlane.f32.xlu1 %v1831_v0 }
 0xcae   :  { %v1922_v58 = vpop.permute.xlu1 %1921 }
 0xcb0   :  { %2429 = vrot.lane.b32.xlu2 %v10662_v30, %s13391_s21 }
 0xcb1   :  { %v1896_v5 = vpop.permute.xlu0 %1895 }
 0xcb6   :  { %v2164_v25 = vpop.permute.xlu1 %2163 }
 0xcb8   :  { %2457 = vrot.lane.b32.xlu2 %v10668_v32, %s13391_s21 }
 0xcb9   :  { %v1894_v6 = vpop.permute.xlu0 %1893 }
 0xcc0   :  { %2591 = vrot.lane.b32.xlu2 %v10668_v32, %s13387_s29 }
 0xcc1   :  { %v2030_v51 = vpop.permute.xlu0 %2029 }
 0xcc4   :  { %2323 = vrot.lane.b32.xlu1 %v10668_v32, %s13384_s24 }
 0xcc8   :  { %1867 = vrot.lane.b32.xlu2 %v10668_v32, %s13312_s26  ;;  %s13395_s26 = smov 36  }
 0xcc9   :  { %v2058_v53 = vpop.permute.xlu0 %2057 }
 0xccc   :  { %2565 = vrot.lane.b32.xlu1 %v10662_v30, %s13392_s20 }
 0xcd0   :  { %9325 = vrot.lane.b32.xlu2 %v10680_v18, %s13393_s27 }
 0xcd1   :  { %v2162_v48 = vpop.permute.xlu0 %2161 }
 0xcd4   :  { %2593 = vrot.lane.b32.xlu1 %v10668_v32, %s13392_s20 }
 0xcd9   :  { %v2190_v52 = vpop.permute.xlu0 %2189 }
 0xcdc   :  { %9335 = vrot.lane.b32.xlu1 %v10680_v18, %s13394_s19  ;;  %v2192_v18 = vpop.permute.xlu1 %2191  ;;  %s13410_s19 = smov 48  }
 0xce1   :  { %v2432_v11 = vpop.permute.xlu0 %2431 }
 0xce4   :  { %v2296_v34 = vpop.permute.xlu1 %2295 }
 0xce9   :  { %v2460_v12 = vpop.permute.xlu0 %2459 }
 0xcf1   :  { %v2564_v21 = vpop.permute.xlu0 %2563 }
 0xcf3   :  { %v1699_v23 = vpop.xlane.xlu2 %1698 }
 0xcf4   :  { %9579 = vrcp.f32 %v1699_v23 }
 0xcf9   :  { %v9321_v63 = vpop.permute.xlu0 %9320 }
 0xcfa   :  { %v9580_v60 = vpop.eup %9579  ;;  %v9323_v9 = vunpack.i.h.bf16 %v9321_v63  ;;  %v9322_v27 = vunpack.i.l.bf16 %v9321_v63 }
 0xcfb   :  { %v1705_v26 = vmul.f32 %v9580_v60, %v9574_v55  ;;  %v2056_v29 = vpop.permute.xlu2 %2055 }
 0xcfc   :  { %2022 = vmatpush.msrb.mxu0 %v9323_v9 }
 0xcfd   :  { %8811 = vmatmul.msk.f32.vlgmr.msrb.gmra.mxu1 %vm268_vm10, %v1705_v26 }
 0xcfe   :  { %8819 = vmatpush.xpose.msk.msrb.mxu1 %vm210_vm8, %v1896_v5 }
 0xd03   :  { %v2298_v17 = vpop.permute.xlu2 %2297 }
 0xd05   :  { %8816 = vmatmul.msk.f32.vlgmr.msra.gmra.mxu1 %vm210_vm8, %v1788_v44 }
 0xd06   :  { %8825 = vmatpush.xpose.msk.msra.mxu1 %vm210_vm8, %v2030_v51 }
 0xd0b   :  { %v2326_v24 = vpop.permute.xlu2 %2325 }
 0xd0d   :  { %8820 = vmatmul.msk.f32.vlgmr.msrb.gmra.mxu1 %vm210_vm8, %v1894_v6 }
 0xd0e   :  { %8831 = vmatpush.xpose.msk.msrb.mxu1 %vm210_vm8, %v2164_v25 }
 0xd13   :  { %v2430_v20 = vpop.permute.xlu2 %2429 }
 0xd15   :  { %8826 = vmatmul.msk.f32.vlgmr.msra.gmra.mxu1 %vm210_vm8, %v2028_v15 }
 0xd16   :  { %v1702_v38 = vpop.xlane.xlu1 %1701  ;;  %8837 = vmatpush.xpose.msk.msra.mxu1 %vm210_vm8, %v2298_v17 }
 0xd17   :  { %9581 = vrcp.f32 %v1702_v38 }
 0xd1b   :  { %v2458_v59 = vpop.permute.xlu2 %2457 }
 0xd1d   :  { %v9582_v39 = vpop.eup %9581  ;;  %8832 = vmatmul.msk.f32.vlgmr.msrb.gmra.mxu1 %vm210_vm8, %v2162_v48 }
 0xd1e   :  { %v1706_v10 = vmul.f32 %v9582_v39, %v9576_v41  ;;  %v1833_v3 = vpop.xlane.xlu1 %1832  ;;  %8843 = vmatpush.xpose.msk.msrb.mxu1 %vm210_vm8, %v2432_v11 }
 0xd1f   :  { %9583 = vrcp.f32 %v1833_v3 }
 0xd20   :  { %8812 = vmatmul.msk.f32.vlgmr.msrb.gmra.mxu2 %vm268_vm10, %v1706_v10 }
 0xd21   :  { %8821 = vmatpush.xpose.msk.msrb.mxu2 %vm210_vm8, %v1924_v7 }
 0xd23   :  { %v2592_v4 = vpop.permute.xlu2 %2591 }
 0xd25   :  { %v9584_v13 = vpop.eup %9583  ;;  %8838 = vmatmul.msk.f32.vlgmr.msra.gmra.mxu1 %vm210_vm8, %v2296_v34 }
 0xd26   :  { %v1839_v1 = vmul.f32 %v9584_v13, %v9578_v2 }
 0xd28   :  { %8817 = vmatmul.msk.f32.vlgmr.msra.gmra.mxu2 %vm268_vm10, %v1839_v1 }
 0xd29   :  { %8827 = vmatpush.xpose.msk.msra.mxu2 %vm210_vm8, %v2058_v53 }
 0xd2b   :  { %v1868_v8 = vpop.permute.xlu2 %1867 }
 0xd2c   :  { %1888 = vmatpush.msra.mxu3 %v1868_v8 }
 0xd2d   :  { %8844 = vmatmul.msk.f32.vlgmr.msrb.gmra.mxu1 %vm210_vm8, %v2430_v20 }
 0xd2e   :  { %1996 = vmatpush.msrb.mxu3 %v9322_v27 }
 0xd30   :  { %8822 = vmatmul.msk.f32.vlgmr.msrb.gmra.mxu2 %vm210_vm8, %v1922_v58 }
 0xd31   :  { %8833 = vmatpush.xpose.msk.msrb.mxu2 %vm210_vm8, %v2192_v18 }
 0xd33   :  { %v10783_v42 = vpop.permute.xlu2 %9325 }
 0xd34   :  { %v9328_v45 = vunpack.i.h.bf16 %v10783_v42 }
 0xd36   :  { %v2324_v46 = vpop.permute.xlu1 %2323  ;;  %2156 = vmatpush.msra.mxu0 %v9328_v45 }
 0xd38   :  { %8828 = vmatmul.msk.f32.vlgmr.msra.gmra.mxu2 %vm210_vm8, %v2056_v29 }
 0xd39   :  { %8839 = vmatpush.xpose.msk.msra.mxu2 %vm210_vm8, %v2326_v24 }
 0xd3e   :  { %v2566_v35 = vpop.permute.xlu1 %2565 }
 0xd3f   :  { %8849 = vmatpush.xpose.msk.msra.mxu1 %vm210_vm8, %v2566_v35  ;;  %v10880_v35 = vpop.permute.xlu0 %9330 }
 0xd40   :  { %8834 = vmatmul.msk.f32.vlgmr.msrb.gmra.mxu2 %vm210_vm8, %v2190_v52 }
 0xd41   :  { %8845 = vmatpush.xpose.msk.msrb.mxu2 %vm210_vm8, %v2460_v12 }
 0xd42   :  { %8850 = vmatmul.msk.f32.vlgmr.msra.gmra.mxu1 %vm210_vm8, %v2564_v21 }
 0xd46   :  { %v2594_v36 = vpop.permute.xlu1 %2593 }
 0xd48   :  { %8840 = vmatmul.msk.f32.vlgmr.msra.gmra.mxu2 %vm210_vm8, %v2324_v46 }
 0xd49   :  { %8851 = vmatpush.xpose.msk.msra.mxu2 %vm210_vm8, %v2594_v36 }
 0xd4e   :  { %v10882_v36 = vpop.permute.xlu1 %9335 }
 0xd50   :  { %8846 = vmatmul.msk.f32.vlgmr.msrb.gmra.mxu2 %vm210_vm8, %v2458_v59 }
 0xd58   :  { %8852 = vmatmul.msk.f32.vlgmr.msra.gmra.mxu2 %vm210_vm8, %v2592_v4 }
 0xd7a   :  { %v10796_v33 = vpop.f32.mrf.mxu1 }
 0xd82   :  { %v1812_v47 = vpop.f32.mrf.mxu1 }
 0xd83   :  { %v1816_v49 = vmul.f32 0.17677669, %v1812_v47 }
 0xd85   :  { %v10800_v50 = vsel %vm10183_vm9, %v1816_v49, -1e+30 }
 0xd86   :  { %v1822_v54 = vsel %vm268_vm10, %v10800_v50, -inf }
 0xd87   :  { %1823 = vmax.xlane.f32.xlu0 %v1822_v54 }
 0xd8a   :  { %v1918_v37 = vpop.f32.mrf.mxu1 }
 0xd8b   :  { %v1949_v55 = vmul.f32 0.17677669, %v1918_v37 }
 0xd8d   :  { %v10806_v56 = vsel %vm10183_vm9, %v1949_v55, -1e+30 }
 0xd8e   :  { %v1953_v44 = vsel %vm268_vm10, %v10806_v56, -inf }
 0xd8f   :  { %1954 = vmax.xlane.f32.xlu1 %v1953_v44 }
 0xd92   :  { %v2052_v43 = vpop.f32.mrf.mxu1 }
 0xd93   :  { %v2083_v31 = vmul.f32 0.17677669, %v2052_v43 }
 0xd95   :  { %v10812_v40 = vsel %vm10183_vm9, %v2083_v31, -1e+30 }
 0xd96   :  { %v2087_v57 = vsel %vm268_vm10, %v10812_v40, -inf }
 0xd97   :  { %2088 = vmax.xlane.f32.xlu2 %v2087_v57 }
 0xd9a   :  { %v2186_v19 = vpop.f32.mrf.mxu1 }
 0xd9b   :  { %v2217_v41 = vmul.f32 0.17677669, %v2186_v19 }
 0xd9d   :  { %v10818_v61 = vsel %vm10183_vm9, %v2217_v41, -1e+30 }
 0xd9e   :  { %v2221_v62 = vsel %vm268_vm10, %v10818_v61, -inf }
 0xd9f   :  { %2222 = vmax.xlane.f32.xlu1 %v2221_v62 }
 0xda2   :  { %v2320_v5 = vpop.f32.mrf.mxu1 }
 0xda3   :  { %v10822_v2 = vpop.f32.mrf.mxu2  ;;  %v2351_v52 = vmul.f32 0.17677669, %v2320_v5 }
 0xda5   :  { %v10834_v12 = vsel %vm10183_vm9, %v2351_v52, -1e+30 }
 0xda6   :  { %v2355_v23 = vsel %vm268_vm10, %v10834_v12, -inf }
 0xdaa   :  { %v2454_v15 = vpop.f32.mrf.mxu1 }
 0xdab   :  { %v10824_v0 = vpop.f32.mrf.mxu2  ;;  %v2485_v63 = vmul.f32 0.17677669, %v2454_v15 }
 0xdad   :  { %v10846_v9 = vsel %vm10183_vm9, %v2485_v63, -1e+30 }
 0xdae   :  { %v2489_v17 = vsel %vm268_vm10, %v10846_v9, -inf }
 0xdb3   :  { %v1946_v6 = vpop.f32.mrf.mxu2 }
 0xdb4   :  { %v1950_v51 = vmul.f32 0.17677669, %v1946_v6 }
 0xdb6   :  { %v10828_v53 = vsel %vm10183_vm9, %v1950_v51, -1e+30 }
 0xdb7   :  { %v1956_v48 = vsel %vm268_vm10, %v10828_v53, -inf }
 0xdb8   :  { %1957 = vmax.xlane.f32.xlu0 %v1956_v48 }
 0xdbb   :  { %v2080_v7 = vpop.f32.mrf.mxu2 }
 0xdbc   :  { %v2084_v11 = vmul.f32 0.17677669, %v2080_v7 }
 0xdbe   :  { %v10838_v58 = vsel %vm10183_vm9, %v2084_v11, -1e+30 }
 0xdbf   :  { %v2090_v21 = vsel %vm268_vm10, %v10838_v58, -inf  ;;  %v2588_v26 = vpop.f32.mrf.mxu1 }
 0xdc0   :  { %2091 = vmax.xlane.f32.xlu2 %v2090_v21  ;;  %2356 = vmax.xlane.f32.xlu0 %v2355_v23  ;;  %v2619_v24 = vmul.f32 0.17677669, %v2588_v26 }
 0xdc2   :  { %v10858_v38 = vsel %vm10183_vm9, %v2619_v24, -1e+30 }
 0xdc3   :  { %v2214_v60 = vpop.f32.mrf.mxu2  ;;  %v2623_v39 = vsel %vm268_vm10, %v10858_v38, -inf }
 0xdc4   :  { %v2218_v25 = vmul.f32 0.17677669, %v2214_v60 }
 0xdc6   :  { %v10850_v29 = vsel %vm10183_vm9, %v2218_v25, -1e+30 }
 0xdc7   :  { %v2224_v18 = vsel %vm268_vm10, %v10850_v29, -inf }
 0xdc8   :  { %2490 = vmax.xlane.f32.xlu2 %v2489_v17  ;;  %2225 = vmax.xlane.f32.xlu1 %v2224_v18 }
 0xdcb   :  { %v2348_v34 = vpop.f32.mrf.mxu2 }
 0xdcc   :  { %v2352_v20 = vmul.f32 0.17677669, %v2348_v34 }
 0xdce   :  { %v10862_v59 = vsel %vm10183_vm9, %v2352_v20, -1e+30 }
 0xdcf   :  { %v2358_v10 = vsel %vm268_vm10, %v10862_v59, -inf }
 0xdd0   :  { %2624 = vmax.xlane.f32.xlu1 %v2623_v39  ;;  %2359 = vmax.xlane.f32.xlu0 %v2358_v10 }
 0xdd3   :  { %v2482_v3 = vpop.f32.mrf.mxu2 }
 0xdd4   :  { %v2486_v4 = vmul.f32 0.17677669, %v2482_v3 }
 0xdd6   :  { %v10870_v13 = vsel %vm10183_vm9, %v2486_v4, -1e+30 }
 0xdd7   :  { %v2492_v1 = vsel %vm268_vm10, %v10870_v13, -inf }
 0xdd8   :  { %2493 = vmax.xlane.f32.xlu0 %v2492_v1 }
 0xddb   :  { %v2616_v27 = vpop.f32.mrf.mxu2 }
 0xddc   :  { %v2620_v8 = vmul.f32 0.17677669, %v2616_v27 }
 0xdde   :  { %v10876_v45 = vsel %vm10183_vm9, %v2620_v8, -1e+30 }
 0xddf   :  { %v2626_v46 = vsel %vm268_vm10, %v10876_v45, -inf }
 0xde0   :  { %2627 = vmax.xlane.f32.xlu0 %v2626_v46 }
 0xdfa   :  { %v1824_v47 = vpop.xlane.xlu0 %1823 }
 0xdfb   :  { %v1826_v49 = vsub.f32 %v10800_v50, %v1824_v47 }
 0xdfd   :  { %v1829_v54 = vmul.f32 1.442695, %v1826_v49 }
 0xdff   :  { %9585 = vpow2.f32 %v1829_v54 }
 0xe02   :  { %v1955_v37 = vpop.xlane.xlu1 %1954 }
 0xe03   :  { %v1959_v55 = vsub.f32 %v10806_v56, %v1955_v37 }
 0xe05   :  { %v10886_v44 = vpop.eup %9585  ;;  %v1961_v43 = vmul.f32 1.442695, %v1959_v55 }
 0xe06   :  { %v1834_v31 = vsel %vm268_vm10, %v10886_v44, 0.0 }
 0xe07   :  { %9587 = vpow2.f32 %v1961_v43  ;;  %1835 = vadd.xlane.f32.xlu2 %v1834_v31 }
 0xe0a   :  { %v2089_v57 = vpop.xlane.xlu2 %2088 }
 0xe0b   :  { %v2093_v19 = vsub.f32 %v10812_v40, %v2089_v57 }
 0xe0d   :  { %v10891_v41 = vpop.eup %9587  ;;  %v2095_v62 = vmul.f32 1.442695, %v2093_v19 }
 0xe0e   :  { %v1965_v50 = vsel %vm268_vm10, %v10891_v41, 0.0 }
 0xe0f   :  { %9589 = vpow2.f32 %v2095_v62  ;;  %1966 = vadd.xlane.f32.xlu1 %v1965_v50 }
 0xe12   :  { %v2223_v6 = vpop.xlane.xlu1 %2222 }
 0xe13   :  { %v2227_v40 = vsub.f32 %v10818_v61, %v2223_v6 }
 0xe15   :  { %v10895_v56 = vpop.eup %9589  ;;  %v2229_v7 = vmul.f32 1.442695, %v2227_v40 }
 0xe16   :  { %v2099_v5 = vsel %vm268_vm10, %v10895_v56, 0.0 }
 0xe17   :  { %2100 = vadd.xlane.f32.xlu1 %v2099_v5 }
 0xe2b   :  { %v1958_v51 = vpop.xlane.xlu0 %1957 }
 0xe2c   :  { %v1960_v48 = vsub.f32 %v10828_v53, %v1958_v51 }
 0xe2e   :  { %v1963_v52 = vmul.f32 1.442695, %v1960_v48 }
 0xe30   :  { %9591 = vpow2.f32 %v1963_v52 }
 0xe31   :  { %9593 = vpow2.f32 %v2229_v7 }
 0xe33   :  { %v2092_v11 = vpop.xlane.xlu2 %2091  ;;  %v2357_v15 = vpop.xlane.xlu0 %2356 }
 0xe34   :  { %v2361_v21 = vsub.f32 %v10834_v12, %v2357_v15  ;;  %v2094_v63 = vsub.f32 %v10838_v58, %v2092_v11  ;;  %v9332_v11 = vunpack.i.l.bf16 %v10880_v35 }
 0xe36   :  { %v10902_v23 = vpop.eup %9591  ;;  %v2363_v60 = vmul.f32 1.442695, %v2361_v21  ;;  %v2097_v53 = vmul.f32 1.442695, %v2094_v63  ;;  %v9337_v63 = vunpack.i.l.bf16 %v10882_v36 }
 0xe37   :  { %v1968_v25 = vsel %vm268_vm10, %v10902_v23, 0.0  ;;  %v10907_v17 = vpop.eup %9593 }
 0xe38   :  { %1969 = vadd.xlane.f32.xlu1 %v1968_v25  ;;  %9595 = vpow2.f32 %v2363_v60  ;;  %v2233_v58 = vsel %vm268_vm10, %v10907_v17, 0.0 }
 0xe39   :  { %9597 = vpow2.f32 %v2097_v53 }
 0xe3b   :  { %v2491_v61 = vpop.xlane.xlu2 %2490  ;;  %v2226_v26 = vpop.xlane.xlu1 %2225 }
 0xe3c   :  { %v2495_v18 = vsub.f32 %v10846_v9, %v2491_v61  ;;  %v2228_v24 = vsub.f32 %v10850_v29, %v2226_v26  ;;  %v9333_v61 = vunpack.i.h.bf16 %v10880_v35 }
 0xe3e   :  { %v2497_v12 = vmul.f32 1.442695, %v2495_v18  ;;  %v10911_v34 = vpop.eup %9595  ;;  %v2231_v39 = vmul.f32 1.442695, %v2228_v24 }
 0xe3f   :  { %v2367_v20 = vsel %vm268_vm10, %v10911_v34, 0.0  ;;  %v10917_v4 = vpop.eup %9597 }
 0xe40   :  { %9599 = vpow2.f32 %v2497_v12  ;;  %2234 = vadd.xlane.f32.xlu1 %v2233_v58  ;;  %2368 = vadd.xlane.f32.xlu2 %v2367_v20  ;;  %v2102_v46 = vsel %vm268_vm10, %v10917_v4, 0.0 }
 0xe41   :  { %9601 = vpow2.f32 %v2231_v39  ;;  %v9338_v39 = vunpack.i.h.bf16 %v10882_v36 }
 0xe43   :  { %v2625_v10 = vpop.xlane.xlu1 %2624  ;;  %v2360_v3 = vpop.xlane.xlu0 %2359 }
 0xe44   :  { %v2629_v9 = vsub.f32 %v10858_v38, %v2625_v10  ;;  %v2362_v27 = vsub.f32 %v10862_v59, %v2360_v3 }
 0xe46   :  { %v10920_v1 = vpop.eup %9599  ;;  %v2631_v29 = vmul.f32 1.442695, %v2629_v9  ;;  %v2365_v47 = vmul.f32 1.442695, %v2362_v27 }
 0xe47   :  { %v2501_v8 = vsel %vm268_vm10, %v10920_v1, 0.0  ;;  %v10927_v49 = vpop.eup %9601 }
 0xe48   :  { %9603 = vpow2.f32 %v2631_v29  ;;  %2502 = vadd.xlane.f32.xlu0 %v2501_v8  ;;  %2103 = vadd.xlane.f32.xlu1 %v2102_v46  ;;  %v2236_v38 = vsel %vm268_vm10, %v10927_v49, 0.0 }
 0xe49   :  { %9605 = vpow2.f32 %v2365_v47 }
 0xe4b   :  { %v2494_v43 = vpop.xlane.xlu0 %2493 }
 0xe4c   :  { %v2496_v31 = vsub.f32 %v10870_v13, %v2494_v43 }
 0xe4e   :  { %v10929_v54 = vpop.eup %9603  ;;  %v2499_v57 = vmul.f32 1.442695, %v2496_v31 }
 0xe4f   :  { %v2635_v59 = vsel %vm268_vm10, %v10929_v54, 0.0  ;;  %v10935_v37 = vpop.eup %9605 }
 0xe50   :  { %2237 = vadd.xlane.f32.xlu1 %v2236_v38  ;;  %2636 = vadd.xlane.f32.xlu2 %v2635_v59  ;;  %v2370_v55 = vsel %vm268_vm10, %v10935_v37, 0.0 }
 0xe53   :  { %v2628_v62 = vpop.xlane.xlu0 %2627 }
 0xe54   :  { %v2630_v50 = vsub.f32 %v10876_v45, %v2628_v62 }
 0xe56   :  { %v2633_v40 = vmul.f32 1.442695, %v2630_v50 }
 0xe58   :  { %2371 = vadd.xlane.f32.xlu1 %v2370_v55 }
 0xe5c   :  { %2645 = vrot.lane.b32.xlu0 %v10662_v30, %s13395_s26 }
 0xe68   :  { %2511 = vrot.lane.b32.xlu2 %v10662_v30, %s13396_s18  ;;  %v9327_v30 = vunpack.i.l.bf16 %v10783_v42 }
 0xe71   :  { %2671 = vrot.lane.b32.xlu1 %v10668_v32, %s13395_s26  ;;  %s13402_s26 = smov 24  }
 0xe7a   :  { %v1836_v19 = vpop.xlane.xlu2 %1835 }
 0xe7b   :  { %9607 = vrcp.f32 %v1836_v19 }
 0xe7c   :  { %9609 = vpow2.f32 %v2499_v57 }
 0xe81   :  { %v9608_v5 = vpop.eup %9607 }
 0xe82   :  { %v10947_v6 = vpop.eup %9609  ;;  %v1840_v51 = vmul.f32 %v9608_v5, %v10886_v44  ;;  %v1967_v48 = vpop.xlane.xlu1 %1966 }
 0xe83   :  { %9611 = vrcp.f32 %v1967_v48  ;;  %v2504_v13 = vsel %vm268_vm10, %v10947_v6, 0.0 }
 0xe84   :  { %8818 = vmatmul.msk.f32.vlgmr.msra.gmra.mxu3 %vm268_vm10, %v1840_v51  ;;  %9613 = vpow2.f32 %v2633_v40 }
 0xe85   :  { %2130 = vmatpush.msra.mxu3 %v9327_v30 }
 0xe86   :  { %2505 = vadd.xlane.f32.xlu0 %v2504_v13 }
 0xe89   :  { %v9612_v52 = vpop.eup %9611 }
 0xe8a   :  { %v1973_v45 = vmul.f32 %v9612_v52, %v10891_v41  ;;  %v2101_v7 = vpop.xlane.xlu1 %2100  ;;  %v10957_v42 = vpop.eup %9613 }
 0xe8b   :  { %9615 = vrcp.f32 %v2101_v7  ;;  %v2638_v44 = vsel %vm268_vm10, %v10957_v42, 0.0  ;;  %v8858_v7 = vld [vmem:[%s13239_s7 + $0x38] sm:$0xff] }
 0xe8c   :  { %8823 = vmatmul.msk.f32.vlgmr.msrb.gmra.mxu3 %vm268_vm10, %v1973_v45  ;;  %2795 = vmatpush.msrb.mxu1 %v8858_v7  ;;  %v9460_v7 = vld [vmem:[%s13241_s9 + $0x1] ss:$0 sm:$0xff] }
 0xe8d   :  { %2264 = vmatpush.msrb.mxu3 %v9332_v11  ;;  %v8857_v11 = vld [vmem:[%s13239_s7 + $0x30] sm:$0xff] }
 0xe8e   :  { %2796 = vmatpush.msrb.mxu1 %v8857_v11 }
 0xe91   :  { %v9616_v15 = vpop.eup %9615  ;;  %2639 = vadd.xlane.f32.xlu2 %v2638_v44 }
 0xe92   :  { %v2107_v21 = vmul.f32 %v9616_v15, %v10895_v56  ;;  %v8855_v15 = vld [vmem:[%s13239_s7 + $0x20] sm:$0xff] }
 0xe94   :  { %8829 = vmatmul.msk.f32.vlgmr.msra.gmra.mxu3 %vm268_vm10, %v2107_v21 }
 0xe95   :  { %2398 = vmatpush.msra.mxu3 %v9337_v63 }
 0xe9a   :  { %2537 = vrot.lane.b32.xlu0 %v10668_v32, %s13396_s18  ;;  %s13401_s18 = smov 20  }
 0xea2   :  { %2699 = vrot.lane.b32.xlu0 %v10824_v0, %s13397_s16 }
 0xeab   :  { %v1970_v41 = vpop.xlane.xlu1 %1969 }
 0xeac   :  { %9617 = vrcp.f32 %v1970_v41 }
 0xeb2   :  { %v9618_v60 = vpop.eup %9617 }
 0xeb3   :  { %v1974_v25 = vmul.f32 %v9618_v60, %v10902_v23  ;;  %v2235_v53 = vpop.xlane.xlu1 %2234  ;;  %v2369_v56 = vpop.xlane.xlu2 %2368 }
 0xeb4   :  { %9619 = vrcp.f32 %v2235_v53 }
 0xeb5   :  { %8824 = vmatmul.msk.f32.vlgmr.msrb.gmra.mxu0 %vm268_vm10, %v1974_v25  ;;  %9621 = vrcp.f32 %v2369_v56 }
 0xeb6   :  { %2290 = vmatpush.msrb.mxu0 %v9333_v61 }
 0xeba   :  { %v9620_v26 = vpop.eup %9619 }
 0xebb   :  { %v2241_v32 = vmul.f32 %v9620_v26, %v10907_v17  ;;  %v2104_v18 = vpop.xlane.xlu1 %2103  ;;  %v2503_v0 = vpop.xlane.xlu0 %2502 }
 0xebc   :  { %9623 = vrcp.f32 %v2104_v18  ;;  %v9622_v12 = vpop.eup %9621 }
 0xebd   :  { %8835 = vmatmul.msk.f32.vlgmr.msrb.gmra.mxu3 %vm268_vm10, %v2241_v32  ;;  %9625 = vrcp.f32 %v2503_v0  ;;  %v2375_v23 = vmul.f32 %v9622_v12, %v10911_v34 }
 0xec2   :  { %v9624_v24 = vpop.eup %9623 }
 0xec3   :  { %v2108_v35 = vmul.f32 %v9624_v24, %v10917_v4  ;;  %v2238_v58 = vpop.xlane.xlu1 %2237  ;;  %v2637_v20 = vpop.xlane.xlu2 %2636 }
 0xec4   :  { %9627 = vrcp.f32 %v2238_v58  ;;  %v9626_v17 = vpop.eup %9625 }
 0xec5   :  { %8830 = vmatmul.msk.f32.vlgmr.msra.gmra.mxu0 %vm268_vm10, %v2108_v35  ;;  %8841 = vmatmul.msk.f32.vlgmr.msra.gmra.mxu3 %vm268_vm10, %v2375_v23  ;;  %9629 = vrcp.f32 %v2637_v20  ;;  %v2509_v3 = vmul.f32 %v9626_v17, %v10920_v1 }
 0xec6   :  { %2424 = vmatpush.msra.mxu0 %v9338_v39 }
 0xeca   :  { %v9628_v10 = vpop.eup %9627 }
 0xecb   :  { %v2242_v9 = vmul.f32 %v9628_v10, %v10927_v49  ;;  %v2512_v34 = vpop.permute.xlu2 %2511  ;;  %v2372_v29 = vpop.xlane.xlu1 %2371 }
 0xecc   :  { %9631 = vrcp.f32 %v2372_v29  ;;  %2532 = vmatpush.msrb.mxu3 %v2512_v34  ;;  %v9630_v4 = vpop.eup %9629 }
 0xecd   :  { %8836 = vmatmul.msk.f32.vlgmr.msrb.gmra.mxu0 %vm268_vm10, %v2242_v9  ;;  %8847 = vmatmul.msk.f32.vlgmr.msrb.gmra.mxu3 %vm268_vm10, %v2509_v3  ;;  %v2643_v8 = vmul.f32 %v9630_v4, %v10929_v54 }
 0xece   :  { %v2646_v36 = vpop.permute.xlu0 %2645 }
 0xecf   :  { %2666 = vmatpush.msra.mxu3 %v2646_v36 }
 0xed2   :  { %v9632_v27 = vpop.eup %9631 }
 0xed3   :  { %v2376_v46 = vmul.f32 %v9632_v27, %v10935_v37 }
 0xed5   :  { %8842 = vmatmul.msk.f32.vlgmr.msra.gmra.mxu0 %vm268_vm10, %v2376_v46  ;;  %8853 = vmatmul.msk.f32.vlgmr.msra.gmra.mxu3 %vm268_vm10, %v2643_v8 }
 0xee3   :  { %v2672_v43 = vpop.permute.xlu1 %2671 }
 0xef9   :  { %v2506_v1 = vpop.xlane.xlu0 %2505 }
 0xefa   :  { %9633 = vrcp.f32 %v2506_v1 }
 0xf00   :  { %v9634_v38 = vpop.eup %9633 }
 0xf01   :  { %v2510_v59 = vmul.f32 %v9634_v38, %v10947_v6 }
 0xf04   :  { %v2640_v49 = vpop.xlane.xlu2 %2639 }
 0xf05   :  { %9635 = vrcp.f32 %v2640_v49 }
 0xf07   :  { %v1890_v47 = vpop.f32.mrf.mxu3 }
 0xf08   :  { %2701 = vrot.lane.b32.xlu0 %v1890_v47, %s13397_s16  ;;  %s13400_s16 = smov 16  }
 0xf0b   :  { %v9636_v37 = vpop.eup %9635 }
 0xf0c   :  { %v2538_v55 = vpop.permute.xlu0 %2537  ;;  %v2644_v31 = vmul.f32 %v9636_v37, %v10957_v42  ;;  %v8856_v42 = vld [vmem:[%s13239_s7 + $0x28] sm:$0xff] }
 0xf0d   :  { %2558 = vmatpush.msrb.mxu0 %v2538_v55  ;;  %2797 = vmatpush.msrb.mxu1 %v8856_v42 }
 0xf0e   :  { %8848 = vmatmul.msk.f32.vlgmr.msrb.gmra.mxu0 %vm268_vm10, %v2510_v59 }
 0xf0f   :  { %2692 = vmatpush.msra.mxu0 %v2672_v43  ;;  %v1998_v54 = vpop.f32.mrf.mxu3  ;;  %2798 = vmatpush.msrb.mxu1 %v8855_v15 }
 0xf10   :  { %2707 = vrot.lane.b32.xlu0 %v1998_v54, %s13398_s15 }
 0xf14   :  { %v2700_v52 = vpop.permute.xlu0 %2699 }
 0xf15   :  { %v2753_v53 = vsel %vm210_vm8, %v10796_v33, %v2700_v52 }
 0xf16   :  { %8854 = vmatmul.msk.f32.vlgmr.msra.gmra.mxu0 %vm268_vm10, %v2644_v31 }
 0xf17   :  { %v2132_v57 = vpop.f32.mrf.mxu3 }
 0xf18   :  { %2715 = vrot.lane.b32.xlu0 %v2132_v57, %s13399_s17  ;;  %v8867_v57 = vld [vmem:[%s13243_s11 + $0x38] sm:$0xff] }
 0xf19   :  { %2894 = vmatpush.msrb.mxu2 %v8867_v57 }
 0xf32   :  { %v2024_v19 = vpop.f32.mrf.mxu0 }
 0xf33   :  { %2709 = vrot.lane.b32.xlu1 %v2024_v19, %s13398_s15  ;;  %s13403_s15 = smov 28   ;;  %v8866_v19 = vld [vmem:[%s13243_s11 + $0x30] sm:$0xff] }
 0xf34   :  { %2895 = vmatpush.msrb.mxu2 %v8866_v19 }
 0xf40   :  { %v2266_v62 = vpop.f32.mrf.mxu3 }
 0xf41   :  { %2723 = vrot.lane.b32.xlu1 %v2266_v62, %s13400_s16  ;;  %v8865_v62 = vld [vmem:[%s13243_s11 + $0x28] sm:$0xff] }
 0xf42   :  { %v2158_v50 = vpop.f32.mrf.mxu0  ;;  %2896 = vmatpush.msrb.mxu2 %v8865_v62 }
 0xf43   :  { %2717 = vrot.lane.b32.xlu0 %v2158_v50, %s13399_s17  ;;  %v8864_v50 = vld [vmem:[%s13243_s11 + $0x20] sm:$0xff]  ;;  %s13408_s17 = smov 64  }
 0xf44   :  { %2897 = vmatpush.msrb.mxu2 %v8864_v50 }
 0xf48   :  { %v2400_v5 = vpop.f32.mrf.mxu3 }
 0xf4a   :  { %v2292_v6 = vpop.f32.mrf.mxu0 }
 0xf4b   :  { %2725 = vrot.lane.b32.xlu1 %v2292_v6, %s13400_s16  ;;  %2731 = vrot.lane.b32.xlu0 %v2400_v5, %s13401_s18  ;;  %s13407_s16 = smov 60  }
 0xf50   :  { %v2534_v51 = vpop.f32.mrf.mxu3 }
 0xf51   :  { %2739 = vrot.lane.b32.xlu2 %v2534_v51, %s13402_s26 }
 0xf52   :  { %v2426_v48 = vpop.f32.mrf.mxu0 }
 0xf53   :  { %2733 = vrot.lane.b32.xlu0 %v2426_v48, %s13401_s18  ;;  %s13409_s18 = smov 124  }
 0xf58   :  { %v2668_v30 = vpop.f32.mrf.mxu3 }
 0xf59   :  { %2747 = vrot.lane.b32.xlu1 %v2668_v30, %s13403_s15 }
 0xf7a   :  { %v2702_v45 = vpop.permute.xlu0 %2701 }
 0xf7b   :  { %v2754_v33 = vsel %vm210_vm8, %v10822_v2, %v2702_v45  ;;  %v9459_v2 = vld [vmem:[%s13240_s8 + $0x1] ss:$0 sm:$0xff] }
 0xf82   :  { %v2708_v44 = vpop.permute.xlu0 %2707 }
 0xf83   :  { %v2755_v61 = vsel %vm268_vm10, %v2753_v53, %v2708_v44  ;;  %v9461_v44 = vld [vmem:[%s13242_s10 + $0x1] ss:$0 sm:$0xff] }
 0xf8a   :  { %v2716_v21 = vpop.permute.xlu0 %2715 }
 0xf8b   :  { %v2560_v40 = vpop.f32.mrf.mxu0  ;;  %v2757_v26 = vsel %vm1341_vm11, %v2755_v61, %v2716_v21  ;;  %v8883_v61 = vld [vmem:[%s13245_s13 + $0xe0] sm:$0xff] }
 0xf8c   :  { %2741 = vrot.lane.b32.xlu2 %v2560_v40, %s13402_s26  ;;  %s13405_s26 = smov 96  }
 0xf93   :  { %v2694_v13 = vpop.f32.mrf.mxu0 }
 0xf94   :  { %2749 = vrot.lane.b32.xlu1 %v2694_v13, %s13403_s15  ;;  %s13406_s15 = smov 88  }
 0xfa5   :  { %v2710_v63 = vpop.permute.xlu1 %2709 }
 0xfa6   :  { %v2756_v35 = vsel %vm268_vm10, %v2754_v33, %v2710_v63  ;;  %v8886_v63 = vld [vmem:[%s13245_s13 + $0xf8] sm:$0xff]  ;;  %v8877_v33 = vld [vmem:[%s13245_s13 + $0xb0] sm:$0xff] }
 0xfa7   :  { %2929 = vmatpush.msrb.mxu3 %v8886_v63 }
 0xfab   :  { %v2740_v0 = vpop.permute.xlu2 %2739 }
 0xfb3   :  { %v2724_v41 = vpop.permute.xlu1 %2723 }
 0xfb4   :  { %v2759_v32 = vsel %vm1344_vm12, %v2757_v26, %v2724_v41  ;;  %v8885_v41 = vld [vmem:[%s13245_s13 + $0xf0] sm:$0xff]  ;;  %v8882_v26 = vld [vmem:[%s13245_s13 + $0xd8] sm:$0xff] }
 0xfb5   :  { %v2718_v60 = vpop.permute.xlu0 %2717  ;;  %2930 = vmatpush.msrb.mxu3 %v8885_v41 }
 0xfb6   :  { %v2758_v20 = vsel %vm1341_vm11, %v2756_v35, %v2718_v60  ;;  %v8884_v60 = vld [vmem:[%s13245_s13 + $0xe8] sm:$0xff] }
 0xfb7   :  { %2931 = vmatpush.msrb.mxu3 %v8884_v60 }
 0xfb9   :  { %2932 = vmatpush.msrb.mxu3 %v8883_v61 }
 0xfbb   :  { %2933 = vmatpush.msrb.mxu3 %v8882_v26 }
 0xfbd   :  { %v2726_v25 = vpop.permute.xlu1 %2725  ;;  %v2732_v56 = vpop.permute.xlu0 %2731 }
 0xfbe   :  { %v2761_v18 = vsel %vm1347_vm13, %v2759_v32, %v2732_v56  ;;  %v2760_v17 = vsel %vm1344_vm12, %v2758_v20, %v2726_v25  ;;  %v8881_v32 = vld [vmem:[%s13245_s13 + $0xd0] sm:$0xff] }
 0xfbf   :  { %v2763_v24 = vsel %vm1350_vm14, %v2761_v18, %v2740_v0  ;;  %v8880_v18 = vld [vmem:[%s13245_s13 + $0xc8] sm:$0xff]  ;;  %2934 = vmatpush.msrb.mxu3 %v8881_v32  ;;  %v8879_v0 = vld [vmem:[%s13245_s13 + $0xc0] sm:$0xff] }
 0xfc1   :  { %2935 = vmatpush.msrb.mxu3 %v8880_v18  ;;  %v9465_v18 = vld [vmem:[%s13237_s5 + $0x2] ss:$0 sm:$0xff] }
 0xfc3   :  { %2936 = vmatpush.msrb.mxu3 %v8879_v0 }
 0xfc5   :  { %v2734_v58 = vpop.permute.xlu0 %2733 }
 0xfc6   :  { %v2762_v10 = vsel %vm1347_vm13, %v2760_v17, %v2734_v58  ;;  %v8876_v58 = vld [vmem:[%s13245_s13 + $0xa8] sm:$0xff] }
 0xfcb   :  { %v2748_v12 = vpop.permute.xlu1 %2747 }
 0xfcc   :  { %v2765_v23 = vsel %vm1353_vm15, %v2763_v24, %v2748_v12  ;;  %v8878_v24 = vld [vmem:[%s13245_s13 + $0xb8] sm:$0xff] }
 0xfcd   :  { %8860 = vmatmul.msk.f32.vlgmr.msrb.gmra.mxu1 %vm73_vm0, %v2765_v23  ;;  %2937 = vmatpush.msrb.mxu3 %v8878_v24 }
 0xfcf   :  { %2938 = vmatpush.msrb.mxu3 %v8877_v33 }
 0xfd1   :  { %2939 = vmatpush.msrb.mxu3 %v8876_v58 }
 0xfe6   :  { %v2742_v39 = vpop.permute.xlu2 %2741 }
 0xfe7   :  { %v2764_v3 = vsel %vm1350_vm14, %v2762_v10, %v2742_v39  ;;  %v8875_v39 = vld [vmem:[%s13245_s13 + $0xa0] sm:$0xff]  ;;  %v8874_v10 = vld [vmem:[%s13245_s13 + $0x98] sm:$0xff] }
 0xfe8   :  { %2940 = vmatpush.msrb.mxu3 %v8875_v39 }
 0xfea   :  { %2941 = vmatpush.msrb.mxu3 %v8874_v10 }
0x1006   :  { %v2750_v9 = vpop.permute.xlu1 %2749 }
0x1007   :  { %v2766_v34 = vsel %vm1353_vm15, %v2764_v3, %v2750_v9 }
0x1008   :  { %8861 = vmatmul.msk.f32.gmra.mxu1 %vm73_vm0, %v2766_v34 }
0x104a   :  { %v2800_v29 = vpop.f32.mrf.mxu1 }
0x104b   :  { %v2801_v36 = vadd.f32 %v9459_v2, %v2800_v29 }
0x104d   :  { %v11037_v4 = vadd.f32 %v2801_v36, %v10625_v14  ;;  %v8873_v36 = vld [vmem:[%s13245_s13 + $0x90] sm:$0xff] }
0x104e   :  { %2942 = vmatpush.msrb.mxu3 %v8873_v36 }
0x104f   :  { %v2812_v27 = vsel %vm73_vm0, %v11037_v4, 0.0 }
0x1050   :  { %2813 = vadd.xlane.f32.xlu0 %v2812_v27  ;;  %v8872_v27 = vld [vmem:[%s13245_s13 + $0x88] sm:$0xff] }
0x1051   :  { %2943 = vmatpush.msrb.mxu3 %v8872_v27 }
0x1085   :  { %v2803_v8 = vpop.f32.mrf.mxu1 }
0x1086   :  { %v2804_v46 = vadd.f32 %v9459_v2, %v2803_v8  ;;  %v8871_v8 = vld [vmem:[%s13245_s13 + $0x80] sm:$0xff] }
0x1087   :  { %2944 = vmatpush.msrb.mxu3 %v8871_v8 }
0x1088   :  { %v11042_v1 = vadd.f32 %v2804_v46, %v10630_v28  ;;  %v9462_v46 = vld [vmem:[%s13244_s12 + $0x1] ss:$0 sm:$0xff] }
0x108a   :  { %v2815_v47 = vsel %vm73_vm0, %v11042_v1, 0.0 }
0x108b   :  { %2816 = vadd.xlane.f32.xlu2 %v2815_v47 }
0x10c3   :  { %v2814_v49 = vpop.xlane.xlu0 %2813 }
0x10c4   :  { %v2818_v38 = vmul.f32 %v2814_v49, %v10126_v22 }
0x10c6   :  { %v2820_v59 = vsub.f32 %v11037_v4, %v2818_v38 }
0x10c8   :  { %v2822_v14 = vmul.f32 %v2820_v59, %v2820_v59 }
0x10ca   :  { %v2824_v55 = vsel %vm73_vm0, %v2822_v14, 0.0 }
0x10cb   :  { %2825 = vadd.xlane.f32.xlu1 %v2824_v55 }
0x10fe   :  { %v2817_v43 = vpop.xlane.xlu2 %2816 }
0x10ff   :  { %v2819_v54 = vmul.f32 %v2817_v43, %v10126_v22  ;;  %v9463_v43 = vld [vmem:[%s13246_s14 + $0x1] ss:$0 sm:$0xff] }
0x1101   :  { %v11051_v37 = vsub.f32 %v11042_v1, %v2819_v54 }
0x1103   :  { %v2823_v28 = vmul.f32 %v11051_v37, %v11051_v37 }
0x1105   :  { %v2827_v31 = vsel %vm73_vm0, %v2823_v28, 0.0 }
0x1106   :  { %2828 = vadd.xlane.f32.xlu0 %v2827_v31 }
0x113e   :  { %v2826_v5 = vpop.xlane.xlu1 %2825 }
0x113f   :  { %v2830_v6 = vmul.f32 %v2826_v5, %v10126_v22 }
0x1141   :  { %v2832_v51 = vadd.f32 1e-05, %v2830_v6 }
0x1143   :  { %9637 = vrsqrt.f32 %v2832_v51  ;;  %vm2840_vm7 = vweird.f32 %v2832_v51 }
0x1149   :  { %v9638_v48 = vpop.eup %9637 }
0x114a   :  { %v2835_v30 = vmul.f32 %v9638_v48, %v2832_v51  ;;  %vm2841_vm6 = vweird.f32 %v9638_v48 }
0x114b   :  { %vm2842_vm1 = vmor %vm2840_vm7, %vm2841_vm6 }
0x114c   :  { %v2836_v40 = vmul.f32 %v9638_v48, %v2835_v30 }
0x114e   :  { %v2837_v13 = vmul.f32 0.5, %v2836_v40 }
0x1150   :  { %v2838_v52 = vsub.f32 1.5, %v2837_v13 }
0x1152   :  { %v2839_v45 = vmul.f32 %v9638_v48, %v2838_v52 }
0x1154   :  { %v2843_v11 = vsel %vm2842_vm1, %v9638_v48, %v2839_v45  ;;  %v8893_v45 = vld [vmem:[%s13238_s6 + $0x58] sm:$0xff] }
0x1155   :  { %v2854_v42 = vmul.f32 %v2843_v11, %v2820_v59  ;;  %3035 = vmatpush.msrb.mxu0 %v8893_v45  ;;  %v8891_v11 = vld [vmem:[%s13238_s6 + $0x48] sm:$0xff] }
0x1157   :  { %v2859_v15 = vmul.f32 %v9460_v7, %v2854_v42  ;;  %v8890_v42 = vld [vmem:[%s13238_s6 + $0x40] sm:$0xff] }
0x1159   :  { %v2864_v21 = vadd.f32 %v9461_v44, %v2859_v15 }
0x115b   :  { %8869 = vmatmul.msk.f32.vlgmr.msrb.gmra.mxu2 %vm73_vm0, %v2864_v21 }
0x1179   :  { %v2829_v25 = vpop.xlane.xlu0 %2828 }
0x117a   :  { %v2831_v53 = vmul.f32 %v2829_v25, %v10126_v22 }
0x117c   :  { %v2833_v56 = vadd.f32 1e-05, %v2831_v53 }
0x117e   :  { %9639 = vrsqrt.f32 %v2833_v56  ;;  %vm2850_vm3 = vweird.f32 %v2833_v56 }
0x1184   :  { %v9640_v12 = vpop.eup %9639 }
0x1185   :  { %v2845_v23 = vmul.f32 %v9640_v12, %v2833_v56  ;;  %vm2851_vm2 = vweird.f32 %v9640_v12  ;;  %v9464_v56 = vld [vmem:[%s13236_s4 + $0x2] ss:$0 sm:$0xff] }
0x1186   :  { %vm2852_vm4 = vmor %vm2850_vm3, %vm2851_vm2 }
0x1187   :  { %v2846_v35 = vmul.f32 %v9640_v12, %v2845_v23 }
0x1189   :  { %v2847_v20 = vmul.f32 0.5, %v2846_v35 }
0x118b   :  { %v2848_v17 = vsub.f32 1.5, %v2847_v20 }
0x118d   :  { %v2849_v3 = vmul.f32 %v9640_v12, %v2848_v17 }
0x118f   :  { %v2853_v9 = vsel %vm2852_vm4, %v9640_v12, %v2849_v3 }
0x1190   :  { %v2855_v34 = vmul.f32 %v2853_v9, %v11051_v37 }
0x1192   :  { %v2860_v2 = vmul.f32 %v9460_v7, %v2855_v34  ;;  %v8892_v7 = vld [vmem:[%s13238_s6 + $0x50] sm:$0xff] }
0x1193   :  { %3036 = vmatpush.msrb.mxu0 %v8892_v7 }
0x1194   :  { %v2865_v29 = vadd.f32 %v9461_v44, %v2860_v2 }
0x1195   :  { %3037 = vmatpush.msrb.mxu0 %v8891_v11 }
0x1196   :  { %8870 = vmatmul.msk.f32.gmra.mxu2 %vm73_vm0, %v2865_v29 }
0x1197   :  { %3038 = vmatpush.msrb.mxu0 %v8890_v42 }
0x11de   :  { %v2899_v47 = vpop.f32.mrf.mxu2 }
0x11df   :  { %v2900_v49 = vadd.f32 %v9462_v46, %v2899_v47 }
0x11e1   :  { %v2905_v38 = vmax.f32 %v2900_v49, 0.0 }
0x11e3   :  { %2945 = vmatmul.f32.vlgmr.msrb.gmra.mxu3 %v2905_v38 }
0x1219   :  { %v2902_v59 = vpop.f32.mrf.mxu2 }
0x121a   :  { %v2903_v14 = vadd.f32 %v9462_v46, %v2902_v59 }
0x121c   :  { %v2906_v55 = vmax.f32 %v2903_v14, 0.0 }
0x121e   :  { %2948 = vmatmul.f32.gmra.mxu3 %v2906_v55 }
0x1266   :  { %v2946_v54 = vpop.f32.mrf.mxu3 }
0x1267   :  { %v2947_v37 = vadd.f32 %v9463_v43, %v2946_v54 }
0x1269   :  { %v11134_v28 = vadd.f32 %v2947_v37, %v11037_v4 }
0x126b   :  { %v2958_v31 = vsel %vm73_vm0, %v11134_v28, 0.0 }
0x126c   :  { %2959 = vadd.xlane.f32.xlu2 %v2958_v31 }
0x12a1   :  { %v2949_v57 = vpop.f32.mrf.mxu3 }
0x12a2   :  { %v2950_v19 = vadd.f32 %v9463_v43, %v2949_v57 }
0x12a4   :  { %v11139_v62 = vadd.f32 %v2950_v19, %v11042_v1 }
0x12a6   :  { %v2961_v50 = vsel %vm73_vm0, %v11139_v62, 0.0 }
0x12a7   :  { %2962 = vadd.xlane.f32.xlu1 %v2961_v50 }
0x12df   :  { %v2960_v5 = vpop.xlane.xlu2 %2959 }
0x12e0   :  { %v2964_v6 = vmul.f32 %v2960_v5, %v10126_v22 }
0x12e2   :  { %v2966_v51 = vsub.f32 %v11134_v28, %v2964_v6 }
0x12e4   :  { %v2968_v4 = vmul.f32 %v2966_v51, %v2966_v51 }
0x12e6   :  { %v2970_v48 = vsel %vm73_vm0, %v2968_v4, 0.0 }
0x12e7   :  { %2971 = vadd.xlane.f32.xlu0 %v2970_v48 }
0x131a   :  { %v2963_v30 = vpop.xlane.xlu1 %2962 }
0x131b   :  { %v2965_v40 = vmul.f32 %v2963_v30, %v10126_v22 }
0x131d   :  { %v2967_v13 = vsub.f32 %v11139_v62, %v2965_v40 }
0x131f   :  { %v2969_v1 = vmul.f32 %v2967_v13, %v2967_v13 }
0x1321   :  { %v2973_v52 = vsel %vm73_vm0, %v2969_v1, 0.0 }
0x1322   :  { %2974 = vadd.xlane.f32.xlu2 %v2973_v52 }
0x135a   :  { %v2972_v44 = vpop.xlane.xlu0 %2971 }
0x135b   :  { %v2976_v15 = vmul.f32 %v2972_v44, %v10126_v22 }
0x135d   :  { %v2978_v21 = vadd.f32 1e-05, %v2976_v15 }
0x135f   :  { %9641 = vrsqrt.f32 %v2978_v21  ;;  %vm2986_vm6 = vweird.f32 %v2978_v21 }
0x1365   :  { %v9642_v63 = vpop.eup %9641 }
0x1366   :  { %v2981_v41 = vmul.f32 %v9642_v63, %v2978_v21  ;;  %vm2987_vm5 = vweird.f32 %v9642_v63 }
0x1367   :  { %vm2988_vm7 = vmor %vm2986_vm6, %vm2987_vm5 }
0x1368   :  { %v2982_v60 = vmul.f32 %v9642_v63, %v2981_v41 }
0x136a   :  { %v2983_v25 = vmul.f32 0.5, %v2982_v60 }
0x136c   :  { %v2984_v53 = vsub.f32 1.5, %v2983_v25 }
0x136e   :  { %v2985_v61 = vmul.f32 %v9642_v63, %v2984_v53 }
0x1370   :  { %v2989_v26 = vsel %vm2988_vm7, %v9642_v63, %v2985_v61 }
0x1371   :  { %v3000_v32 = vmul.f32 %v2989_v26, %v2966_v51 }
0x1373   :  { %v3005_v0 = vmul.f32 %v9464_v56, %v3000_v32 }
0x1375   :  { %v3010_v12 = vadd.f32 %v9465_v18, %v3005_v0 }
0x1377   :  { %8894 = vmatmul.msk.f32.vlgmr.msrb.gmra.mxu0 %vm73_vm0, %v3010_v12 }
0x1395   :  { %v2975_v24 = vpop.xlane.xlu2 %2974 }
0x1396   :  { %v2977_v23 = vmul.f32 %v2975_v24, %v10126_v22 }
0x1398   :  { %v2979_v33 = vadd.f32 1e-05, %v2977_v23 }
0x139a   :  { %9643 = vrsqrt.f32 %v2979_v33  ;;  %vm2996_vm2 = vweird.f32 %v2979_v33 }
0x13a0   :  { %v9644_v35 = vpop.eup %9643 }
0x13a1   :  { %v2991_v58 = vmul.f32 %v9644_v35, %v2979_v33  ;;  %vm2997_vm1 = vweird.f32 %v9644_v35 }
0x13a2   :  { %vm2998_vm3 = vmor %vm2996_vm2, %vm2997_vm1 }
0x13a3   :  { %v2992_v20 = vmul.f32 %v9644_v35, %v2991_v58 }
0x13a5   :  { %v2993_v39 = vmul.f32 0.5, %v2992_v20 }
0x13a7   :  { %v2994_v17 = vsub.f32 1.5, %v2993_v39 }
0x13a9   :  { %v2995_v10 = vmul.f32 %v9644_v35, %v2994_v17 }
0x13ab   :  { %v2999_v3 = vsel %vm2998_vm3, %v9644_v35, %v2995_v10 }
0x13ac   :  { %v3001_v9 = vmul.f32 %v2999_v3, %v2967_v13 }
0x13ae   :  { %v3006_v34 = vmul.f32 %v9464_v56, %v3001_v9 }
0x13b0   :  { %v3011_v2 = vadd.f32 %v9465_v18, %v3006_v34 }
0x13b2   :  { %8895 = vmatmul.msk.f32.gmra.mxu0 %vm73_vm0, %v3011_v2 }
0x13f4   :  { %v11171_v29 = vpop.f32.mrf.mxu0 }
0x13f5   :  { %3180 = vrot.lane.b32.xlu2 %v11171_v29, %s13404_s22  ;;  %3047 = vrot.lane.b32.xlu1 %v11171_v29, %s13405_s26 }
0x13fd   :  { %3314 = vrot.lane.b32.xlu1 %v11171_v29, %s13406_s15 }
0x1405   :  { %3260 = vrot.lane.b32.xlu1 %v11171_v29, %s13407_s16 }
0x140d   :  { %3446 = vrot.lane.b32.xlu1 %v11171_v29, %s13380_s0 }
0x1415   :  { %3582 = vrot.lane.b32.xlu1 %v11171_v29, %s13382_s2 }
0x142f   :  { %v11185_v36 = vpop.f32.mrf.mxu0 }
0x1430   :  { %3208 = vrot.lane.b32.xlu1 %v11185_v36, %s13404_s22  ;;  %3074 = vrot.lane.b32.xlu0 %v11185_v36, %s13405_s26  ;;  %v11193_v27 = vpack.i.bf16 %v11185_v36, %v11171_v29 }
0x1432   :  { %9340 = vrot.lane.b32.xlu2 %v11193_v27, %s13408_s17 }
0x1438   :  { %3178 = vrot.lane.b32.xlu0 %v11171_v29, %s13409_s18 }
0x1440   :  { %3312 = vrot.lane.b32.xlu0 %v11171_v29, %s13381_s30 }
0x1448   :  { %3448 = vrot.lane.b32.xlu0 %v11171_v29, %s13383_s23 }
0x144f   :  { %v3181_v47 = vpop.permute.xlu2 %3180 }
0x1450   :  { %3206 = vrot.lane.b32.xlu0 %v11185_v36, %s13409_s18 }
0x1458   :  { %3342 = vrot.lane.b32.xlu0 %v11185_v36, %s13406_s15 }
0x1460   :  { %3340 = vrot.lane.b32.xlu0 %v11185_v36, %s13381_s30 }
0x1467   :  { %v3048_v8 = vpop.permute.xlu1 %3047 }
0x1468   :  { %8896 = vmatpush.xpose.msk.msra.mxu1 %vm210_vm8, %v3048_v8  ;;  %3476 = vrot.lane.b32.xlu0 %v11185_v36, %s13383_s23 }
0x146b   :  { %8897 = vmatmul.msk.f32.vlgmr.msra.gmra.mxu1 %vm210_vm8, %v11171_v29 }
0x146f   :  { %v11214_v46 = vpop.permute.xlu1 %3314 }
0x1477   :  { %v3261_v49 = vpop.permute.xlu1 %3260 }
0x147f   :  { %v11216_v55 = vpop.permute.xlu1 %3446 }
0x1487   :  { %v11218_v43 = vpop.permute.xlu1 %3582 }
0x148c   :  { %v9341_v38 = vpop.permute.xlu2 %9340 }
0x148d   :  { %v9343_v59 = vunpack.i.h.bf16 %v9341_v38  ;;  %v9342_v14 = vunpack.i.l.bf16 %v9341_v38 }
0x148f   :  { %3147 = vmatpush.msra.mxu0 %v9342_v14  ;;  %3173 = vmatpush.msrb.mxu1 %v9343_v59 }
0x1491   :  { %3281 = vmatpush.msra.mxu1 %v3261_v49 }
0x14a2   :  { %v3209_v54 = vpop.permute.xlu1 %3208  ;;  %v3075_v37 = vpop.permute.xlu0 %3074 }
0x14a3   :  { %8898 = vmatpush.xpose.msk.msra.mxu2 %vm210_vm8, %v3075_v37  ;;  %8904 = vmatpush.xpose.msk.msrb.mxu0 %vm210_vm8, %v3209_v54 }
0x14a6   :  { %8899 = vmatmul.msk.f32.vlgmr.msra.gmra.mxu2 %vm210_vm8, %v11185_v36 }
0x14a7   :  { %8902 = vmatpush.xpose.msk.msrb.mxu2 %vm210_vm8, %v3181_v47 }
0x14aa   :  { %v3179_v31 = vpop.permute.xlu0 %3178 }
0x14ae   :  { %8903 = vmatmul.msk.f32.vlgmr.msrb.gmra.mxu2 %vm210_vm8, %v3179_v31 }
0x14b2   :  { %v3313_v44 = vpop.permute.xlu0 %3312 }
0x14ba   :  { %v3449_v15 = vpop.permute.xlu0 %3448 }
0x14c2   :  { %v3207_v21 = vpop.permute.xlu0 %3206 }
0x14ca   :  { %v11246_v63 = vpop.permute.xlu0 %3342 }
0x14d2   :  { %v11252_v41 = vpop.permute.xlu0 %3340 }
0x14da   :  { %v11256_v60 = vpop.permute.xlu0 %3476 }
0x14e8   :  { %v3070_v57 = vpop.f32.mrf.mxu1 }
0x14e9   :  { %v3100_v19 = vmul.f32 0.17677669, %v3070_v57 }
0x14eb   :  { %v3102_v50 = vsel %vm10183_vm9, %v3100_v19, -1e+30 }
0x14ec   :  { %v3104_v5 = vsel %vm268_vm10, %v3102_v50, -inf }
0x14ed   :  { %3105 = vmax.xlane.f32.xlu1 %v3104_v5 }
0x1506   :  { %3580 = vrot.lane.b32.xlu1 %v11171_v29, %s13385_s3 }
0x1529   :  { %v3097_v6 = vpop.f32.mrf.mxu2 }
0x152a   :  { %v3101_v51 = vmul.f32 0.17677669, %v3097_v6 }
0x152c   :  { %v3103_v4 = vsel %vm10183_vm9, %v3101_v51, -1e+30 }
0x152d   :  { %v3107_v48 = vsel %vm268_vm10, %v3103_v4, -inf }
0x152e   :  { %3108 = vmax.xlane.f32.xlu2 %v3107_v48 }
0x1531   :  { %v3203_v30 = vpop.f32.mrf.mxu2 }
0x1532   :  { %v3234_v40 = vmul.f32 0.17677669, %v3203_v30 }
0x1534   :  { %v3236_v13 = vsel %vm10183_vm9, %v3234_v40, -1e+30 }
0x1535   :  { %v3238_v1 = vsel %vm268_vm10, %v3236_v13, -inf }
0x1536   :  { %3239 = vmax.xlane.f32.xlu0 %v3238_v1 }
0x1546   :  { %3716 = vrot.lane.b32.xlu2 %v11171_v29, %s13390_s25 }
0x154a   :  { %3714 = vrot.lane.b32.xlu0 %v11171_v29, %s13384_s24 }
0x1552   :  { %3850 = vrot.lane.b32.xlu0 %v11171_v29, %s13386_s28 }
0x1560   :  { %v3106_v52 = vpop.xlane.xlu1 %3105 }
0x1561   :  { %v3110_v45 = vsub.f32 %v3102_v50, %v3106_v52 }
0x1563   :  { %v3112_v7 = vmul.f32 1.442695, %v3110_v45 }
0x1565   :  { %9645 = vpow2.f32 %v3112_v7 }
0x156b   :  { %v9646_v11 = vpop.eup %9645 }
0x156c   :  { %v3116_v42 = vsel %vm268_vm10, %v9646_v11, 0.0 }
0x156d   :  { %3117 = vadd.xlane.f32.xlu1 %v3116_v42 }
0x1578   :  { %v3581_v23 = vpop.permute.xlu1 %3580 }
0x1586   :  { %3474 = vrot.lane.b32.xlu1 %v11185_v36, %s13380_s0 }
0x158e   :  { %3610 = vrot.lane.b32.xlu1 %v11185_v36, %s13382_s2 }
0x1596   :  { %3608 = vrot.lane.b32.xlu1 %v11185_v36, %s13385_s3  ;;  %s13428_s3 = smov 48  }
0x159e   :  { %3984 = vrot.lane.b32.xlu1 %v11171_v29, %s13392_s20 }
0x15a1   :  { %v3109_v25 = vpop.xlane.xlu2 %3108 }
0x15a2   :  { %v3111_v53 = vsub.f32 %v3103_v4, %v3109_v25 }
0x15a4   :  { %v3114_v61 = vmul.f32 1.442695, %v3111_v53 }
0x15a6   :  { %9647 = vpow2.f32 %v3114_v61  ;;  %3878 = vrot.lane.b32.xlu1 %v11185_v36, %s13386_s28  ;;  %s13421_s28 = smov 28  }
0x15a9   :  { %v3240_v56 = vpop.xlane.xlu0 %3239  ;;  %v3717_v10 = vpop.permute.xlu2 %3716 }
0x15aa   :  { %v3244_v26 = vsub.f32 %v3236_v13, %v3240_v56 }
0x15ac   :  { %v9648_v32 = vpop.eup %9647  ;;  %v3246_v18 = vmul.f32 1.442695, %v3244_v26 }
0x15ad   :  { %v3119_v0 = vsel %vm268_vm10, %v9648_v32, 0.0 }
0x15ae   :  { %9649 = vpow2.f32 %v3246_v18  ;;  %4010 = vrot.lane.b32.xlu1 %v11185_v36, %s13387_s29  ;;  %3120 = vadd.xlane.f32.xlu0 %v3119_v0 }
0x15b4   :  { %v9650_v12 = vpop.eup %9649 }
0x15b5   :  { %v3250_v24 = vsel %vm268_vm10, %v9650_v12, 0.0 }
0x15b6   :  { %3286 = vrot.lane.b32.xlu1 %v11185_v36, %s13407_s16  ;;  %3251 = vadd.xlane.f32.xlu2 %v3250_v24 }
0x15bc   :  { %v3715_v39 = vpop.permute.xlu0 %3714 }
0x15be   :  { %9350 = vrot.lane.b32.xlu1 %v11193_v27, %s13393_s27  ;;  %s13412_s27 = smov 44  }
0x15c2   :  { %3848 = vrot.lane.b32.xlu0 %v11171_v29, %s13391_s21 }
0x15c4   :  { %v3851_v9 = vpop.permute.xlu0 %3850 }
0x15c6   :  { %9355 = vrot.lane.b32.xlu1 %v11193_v27, %s13410_s19  ;;  %s13417_s19 = smov 12  }
0x15ca   :  { %3742 = vrot.lane.b32.xlu0 %v11185_v36, %s13384_s24  ;;  %s13427_s24 = smov 100  }
0x15ce   :  { %3744 = vrot.lane.b32.xlu2 %v11185_v36, %s13390_s25 }
0x15d2   :  { %3876 = vrot.lane.b32.xlu0 %v11185_v36, %s13391_s21  ;;  %s13425_s21 = smov 72  }
0x15d6   :  { %3982 = vrot.lane.b32.xlu2 %v11171_v29, %s13387_s29  ;;  %s13419_s29 = smov 20  }
0x15da   :  { %9345 = vrot.lane.b32.xlu0 %v11193_v27, %s13411_s1  ;;  %s13414_s1 = smov 40  }
0x15de   :  { %4012 = vrot.lane.b32.xlu2 %v11185_v36, %s13392_s20  ;;  %s13420_s20 = smov 24  }
0x15e0   :  { %v3118_v33 = vpop.xlane.xlu1 %3117 }
0x15e1   :  { %9651 = vrcp.f32 %v3118_v33 }
0x15e6   :  { %9360 = vrot.lane.b32.xlu2 %v11193_v27, %s13412_s27  ;;  %s13413_s27 = smov 36  }
0x15e7   :  { %v9652_v35 = vpop.eup %9651 }
0x15e8   :  { %v3124_v58 = vmul.f32 %v9652_v35, %v9646_v11 }
0x15ea   :  { %8900 = vmatmul.msk.f32.vlgmr.msra.gmra.mxu0 %vm268_vm10, %v3124_v58 }
0x15eb   :  { %8908 = vmatpush.xpose.msk.msra.mxu0 %vm210_vm8, %v11214_v46 }
0x15f2   :  { %8905 = vmatmul.msk.f32.vlgmr.msrb.gmra.mxu0 %vm210_vm8, %v3207_v21 }
0x15f3   :  { %8914 = vmatpush.xpose.msk.msrb.mxu0 %vm210_vm8, %v3449_v15 }
0x15f8   :  { %v3475_v20 = vpop.permute.xlu1 %3474 }
0x15fa   :  { %8909 = vmatmul.msk.f32.vlgmr.msra.gmra.mxu0 %vm210_vm8, %v3313_v44 }
0x15fb   :  { %8920 = vmatpush.xpose.msk.msra.mxu0 %vm210_vm8, %v11218_v43 }
0x1600   :  { %v3611_v17 = vpop.permute.xlu1 %3610 }
0x1602   :  { %8915 = vmatmul.msk.f32.vlgmr.msrb.gmra.mxu0 %vm210_vm8, %v11216_v55 }
0x1603   :  { %8926 = vmatpush.xpose.msk.msrb.mxu0 %vm210_vm8, %v3717_v10 }
0x1608   :  { %v3609_v3 = vpop.permute.xlu1 %3608 }
0x160a   :  { %8921 = vmatmul.msk.f32.vlgmr.msra.gmra.mxu0 %vm210_vm8, %v3581_v23 }
0x160b   :  { %8932 = vmatpush.xpose.msk.msra.mxu0 %vm210_vm8, %v3851_v9 }
0x1610   :  { %v3985_v34 = vpop.permute.xlu1 %3984 }
0x1612   :  { %8927 = vmatmul.msk.f32.vlgmr.msrb.gmra.mxu0 %vm210_vm8, %v3715_v39 }
0x1613   :  { %8938 = vmatpush.xpose.msk.msrb.mxu0 %vm210_vm8, %v3985_v34 }
0x1618   :  { %v3879_v2 = vpop.permute.xlu1 %3878 }
0x1620   :  { %v4011_v27 = vpop.permute.xlu1 %4010 }
0x1621   :  { %v3121_v8 = vpop.xlane.xlu0 %3120 }
0x1622   :  { %9653 = vrcp.f32 %v3121_v8 }
0x1628   :  { %v9654_v46 = vpop.eup %9653  ;;  %v3287_v47 = vpop.permute.xlu1 %3286 }
0x1629   :  { %v3125_v49 = vmul.f32 %v9654_v46, %v9648_v32  ;;  %3307 = vmatpush.msra.mxu2 %v3287_v47  ;;  %v3252_v38 = vpop.xlane.xlu2 %3251 }
0x162a   :  { %9655 = vrcp.f32 %v3252_v38 }
0x162b   :  { %8901 = vmatmul.msk.f32.vlgmr.msrb.gmra.mxu1 %vm268_vm10, %v3125_v49 }
0x162c   :  { %8910 = vmatpush.xpose.msk.msrb.mxu1 %vm210_vm8, %v11246_v63 }
0x1630   :  { %v9656_v59 = vpop.eup %9655  ;;  %v11314_v57 = vpop.permute.xlu1 %9350 }
0x1631   :  { %v3258_v14 = vmul.f32 %v9656_v59, %v9650_v12  ;;  %v3745_v55 = vpop.permute.xlu2 %3744  ;;  %v9353_v6 = vunpack.i.h.bf16 %v11314_v57 }
0x1633   :  { %8906 = vmatmul.msk.f32.vlgmr.msra.gmra.mxu1 %vm268_vm10, %v3258_v14 }
0x1634   :  { %8916 = vmatpush.xpose.msk.msra.mxu1 %vm210_vm8, %v11256_v60  ;;  %v3849_v43 = vpop.permute.xlu0 %3848 }
0x1635   :  { %8933 = vmatmul.msk.f32.vlgmr.msra.gmra.mxu0 %vm210_vm8, %v3849_v43 }
0x1639   :  { %v3983_v54 = vpop.permute.xlu2 %3982 }
0x163b   :  { %8911 = vmatmul.msk.f32.vlgmr.msrb.gmra.mxu1 %vm210_vm8, %v11252_v41 }
0x163c   :  { %8922 = vmatpush.xpose.msk.msrb.mxu1 %vm210_vm8, %v3611_v17  ;;  %v3743_v37 = vpop.permute.xlu0 %3742 }
0x163d   :  { %8939 = vmatmul.msk.f32.vlgmr.msrb.gmra.mxu0 %vm210_vm8, %v3983_v54 }
0x1641   :  { %v4013_v51 = vpop.permute.xlu2 %4012 }
0x1643   :  { %8917 = vmatmul.msk.f32.vlgmr.msra.gmra.mxu1 %vm210_vm8, %v3475_v20 }
0x1644   :  { %8928 = vmatpush.xpose.msk.msra.mxu1 %vm210_vm8, %v3745_v55  ;;  %v3877_v31 = vpop.permute.xlu0 %3876 }
0x164b   :  { %8923 = vmatmul.msk.f32.vlgmr.msrb.gmra.mxu1 %vm210_vm8, %v3609_v3 }
0x164c   :  { %8934 = vmatpush.xpose.msk.msrb.mxu1 %vm210_vm8, %v3879_v2  ;;  %v9346_v19 = vpop.permute.xlu0 %9345 }
0x164d   :  { %v9348_v50 = vunpack.i.h.bf16 %v9346_v19  ;;  %v9347_v5 = vunpack.i.l.bf16 %v9346_v19 }
0x164f   :  { %3415 = vmatpush.msrb.mxu2 %v9347_v5  ;;  %3441 = vmatpush.msra.mxu3 %v9348_v50 }
0x1651   :  { %3575 = vmatpush.msrb.mxu3 %v9353_v6  ;;  %v11407_v6 = vpop.permute.xlu2 %9360 }
0x1653   :  { %8929 = vmatmul.msk.f32.vlgmr.msra.gmra.mxu1 %vm210_vm8, %v3743_v37 }
0x1654   :  { %8940 = vmatpush.xpose.msk.msra.mxu1 %vm210_vm8, %v4013_v51 }
0x165b   :  { %8935 = vmatmul.msk.f32.vlgmr.msrb.gmra.mxu1 %vm210_vm8, %v3877_v31 }
0x1663   :  { %8941 = vmatmul.msk.f32.vlgmr.msra.gmra.mxu1 %vm210_vm8, %v4011_v27 }
0x1667   :  { %v11323_v4 = vpop.f32.mrf.mxu0 }
0x166f   :  { %v3231_v48 = vpop.f32.mrf.mxu0 }
0x1670   :  { %v3235_v30 = vmul.f32 0.17677669, %v3231_v48 }
0x1672   :  { %v11327_v40 = vsel %vm10183_vm9, %v3235_v30, -1e+30 }
0x1673   :  { %v3241_v13 = vsel %vm268_vm10, %v11327_v40, -inf }
0x1674   :  { %3242 = vmax.xlane.f32.xlu0 %v3241_v13  ;;  %v11410_v13 = vpop.permute.xlu1 %9355 }
0x1677   :  { %v3337_v1 = vpop.f32.mrf.mxu0 }
0x1678   :  { %v3368_v52 = vmul.f32 0.17677669, %v3337_v1 }
0x167a   :  { %v11333_v45 = vsel %vm10183_vm9, %v3368_v52, -1e+30 }
0x167b   :  { %v3372_v7 = vsel %vm268_vm10, %v11333_v45, -inf }
0x167c   :  { %3373 = vmax.xlane.f32.xlu2 %v3372_v7 }
0x167f   :  { %v3471_v11 = vpop.f32.mrf.mxu0 }
0x1680   :  { %v3502_v42 = vmul.f32 0.17677669, %v3471_v11 }
0x1682   :  { %v11339_v44 = vsel %vm10183_vm9, %v3502_v42, -1e+30 }
0x1683   :  { %v3506_v15 = vsel %vm268_vm10, %v11339_v44, -inf }
0x1684   :  { %3507 = vmax.xlane.f32.xlu1 %v3506_v15 }
0x1687   :  { %v3605_v21 = vpop.f32.mrf.mxu0 }
0x1688   :  { %v3636_v63 = vmul.f32 0.17677669, %v3605_v21 }
0x168a   :  { %v11345_v41 = vsel %vm10183_vm9, %v3636_v63, -1e+30 }
0x168b   :  { %v3640_v60 = vsel %vm268_vm10, %v11345_v41, -inf }
0x168c   :  { %3641 = vmax.xlane.f32.xlu2 %v3640_v60 }
0x168f   :  { %v3739_v61 = vpop.f32.mrf.mxu0 }
0x1690   :  { %v3770_v0 = vmul.f32 0.17677669, %v3739_v61 }
0x1692   :  { %v11361_v33 = vsel %vm10183_vm9, %v3770_v0, -1e+30 }
0x1693   :  { %v3774_v20 = vsel %vm268_vm10, %v11361_v33, -inf }
0x16a8   :  { %v11349_v25 = vpop.f32.mrf.mxu1 }
0x16b0   :  { %v11351_v53 = vpop.f32.mrf.mxu1 }
0x16b2   :  { %v3873_v12 = vpop.f32.mrf.mxu0 }
0x16b3   :  { %v3904_v39 = vmul.f32 0.17677669, %v3873_v12 }
0x16b5   :  { %v11373_v3 = vsel %vm10183_vm9, %v3904_v39, -1e+30 }
0x16b6   :  { %v3908_v27 = vsel %vm268_vm10, %v11373_v3, -inf }
0x16b8   :  { %v3365_v56 = vpop.f32.mrf.mxu1 }
0x16b9   :  { %v3369_v26 = vmul.f32 0.17677669, %v3365_v56 }
0x16ba   :  { %v4007_v9 = vpop.f32.mrf.mxu0 }
0x16bb   :  { %v11355_v32 = vsel %vm10183_vm9, %v3369_v26, -1e+30  ;;  %v4038_v8 = vmul.f32 0.17677669, %v4007_v9 }
0x16bc   :  { %v3375_v18 = vsel %vm268_vm10, %v11355_v32, -inf }
0x16bd   :  { %3376 = vmax.xlane.f32.xlu0 %v3375_v18  ;;  %v11385_v49 = vsel %vm10183_vm9, %v4038_v8, -1e+30 }
0x16be   :  { %v4042_v59 = vsel %vm268_vm10, %v11385_v49, -inf }
0x16c0   :  { %v3499_v24 = vpop.f32.mrf.mxu1 }
0x16c1   :  { %v3503_v23 = vmul.f32 0.17677669, %v3499_v24 }
0x16c3   :  { %v11365_v35 = vsel %vm10183_vm9, %v3503_v23, -1e+30 }
0x16c4   :  { %v3509_v58 = vsel %vm268_vm10, %v11365_v35, -inf }
0x16c5   :  { %3510 = vmax.xlane.f32.xlu1 %v3509_v58  ;;  %3775 = vmax.xlane.f32.xlu0 %v3774_v20 }
0x16c8   :  { %v3633_v17 = vpop.f32.mrf.mxu1 }
0x16c9   :  { %v3637_v10 = vmul.f32 0.17677669, %v3633_v17 }
0x16cb   :  { %v11377_v34 = vsel %vm10183_vm9, %v3637_v10, -1e+30 }
0x16cc   :  { %v3643_v2 = vsel %vm268_vm10, %v11377_v34, -inf }
0x16cd   :  { %3644 = vmax.xlane.f32.xlu2 %v3643_v2  ;;  %3909 = vmax.xlane.f32.xlu1 %v3908_v27 }
0x16d0   :  { %v3767_v46 = vpop.f32.mrf.mxu1 }
0x16d1   :  { %v3771_v47 = vmul.f32 0.17677669, %v3767_v46 }
0x16d3   :  { %v11389_v38 = vsel %vm10183_vm9, %v3771_v47, -1e+30 }
0x16d4   :  { %v3777_v14 = vsel %vm268_vm10, %v11389_v38, -inf }
0x16d5   :  { %4043 = vmax.xlane.f32.xlu2 %v4042_v59  ;;  %3778 = vmax.xlane.f32.xlu0 %v3777_v14 }
0x16d8   :  { %v3901_v55 = vpop.f32.mrf.mxu1 }
0x16d9   :  { %v3905_v43 = vmul.f32 0.17677669, %v3901_v55 }
0x16db   :  { %v11397_v54 = vsel %vm10183_vm9, %v3905_v43, -1e+30 }
0x16dc   :  { %v3911_v37 = vsel %vm268_vm10, %v11397_v54, -inf }
0x16dd   :  { %3912 = vmax.xlane.f32.xlu0 %v3911_v37 }
0x16e0   :  { %v4035_v31 = vpop.f32.mrf.mxu1 }
0x16e1   :  { %v4039_v19 = vmul.f32 0.17677669, %v4035_v31 }
0x16e3   :  { %v11403_v50 = vsel %vm10183_vm9, %v4039_v19, -1e+30 }
0x16e4   :  { %v4045_v5 = vsel %vm268_vm10, %v11403_v50, -inf }
0x16e5   :  { %4046 = vmax.xlane.f32.xlu0 %v4045_v5 }
0x16e7   :  { %v3243_v51 = vpop.xlane.xlu0 %3242 }
0x16e8   :  { %v3245_v48 = vsub.f32 %v11327_v40, %v3243_v51 }
0x16ea   :  { %v3248_v30 = vmul.f32 1.442695, %v3245_v48 }
0x16ec   :  { %9657 = vpow2.f32 %v3248_v30 }
0x16ef   :  { %v3374_v1 = vpop.xlane.xlu2 %3373 }
0x16f0   :  { %v3378_v52 = vsub.f32 %v11333_v45, %v3374_v1 }
0x16f2   :  { %v11413_v7 = vpop.eup %9657  ;;  %v3380_v11 = vmul.f32 1.442695, %v3378_v52 }
0x16f3   :  { %v3253_v42 = vsel %vm268_vm10, %v11413_v7, 0.0 }
0x16f4   :  { %9659 = vpow2.f32 %v3380_v11  ;;  %3254 = vadd.xlane.f32.xlu1 %v3253_v42 }
0x16f7   :  { %v3508_v15 = vpop.xlane.xlu1 %3507 }
0x16f8   :  { %v3512_v21 = vsub.f32 %v11339_v44, %v3508_v15 }
0x16fa   :  { %v11418_v63 = vpop.eup %9659  ;;  %v3514_v40 = vmul.f32 1.442695, %v3512_v21 }
0x16fb   :  { %v3384_v60 = vsel %vm268_vm10, %v11418_v63, 0.0 }
0x16fc   :  { %9661 = vpow2.f32 %v3514_v40  ;;  %3385 = vadd.xlane.f32.xlu2 %v3384_v60  ;;  %v9352_v40 = vunpack.i.l.bf16 %v11314_v57 }
0x16ff   :  { %v3642_v56 = vpop.xlane.xlu2 %3641 }
0x1700   :  { %v3646_v44 = vsub.f32 %v11345_v41, %v3642_v56 }
0x1702   :  { %v11422_v45 = vpop.eup %9661  ;;  %v3648_v12 = vmul.f32 1.442695, %v3646_v44 }
0x1703   :  { %v3518_v61 = vsel %vm268_vm10, %v11422_v45, 0.0 }
0x1704   :  { %3519 = vadd.xlane.f32.xlu2 %v3518_v61 }
0x1730   :  { %v3377_v26 = vpop.xlane.xlu0 %3376 }
0x1731   :  { %v3379_v18 = vsub.f32 %v11355_v32, %v3377_v26 }
0x1733   :  { %v3382_v0 = vmul.f32 1.442695, %v3379_v18 }
0x1735   :  { %9663 = vpow2.f32 %v3382_v0  ;;  %v9362_v0 = vunpack.i.l.bf16 %v11407_v6 }
0x1736   :  { %9665 = vpow2.f32 %v3648_v12 }
0x1738   :  { %v3511_v24 = vpop.xlane.xlu1 %3510  ;;  %v3776_v23 = vpop.xlane.xlu0 %3775 }
0x1739   :  { %v3780_v58 = vsub.f32 %v11361_v33, %v3776_v23  ;;  %v3513_v39 = vsub.f32 %v11365_v35, %v3511_v24 }
0x173b   :  { %v11429_v20 = vpop.eup %9663  ;;  %v3782_v17 = vmul.f32 1.442695, %v3780_v58  ;;  %v3516_v32 = vmul.f32 1.442695, %v3513_v39 }
0x173c   :  { %v3387_v10 = vsel %vm268_vm10, %v11429_v20, 0.0  ;;  %v11434_v2 = vpop.eup %9665 }
0x173d   :  { %3388 = vadd.xlane.f32.xlu2 %v3387_v10  ;;  %9667 = vpow2.f32 %v3782_v17  ;;  %v3652_v35 = vsel %vm268_vm10, %v11434_v2, 0.0 }
0x173e   :  { %9669 = vpow2.f32 %v3516_v32  ;;  %v9358_v32 = vunpack.i.h.bf16 %v11410_v13 }
0x1740   :  { %v3645_v41 = vpop.xlane.xlu2 %3644  ;;  %v3910_v9 = vpop.xlane.xlu1 %3909 }
0x1741   :  { %v3914_v27 = vsub.f32 %v11373_v3, %v3910_v9  ;;  %v3647_v33 = vsub.f32 %v11377_v34, %v3645_v41 }
0x1743   :  { %v3916_v8 = vmul.f32 1.442695, %v3914_v27  ;;  %v11438_v46 = vpop.eup %9667  ;;  %v3650_v59 = vmul.f32 1.442695, %v3647_v33 }
0x1744   :  { %v3786_v47 = vsel %vm268_vm10, %v11438_v46, 0.0  ;;  %v11444_v43 = vpop.eup %9669 }
0x1745   :  { %3653 = vadd.xlane.f32.xlu2 %v3652_v35  ;;  %9671 = vpow2.f32 %v3916_v8  ;;  %3787 = vadd.xlane.f32.xlu0 %v3786_v47  ;;  %v3521_v19 = vsel %vm268_vm10, %v11444_v43, 0.0  ;;  %v9363_v35 = vunpack.i.h.bf16 %v11407_v6 }
0x1746   :  { %9673 = vpow2.f32 %v3650_v59 }
0x1748   :  { %v4044_v14 = vpop.xlane.xlu2 %4043  ;;  %v3779_v55 = vpop.xlane.xlu0 %3778 }
0x1749   :  { %v4048_v3 = vsub.f32 %v11385_v49, %v4044_v14  ;;  %v3781_v37 = vsub.f32 %v11389_v38, %v3779_v55 }
0x174b   :  { %v4050_v34 = vmul.f32 1.442695, %v4048_v3  ;;  %v11448_v31 = vpop.eup %9671  ;;  %v3784_v51 = vmul.f32 1.442695, %v3781_v37 }
0x174c   :  { %v3920_v5 = vsel %vm268_vm10, %v11448_v31, 0.0  ;;  %v11454_v48 = vpop.eup %9673 }
0x174d   :  { %9675 = vpow2.f32 %v4050_v34  ;;  %3522 = vadd.xlane.f32.xlu2 %v3521_v19  ;;  %3921 = vadd.xlane.f32.xlu1 %v3920_v5  ;;  %v3655_v49 = vsel %vm268_vm10, %v11454_v48, 0.0 }
0x174e   :  { %9677 = vpow2.f32 %v3784_v51 }
0x1750   :  { %v3913_v60 = vpop.xlane.xlu0 %3912 }
0x1751   :  { %v3915_v18 = vsub.f32 %v11397_v54, %v3913_v60 }
0x1753   :  { %v11456_v30 = vpop.eup %9675 }
0x1754   :  { %v4054_v38 = vsel %vm268_vm10, %v11456_v30, 0.0  ;;  %v11462_v1 = vpop.eup %9677 }
0x1755   :  { %3656 = vadd.xlane.f32.xlu2 %v3655_v49  ;;  %4055 = vadd.xlane.f32.xlu0 %v4054_v38  ;;  %v3789_v52 = vsel %vm268_vm10, %v11462_v1, 0.0 }
0x1758   :  { %v4047_v57 = vpop.xlane.xlu0 %4046 }
0x1759   :  { %v4049_v12 = vsub.f32 %v11403_v50, %v4047_v57 }
0x175b   :  { %v4052_v24 = vmul.f32 1.442695, %v4049_v12  ;;  %v8945_v12 = vld [vmem:[%s13239_s7 + $0x48] sm:$0xff] }
0x175d   :  { %3790 = vadd.xlane.f32.xlu2 %v3789_v52 }
0x1766   :  { %4064 = vrot.lane.b32.xlu1 %v11171_v29, %s13413_s27 }
0x1767   :  { %v3255_v11 = vpop.xlane.xlu1 %3254 }
0x1768   :  { %9679 = vrcp.f32 %v3255_v11 }
0x1769   :  { %3930 = vrot.lane.b32.xlu0 %v11171_v29, %s13414_s1  ;;  %v9357_v29 = vunpack.i.l.bf16 %v11410_v13 }
0x176e   :  { %v9680_v42 = vpop.eup %9679 }
0x176f   :  { %v3259_v15 = vmul.f32 %v9680_v42, %v11413_v7  ;;  %v3386_v21 = vpop.xlane.xlu2 %3385 }
0x1770   :  { %9681 = vrcp.f32 %v3386_v21 }
0x1771   :  { %8907 = vmatmul.msk.f32.vlgmr.msra.gmra.mxu2 %vm268_vm10, %v3259_v15 }
0x1772   :  { %3549 = vmatpush.msra.mxu2 %v9352_v40 }
0x1775   :  { %3956 = vrot.lane.b32.xlu2 %v11185_v36, %s13414_s1  ;;  %s13415_s1 = smov 4  }
0x1776   :  { %v9682_v61 = vpop.eup %9681 }
0x1777   :  { %v3392_v56 = vmul.f32 %v9682_v61, %v11418_v63  ;;  %v3520_v26 = vpop.xlane.xlu2 %3519  ;;  %v3918_v63 = vmul.f32 1.442695, %v3915_v18 }
0x1778   :  { %9683 = vrcp.f32 %v3520_v26 }
0x1779   :  { %8912 = vmatmul.msk.f32.vlgmr.msrb.gmra.mxu2 %vm268_vm10, %v3392_v56  ;;  %9685 = vpow2.f32 %v3918_v63  ;;  %v8944_v63 = vld [vmem:[%s13239_s7 + $0x40] sm:$0xff] }
0x177a   :  { %3683 = vmatpush.msrb.mxu2 %v9357_v29  ;;  %9687 = vpow2.f32 %v4052_v24 }
0x177e   :  { %v9684_v7 = vpop.eup %9683 }
0x177f   :  { %v3526_v44 = vmul.f32 %v9684_v7, %v11422_v45  ;;  %v11483_v23 = vpop.eup %9685 }
0x1780   :  { %v11485_v58 = vpop.eup %9687  ;;  %v3923_v54 = vsel %vm268_vm10, %v11483_v23, 0.0 }
0x1781   :  { %8918 = vmatmul.msk.f32.vlgmr.msra.gmra.mxu2 %vm268_vm10, %v3526_v44  ;;  %v4057_v45 = vsel %vm268_vm10, %v11485_v58, 0.0  ;;  %v8947_v44 = vld [vmem:[%s13239_s7 + $0x58] sm:$0xff] }
0x1782   :  { %3817 = vmatpush.msra.mxu2 %v9362_v0  ;;  %v8946_v0 = vld [vmem:[%s13239_s7 + $0x50] sm:$0xff]  ;;  %4214 = vmatpush.msra.mxu0 %v8947_v44 }
0x1784   :  { %4215 = vmatpush.msra.mxu0 %v8946_v0 }
0x1786   :  { %4216 = vmatpush.msra.mxu0 %v8945_v12  ;;  %v9467_v12 = vld [vmem:[%s13241_s9 + $0x2] ss:$0 sm:$0xff] }
0x1788   :  { %4217 = vmatpush.msra.mxu0 %v8944_v63 }
0x1790   :  { %3924 = vadd.xlane.f32.xlu1 %v3923_v54 }
0x1793   :  { %4058 = vadd.xlane.f32.xlu0 %v4057_v45 }
0x17a9   :  { %4090 = vrot.lane.b32.xlu1 %v11185_v36, %s13413_s27  ;;  %s13416_s27 = smov 8  }
0x17b0   :  { %v3389_v50 = vpop.xlane.xlu2 %3388 }
0x17b1   :  { %9689 = vrcp.f32 %v3389_v50  ;;  %4118 = vrot.lane.b32.xlu1 %v11351_v53, %s13415_s1 }
0x17b7   :  { %v9690_v39 = vpop.eup %9689 }
0x17b8   :  { %v3393_v17 = vmul.f32 %v9690_v39, %v11429_v20  ;;  %v3654_v10 = vpop.xlane.xlu2 %3653  ;;  %v3788_v41 = vpop.xlane.xlu0 %3787 }
0x17b9   :  { %9691 = vrcp.f32 %v3654_v10 }
0x17ba   :  { %8913 = vmatmul.msk.f32.vlgmr.msra.gmra.mxu3 %vm268_vm10, %v3393_v17  ;;  %9693 = vrcp.f32 %v3788_v41 }
0x17bb   :  { %3709 = vmatpush.msra.mxu3 %v9358_v32 }
0x17bf   :  { %v9692_v9 = vpop.eup %9691 }
0x17c0   :  { %v3660_v36 = vmul.f32 %v9692_v9, %v11434_v2  ;;  %v3523_v27 = vpop.xlane.xlu2 %3522  ;;  %v9694_v53 = vpop.eup %9693 }
0x17c1   :  { %9695 = vrcp.f32 %v3523_v27  ;;  %v3794_v20 = vmul.f32 %v9694_v53, %v11438_v46  ;;  %v3922_v47 = vpop.xlane.xlu1 %3921 }
0x17c2   :  { %8924 = vmatmul.msk.f32.vlgmr.msrb.gmra.mxu2 %vm268_vm10, %v3660_v36 }
0x17c7   :  { %v9696_v33 = vpop.eup %9695 }
0x17c8   :  { %v3527_v8 = vmul.f32 %v9696_v33, %v11444_v43  ;;  %v3657_v13 = vpop.xlane.xlu2 %3656  ;;  %v4056_v46 = vpop.xlane.xlu0 %4055 }
0x17c9   :  { %9697 = vrcp.f32 %v3657_v13 }
0x17ca   :  { %8919 = vmatmul.msk.f32.vlgmr.msrb.gmra.mxu3 %vm268_vm10, %v3527_v8  ;;  %8930 = vmatmul.msk.f32.vlgmr.msra.gmra.mxu2 %vm268_vm10, %v3794_v20 }
0x17cb   :  { %3843 = vmatpush.msrb.mxu3 %v9363_v35 }
0x17cf   :  { %v9698_v2 = vpop.eup %9697 }
0x17d0   :  { %v3661_v59 = vmul.f32 %v9698_v2, %v11454_v48  ;;  %v3791_v14 = vpop.xlane.xlu2 %3790 }
0x17d1   :  { %9699 = vrcp.f32 %v3791_v14 }
0x17d2   :  { %9701 = vrcp.f32 %v3922_v47  ;;  %8925 = vmatmul.msk.f32.vlgmr.msra.gmra.mxu3 %vm268_vm10, %v3661_v59 }
0x17d3   :  { %9703 = vrcp.f32 %v4056_v46 }
0x17d7   :  { %v9700_v55 = vpop.eup %9699 }
0x17d8   :  { %v9702_v43 = vpop.eup %9701  ;;  %v3795_v6 = vmul.f32 %v9700_v55, %v11462_v1  ;;  %v3957_v3 = vpop.permute.xlu2 %3956 }
0x17d9   :  { %3977 = vmatpush.msra.mxu3 %v3957_v3  ;;  %v3928_v34 = vmul.f32 %v9702_v43, %v11448_v31  ;;  %v4065_v19 = vpop.permute.xlu1 %4064  ;;  %v9704_v5 = vpop.eup %9703 }
0x17da   :  { %8931 = vmatmul.msk.f32.vlgmr.msrb.gmra.mxu3 %vm268_vm10, %v3795_v6  ;;  %v4062_v51 = vmul.f32 %v9704_v5, %v11456_v30 }
0x17db   :  { %v3931_v37 = vpop.permute.xlu0 %3930 }
0x17dc   :  { %3951 = vmatpush.msrb.mxu2 %v3931_v37 }
0x17dd   :  { %8936 = vmatmul.msk.f32.vlgmr.msrb.gmra.mxu2 %vm268_vm10, %v3928_v34 }
0x17de   :  { %4085 = vmatpush.msra.mxu2 %v4065_v19 }
0x17e5   :  { %8942 = vmatmul.msk.f32.vlgmr.msra.gmra.mxu2 %vm268_vm10, %v4062_v51 }
0x17f4   :  { %v3309_v48 = vpop.f32.mrf.mxu2 }
0x17f5   :  { %4120 = vrot.lane.b32.xlu1 %v3309_v48, %s13415_s1  ;;  %s13418_s1 = smov 16  }
0x17fc   :  { %v3417_v49 = vpop.f32.mrf.mxu2 }
0x17fd   :  { %4126 = vrot.lane.b32.xlu2 %v3417_v49, %s13416_s27 }
0x1803   :  { %v3925_v38 = vpop.xlane.xlu1 %3924 }
0x1804   :  { %v3551_v1 = vpop.f32.mrf.mxu2  ;;  %9705 = vrcp.f32 %v3925_v38 }
0x1805   :  { %4134 = vrot.lane.b32.xlu1 %v3551_v1, %s13417_s19 }
0x1806   :  { %v4059_v11 = vpop.xlane.xlu0 %4058 }
0x1807   :  { %9707 = vrcp.f32 %v4059_v11 }
0x180a   :  { %v9706_v31 = vpop.eup %9705 }
0x180b   :  { %v3929_v52 = vmul.f32 %v9706_v31, %v11483_v23 }
0x180d   :  { %8937 = vmatmul.msk.f32.vlgmr.msra.gmra.mxu3 %vm268_vm10, %v3929_v52  ;;  %v9708_v30 = vpop.eup %9707 }
0x180e   :  { %v4063_v42 = vmul.f32 %v9708_v30, %v11485_v58 }
0x181b   :  { %v4091_v15 = vpop.permute.xlu1 %4090 }
0x181c   :  { %4111 = vmatpush.msrb.mxu3 %v4091_v15  ;;  %v8956_v15 = vld [vmem:[%s13243_s11 + $0x58] sm:$0xff] }
0x181d   :  { %8943 = vmatmul.msk.f32.vlgmr.msrb.gmra.mxu3 %vm268_vm10, %v4063_v42  ;;  %4313 = vmatpush.msrb.mxu1 %v8956_v15 }
0x1823   :  { %v4119_v24 = vpop.permute.xlu1 %4118 }
0x1824   :  { %v4172_v50 = vsel %vm210_vm8, %v11323_v4, %v4119_v24  ;;  %v9468_v24 = vld [vmem:[%s13242_s10 + $0x2] ss:$0 sm:$0xff] }
0x183d   :  { %v3443_v40 = vpop.f32.mrf.mxu3 }
0x1845   :  { %v3685_v21 = vpop.f32.mrf.mxu2 }
0x1846   :  { %4142 = vrot.lane.b32.xlu2 %v3685_v21, %s13418_s1  ;;  %v8955_v21 = vld [vmem:[%s13243_s11 + $0x50] sm:$0xff] }
0x1847   :  { %4314 = vmatpush.msrb.mxu1 %v8955_v21 }
0x184d   :  { %v3819_v60 = vpop.f32.mrf.mxu2  ;;  %v3577_v61 = vpop.f32.mrf.mxu3 }
0x184e   :  { %4150 = vrot.lane.b32.xlu1 %v3819_v60, %s13419_s29  ;;  %v8953_v60 = vld [vmem:[%s13243_s11 + $0x40] sm:$0xff] }
0x1855   :  { %v3711_v26 = vpop.f32.mrf.mxu3 }
0x1856   :  { %4136 = vrot.lane.b32.xlu1 %v3577_v61, %s13417_s19  ;;  %s13422_s19 = smov 112  }
0x1857   :  { %v4127_v58 = vpop.permute.xlu2 %4126 }
0x1858   :  { %v4174_v39 = vsel %vm268_vm10, %v4172_v50, %v4127_v58  ;;  %v8974_v50 = vld [vmem:[%s13245_s13 + $0x170] sm:$0xff] }
0x185d   :  { %v3845_v7 = vpop.f32.mrf.mxu3 }
0x1860   :  { %v3953_v56 = vpop.f32.mrf.mxu2 }
0x1861   :  { %4158 = vrot.lane.b32.xlu0 %v3953_v56, %s13420_s20 }
0x1867   :  { %v4121_v23 = vpop.permute.xlu1 %4120 }
0x1868   :  { %v4087_v29 = vpop.f32.mrf.mxu2  ;;  %v4173_v4 = vsel %vm210_vm8, %v11349_v25, %v4121_v23  ;;  %v9466_v25 = vld [vmem:[%s13240_s8 + $0x2] ss:$0 sm:$0xff] }
0x1869   :  { %4144 = vrot.lane.b32.xlu0 %v3711_v26, %s13418_s1  ;;  %4166 = vrot.lane.b32.xlu2 %v4087_v29, %s13421_s28  ;;  %s13423_s1 = smov 108  }
0x1871   :  { %4128 = vrot.lane.b32.xlu2 %v3443_v40, %s13416_s27  ;;  %v8954_v40 = vld [vmem:[%s13243_s11 + $0x48] sm:$0xff]  ;;  %s13426_s27 = smov 68  }
0x1872   :  { %4315 = vmatpush.msrb.mxu1 %v8954_v40 }
0x1874   :  { %4316 = vmatpush.msrb.mxu1 %v8953_v60 }
0x1877   :  { %v4135_v54 = vpop.permute.xlu1 %4134 }
0x1878   :  { %v4176_v10 = vsel %vm1341_vm11, %v4174_v39, %v4135_v54  ;;  %v8973_v39 = vld [vmem:[%s13245_s13 + $0x168] sm:$0xff] }
0x1879   :  { %4152 = vrot.lane.b32.xlu2 %v3845_v7, %s13419_s29  ;;  %s13429_s29 = smov 56  }
0x1890   :  { %v3979_v57 = vpop.f32.mrf.mxu3 }
0x1891   :  { %4160 = vrot.lane.b32.xlu1 %v3979_v57, %s13420_s20  ;;  %s13424_s20 = smov 104  }
0x18a0   :  { %v4113_v18 = vpop.f32.mrf.mxu3  ;;  %v4143_v45 = vpop.permute.xlu2 %4142 }
0x18a1   :  { %4168 = vrot.lane.b32.xlu0 %v4113_v18, %s13421_s28  ;;  %v4178_v32 = vsel %vm1344_vm12, %v4176_v10, %v4143_v45  ;;  %v8975_v45 = vld [vmem:[%s13245_s13 + $0x178] sm:$0xff] }
0x18a2   :  { %4348 = vmatpush.msrb.mxu2 %v8975_v45 }
0x18a4   :  { %4349 = vmatpush.msrb.mxu2 %v8974_v50 }
0x18a6   :  { %4350 = vmatpush.msrb.mxu2 %v8973_v39 }
0x18c0   :  { %v4151_v17 = vpop.permute.xlu1 %4150 }
0x18c1   :  { %v4180_v41 = vsel %vm1347_vm13, %v4178_v32, %v4151_v17  ;;  %v8972_v32 = vld [vmem:[%s13245_s13 + $0x160] sm:$0xff] }
0x18c2   :  { %4351 = vmatpush.msrb.mxu2 %v8972_v32 }
0x18c3   :  { %v4167_v36 = vpop.permute.xlu2 %4166 }
0x18c8   :  { %v4137_v20 = vpop.permute.xlu1 %4136 }
0x18cb   :  { %v4129_v33 = vpop.permute.xlu2 %4128 }
0x18cc   :  { %v4175_v8 = vsel %vm268_vm10, %v4173_v4, %v4129_v33 }
0x18cd   :  { %v4177_v35 = vsel %vm1341_vm11, %v4175_v8, %v4137_v20  ;;  %v8967_v20 = vld [vmem:[%s13245_s13 + $0x138] sm:$0xff]  ;;  %v8966_v8 = vld [vmem:[%s13245_s13 + $0x130] sm:$0xff] }
0x18d3   :  { %v4159_v9 = vpop.permute.xlu0 %4158  ;;  %v4153_v59 = vpop.permute.xlu2 %4152 }
0x18d4   :  { %v4182_v27 = vsel %vm1350_vm14, %v4180_v41, %v4159_v9  ;;  %v8971_v9 = vld [vmem:[%s13245_s13 + $0x158] sm:$0xff] }
0x18d5   :  { %v4184_v53 = vsel %vm1353_vm15, %v4182_v27, %v4167_v36  ;;  %v8970_v36 = vld [vmem:[%s13245_s13 + $0x150] sm:$0xff]  ;;  %4352 = vmatpush.msrb.mxu2 %v8971_v9  ;;  %v8969_v27 = vld [vmem:[%s13245_s13 + $0x148] sm:$0xff] }
0x18d6   :  { %8949 = vmatmul.msk.f32.vlgmr.msra.gmra.mxu0 %vm73_vm0, %v4184_v53  ;;  %v8968_v53 = vld [vmem:[%s13245_s13 + $0x140] sm:$0xff] }
0x18d7   :  { %4353 = vmatpush.msrb.mxu2 %v8970_v36  ;;  %v9472_v36 = vld [vmem:[%s13237_s5 + $0x3] ss:$0 sm:$0xff] }
0x18d9   :  { %4354 = vmatpush.msrb.mxu2 %v8969_v27 }
0x18db   :  { %v4145_v13 = vpop.permute.xlu0 %4144  ;;  %4355 = vmatpush.msrb.mxu2 %v8968_v53 }
0x18dc   :  { %v4179_v2 = vsel %vm1344_vm12, %v4177_v35, %v4145_v13  ;;  %v8965_v35 = vld [vmem:[%s13245_s13 + $0x128] sm:$0xff] }
0x18dd   :  { %v4181_v14 = vsel %vm1347_vm13, %v4179_v2, %v4153_v59  ;;  %4356 = vmatpush.msrb.mxu2 %v8967_v20 }
0x18df   :  { %4357 = vmatpush.msrb.mxu2 %v8966_v8 }
0x18e1   :  { %4358 = vmatpush.msrb.mxu2 %v8965_v35 }
0x1903   :  { %v4161_v47 = vpop.permute.xlu1 %4160 }
0x1904   :  { %v4183_v46 = vsel %vm1350_vm14, %v4181_v14, %v4161_v47  ;;  %v8964_v47 = vld [vmem:[%s13245_s13 + $0x120] sm:$0xff]  ;;  %v8963_v14 = vld [vmem:[%s13245_s13 + $0x118] sm:$0xff] }
0x1905   :  { %4359 = vmatpush.msrb.mxu2 %v8964_v47 }
0x1907   :  { %4360 = vmatpush.msrb.mxu2 %v8963_v14 }
0x1913   :  { %v4169_v55 = vpop.permute.xlu0 %4168 }
0x1914   :  { %v4185_v43 = vsel %vm1353_vm15, %v4183_v46, %v4169_v55 }
0x1915   :  { %8950 = vmatmul.msk.f32.gmra.mxu0 %vm73_vm0, %v4185_v43 }
0x1953   :  { %v4219_v6 = vpop.f32.mrf.mxu0 }
0x1954   :  { %v4220_v3 = vadd.f32 %v9466_v25, %v4219_v6 }
0x1956   :  { %v11564_v34 = vadd.f32 %v4220_v3, %v11134_v28  ;;  %v8962_v3 = vld [vmem:[%s13245_s13 + $0x110] sm:$0xff] }
0x1957   :  { %4361 = vmatpush.msrb.mxu2 %v8962_v3 }
0x1958   :  { %v4231_v37 = vsel %vm73_vm0, %v11564_v34, 0.0 }
0x1959   :  { %4232 = vadd.xlane.f32.xlu2 %v4231_v37  ;;  %v8961_v37 = vld [vmem:[%s13245_s13 + $0x108] sm:$0xff] }
0x195a   :  { %4362 = vmatpush.msrb.mxu2 %v8961_v37 }
0x1992   :  { %v4222_v19 = vpop.f32.mrf.mxu0 }
0x1993   :  { %v4223_v5 = vadd.f32 %v9466_v25, %v4222_v19  ;;  %v8960_v19 = vld [vmem:[%s13245_s13 + $0x100] sm:$0xff] }
0x1994   :  { %4363 = vmatpush.msrb.mxu2 %v8960_v19 }
0x1995   :  { %v11569_v51 = vadd.f32 %v4223_v5, %v11139_v62  ;;  %v9469_v5 = vld [vmem:[%s13244_s12 + $0x2] ss:$0 sm:$0xff] }
0x1997   :  { %v4234_v48 = vsel %vm73_vm0, %v11569_v51, 0.0 }
0x1998   :  { %4235 = vadd.xlane.f32.xlu1 %v4234_v48 }
0x19cc   :  { %v4233_v49 = vpop.xlane.xlu2 %4232 }
0x19cd   :  { %v4237_v38 = vmul.f32 %v4233_v49, %v10126_v22 }
0x19cf   :  { %v4239_v1 = vsub.f32 %v11564_v34, %v4237_v38 }
0x19d1   :  { %v4241_v28 = vmul.f32 %v4239_v1, %v4239_v1 }
0x19d3   :  { %v4243_v31 = vsel %vm73_vm0, %v4241_v28, 0.0 }
0x19d4   :  { %4244 = vadd.xlane.f32.xlu0 %v4243_v31 }
0x1a0b   :  { %v4236_v52 = vpop.xlane.xlu1 %4235 }
0x1a0c   :  { %v4238_v11 = vmul.f32 %v4236_v52, %v10126_v22  ;;  %v9470_v52 = vld [vmem:[%s13246_s14 + $0x2] ss:$0 sm:$0xff] }
0x1a0e   :  { %v11578_v30 = vsub.f32 %v11569_v51, %v4238_v11 }
0x1a10   :  { %v4242_v62 = vmul.f32 %v11578_v30, %v11578_v30 }
0x1a12   :  { %v4246_v42 = vsel %vm73_vm0, %v4242_v62, 0.0 }
0x1a13   :  { %4247 = vadd.xlane.f32.xlu2 %v4246_v42 }
0x1a47   :  { %v4245_v61 = vpop.xlane.xlu0 %4244 }
0x1a48   :  { %v4249_v56 = vmul.f32 %v4245_v61, %v10126_v22 }
0x1a4a   :  { %v4251_v26 = vadd.f32 1e-05, %v4249_v56 }
0x1a4c   :  { %9709 = vrsqrt.f32 %v4251_v26  ;;  %vm4259_vm5 = vweird.f32 %v4251_v26 }
0x1a52   :  { %v9710_v29 = vpop.eup %9709 }
0x1a53   :  { %v4254_v7 = vmul.f32 %v9710_v29, %v4251_v26  ;;  %vm4260_vm4 = vweird.f32 %v9710_v29 }
0x1a54   :  { %vm4261_vm6 = vmor %vm4259_vm5, %vm4260_vm4 }
0x1a55   :  { %v4255_v57 = vmul.f32 %v9710_v29, %v4254_v7 }
0x1a57   :  { %v4256_v18 = vmul.f32 0.5, %v4255_v57 }
0x1a59   :  { %v4257_v44 = vsub.f32 1.5, %v4256_v18 }
0x1a5b   :  { %v4258_v0 = vmul.f32 %v9710_v29, %v4257_v44 }
0x1a5d   :  { %v4262_v63 = vsel %vm4261_vm6, %v9710_v29, %v4258_v0  ;;  %v8982_v0 = vld [vmem:[%s13238_s6 + $0x78] sm:$0xff] }
0x1a5e   :  { %v4273_v23 = vmul.f32 %v4262_v63, %v4239_v1  ;;  %4454 = vmatpush.msra.mxu3 %v8982_v0  ;;  %v8980_v63 = vld [vmem:[%s13238_s6 + $0x68] sm:$0xff] }
0x1a60   :  { %v4278_v58 = vmul.f32 %v9467_v12, %v4273_v23 }
0x1a62   :  { %v4283_v54 = vadd.f32 %v9468_v24, %v4278_v58 }
0x1a64   :  { %8958 = vmatmul.msk.f32.vlgmr.msrb.gmra.mxu1 %vm73_vm0, %v4283_v54 }
0x1a86   :  { %v4248_v17 = vpop.xlane.xlu2 %4247 }
0x1a87   :  { %v4250_v10 = vmul.f32 %v4248_v17, %v10126_v22 }
0x1a89   :  { %v4252_v41 = vadd.f32 1e-05, %v4250_v10 }
0x1a8b   :  { %9711 = vrsqrt.f32 %v4252_v41  ;;  %vm4269_vm1 = vweird.f32 %v4252_v41 }
0x1a91   :  { %v9712_v33 = vpop.eup %9711 }
0x1a92   :  { %v4264_v4 = vmul.f32 %v9712_v33, %v4252_v41  ;;  %vm4270_vm7 = vweird.f32 %v9712_v33  ;;  %v9471_v41 = vld [vmem:[%s13236_s4 + $0x3] ss:$0 sm:$0xff] }
0x1a93   :  { %vm4271_vm2 = vmor %vm4269_vm1, %vm4270_vm7 }
0x1a94   :  { %v4265_v13 = vmul.f32 %v9712_v33, %v4264_v4 }
0x1a96   :  { %v4266_v2 = vmul.f32 0.5, %v4265_v13 }
0x1a98   :  { %v4267_v59 = vsub.f32 1.5, %v4266_v2 }
0x1a9a   :  { %v4268_v46 = vmul.f32 %v9712_v33, %v4267_v59 }
0x1a9c   :  { %v4272_v55 = vsel %vm4271_vm2, %v9712_v33, %v4268_v46 }
0x1a9d   :  { %v4274_v43 = vmul.f32 %v4272_v55, %v11578_v30 }
0x1a9f   :  { %v4279_v25 = vmul.f32 %v9467_v12, %v4274_v43  ;;  %v8981_v12 = vld [vmem:[%s13238_s6 + $0x70] sm:$0xff] }
0x1aa0   :  { %4455 = vmatpush.msra.mxu3 %v8981_v12 }
0x1aa1   :  { %v4284_v6 = vadd.f32 %v9468_v24, %v4279_v25  ;;  %v8979_v24 = vld [vmem:[%s13238_s6 + $0x60] sm:$0xff] }
0x1aa2   :  { %4456 = vmatpush.msra.mxu3 %v8980_v63 }
0x1aa3   :  { %8959 = vmatmul.msk.f32.gmra.mxu1 %vm73_vm0, %v4284_v6 }
0x1aa4   :  { %4457 = vmatpush.msra.mxu3 %v8979_v24 }
0x1ae1   :  { %v4318_v48 = vpop.f32.mrf.mxu1 }
0x1ae2   :  { %v4319_v49 = vadd.f32 %v9469_v5, %v4318_v48 }
0x1ae4   :  { %v4324_v38 = vmax.f32 %v4319_v49, 0.0 }
0x1ae6   :  { %4364 = vmatmul.f32.vlgmr.msrb.gmra.mxu2 %v4324_v38 }
0x1b20   :  { %v4321_v1 = vpop.f32.mrf.mxu1 }
0x1b21   :  { %v4322_v28 = vadd.f32 %v9469_v5, %v4321_v1 }
0x1b23   :  { %v4325_v31 = vmax.f32 %v4322_v28, 0.0 }
0x1b25   :  { %4367 = vmatmul.f32.gmra.mxu2 %v4325_v31 }
0x1b69   :  { %v4365_v11 = vpop.f32.mrf.mxu2 }
0x1b6a   :  { %v4366_v30 = vadd.f32 %v9470_v52, %v4365_v11 }
0x1b6c   :  { %v11661_v62 = vadd.f32 %v4366_v30, %v11564_v34 }
0x1b6e   :  { %v4377_v42 = vsel %vm73_vm0, %v11661_v62, 0.0 }
0x1b6f   :  { %4378 = vadd.xlane.f32.xlu1 %v4377_v42 }
0x1ba8   :  { %v4368_v15 = vpop.f32.mrf.mxu2 }
0x1ba9   :  { %v4369_v21 = vadd.f32 %v9470_v52, %v4368_v15 }
0x1bab   :  { %v11666_v40 = vadd.f32 %v4369_v21, %v11569_v51 }
0x1bad   :  { %v4380_v60 = vsel %vm73_vm0, %v11666_v40, 0.0 }
0x1bae   :  { %4381 = vadd.xlane.f32.xlu0 %v4380_v60 }
0x1be2   :  { %v4379_v61 = vpop.xlane.xlu1 %4378 }
0x1be3   :  { %v4383_v56 = vmul.f32 %v4379_v61, %v10126_v22 }
0x1be5   :  { %v4385_v26 = vsub.f32 %v11661_v62, %v4383_v56 }
0x1be7   :  { %v4387_v34 = vmul.f32 %v4385_v26, %v4385_v26 }
0x1be9   :  { %v4389_v29 = vsel %vm73_vm0, %v4387_v34, 0.0 }
0x1bea   :  { %4390 = vadd.xlane.f32.xlu2 %v4389_v29 }
0x1c21   :  { %v4382_v7 = vpop.xlane.xlu0 %4381 }
0x1c22   :  { %v4384_v57 = vmul.f32 %v4382_v7, %v10126_v22 }
0x1c24   :  { %v4386_v18 = vsub.f32 %v11666_v40, %v4384_v57 }
0x1c26   :  { %v4388_v51 = vmul.f32 %v4386_v18, %v4386_v18 }
0x1c28   :  { %v4392_v44 = vsel %vm73_vm0, %v4388_v51, 0.0 }
0x1c29   :  { %4393 = vadd.xlane.f32.xlu1 %v4392_v44 }
0x1c5d   :  { %v4391_v23 = vpop.xlane.xlu2 %4390 }
0x1c5e   :  { %v4395_v58 = vmul.f32 %v4391_v23, %v10126_v22 }
0x1c60   :  { %v4397_v54 = vadd.f32 1e-05, %v4395_v58 }
0x1c62   :  { %9713 = vrsqrt.f32 %v4397_v54  ;;  %vm4405_vm4 = vweird.f32 %v4397_v54 }
0x1c68   :  { %v9714_v45 = vpop.eup %9713 }
0x1c69   :  { %v4400_v50 = vmul.f32 %v9714_v45, %v4397_v54  ;;  %vm4406_vm3 = vweird.f32 %v9714_v45 }
0x1c6a   :  { %vm4407_vm5 = vmor %vm4405_vm4, %vm4406_vm3 }
0x1c6b   :  { %v4401_v39 = vmul.f32 %v9714_v45, %v4400_v50 }
0x1c6d   :  { %v4402_v17 = vmul.f32 0.5, %v4401_v39 }
0x1c6f   :  { %v4403_v10 = vsub.f32 1.5, %v4402_v17 }
0x1c71   :  { %v4404_v32 = vmul.f32 %v9714_v45, %v4403_v10 }
0x1c73   :  { %v4408_v9 = vsel %vm4407_vm5, %v9714_v45, %v4404_v32 }
0x1c74   :  { %v4419_v27 = vmul.f32 %v4408_v9, %v4385_v26 }
0x1c76   :  { %v4424_v53 = vmul.f32 %v9471_v41, %v4419_v27 }
0x1c78   :  { %v4429_v33 = vadd.f32 %v9472_v36, %v4424_v53 }
0x1c7a   :  { %8983 = vmatmul.msk.f32.vlgmr.msra.gmra.mxu3 %vm73_vm0, %v4429_v33 }
0x1c9c   :  { %v4394_v20 = vpop.xlane.xlu1 %4393 }
0x1c9d   :  { %v4396_v4 = vmul.f32 %v4394_v20, %v10126_v22 }
0x1c9f   :  { %v4398_v8 = vadd.f32 1e-05, %v4396_v4 }
0x1ca1   :  { %9715 = vrsqrt.f32 %v4398_v8  ;;  %vm4415_vm7 = vweird.f32 %v4398_v8 }
0x1ca7   :  { %v9716_v13 = vpop.eup %9715 }
0x1ca8   :  { %v4410_v35 = vmul.f32 %v9716_v13, %v4398_v8  ;;  %vm4416_vm6 = vweird.f32 %v9716_v13 }
0x1ca9   :  { %vm4417_vm1 = vmor %vm4415_vm7, %vm4416_vm6 }
0x1caa   :  { %v4411_v2 = vmul.f32 %v9716_v13, %v4410_v35 }
0x1cac   :  { %v4412_v47 = vmul.f32 0.5, %v4411_v2 }
0x1cae   :  { %v4413_v59 = vsub.f32 1.5, %v4412_v47 }
0x1cb0   :  { %v4414_v14 = vmul.f32 %v9716_v13, %v4413_v59 }
0x1cb2   :  { %v4418_v46 = vsel %vm4417_vm1, %v9716_v13, %v4414_v14 }
0x1cb3   :  { %v4420_v55 = vmul.f32 %v4418_v46, %v4386_v18 }
0x1cb5   :  { %v4425_v43 = vmul.f32 %v9471_v41, %v4420_v55 }
0x1cb7   :  { %v4430_v25 = vadd.f32 %v9472_v36, %v4425_v43 }
0x1cb9   :  { %8984 = vmatmul.msk.f32.gmra.mxu3 %vm73_vm0, %v4430_v25 }
0x1cfd   :  { %v11698_v6 = vpop.f32.mrf.mxu3 }
0x1cfe   :  { %4599 = vrot.lane.b32.xlu1 %v11698_v6, %s13404_s22  ;;  %4466 = vrot.lane.b32.xlu0 %v11698_v6, %s13405_s26 }
0x1d06   :  { %4731 = vrot.lane.b32.xlu1 %v11698_v6, %s13381_s30  ;;  %4597 = vrot.lane.b32.xlu0 %v11698_v6, %s13409_s18 }
0x1d0e   :  { %4867 = vrot.lane.b32.xlu1 %v11698_v6, %s13383_s23 }
0x1d3c   :  { %v11710_v3 = vpop.f32.mrf.mxu3 }
0x1d3d   :  { %4625 = vrot.lane.b32.xlu1 %v11710_v3, %s13409_s18  ;;  %4493 = vrot.lane.b32.xlu2 %v11710_v3, %s13405_s26  ;;  %v11718_v37 = vpack.i.bf16 %v11710_v3, %v11698_v6 }
0x1d3f   :  { %9365 = vrot.lane.b32.xlu0 %v11718_v37, %s13408_s17 }
0x1d45   :  { %4761 = vrot.lane.b32.xlu1 %v11710_v3, %s13406_s15  ;;  %4733 = vrot.lane.b32.xlu2 %v11698_v6, %s13406_s15 }
0x1d47   :  { %4895 = vrot.lane.b32.xlu0 %v11710_v3, %s13383_s23 }
0x1d4d   :  { %4759 = vrot.lane.b32.xlu1 %v11710_v3, %s13381_s30  ;;  %4679 = vrot.lane.b32.xlu2 %v11698_v6, %s13407_s16 }
0x1d55   :  { %5135 = vrot.lane.b32.xlu1 %v11698_v6, %s13390_s25  ;;  %4865 = vrot.lane.b32.xlu2 %v11698_v6, %s13380_s0 }
0x1d5d   :  { %5001 = vrot.lane.b32.xlu2 %v11698_v6, %s13382_s2 }
0x1d65   :  { %4627 = vrot.lane.b32.xlu2 %v11710_v3, %s13404_s22 }
0x1d70   :  { %v4467_v19 = vpop.permute.xlu0 %4466  ;;  %v4600_v48 = vpop.permute.xlu1 %4599 }
0x1d71   :  { %8985 = vmatpush.xpose.msk.msrb.mxu0 %vm210_vm8, %v4467_v19 }
0x1d74   :  { %8986 = vmatmul.msk.f32.vlgmr.msrb.gmra.mxu0 %vm210_vm8, %v11698_v6 }
0x1d78   :  { %v4598_v38 = vpop.permute.xlu0 %4597  ;;  %v4732_v44 = vpop.permute.xlu1 %4731 }
0x1d80   :  { %v4868_v63 = vpop.permute.xlu1 %4867 }
0x1d97   :  { %v4494_v5 = vpop.permute.xlu2 %4493 }
0x1d98   :  { %8987 = vmatpush.xpose.msk.msra.mxu1 %vm210_vm8, %v4494_v5 }
0x1d9b   :  { %8988 = vmatmul.msk.f32.vlgmr.msra.gmra.mxu1 %vm210_vm8, %v11710_v3 }
0x1d9c   :  { %8991 = vmatpush.xpose.msk.msrb.mxu1 %vm210_vm8, %v4600_v48 }
0x1d9f   :  { %v11747_v49 = vpop.permute.xlu2 %4733 }
0x1da3   :  { %8992 = vmatmul.msk.f32.vlgmr.msrb.gmra.mxu1 %vm210_vm8, %v4598_v38 }
0x1da7   :  { %v4680_v1 = vpop.permute.xlu2 %4679 }
0x1daf   :  { %v11750_v28 = vpop.permute.xlu2 %4865  ;;  %v4626_v23 = vpop.permute.xlu1 %4625 }
0x1db1   :  { %v9366_v31 = vpop.permute.xlu0 %9365 }
0x1db2   :  { %v9368_v52 = vunpack.i.h.bf16 %v9366_v31  ;;  %v9367_v11 = vunpack.i.l.bf16 %v9366_v31 }
0x1db4   :  { %4566 = vmatpush.msrb.mxu3 %v9367_v11  ;;  %4592 = vmatpush.msra.mxu0 %v9368_v52 }
0x1db6   :  { %4700 = vmatpush.msrb.mxu0 %v4680_v1 }
0x1db7   :  { %v11752_v30 = vpop.permute.xlu2 %5001  ;;  %v11771_v45 = vpop.permute.xlu1 %4761 }
0x1db9   :  { %v11775_v39 = vpop.permute.xlu0 %4895 }
0x1dbf   :  { %v4628_v42 = vpop.permute.xlu2 %4627  ;;  %v11773_v50 = vpop.permute.xlu1 %4759 }
0x1dc0   :  { %8993 = vmatpush.xpose.msk.msra.mxu3 %vm210_vm8, %v4628_v42 }
0x1dc7   :  { %v5136_v17 = vpop.permute.xlu1 %5135 }
0x1df1   :  { %v4489_v15 = vpop.f32.mrf.mxu0 }
0x1df2   :  { %v4519_v21 = vmul.f32 0.17677669, %v4489_v15 }
0x1df4   :  { %v4521_v60 = vsel %vm10183_vm9, %v4519_v21, -1e+30 }
0x1df5   :  { %v4523_v61 = vsel %vm268_vm10, %v4521_v60, -inf }
0x1df6   :  { %4524 = vmax.xlane.f32.xlu2 %v4523_v61 }
0x1e0e   :  { %4999 = vrot.lane.b32.xlu2 %v11698_v6, %s13422_s19 }
0x1e18   :  { %v4516_v56 = vpop.f32.mrf.mxu1 }
0x1e19   :  { %v4520_v26 = vmul.f32 0.17677669, %v4516_v56 }
0x1e1b   :  { %v4522_v34 = vsel %vm10183_vm9, %v4520_v26, -1e+30 }
0x1e1c   :  { %v4526_v29 = vsel %vm268_vm10, %v4522_v34, -inf }
0x1e1d   :  { %4527 = vmax.xlane.f32.xlu0 %v4526_v29 }
0x1e20   :  { %v4622_v7 = vpop.f32.mrf.mxu1 }
0x1e21   :  { %v4653_v57 = vmul.f32 0.17677669, %v4622_v7 }
0x1e23   :  { %v4655_v18 = vsel %vm10183_vm9, %v4653_v57, -1e+30 }
0x1e24   :  { %v4657_v51 = vsel %vm268_vm10, %v4655_v18, -inf }
0x1e25   :  { %4658 = vmax.xlane.f32.xlu1 %v4657_v51 }
0x1e31   :  { %5027 = vrot.lane.b32.xlu0 %v11710_v3, %s13422_s19  ;;  %s13444_s19 = smov 76  }
0x1e3e   :  { %5133 = vrot.lane.b32.xlu1 %v11698_v6, %s13423_s1 }
0x1e69   :  { %v4525_v0 = vpop.xlane.xlu2 %4524 }
0x1e6a   :  { %v4529_v12 = vsub.f32 %v4521_v60, %v4525_v0 }
0x1e6c   :  { %v4531_v24 = vmul.f32 1.442695, %v4529_v12 }
0x1e6e   :  { %9717 = vpow2.f32 %v4531_v24 }
0x1e71   :  { %v5000_v8 = vpop.permute.xlu2 %4999 }
0x1e74   :  { %v9718_v58 = vpop.eup %9717 }
0x1e75   :  { %v4535_v54 = vsel %vm268_vm10, %v9718_v58, 0.0 }
0x1e76   :  { %4536 = vadd.xlane.f32.xlu2 %v4535_v54 }
0x1e8e   :  { %4893 = vrot.lane.b32.xlu2 %v11710_v3, %s13380_s0  ;;  %s13443_s0 = smov 100  }
0x1e90   :  { %v4528_v10 = vpop.xlane.xlu0 %4527 }
0x1e91   :  { %v4530_v32 = vsub.f32 %v4522_v34, %v4528_v10 }
0x1e93   :  { %v4533_v41 = vmul.f32 1.442695, %v4530_v32 }
0x1e95   :  { %9719 = vpow2.f32 %v4533_v41 }
0x1e96   :  { %5029 = vrot.lane.b32.xlu2 %v11710_v3, %s13382_s2 }
0x1e98   :  { %v4659_v9 = vpop.xlane.xlu1 %4658 }
0x1e99   :  { %v4663_v36 = vsub.f32 %v4655_v18, %v4659_v9 }
0x1e9b   :  { %v9720_v27 = vpop.eup %9719  ;;  %v4665_v53 = vmul.f32 1.442695, %v4663_v36 }
0x1e9c   :  { %v4538_v33 = vsel %vm268_vm10, %v9720_v27, 0.0 }
0x1e9d   :  { %9721 = vpow2.f32 %v4665_v53  ;;  %4539 = vadd.xlane.f32.xlu1 %v4538_v33 }
0x1e9e   :  { %5267 = vrot.lane.b32.xlu2 %v11698_v6, %s13424_s20 }
0x1ea3   :  { %v9722_v20 = vpop.eup %9721  ;;  %v5028_v43 = vpop.permute.xlu0 %5027 }
0x1ea4   :  { %v4669_v4 = vsel %vm268_vm10, %v9722_v20, 0.0 }
0x1ea5   :  { %4670 = vadd.xlane.f32.xlu0 %v4669_v4 }
0x1ea6   :  { %5161 = vrot.lane.b32.xlu2 %v11710_v3, %s13423_s1 }
0x1eae   :  { %5295 = vrot.lane.b32.xlu2 %v11710_v3, %s13424_s20  ;;  %s13434_s20 = smov 36  }
0x1eb0   :  { %v5134_v46 = vpop.permute.xlu1 %5133 }
0x1eb6   :  { %4705 = vrot.lane.b32.xlu2 %v11710_v3, %s13407_s16  ;;  %5269 = vrot.lane.b32.xlu1 %v11698_v6, %s13425_s21 }
0x1eb9   :  { %5403 = vrot.lane.b32.xlu0 %v11698_v6, %s13426_s27 }
0x1ebe   :  { %5163 = vrot.lane.b32.xlu1 %v11710_v3, %s13390_s25  ;;  %s13438_s25 = smov 20  }
0x1ec1   :  { %5297 = vrot.lane.b32.xlu0 %v11710_v3, %s13425_s21  ;;  %s13446_s21 = smov 104  }
0x1ec6   :  { %5401 = vrot.lane.b32.xlu1 %v11698_v6, %s13427_s24 }
0x1ec9   :  { %5429 = vrot.lane.b32.xlu0 %v11710_v3, %s13427_s24  ;;  %s13439_s24 = smov 24  }
0x1ece   :  { %5431 = vrot.lane.b32.xlu1 %v11710_v3, %s13426_s27  ;;  %s13437_s27 = smov 16  }
0x1ed1   :  { %9380 = vrot.lane.b32.xlu0 %v11718_v37, %s13428_s3  ;;  %s13430_s3 = smov 52  }
0x1ed6   :  { %9370 = vrot.lane.b32.xlu1 %v11718_v37, %s13429_s29  ;;  %s13432_s29 = smov 40  }
0x1ee9   :  { %v4537_v13 = vpop.xlane.xlu2 %4536 }
0x1eea   :  { %9723 = vrcp.f32 %v4537_v13 }
0x1ef0   :  { %v9724_v35 = vpop.eup %9723 }
0x1ef1   :  { %v4543_v2 = vmul.f32 %v9724_v35, %v9718_v58  ;;  %v4894_v47 = vpop.permute.xlu2 %4893 }
0x1ef3   :  { %8989 = vmatmul.msk.f32.vlgmr.msrb.gmra.mxu3 %vm268_vm10, %v4543_v2 }
0x1ef4   :  { %8997 = vmatpush.xpose.msk.msrb.mxu3 %vm210_vm8, %v11747_v49 }
0x1ef9   :  { %v5030_v59 = vpop.permute.xlu2 %5029 }
0x1efb   :  { %8994 = vmatmul.msk.f32.vlgmr.msra.gmra.mxu3 %vm210_vm8, %v4626_v23 }
0x1efc   :  { %9003 = vmatpush.xpose.msk.msra.mxu3 %vm210_vm8, %v4868_v63 }
0x1f01   :  { %v5268_v14 = vpop.permute.xlu2 %5267 }
0x1f03   :  { %8998 = vmatmul.msk.f32.vlgmr.msrb.gmra.mxu3 %vm210_vm8, %v4732_v44 }
0x1f04   :  { %9009 = vmatpush.xpose.msk.msrb.mxu3 %vm210_vm8, %v11752_v30 }
0x1f09   :  { %v5162_v55 = vpop.permute.xlu2 %5161 }
0x1f0b   :  { %9004 = vmatmul.msk.f32.vlgmr.msra.gmra.mxu3 %vm210_vm8, %v11750_v28 }
0x1f0c   :  { %9015 = vmatpush.xpose.msk.msra.mxu3 %vm210_vm8, %v5136_v17 }
0x1f10   :  { %v4540_v25 = vpop.xlane.xlu1 %4539 }
0x1f11   :  { %v5296_v19 = vpop.permute.xlu2 %5295  ;;  %9725 = vrcp.f32 %v4540_v25 }
0x1f13   :  { %9010 = vmatmul.msk.f32.vlgmr.msrb.gmra.mxu3 %vm210_vm8, %v5000_v8 }
0x1f17   :  { %v9726_v5 = vpop.eup %9725 }
0x1f18   :  { %v4544_v48 = vmul.f32 %v9726_v5, %v9720_v27  ;;  %v4671_v49 = vpop.xlane.xlu0 %4670 }
0x1f19   :  { %v4706_v38 = vpop.permute.xlu2 %4705  ;;  %9727 = vrcp.f32 %v4671_v49 }
0x1f1a   :  { %4726 = vmatpush.msra.mxu1 %v4706_v38  ;;  %8990 = vmatmul.msk.f32.vlgmr.msra.gmra.mxu0 %vm268_vm10, %v4544_v48 }
0x1f1b   :  { %9016 = vmatmul.msk.f32.vlgmr.msra.gmra.mxu3 %vm210_vm8, %v5134_v46  ;;  %8999 = vmatpush.xpose.msk.msra.mxu0 %vm210_vm8, %v11771_v45 }
0x1f1f   :  { %v9728_v1 = vpop.eup %9727 }
0x1f20   :  { %v4677_v28 = vmul.f32 %v9728_v1, %v9722_v20 }
0x1f22   :  { %8995 = vmatmul.msk.f32.vlgmr.msrb.gmra.mxu0 %vm268_vm10, %v4677_v28 }
0x1f23   :  { %9005 = vmatpush.xpose.msk.msrb.mxu0 %vm210_vm8, %v11775_v39 }
0x1f28   :  { %v5270_v31 = vpop.permute.xlu1 %5269 }
0x1f29   :  { %9021 = vmatpush.xpose.msk.msrb.mxu3 %vm210_vm8, %v5270_v31 }
0x1f2a   :  { %9000 = vmatmul.msk.f32.vlgmr.msra.gmra.mxu0 %vm210_vm8, %v11773_v50 }
0x1f2b   :  { %9011 = vmatpush.xpose.msk.msra.mxu0 %vm210_vm8, %v5030_v59  ;;  %v5404_v52 = vpop.permute.xlu0 %5403 }
0x1f2c   :  { %9022 = vmatmul.msk.f32.vlgmr.msrb.gmra.mxu3 %vm210_vm8, %v5268_v14 }
0x1f2d   :  { %9027 = vmatpush.xpose.msk.msra.mxu3 %vm210_vm8, %v5404_v52 }
0x1f30   :  { %v5164_v11 = vpop.permute.xlu1 %5163 }
0x1f32   :  { %9006 = vmatmul.msk.f32.vlgmr.msrb.gmra.mxu0 %vm210_vm8, %v4894_v47 }
0x1f33   :  { %9017 = vmatpush.xpose.msk.msrb.mxu0 %vm210_vm8, %v5164_v11  ;;  %v5298_v42 = vpop.permute.xlu0 %5297 }
0x1f38   :  { %v5402_v30 = vpop.permute.xlu1 %5401 }
0x1f39   :  { %9028 = vmatmul.msk.f32.vlgmr.msra.gmra.mxu3 %vm210_vm8, %v5402_v30 }
0x1f3a   :  { %9012 = vmatmul.msk.f32.vlgmr.msra.gmra.mxu0 %vm210_vm8, %v5028_v43 }
0x1f3b   :  { %9023 = vmatpush.xpose.msk.msra.mxu0 %vm210_vm8, %v5298_v42  ;;  %v5430_v56 = vpop.permute.xlu0 %5429 }
0x1f40   :  { %v5432_v15 = vpop.permute.xlu1 %5431 }
0x1f42   :  { %9018 = vmatmul.msk.f32.vlgmr.msrb.gmra.mxu0 %vm210_vm8, %v5162_v55 }
0x1f43   :  { %9029 = vmatpush.xpose.msk.msrb.mxu0 %vm210_vm8, %v5432_v15 }
0x1f48   :  { %v9371_v21 = vpop.permute.xlu1 %9370 }
0x1f49   :  { %v9373_v60 = vunpack.i.h.bf16 %v9371_v21  ;;  %v9372_v61 = vunpack.i.l.bf16 %v9371_v21 }
0x1f4a   :  { %9024 = vmatmul.msk.f32.vlgmr.msra.gmra.mxu0 %vm210_vm8, %v5296_v19 }
0x1f4b   :  { %4834 = vmatpush.msrb.mxu1 %v9372_v61  ;;  %4860 = vmatpush.msra.mxu2 %v9373_v60 }
0x1f52   :  { %9030 = vmatmul.msk.f32.vlgmr.msrb.gmra.mxu0 %vm210_vm8, %v5430_v56 }
0x1f76   :  { %v11843_v26 = vpop.f32.mrf.mxu3 }
0x1f7e   :  { %v4650_v34 = vpop.f32.mrf.mxu3 }
0x1f7f   :  { %v4654_v29 = vmul.f32 0.17677669, %v4650_v34 }
0x1f81   :  { %v11847_v7 = vsel %vm10183_vm9, %v4654_v29, -1e+30 }
0x1f82   :  { %v4660_v57 = vsel %vm268_vm10, %v11847_v7, -inf }
0x1f83   :  { %4661 = vmax.xlane.f32.xlu2 %v4660_v57 }
0x1f86   :  { %v4756_v18 = vpop.f32.mrf.mxu3 }
0x1f87   :  { %v4787_v51 = vmul.f32 0.17677669, %v4756_v18 }
0x1f89   :  { %v11853_v44 = vsel %vm10183_vm9, %v4787_v51, -1e+30 }
0x1f8a   :  { %v4791_v0 = vsel %vm268_vm10, %v11853_v44, -inf }
0x1f8b   :  { %4792 = vmax.xlane.f32.xlu1 %v4791_v0 }
0x1f8e   :  { %v4890_v63 = vpop.f32.mrf.mxu3 }
0x1f8f   :  { %v4921_v8 = vmul.f32 0.17677669, %v4890_v63 }
0x1f91   :  { %v11889_v2 = vsel %vm10183_vm9, %v4921_v8, -1e+30 }
0x1f92   :  { %v4925_v46 = vsel %vm268_vm10, %v11889_v2, -inf }
0x1f96   :  { %v5024_v23 = vpop.f32.mrf.mxu3 }
0x1f97   :  { %v11857_v12 = vpop.f32.mrf.mxu0  ;;  %v5055_v39 = vmul.f32 0.17677669, %v5024_v23 }
0x1f99   :  { %v11871_v32 = vsel %vm10183_vm9, %v5055_v39, -1e+30 }
0x1f9a   :  { %v5059_v36 = vsel %vm268_vm10, %v11871_v32, -inf }
0x1f9b   :  { %9375 = vrot.lane.b32.xlu2 %v11718_v37, %s13430_s3  ;;  %s13431_s3 = smov 44  }
0x1f9e   :  { %v5158_v41 = vpop.f32.mrf.mxu3 }
0x1f9f   :  { %v11861_v24 = vpop.f32.mrf.mxu0  ;;  %v5189_v53 = vmul.f32 0.17677669, %v5158_v41 }
0x1fa1   :  { %v11883_v20 = vsel %vm10183_vm9, %v5189_v53, -1e+30 }
0x1fa2   :  { %v5193_v13 = vsel %vm268_vm10, %v11883_v20, -inf }
0x1fa7   :  { %v4784_v58 = vpop.f32.mrf.mxu0 }
0x1fa8   :  { %v4788_v54 = vmul.f32 0.17677669, %v4784_v58 }
0x1faa   :  { %v11865_v45 = vsel %vm10183_vm9, %v4788_v54, -1e+30  ;;  %v11942_v54 = vpop.permute.xlu0 %9380 }
0x1fab   :  { %v4794_v50 = vsel %vm268_vm10, %v11865_v45, -inf }
0x1fac   :  { %4795 = vmax.xlane.f32.xlu0 %v4794_v50 }
0x1faf   :  { %v4918_v17 = vpop.f32.mrf.mxu0  ;;  %v5292_v4 = vpop.f32.mrf.mxu3 }
0x1fb0   :  { %v4922_v10 = vmul.f32 0.17677669, %v4918_v17  ;;  %v5323_v28 = vmul.f32 0.17677669, %v5292_v4 }
0x1fb2   :  { %v11875_v9 = vsel %vm10183_vm9, %v4922_v10, -1e+30  ;;  %v11919_v11 = vsel %vm10183_vm9, %v5323_v28, -1e+30 }
0x1fb3   :  { %v4928_v27 = vsel %vm268_vm10, %v11875_v9, -inf  ;;  %v5327_v21 = vsel %vm268_vm10, %v11919_v11, -inf }
0x1fb4   :  { %5060 = vmax.xlane.f32.xlu0 %v5059_v36  ;;  %4929 = vmax.xlane.f32.xlu1 %v4928_v27 }
0x1fb7   :  { %v5052_v33 = vpop.f32.mrf.mxu0 }
0x1fb8   :  { %v5056_v55 = vmul.f32 0.17677669, %v5052_v33 }
0x1fba   :  { %v11901_v5 = vsel %vm10183_vm9, %v5056_v55, -1e+30 }
0x1fbb   :  { %v5062_v1 = vsel %vm268_vm10, %v11901_v5, -inf }
0x1fbc   :  { %5194 = vmax.xlane.f32.xlu1 %v5193_v13  ;;  %v5426_v59 = vpop.f32.mrf.mxu3 }
0x1fbd   :  { %v5457_v25 = vmul.f32 0.17677669, %v5426_v59 }
0x1fbf   :  { %v5186_v35 = vpop.f32.mrf.mxu0  ;;  %v11905_v48 = vsel %vm10183_vm9, %v5457_v25, -1e+30 }
0x1fc0   :  { %v5190_v47 = vmul.f32 0.17677669, %v5186_v35  ;;  %v5461_v31 = vsel %vm268_vm10, %v11905_v48, -inf }
0x1fc2   :  { %v11893_v14 = vsel %vm10183_vm9, %v5190_v47, -1e+30 }
0x1fc3   :  { %v5196_v43 = vsel %vm268_vm10, %v11893_v14, -inf }
0x1fc4   :  { %4926 = vmax.xlane.f32.xlu2 %v4925_v46  ;;  %5197 = vmax.xlane.f32.xlu0 %v5196_v43 }
0x1fc7   :  { %v5320_v19 = vpop.f32.mrf.mxu0 }
0x1fc8   :  { %v5324_v49 = vmul.f32 0.17677669, %v5320_v19 }
0x1fca   :  { %v11909_v38 = vsel %vm10183_vm9, %v5324_v49, -1e+30 }
0x1fcb   :  { %v5330_v52 = vsel %vm268_vm10, %v11909_v38, -inf }
0x1fcc   :  { %5063 = vmax.xlane.f32.xlu2 %v5062_v1  ;;  %5462 = vmax.xlane.f32.xlu0 %v5461_v31 }
0x1fcd   :  { %5331 = vmax.xlane.f32.xlu1 %v5330_v52 }
0x1fcf   :  { %v5454_v30 = vpop.f32.mrf.mxu0 }
0x1fd0   :  { %v5458_v42 = vmul.f32 0.17677669, %v5454_v30 }
0x1fd2   :  { %v11923_v15 = vsel %vm10183_vm9, %v5458_v42, -1e+30 }
0x1fd3   :  { %v5464_v60 = vsel %vm268_vm10, %v11923_v15, -inf }
0x1fd4   :  { %5328 = vmax.xlane.f32.xlu2 %v5327_v21 }
0x1fd5   :  { %5465 = vmax.xlane.f32.xlu1 %v5464_v60 }
0x1ff6   :  { %v4662_v61 = vpop.xlane.xlu2 %4661 }
0x1ff7   :  { %v4664_v56 = vsub.f32 %v11847_v7, %v4662_v61 }
0x1ff9   :  { %v4667_v34 = vmul.f32 1.442695, %v4664_v56 }
0x1ffb   :  { %9729 = vpow2.f32 %v4667_v34 }
0x1ffe   :  { %v4793_v29 = vpop.xlane.xlu1 %4792  ;;  %v11930_v57 = vpop.permute.xlu2 %9375 }
0x1fff   :  { %v4797_v18 = vsub.f32 %v11853_v44, %v4793_v29  ;;  %v9378_v51 = vunpack.i.h.bf16 %v11930_v57 }
0x2001   :  { %v11934_v0 = vpop.eup %9729  ;;  %v4799_v63 = vmul.f32 1.442695, %v4797_v18  ;;  %4994 = vmatpush.msrb.mxu2 %v9378_v51 }
0x2002   :  { %v4672_v23 = vsel %vm268_vm10, %v11934_v0, 0.0 }
0x2003   :  { %9731 = vpow2.f32 %v4799_v63  ;;  %4673 = vadd.xlane.f32.xlu2 %v4672_v23 }
0x2009   :  { %v11938_v58 = vpop.eup %9731 }
0x200a   :  { %v4803_v7 = vsel %vm268_vm10, %v11938_v58, 0.0 }
0x200b   :  { %4804 = vadd.xlane.f32.xlu0 %v4803_v7 }
0x201f   :  { %v4796_v44 = vpop.xlane.xlu0 %4795 }
0x2020   :  { %v4798_v50 = vsub.f32 %v11865_v45, %v4796_v44 }
0x2022   :  { %v4801_v39 = vmul.f32 1.442695, %v4798_v50 }
0x2024   :  { %9733 = vpow2.f32 %v4801_v39 }
0x2027   :  { %v4930_v17 = vpop.xlane.xlu1 %4929  ;;  %v5061_v36 = vpop.xlane.xlu0 %5060 }
0x2028   :  { %v4932_v35 = vsub.f32 %v11875_v9, %v4930_v17 }
0x202a   :  { %v11945_v10 = vpop.eup %9733 }
0x202b   :  { %v4806_v41 = vsel %vm268_vm10, %v11945_v10, 0.0 }
0x202c   :  { %4807 = vadd.xlane.f32.xlu1 %v4806_v41 }
0x202f   :  { %v5195_v27 = vpop.xlane.xlu1 %5194 }
0x2030   :  { %v5199_v53 = vsub.f32 %v11883_v20, %v5195_v27  ;;  %v4935_v20 = vmul.f32 1.442695, %v4932_v35 }
0x2032   :  { %v5201_v33 = vmul.f32 1.442695, %v5199_v53 }
0x2034   :  { %9735 = vpow2.f32 %v5201_v33  ;;  %v9377_v33 = vunpack.i.l.bf16 %v11930_v57 }
0x2037   :  { %v4927_v4 = vpop.xlane.xlu2 %4926  ;;  %v5198_v8 = vpop.xlane.xlu0 %5197 }
0x2038   :  { %v4931_v13 = vsub.f32 %v11889_v2, %v4927_v4  ;;  %v5200_v45 = vsub.f32 %v11893_v14, %v5198_v8  ;;  %v5065_v14 = vsub.f32 %v11871_v32, %v5061_v36  ;;  %v9382_v4 = vunpack.i.l.bf16 %v11942_v54 }
0x203a   :  { %v4933_v47 = vmul.f32 1.442695, %v4931_v13  ;;  %v11953_v59 = vpop.eup %9735  ;;  %v5203_v46 = vmul.f32 1.442695, %v5200_v45  ;;  %v9383_v13 = vunpack.i.h.bf16 %v11942_v54 }
0x203b   :  { %v5205_v55 = vsel %vm268_vm10, %v11953_v59, 0.0 }
0x203c   :  { %9737 = vpow2.f32 %v4933_v47  ;;  %5206 = vadd.xlane.f32.xlu2 %v5205_v55 }
0x203d   :  { %9739 = vpow2.f32 %v5203_v46 }
0x203e   :  { %9741 = vpow2.f32 %v4935_v20 }
0x203f   :  { %v5463_v25 = vpop.xlane.xlu0 %5462  ;;  %v5064_v52 = vpop.xlane.xlu2 %5063 }
0x2040   :  { %v5332_v43 = vpop.xlane.xlu1 %5331  ;;  %v5467_v28 = vsub.f32 %v11905_v48, %v5463_v25  ;;  %v5066_v42 = vsub.f32 %v11901_v5, %v5064_v52 }
0x2041   :  { %v5334_v19 = vsub.f32 %v11909_v38, %v5332_v43  ;;  %v5067_v38 = vmul.f32 1.442695, %v5065_v14 }
0x2042   :  { %v11958_v2 = vpop.eup %9737  ;;  %v5469_v32 = vmul.f32 1.442695, %v5467_v28  ;;  %v5069_v61 = vmul.f32 1.442695, %v5066_v42 }
0x2043   :  { %v11961_v9 = vpop.eup %9739  ;;  %v5337_v49 = vmul.f32 1.442695, %v5334_v19  ;;  %v4937_v1 = vsel %vm268_vm10, %v11958_v2, 0.0 }
0x2044   :  { %v5208_v31 = vsel %vm268_vm10, %v11961_v9, 0.0  ;;  %4938 = vadd.xlane.f32.xlu0 %v4937_v1  ;;  %v11968_v30 = vpop.eup %9741 }
0x2045   :  { %5209 = vadd.xlane.f32.xlu1 %v5208_v31  ;;  %9743 = vpow2.f32 %v5337_v49  ;;  %v4940_v21 = vsel %vm268_vm10, %v11968_v30, 0.0 }
0x2046   :  { %9745 = vpow2.f32 %v5067_v38 }
0x2047   :  { %9747 = vpow2.f32 %v5469_v32  ;;  %v5329_v56 = vpop.xlane.xlu2 %5328 }
0x2048   :  { %9749 = vpow2.f32 %v5069_v61  ;;  %v5333_v5 = vsub.f32 %v11919_v11, %v5329_v56  ;;  %v5466_v50 = vpop.xlane.xlu1 %5465 }
0x2049   :  { %v5468_v39 = vsub.f32 %v11923_v15, %v5466_v50 }
0x204a   :  { %v5335_v63 = vmul.f32 1.442695, %v5333_v5 }
0x204b   :  { %v11973_v60 = vpop.eup %9743  ;;  %v5471_v17 = vmul.f32 1.442695, %v5468_v39 }
0x204c   :  { %4941 = vadd.xlane.f32.xlu0 %v4940_v21  ;;  %v5342_v48 = vsel %vm268_vm10, %v11973_v60, 0.0  ;;  %v11977_v34 = vpop.eup %9745  ;;  %9751 = vpow2.f32 %v5335_v63 }
0x204d   :  { %5343 = vadd.xlane.f32.xlu1 %v5342_v48  ;;  %v11979_v29 = vpop.eup %9747  ;;  %v5071_v18 = vsel %vm268_vm10, %v11977_v34, 0.0  ;;  %9753 = vpow2.f32 %v5471_v17 }
0x204e   :  { %v5473_v51 = vsel %vm268_vm10, %v11979_v29, 0.0  ;;  %v11988_v23 = vpop.eup %9749 }
0x204f   :  { %v5074_v7 = vsel %vm268_vm10, %v11988_v23, 0.0 }
0x2052   :  { %v11992_v11 = vpop.eup %9751 }
0x2053   :  { %v5339_v44 = vsel %vm268_vm10, %v11992_v11, 0.0  ;;  %v12003_v36 = vpop.eup %9753 }
0x2054   :  { %5072 = vadd.xlane.f32.xlu0 %v5071_v18  ;;  %9385 = vrot.lane.b32.xlu2 %v11718_v37, %s13431_s3  ;;  %s13433_s3 = smov 4   ;;  %v5476_v53 = vsel %vm268_vm10, %v12003_v36, 0.0 }
0x2055   :  { %5474 = vadd.xlane.f32.xlu1 %v5473_v51 }
0x205c   :  { %5075 = vadd.xlane.f32.xlu0 %v5074_v7 }
0x2064   :  { %5340 = vadd.xlane.f32.xlu0 %v5339_v44 }
0x206e   :  { %9390 = vrot.lane.b32.xlu1 %v11718_v37, %s13432_s29  ;;  %s13436_s29 = smov 12  }
0x2076   :  { %v4674_v41 = vpop.xlane.xlu2 %4673  ;;  %5537 = vrot.lane.b32.xlu1 %v11861_v24, %s13433_s3 }
0x2077   :  { %9755 = vrcp.f32 %v4674_v41 }
0x2078   :  { %5483 = vrot.lane.b32.xlu0 %v11698_v6, %s13434_s20 }
0x207d   :  { %v9756_v27 = vpop.eup %9755  ;;  %5477 = vadd.xlane.f32.xlu2 %v5476_v53 }
0x207e   :  { %v4678_v15 = vmul.f32 %v9756_v27, %v11934_v0  ;;  %v4805_v37 = vpop.xlane.xlu0 %4804 }
0x207f   :  { %9757 = vrcp.f32 %v4805_v37 }
0x2080   :  { %5509 = vrot.lane.b32.xlu0 %v11710_v3, %s13434_s20  ;;  %8996 = vmatmul.msk.f32.vlgmr.msra.gmra.mxu1 %vm268_vm10, %v4678_v15  ;;  %s13435_s20 = smov 8  }
0x2081   :  { %4968 = vmatpush.msra.mxu1 %v9377_v33 }
0x2085   :  { %v9758_v6 = vpop.eup %9757 }
0x2086   :  { %v4811_v24 = vmul.f32 %v9758_v6, %v11938_v58  ;;  %v9036_v6 = vld [vmem:[%s13239_s7 + $0x78] sm:$0xff] }
0x2088   :  { %9001 = vmatmul.msk.f32.vlgmr.msrb.gmra.mxu1 %vm268_vm10, %v4811_v24  ;;  %v9035_v24 = vld [vmem:[%s13239_s7 + $0x70] sm:$0xff] }
0x2089   :  { %5102 = vmatpush.msrb.mxu1 %v9382_v4  ;;  %v9034_v4 = vld [vmem:[%s13239_s7 + $0x68] sm:$0xff] }
0x209f   :  { %v4808_v0 = vpop.xlane.xlu1 %4807 }
0x20a0   :  { %9759 = vrcp.f32 %v4808_v0  ;;  %v9033_v0 = vld [vmem:[%s13239_s7 + $0x60] sm:$0xff] }
0x20a6   :  { %v9760_v8 = vpop.eup %9759 }
0x20a7   :  { %v4812_v57 = vmul.f32 %v9760_v8, %v11945_v10 }
0x20a9   :  { %9002 = vmatmul.msk.f32.vlgmr.msra.gmra.mxu2 %vm268_vm10, %v4812_v57 }
0x20aa   :  { %5128 = vmatpush.msra.mxu2 %v9383_v13 }
0x20af   :  { %v5207_v3 = vpop.xlane.xlu2 %5206 }
0x20b7   :  { %v4939_v45 = vpop.xlane.xlu0 %4938  ;;  %v9386_v35 = vpop.permute.xlu2 %9385 }
0x20b8   :  { %9761 = vrcp.f32 %v4939_v45  ;;  %v9387_v55 = vunpack.i.l.bf16 %v9386_v35  ;;  %v5210_v20 = vpop.xlane.xlu1 %5209  ;;  %v9388_v25 = vunpack.i.h.bf16 %v9386_v35 }
0x20be   :  { %v9762_v58 = vpop.eup %9761 }
0x20bf   :  { %v4945_v47 = vmul.f32 %v9762_v58, %v11958_v2  ;;  %v4942_v46 = vpop.xlane.xlu0 %4941 }
0x20c0   :  { %9763 = vrcp.f32 %v4942_v46  ;;  %v5344_v14 = vpop.xlane.xlu1 %5343 }
0x20c1   :  { %9007 = vmatmul.msk.f32.vlgmr.msra.gmra.mxu1 %vm268_vm10, %v4945_v47 }
0x20c2   :  { %5236 = vmatpush.msra.mxu1 %v9387_v55 }
0x20c6   :  { %v9764_v10 = vpop.eup %9763 }
0x20c7   :  { %v4946_v54 = vmul.f32 %v9764_v10, %v11968_v30  ;;  %v5073_v43 = vpop.xlane.xlu0 %5072 }
0x20c8   :  { %9765 = vrcp.f32 %v5073_v43  ;;  %v5475_v30 = vpop.xlane.xlu1 %5474 }
0x20c9   :  { %9008 = vmatmul.msk.f32.vlgmr.msrb.gmra.mxu2 %vm268_vm10, %v4946_v54  ;;  %9767 = vrcp.f32 %v5207_v3 }
0x20ca   :  { %5262 = vmatpush.msrb.mxu2 %v9388_v25 }
0x20ce   :  { %v9766_v19 = vpop.eup %9765 }
0x20cf   :  { %v5079_v2 = vmul.f32 %v9766_v19, %v11977_v34  ;;  %v5076_v49 = vpop.xlane.xlu0 %5075  ;;  %v9768_v1 = vpop.eup %9767 }
0x20d0   :  { %9769 = vrcp.f32 %v5076_v49  ;;  %v5213_v31 = vmul.f32 %v9768_v1, %v11953_v59 }
0x20d1   :  { %9013 = vmatmul.msk.f32.vlgmr.msrb.gmra.mxu1 %vm268_vm10, %v5079_v2  ;;  %9771 = vrcp.f32 %v5210_v20 }
0x20d6   :  { %v9770_v28 = vpop.eup %9769 }
0x20d7   :  { %v5080_v52 = vmul.f32 %v9770_v28, %v11988_v23  ;;  %v5341_v38 = vpop.xlane.xlu0 %5340  ;;  %v9772_v32 = vpop.eup %9771 }
0x20d8   :  { %9773 = vrcp.f32 %v5341_v38  ;;  %v5214_v42 = vmul.f32 %v9772_v32, %v11961_v9 }
0x20d9   :  { %9014 = vmatmul.msk.f32.vlgmr.msra.gmra.mxu2 %vm268_vm10, %v5080_v52  ;;  %9019 = vmatmul.msk.f32.vlgmr.msra.gmra.mxu1 %vm268_vm10, %v5213_v31  ;;  %9775 = vrcp.f32 %v5344_v14 }
0x20da   :  { %9777 = vrcp.f32 %v5475_v30 }
0x20de   :  { %v9774_v21 = vpop.eup %9773 }
0x20df   :  { %v5347_v56 = vmul.f32 %v9774_v21, %v11992_v11  ;;  %v9776_v34 = vpop.eup %9775 }
0x20e0   :  { %v9391_v48 = vpop.permute.xlu1 %9390  ;;  %v5348_v5 = vmul.f32 %v9776_v34, %v11973_v60  ;;  %v9778_v18 = vpop.eup %9777 }
0x20e1   :  { %9020 = vmatmul.msk.f32.vlgmr.msrb.gmra.mxu2 %vm268_vm10, %v5214_v42  ;;  %v9393_v61 = vunpack.i.h.bf16 %v9391_v48  ;;  %v9392_v59 = vunpack.i.l.bf16 %v9391_v48  ;;  %v5481_v51 = vmul.f32 %v9778_v18, %v11979_v29 }
0x20e3   :  { %5370 = vmatpush.msrb.mxu1 %v9392_v59  ;;  %5396 = vmatpush.msra.mxu2 %v9393_v61 }
0x20e4   :  { %9025 = vmatmul.msk.f32.vlgmr.msrb.gmra.mxu1 %vm268_vm10, %v5347_v56 }
0x20e8   :  { %v5538_v8 = vpop.permute.xlu1 %5537 }
0x20e9   :  { %9026 = vmatmul.msk.f32.vlgmr.msra.gmra.mxu2 %vm268_vm10, %v5348_v5  ;;  %v5591_v58 = vsel %vm210_vm8, %v11843_v26, %v5538_v8 }
0x20ea   :  { %v5484_v9 = vpop.permute.xlu0 %5483 }
0x20eb   :  { %5504 = vmatpush.msra.mxu1 %v5484_v9 }
0x20ec   :  { %9031 = vmatmul.msk.f32.vlgmr.msra.gmra.mxu1 %vm268_vm10, %v5481_v51 }
0x20ed   :  { %5633 = vmatpush.msrb.mxu1 %v9036_v6  ;;  %v9064_v6 = vld [vmem:[%s13245_s13 + $0x1f8] sm:$0xff] }
0x20ef   :  { %5634 = vmatpush.msrb.mxu1 %v9035_v24  ;;  %v9063_v24 = vld [vmem:[%s13245_s13 + $0x1f0] sm:$0xff] }
0x20f0   :  { %v5478_v63 = vpop.xlane.xlu2 %5477 }
0x20f1   :  { %9779 = vrcp.f32 %v5478_v63  ;;  %5635 = vmatpush.msrb.mxu1 %v9034_v4 }
0x20f2   :  { %v5510_v23 = vpop.permute.xlu0 %5509 }
0x20f3   :  { %5530 = vmatpush.msrb.mxu2 %v5510_v23  ;;  %5636 = vmatpush.msrb.mxu1 %v9033_v0  ;;  %v9062_v0 = vld [vmem:[%s13245_s13 + $0x1e8] sm:$0xff] }
0x20f5   :  { %5767 = vmatpush.msra.mxu1 %v9064_v6 }
0x20f7   :  { %v9780_v7 = vpop.eup %9779  ;;  %5768 = vmatpush.msra.mxu1 %v9063_v24  ;;  %v9071_v24 = vld [vmem:[%s13238_s6 + $0x98] sm:$0xff] }
0x20f8   :  { %v5482_v11 = vmul.f32 %v9780_v7, %v12003_v36  ;;  %5873 = vmatpush.msra.mxu2 %v9071_v24 }
0x20f9   :  { %5769 = vmatpush.msra.mxu1 %v9062_v0  ;;  %v9069_v0 = vld [vmem:[%s13238_s6 + $0x88] sm:$0xff] }
0x20fa   :  { %9032 = vmatmul.msk.f32.vlgmr.msrb.gmra.mxu2 %vm268_vm10, %v5482_v11 }
0x20fd   :  { %v4728_v44 = vpop.f32.mrf.mxu1 }
0x2105   :  { %v4836_v60 = vpop.f32.mrf.mxu1 }
0x2106   :  { %5545 = vrot.lane.b32.xlu0 %v4836_v60, %s13435_s20 }
0x212c   :  { %v4862_v29 = vpop.f32.mrf.mxu2 }
0x213e   :  { %v4970_v50 = vpop.f32.mrf.mxu1 }
0x213f   :  { %5553 = vrot.lane.b32.xlu1 %v4970_v50, %s13436_s29  ;;  %v9045_v50 = vld [vmem:[%s13243_s11 + $0x78] sm:$0xff] }
0x2140   :  { %5732 = vmatpush.msra.mxu0 %v9045_v50 }
0x214c   :  { %v4996_v17 = vpop.f32.mrf.mxu2 }
0x214e   :  { %v5104_v39 = vpop.f32.mrf.mxu1 }
0x214f   :  { %5561 = vrot.lane.b32.xlu0 %v5104_v39, %s13437_s27  ;;  %v9043_v39 = vld [vmem:[%s13243_s11 + $0x68] sm:$0xff] }
0x2156   :  { %v5238_v41 = vpop.f32.mrf.mxu1 }
0x2157   :  { %5547 = vrot.lane.b32.xlu0 %v4862_v29, %s13435_s20  ;;  %5569 = vrot.lane.b32.xlu1 %v5238_v41, %s13438_s25  ;;  %v9044_v29 = vld [vmem:[%s13243_s11 + $0x70] sm:$0xff]  ;;  %s13445_s20 = smov 68  }
0x2158   :  { %5733 = vmatpush.msra.mxu0 %v9044_v29 }
0x215a   :  { %5734 = vmatpush.msra.mxu0 %v9043_v39 }
0x215c   :  { %v5130_v36 = vpop.f32.mrf.mxu2 }
0x215f   :  { %5539 = vrot.lane.b32.xlu1 %v4728_v44, %s13433_s3  ;;  %s13440_s3 = smov 116  }
0x2161   :  { %v5372_v27 = vpop.f32.mrf.mxu1 }
0x2162   :  { %5577 = vrot.lane.b32.xlu2 %v5372_v27, %s13439_s24 }
0x2164   :  { %v5264_v53 = vpop.f32.mrf.mxu2 }
0x2167   :  { %5555 = vrot.lane.b32.xlu1 %v4996_v17, %s13436_s29  ;;  %v9042_v17 = vld [vmem:[%s13243_s11 + $0x60] sm:$0xff]  ;;  %s13441_s29 = smov 112  }
0x2168   :  { %5735 = vmatpush.msra.mxu0 %v9042_v17 }
0x2169   :  { %v5506_v15 = vpop.f32.mrf.mxu1 }
0x216a   :  { %5585 = vrot.lane.b32.xlu0 %v5506_v15, %s13421_s28 }
0x216c   :  { %v5398_v37 = vpop.f32.mrf.mxu2 }
0x216d   :  { %5579 = vrot.lane.b32.xlu2 %v5398_v37, %s13439_s24  ;;  %s13447_s24 = smov 56  }
0x216f   :  { %5571 = vrot.lane.b32.xlu1 %v5264_v53, %s13438_s25  ;;  %s13442_s25 = smov 72  }
0x2172   :  { %5563 = vrot.lane.b32.xlu0 %v5130_v36, %s13437_s27 }
0x2178   :  { %v5546_v57 = vpop.permute.xlu0 %5545 }
0x2179   :  { %v5593_v47 = vsel %vm268_vm10, %v5591_v58, %v5546_v57  ;;  %v9475_v58 = vld [vmem:[%s13242_s10 + $0x3] ss:$0 sm:$0xff] }
0x217d   :  { %v5532_v33 = vpop.f32.mrf.mxu2 }
0x217e   :  { %5587 = vrot.lane.b32.xlu0 %v5532_v33, %s13421_s28 }
0x21b1   :  { %v5554_v13 = vpop.permute.xlu1 %5553 }
0x21b2   :  { %v5595_v46 = vsel %vm1341_vm11, %v5593_v47, %v5554_v13  ;;  %v9474_v13 = vld [vmem:[%s13241_s9 + $0x3] ss:$0 sm:$0xff] }
0x21bc   :  { %v5578_v54 = vpop.permute.xlu2 %5577 }
0x21c1   :  { %v5562_v3 = vpop.permute.xlu0 %5561 }
0x21c2   :  { %v5597_v55 = vsel %vm1344_vm12, %v5595_v46, %v5562_v3 }
0x21c7   :  { %v5580_v38 = vpop.permute.xlu2 %5579 }
0x21c9   :  { %v5570_v45 = vpop.permute.xlu1 %5569  ;;  %v5548_v35 = vpop.permute.xlu0 %5547 }
0x21ca   :  { %v5599_v10 = vsel %vm1347_vm13, %v5597_v55, %v5570_v45  ;;  %v9061_v45 = vld [vmem:[%s13245_s13 + $0x1e0] sm:$0xff]  ;;  %v9060_v55 = vld [vmem:[%s13245_s13 + $0x1d8] sm:$0xff] }
0x21cb   :  { %v5601_v43 = vsel %vm1350_vm14, %v5599_v10, %v5578_v54  ;;  %5770 = vmatpush.msra.mxu1 %v9061_v45  ;;  %v9059_v10 = vld [vmem:[%s13245_s13 + $0x1d0] sm:$0xff] }
0x21cd   :  { %5771 = vmatpush.msra.mxu1 %v9060_v55 }
0x21cf   :  { %5772 = vmatpush.msra.mxu1 %v9059_v10  ;;  %v9478_v10 = vld [vmem:[%s13236_s4 + $0x4] ss:$0 sm:$0xff] }
0x21d1   :  { %v5540_v20 = vpop.permute.xlu1 %5539 }
0x21d2   :  { %v5592_v26 = vsel %vm210_vm8, %v11857_v12, %v5540_v20  ;;  %v9473_v12 = vld [vmem:[%s13240_s8 + $0x3] ss:$0 sm:$0xff] }
0x21d3   :  { %v5594_v49 = vsel %vm268_vm10, %v5592_v26, %v5548_v35 }
0x21d9   :  { %v5556_v14 = vpop.permute.xlu1 %5555 }
0x21da   :  { %v5596_v1 = vsel %vm1341_vm11, %v5594_v49, %v5556_v14  ;;  %v9056_v14 = vld [vmem:[%s13245_s13 + $0x1b8] sm:$0xff] }
0x21dc   :  { %v5586_v25 = vpop.permute.xlu0 %5585 }
0x21dd   :  { %v5603_v19 = vsel %vm1353_vm15, %v5601_v43, %v5586_v25  ;;  %v9058_v43 = vld [vmem:[%s13245_s13 + $0x1c8] sm:$0xff]  ;;  %v9057_v25 = vld [vmem:[%s13245_s13 + $0x1c0] sm:$0xff] }
0x21de   :  { %9038 = vmatmul.msk.f32.vlgmr.msrb.gmra.mxu1 %vm73_vm0, %v5603_v19 }
0x21df   :  { %5773 = vmatpush.msra.mxu1 %v9058_v43 }
0x21e1   :  { %v5572_v31 = vpop.permute.xlu1 %5571  ;;  %5774 = vmatpush.msra.mxu1 %v9057_v25  ;;  %v9479_v25 = vld [vmem:[%s13237_s5 + $0x4] ss:$0 sm:$0xff] }
0x21e3   :  { %5775 = vmatpush.msra.mxu1 %v9056_v14 }
0x21e4   :  { %v5564_v2 = vpop.permute.xlu0 %5563 }
0x21e5   :  { %v5598_v28 = vsel %vm1344_vm12, %v5596_v1, %v5564_v2  ;;  %v9055_v2 = vld [vmem:[%s13245_s13 + $0x1b0] sm:$0xff]  ;;  %v9054_v1 = vld [vmem:[%s13245_s13 + $0x1a8] sm:$0xff] }
0x21e6   :  { %v5600_v52 = vsel %vm1347_vm13, %v5598_v28, %v5572_v31  ;;  %5776 = vmatpush.msra.mxu1 %v9055_v2  ;;  %v9053_v31 = vld [vmem:[%s13245_s13 + $0x1a0] sm:$0xff] }
0x21e7   :  { %v5602_v30 = vsel %vm1350_vm14, %v5600_v52, %v5580_v38  ;;  %v9052_v38 = vld [vmem:[%s13245_s13 + $0x198] sm:$0xff] }
0x21e8   :  { %5777 = vmatpush.msra.mxu1 %v9054_v1 }
0x21ea   :  { %5778 = vmatpush.msra.mxu1 %v9053_v31 }
0x21ec   :  { %5779 = vmatpush.msra.mxu1 %v9052_v38 }
0x21f0   :  { %v5588_v32 = vpop.permute.xlu0 %5587 }
0x21f1   :  { %v5604_v42 = vsel %vm1353_vm15, %v5602_v30, %v5588_v32 }
0x21f2   :  { %9039 = vmatmul.msk.f32.gmra.mxu1 %vm73_vm0, %v5604_v42 }
0x225b   :  { %v5638_v21 = vpop.f32.mrf.mxu1 }
0x225c   :  { %v5639_v48 = vadd.f32 %v9473_v12, %v5638_v21 }
0x225e   :  { %v12085_v61 = vadd.f32 %v5639_v48, %v11661_v62  ;;  %v9051_v48 = vld [vmem:[%s13245_s13 + $0x190] sm:$0xff] }
0x225f   :  { %5780 = vmatpush.msra.mxu1 %v9051_v48 }
0x2260   :  { %v5650_v59 = vsel %vm73_vm0, %v12085_v61, 0.0 }
0x2261   :  { %5651 = vadd.xlane.f32.xlu1 %v5650_v59  ;;  %v9050_v59 = vld [vmem:[%s13245_s13 + $0x188] sm:$0xff] }
0x2262   :  { %5781 = vmatpush.msra.mxu1 %v9050_v59 }
0x226f   :  { %v5641_v56 = vpop.f32.mrf.mxu1 }
0x2270   :  { %v5642_v34 = vadd.f32 %v9473_v12, %v5641_v56  ;;  %v9049_v56 = vld [vmem:[%s13245_s13 + $0x180] sm:$0xff] }
0x2271   :  { %5782 = vmatpush.msra.mxu1 %v9049_v56 }
0x2272   :  { %v12090_v5 = vadd.f32 %v5642_v34, %v11666_v40  ;;  %v9476_v34 = vld [vmem:[%s13244_s12 + $0x3] ss:$0 sm:$0xff] }
0x2274   :  { %v5653_v18 = vsel %vm73_vm0, %v12090_v5, 0.0 }
0x2275   :  { %5654 = vadd.xlane.f32.xlu2 %v5653_v18 }
0x22d4   :  { %v5652_v9 = vpop.xlane.xlu1 %5651 }
0x22d5   :  { %v5656_v51 = vmul.f32 %v5652_v9, %v10126_v22 }
0x22d7   :  { %v5658_v63 = vsub.f32 %v12085_v61, %v5656_v51 }
0x22d9   :  { %v5660_v62 = vmul.f32 %v5658_v63, %v5658_v63 }
0x22db   :  { %v5662_v23 = vsel %vm73_vm0, %v5660_v62, 0.0 }
0x22dc   :  { %5663 = vadd.xlane.f32.xlu0 %v5662_v23 }
0x22e8   :  { %v5655_v7 = vpop.xlane.xlu2 %5654 }
0x22e9   :  { %v5657_v11 = vmul.f32 %v5655_v7, %v10126_v22  ;;  %v9477_v7 = vld [vmem:[%s13246_s14 + $0x3] ss:$0 sm:$0xff] }
0x22eb   :  { %v12099_v44 = vsub.f32 %v12090_v5, %v5657_v11 }
0x22ed   :  { %v5661_v40 = vmul.f32 %v12099_v44, %v12099_v44 }
0x22ef   :  { %v5665_v60 = vsel %vm73_vm0, %v5661_v40, 0.0 }
0x22f0   :  { %5666 = vadd.xlane.f32.xlu2 %v5665_v60 }
0x234f   :  { %v5664_v41 = vpop.xlane.xlu0 %5663 }
0x2350   :  { %v5668_v36 = vmul.f32 %v5664_v41, %v10126_v22 }
0x2352   :  { %v5670_v27 = vadd.f32 1e-05, %v5668_v36 }
0x2354   :  { %9781 = vrsqrt.f32 %v5670_v27  ;;  %vm5678_vm3 = vweird.f32 %v5670_v27 }
0x235a   :  { %v9782_v53 = vpop.eup %9781 }
0x235b   :  { %v5673_v15 = vmul.f32 %v9782_v53, %v5670_v27  ;;  %vm5679_vm2 = vweird.f32 %v9782_v53 }
0x235c   :  { %vm5680_vm4 = vmor %vm5678_vm3, %vm5679_vm2 }
0x235d   :  { %v5674_v37 = vmul.f32 %v9782_v53, %v5673_v15 }
0x235f   :  { %v5675_v33 = vmul.f32 0.5, %v5674_v37 }
0x2361   :  { %v5676_v4 = vsub.f32 1.5, %v5675_v33 }
0x2363   :  { %v5677_v8 = vmul.f32 %v9782_v53, %v5676_v4  ;;  %v5667_v57 = vpop.xlane.xlu2 %5666  ;;  %v9070_v4 = vld [vmem:[%s13238_s6 + $0x90] sm:$0xff] }
0x2364   :  { %v5669_v3 = vmul.f32 %v5667_v57, %v10126_v22  ;;  %5874 = vmatpush.msra.mxu2 %v9070_v4 }
0x2365   :  { %v5681_v35 = vsel %vm5680_vm4, %v9782_v53, %v5677_v8  ;;  %v9068_v8 = vld [vmem:[%s13238_s6 + $0x80] sm:$0xff] }
0x2366   :  { %v5692_v47 = vmul.f32 %v5681_v35, %v5658_v63  ;;  %v5671_v46 = vadd.f32 1e-05, %v5669_v3  ;;  %5875 = vmatpush.msra.mxu2 %v9069_v0 }
0x2368   :  { %v5697_v20 = vmul.f32 %v9474_v13, %v5692_v47  ;;  %9783 = vrsqrt.f32 %v5671_v46  ;;  %vm5688_vm6 = vweird.f32 %v5671_v46  ;;  %5876 = vmatpush.msra.mxu2 %v9068_v8 }
0x236a   :  { %v5702_v54 = vadd.f32 %v9475_v58, %v5697_v20 }
0x236c   :  { %9047 = vmatmul.msk.f32.vlgmr.msra.gmra.mxu0 %vm73_vm0, %v5702_v54 }
0x236e   :  { %v9784_v19 = vpop.eup %9783 }
0x236f   :  { %v5683_v26 = vmul.f32 %v9784_v19, %v5671_v46  ;;  %vm5689_vm5 = vweird.f32 %v9784_v19 }
0x2370   :  { %vm5690_vm7 = vmor %vm5688_vm6, %vm5689_vm5 }
0x2371   :  { %v5684_v49 = vmul.f32 %v9784_v19, %v5683_v26 }
0x2373   :  { %v5685_v28 = vmul.f32 0.5, %v5684_v49 }
0x2375   :  { %v5686_v52 = vsub.f32 1.5, %v5685_v28 }
0x2377   :  { %v5687_v30 = vmul.f32 %v9784_v19, %v5686_v52 }
0x2379   :  { %v5691_v32 = vsel %vm5690_vm7, %v9784_v19, %v5687_v30 }
0x237a   :  { %v5693_v42 = vmul.f32 %v5691_v32, %v12099_v44 }
0x237c   :  { %v5698_v12 = vmul.f32 %v9474_v13, %v5693_v42 }
0x237e   :  { %v5703_v21 = vadd.f32 %v9475_v58, %v5698_v12 }
0x2380   :  { %9048 = vmatmul.msk.f32.gmra.mxu0 %vm73_vm0, %v5703_v21 }
0x23e9   :  { %v5737_v18 = vpop.f32.mrf.mxu0 }
0x23ea   :  { %v5738_v9 = vadd.f32 %v9476_v34, %v5737_v18 }
0x23ec   :  { %v5743_v51 = vmax.f32 %v5738_v9, 0.0 }
0x23ee   :  { %5783 = vmatmul.f32.vlgmr.msra.gmra.mxu1 %v5743_v51 }
0x23fd   :  { %v5740_v63 = vpop.f32.mrf.mxu0 }
0x23fe   :  { %v5741_v62 = vadd.f32 %v9476_v34, %v5740_v63 }
0x2400   :  { %v5744_v23 = vmax.f32 %v5741_v62, 0.0 }
0x2402   :  { %5786 = vmatmul.f32.gmra.mxu1 %v5744_v23 }
0x246b   :  { %v5784_v11 = vpop.f32.mrf.mxu1 }
0x246c   :  { %v5785_v44 = vadd.f32 %v9477_v7, %v5784_v11 }
0x246e   :  { %v12182_v40 = vadd.f32 %v5785_v44, %v12085_v61 }
0x2470   :  { %v5796_v60 = vsel %vm73_vm0, %v12182_v40, 0.0 }
0x2471   :  { %5797 = vadd.xlane.f32.xlu1 %v5796_v60 }
0x247f   :  { %v5787_v50 = vpop.f32.mrf.mxu1 }
0x2480   :  { %v5788_v29 = vadd.f32 %v9477_v7, %v5787_v50 }
0x2482   :  { %v12187_v39 = vadd.f32 %v5788_v29, %v12090_v5 }
0x2484   :  { %v5799_v17 = vsel %vm73_vm0, %v12187_v39, 0.0 }
0x2485   :  { %5800 = vadd.xlane.f32.xlu0 %v5799_v17 }
0x24e4   :  { %v5798_v41 = vpop.xlane.xlu1 %5797 }
0x24e5   :  { %v5802_v36 = vmul.f32 %v5798_v41, %v10126_v22 }
0x24e7   :  { %v5804_v27 = vsub.f32 %v12182_v40, %v5802_v36 }
0x24e9   :  { %v5806_v61 = vmul.f32 %v5804_v27, %v5804_v27 }
0x24eb   :  { %v5808_v53 = vsel %vm73_vm0, %v5806_v61, 0.0 }
0x24ec   :  { %5809 = vadd.xlane.f32.xlu2 %v5808_v53 }
0x24f8   :  { %v5801_v15 = vpop.xlane.xlu0 %5800 }
0x24f9   :  { %v5803_v37 = vmul.f32 %v5801_v15, %v10126_v22 }
0x24fb   :  { %v5805_v33 = vsub.f32 %v12187_v39, %v5803_v37 }
0x24fd   :  { %v5807_v5 = vmul.f32 %v5805_v33, %v5805_v33 }
0x24ff   :  { %v5811_v6 = vsel %vm73_vm0, %v5807_v5, 0.0 }
0x2500   :  { %5812 = vadd.xlane.f32.xlu1 %v5811_v6 }
0x255f   :  { %v5810_v57 = vpop.xlane.xlu2 %5809 }
0x2560   :  { %v5814_v13 = vmul.f32 %v5810_v57, %v10126_v22 }
0x2562   :  { %v5816_v3 = vadd.f32 1e-05, %v5814_v13 }
0x2564   :  { %9785 = vrsqrt.f32 %v5816_v3  ;;  %vm5824_vm2 = vweird.f32 %v5816_v3 }
0x256a   :  { %v9786_v45 = vpop.eup %9785 }
0x256b   :  { %v5819_v35 = vmul.f32 %v9786_v45, %v5816_v3  ;;  %vm5825_vm1 = vweird.f32 %v9786_v45 }
0x256c   :  { %vm5826_vm3 = vmor %vm5824_vm2, %vm5825_vm1 }
0x256d   :  { %v5820_v58 = vmul.f32 %v9786_v45, %v5819_v35 }
0x256f   :  { %v5821_v47 = vmul.f32 0.5, %v5820_v58 }
0x2571   :  { %v5822_v46 = vsub.f32 1.5, %v5821_v47 }
0x2573   :  { %v5823_v55 = vmul.f32 %v9786_v45, %v5822_v46  ;;  %v5813_v20 = vpop.xlane.xlu1 %5812 }
0x2574   :  { %v5815_v54 = vmul.f32 %v5813_v20, %v10126_v22 }
0x2575   :  { %v5827_v43 = vsel %vm5826_vm3, %v9786_v45, %v5823_v55 }
0x2576   :  { %v5838_v19 = vmul.f32 %v5827_v43, %v5804_v27  ;;  %v5817_v14 = vadd.f32 1e-05, %v5815_v54 }
0x2578   :  { %v5843_v26 = vmul.f32 %v9478_v10, %v5838_v19  ;;  %9787 = vrsqrt.f32 %v5817_v14  ;;  %vm5834_vm5 = vweird.f32 %v5817_v14 }
0x257a   :  { %v5848_v2 = vadd.f32 %v9479_v25, %v5843_v26 }
0x257c   :  { %9072 = vmatmul.msk.f32.vlgmr.msra.gmra.mxu2 %vm73_vm0, %v5848_v2 }
0x257e   :  { %v9788_v49 = vpop.eup %9787 }
0x257f   :  { %v5829_v1 = vmul.f32 %v9788_v49, %v5817_v14  ;;  %vm5835_vm4 = vweird.f32 %v9788_v49 }
0x2580   :  { %vm5836_vm6 = vmor %vm5834_vm5, %vm5835_vm4 }
0x2581   :  { %v5830_v28 = vmul.f32 %v9788_v49, %v5829_v1 }
0x2583   :  { %v5831_v31 = vmul.f32 0.5, %v5830_v28 }
0x2585   :  { %v5832_v52 = vsub.f32 1.5, %v5831_v31 }
0x2587   :  { %v5833_v38 = vmul.f32 %v9788_v49, %v5832_v52 }
0x2589   :  { %v5837_v30 = vsel %vm5836_vm6, %v9788_v49, %v5833_v38 }
0x258a   :  { %v5839_v32 = vmul.f32 %v5837_v30, %v5805_v33 }
0x258c   :  { %v5844_v42 = vmul.f32 %v9478_v10, %v5839_v32 }
0x258e   :  { %v5849_v12 = vadd.f32 %v9479_v25, %v5844_v42 }
0x2590   :  { %9073 = vmatmul.msk.f32.gmra.mxu2 %vm73_vm0, %v5849_v12 }
0x25ff   :  { %v12219_v21 = vpop.f32.mrf.mxu2 }
0x2600   :  { %6018 = vrot.lane.b32.xlu1 %v12219_v21, %s13404_s22  ;;  %5885 = vrot.lane.b32.xlu0 %v12219_v21, %s13405_s26 }
0x2608   :  { %6016 = vrot.lane.b32.xlu0 %v12219_v21, %s13409_s18 }
0x2613   :  { %v12227_v48 = vpop.f32.mrf.mxu2 }
0x2614   :  { %6044 = vrot.lane.b32.xlu1 %v12227_v48, %s13409_s18  ;;  %5912 = vrot.lane.b32.xlu2 %v12227_v48, %s13405_s26  ;;  %v12235_v59 = vpack.i.bf16 %v12227_v48, %v12219_v21 }
0x2616   :  { %9395 = vrot.lane.b32.xlu0 %v12235_v59, %s13408_s17 }
0x261c   :  { %6046 = vrot.lane.b32.xlu2 %v12227_v48, %s13404_s22 }
0x266e   :  { %v5913_v56 = vpop.permute.xlu2 %5912 }
0x266f   :  { %9076 = vmatpush.xpose.msk.msrb.mxu0 %vm210_vm8, %v5913_v56 }
0x2672   :  { %v5886_v34 = vpop.permute.xlu0 %5885  ;;  %9077 = vmatmul.msk.f32.vlgmr.msrb.gmra.mxu0 %vm210_vm8, %v12227_v48  ;;  %v6019_v18 = vpop.permute.xlu1 %6018 }
0x2673   :  { %9074 = vmatpush.xpose.msk.msrb.mxu3 %vm210_vm8, %v5886_v34  ;;  %9080 = vmatpush.xpose.msk.msra.mxu0 %vm210_vm8, %v6019_v18 }
0x2676   :  { %9075 = vmatmul.msk.f32.vlgmr.msrb.gmra.mxu3 %vm210_vm8, %v12219_v21  ;;  %v6047_v23 = vpop.permute.xlu2 %6046 }
0x267a   :  { %v6017_v9 = vpop.permute.xlu0 %6016 }
0x267b   :  { %9081 = vmatmul.msk.f32.vlgmr.msra.gmra.mxu0 %vm210_vm8, %v6017_v9 }
0x2686   :  { %v12293_v15 = vpop.permute.xlu1 %6044 }
0x2688   :  { %v9396_v51 = vpop.permute.xlu0 %9395 }
0x2689   :  { %v9398_v63 = vunpack.i.h.bf16 %v9396_v51  ;;  %v9397_v62 = vunpack.i.l.bf16 %v9396_v51 }
0x268b   :  { %5985 = vmatpush.msrb.mxu2 %v9397_v62  ;;  %6011 = vmatpush.msra.mxu3 %v9398_v63 }
0x268d   :  { %9082 = vmatpush.xpose.msk.msra.mxu2 %vm210_vm8, %v6047_v23 }
0x26ef   :  { %v5935_v7 = vpop.f32.mrf.mxu0 }
0x26f0   :  { %v5939_v11 = vmul.f32 0.17677669, %v5935_v7 }
0x26f2   :  { %v5941_v44 = vsel %vm10183_vm9, %v5939_v11, -1e+30 }
0x26f3   :  { %v5945_v60 = vsel %vm268_vm10, %v5941_v44, -inf }
0x26f4   :  { %5946 = vmax.xlane.f32.xlu1 %v5945_v60 }
0x26f8   :  { %v6041_v50 = vpop.f32.mrf.mxu0 }
0x26f9   :  { %v6072_v29 = vmul.f32 0.17677669, %v6041_v50  ;;  %v5908_v17 = vpop.f32.mrf.mxu3 }
0x26fa   :  { %v5938_v41 = vmul.f32 0.17677669, %v5908_v17 }
0x26fb   :  { %v6074_v36 = vsel %vm10183_vm9, %v6072_v29, -1e+30 }
0x26fc   :  { %v5940_v27 = vsel %vm10183_vm9, %v5938_v41, -1e+30  ;;  %v6076_v61 = vsel %vm268_vm10, %v6074_v36, -inf }
0x26fd   :  { %6077 = vmax.xlane.f32.xlu0 %v6076_v61  ;;  %v5942_v53 = vsel %vm268_vm10, %v5940_v27, -inf }
0x26fe   :  { %5943 = vmax.xlane.f32.xlu2 %v5942_v53 }
0x270d   :  { %6178 = vrot.lane.b32.xlu1 %v12227_v48, %s13381_s30 }
0x2711   :  { %6152 = vrot.lane.b32.xlu0 %v12219_v21, %s13406_s15 }
0x2715   :  { %6420 = vrot.lane.b32.xlu1 %v12219_v21, %s13382_s2 }
0x2716   :  { %6098 = vrot.lane.b32.xlu2 %v12219_v21, %s13407_s16 }
0x2719   :  { %6150 = vrot.lane.b32.xlu0 %v12219_v21, %s13381_s30 }
0x271d   :  { %6448 = vrot.lane.b32.xlu1 %v12227_v48, %s13382_s2 }
0x271e   :  { %6180 = vrot.lane.b32.xlu2 %v12227_v48, %s13406_s15 }
0x2721   :  { %6286 = vrot.lane.b32.xlu0 %v12219_v21, %s13383_s23 }
0x2725   :  { %6552 = vrot.lane.b32.xlu1 %v12219_v21, %s13423_s1 }
0x2726   :  { %6284 = vrot.lane.b32.xlu2 %v12219_v21, %s13440_s3 }
0x2729   :  { %6314 = vrot.lane.b32.xlu0 %v12227_v48, %s13383_s23 }
0x2731   :  { %6418 = vrot.lane.b32.xlu0 %v12219_v21, %s13441_s29 }
0x2739   :  { %6446 = vrot.lane.b32.xlu0 %v12227_v48, %s13441_s29  ;;  %s13475_s29 = smov 24  }
0x2741   :  { %6688 = vrot.lane.b32.xlu0 %v12219_v21, %s13442_s25 }
0x2749   :  { %6716 = vrot.lane.b32.xlu0 %v12227_v48, %s13442_s25  ;;  %s9991_s25 = smov 128  }
0x2751   :  { %6820 = vrot.lane.b32.xlu0 %v12219_v21, %s13443_s0 }
0x2759   :  { %6124 = vrot.lane.b32.xlu0 %v12227_v48, %s13407_s16 }
0x2767   :  { %v5947_v37 = vpop.xlane.xlu1 %5946 }
0x2768   :  { %v5949_v33 = vsub.f32 %v5941_v44, %v5947_v37 }
0x276a   :  { %v5952_v5 = vmul.f32 1.442695, %v5949_v33 }
0x276c   :  { %9789 = vpow2.f32 %v5952_v5 }
0x2770   :  { %v6078_v6 = vpop.xlane.xlu0 %6077 }
0x2771   :  { %v6082_v24 = vsub.f32 %v6074_v36, %v6078_v6  ;;  %v5944_v4 = vpop.xlane.xlu2 %5943 }
0x2772   :  { %v9790_v0 = vpop.eup %9789  ;;  %v5948_v8 = vsub.f32 %v5940_v27, %v5944_v4 }
0x2773   :  { %v6084_v57 = vmul.f32 1.442695, %v6082_v24  ;;  %v5957_v13 = vsel %vm268_vm10, %v9790_v0, 0.0 }
0x2774   :  { %v5950_v3 = vmul.f32 1.442695, %v5948_v8  ;;  %5958 = vadd.xlane.f32.xlu1 %v5957_v13 }
0x2775   :  { %9791 = vpow2.f32 %v6084_v57 }
0x2776   :  { %9793 = vpow2.f32 %v5950_v3 }
0x2779   :  { %v6099_v45 = vpop.permute.xlu2 %6098 }
0x277a   :  { %6119 = vmatpush.msrb.mxu3 %v6099_v45 }
0x277b   :  { %v9792_v35 = vpop.eup %9791 }
0x277c   :  { %v9794_v58 = vpop.eup %9793  ;;  %v6088_v47 = vsel %vm268_vm10, %v9792_v35, 0.0 }
0x277d   :  { %6089 = vadd.xlane.f32.xlu1 %v6088_v47  ;;  %v5954_v46 = vsel %vm268_vm10, %v9794_v58, 0.0 }
0x277e   :  { %5955 = vadd.xlane.f32.xlu2 %v5954_v46 }
0x277f   :  { %v6179_v26 = vpop.permute.xlu1 %6178 }
0x2781   :  { %v6181_v31 = vpop.permute.xlu2 %6180 }
0x2783   :  { %v6153_v55 = vpop.permute.xlu0 %6152 }
0x2787   :  { %v6421_v49 = vpop.permute.xlu1 %6420 }
0x2789   :  { %v6285_v30 = vpop.permute.xlu2 %6284 }
0x278b   :  { %v6151_v20 = vpop.permute.xlu0 %6150 }
0x278f   :  { %v6449_v28 = vpop.permute.xlu1 %6448 }
0x2793   :  { %v6287_v10 = vpop.permute.xlu0 %6286 }
0x2796   :  { %6312 = vrot.lane.b32.xlu2 %v12227_v48, %s13440_s3  ;;  %6580 = vrot.lane.b32.xlu1 %v12227_v48, %s13423_s1 }
0x2797   :  { %v6553_v52 = vpop.permute.xlu1 %6552 }
0x279b   :  { %v6315_v54 = vpop.permute.xlu0 %6314 }
0x279e   :  { %6554 = vrot.lane.b32.xlu2 %v12219_v21, %s13444_s19  ;;  %6822 = vrot.lane.b32.xlu1 %v12219_v21, %s13445_s20 }
0x27a3   :  { %v6419_v43 = vpop.permute.xlu0 %6418 }
0x27a6   :  { %6582 = vrot.lane.b32.xlu2 %v12227_v48, %s13444_s19  ;;  %6850 = vrot.lane.b32.xlu1 %v12227_v48, %s13445_s20  ;;  %s13448_s19 = smov 52   ;;  %s13449_s20 = smov 48  }
0x27ab   :  { %v6447_v25 = vpop.permute.xlu0 %6446 }
0x27ae   :  { %6686 = vrot.lane.b32.xlu2 %v12219_v21, %s13446_s21  ;;  %9400 = vrot.lane.b32.xlu1 %v12235_v59, %s13447_s24  ;;  %s13457_s24 = smov 24  }
0x27b3   :  { %v6689_v19 = vpop.permute.xlu0 %6688 }
0x27b6   :  { %6714 = vrot.lane.b32.xlu2 %v12227_v48, %s13446_s21  ;;  %s13452_s21 = smov 36  }
0x27bb   :  { %v6717_v14 = vpop.permute.xlu0 %6716 }
0x27be   :  { %6848 = vrot.lane.b32.xlu2 %v12227_v48, %s13443_s0 }
0x27c3   :  { %v12318_v2 = vpop.permute.xlu0 %6820 }
0x27c6   :  { %9405 = vrot.lane.b32.xlu2 %v12235_v59, %s13448_s19  ;;  %s13451_s19 = smov 44  }
0x27cb   :  { %v6125_v1 = vpop.permute.xlu0 %6124 }
0x27cc   :  { %6145 = vmatpush.msrb.mxu0 %v6125_v1 }
0x27e7   :  { %v5959_v38 = vpop.xlane.xlu1 %5958 }
0x27e8   :  { %9795 = vrcp.f32 %v5959_v38 }
0x27ee   :  { %v9796_v32 = vpop.eup %9795 }
0x27ef   :  { %v5963_v42 = vmul.f32 %v9796_v32, %v9790_v0 }
0x27f0   :  { %v6090_v12 = vpop.xlane.xlu1 %6089 }
0x27f1   :  { %9797 = vrcp.f32 %v6090_v12  ;;  %v5956_v56 = vpop.xlane.xlu2 %5955  ;;  %9079 = vmatmul.msk.f32.vlgmr.msra.gmra.mxu3 %vm268_vm10, %v5963_v42 }
0x27f2   :  { %9799 = vrcp.f32 %v5956_v56  ;;  %9088 = vmatpush.xpose.msk.msra.mxu3 %vm210_vm8, %v6181_v31 }
0x27f7   :  { %v9798_v34 = vpop.eup %9797 }
0x27f8   :  { %v9800_v18 = vpop.eup %9799  ;;  %v6096_v9 = vmul.f32 %v9798_v34, %v9792_v35 }
0x27f9   :  { %v5962_v51 = vmul.f32 %v9800_v18, %v9794_v58  ;;  %v6313_v63 = vpop.permute.xlu2 %6312 }
0x27fa   :  { %9084 = vmatmul.msk.f32.vlgmr.msrb.gmra.mxu3 %vm268_vm10, %v6096_v9 }
0x27fb   :  { %9094 = vmatpush.xpose.msk.msrb.mxu3 %vm210_vm8, %v6315_v54  ;;  %9078 = vmatmul.msk.f32.vlgmr.msrb.gmra.mxu2 %vm268_vm10, %v5962_v51 }
0x27fc   :  { %9086 = vmatpush.xpose.msk.msrb.mxu2 %vm210_vm8, %v6153_v55 }
0x2801   :  { %v6555_v62 = vpop.permute.xlu2 %6554 }
0x2802   :  { %9089 = vmatmul.msk.f32.vlgmr.msra.gmra.mxu3 %vm210_vm8, %v6179_v26 }
0x2803   :  { %9100 = vmatpush.xpose.msk.msra.mxu3 %vm210_vm8, %v6449_v28  ;;  %9083 = vmatmul.msk.f32.vlgmr.msra.gmra.mxu2 %vm210_vm8, %v12293_v15 }
0x2804   :  { %9092 = vmatpush.xpose.msk.msra.mxu2 %vm210_vm8, %v6287_v10 }
0x2808   :  { %v6581_v23 = vpop.permute.xlu1 %6580 }
0x2809   :  { %v6583_v7 = vpop.permute.xlu2 %6582 }
0x280a   :  { %9095 = vmatmul.msk.f32.vlgmr.msrb.gmra.mxu3 %vm210_vm8, %v6313_v63 }
0x280b   :  { %9106 = vmatpush.xpose.msk.msrb.mxu3 %vm210_vm8, %v6583_v7  ;;  %9087 = vmatmul.msk.f32.vlgmr.msrb.gmra.mxu2 %vm210_vm8, %v6151_v20 }
0x280c   :  { %9098 = vmatpush.xpose.msk.msrb.mxu2 %vm210_vm8, %v6421_v49 }
0x2810   :  { %v6823_v11 = vpop.permute.xlu1 %6822 }
0x2811   :  { %v6687_v44 = vpop.permute.xlu2 %6686 }
0x2812   :  { %9101 = vmatmul.msk.f32.vlgmr.msra.gmra.mxu3 %vm210_vm8, %v6447_v25 }
0x2813   :  { %9112 = vmatpush.xpose.msk.msra.mxu3 %vm210_vm8, %v6717_v14  ;;  %9093 = vmatmul.msk.f32.vlgmr.msra.gmra.mxu2 %vm210_vm8, %v6285_v30 }
0x2814   :  { %9104 = vmatpush.xpose.msk.msra.mxu2 %vm210_vm8, %v6555_v62 }
0x2818   :  { %v6851_v60 = vpop.permute.xlu1 %6850 }
0x2819   :  { %v6715_v50 = vpop.permute.xlu2 %6714 }
0x281a   :  { %9107 = vmatmul.msk.f32.vlgmr.msrb.gmra.mxu3 %vm210_vm8, %v6581_v23 }
0x281b   :  { %9118 = vmatpush.xpose.msk.msrb.mxu3 %vm210_vm8, %v6851_v60  ;;  %9099 = vmatmul.msk.f32.vlgmr.msrb.gmra.mxu2 %vm210_vm8, %v6419_v43 }
0x281c   :  { %9110 = vmatpush.xpose.msk.msrb.mxu2 %vm210_vm8, %v6689_v19 }
0x2820   :  { %v9401_v29 = vpop.permute.xlu1 %9400 }
0x2821   :  { %v9403_v17 = vunpack.i.h.bf16 %v9401_v29  ;;  %v9402_v41 = vunpack.i.l.bf16 %v9401_v29  ;;  %v6849_v36 = vpop.permute.xlu2 %6848 }
0x2822   :  { %9113 = vmatmul.msk.f32.vlgmr.msra.gmra.mxu3 %vm210_vm8, %v6715_v50 }
0x2823   :  { %6253 = vmatpush.msra.mxu0 %v9402_v41  ;;  %6279 = vmatpush.msrb.mxu1 %v9403_v17 }
0x2824   :  { %9105 = vmatmul.msk.f32.vlgmr.msra.gmra.mxu2 %vm210_vm8, %v6553_v52 }
0x2825   :  { %9116 = vmatpush.xpose.msk.msra.mxu2 %vm210_vm8, %v6823_v11 }
0x2829   :  { %v12348_v27 = vpop.permute.xlu2 %9405 }
0x282a   :  { %v9408_v61 = vunpack.i.h.bf16 %v12348_v27  ;;  %9119 = vmatmul.msk.f32.vlgmr.msrb.gmra.mxu3 %vm210_vm8, %v6849_v36 }
0x282c   :  { %9111 = vmatmul.msk.f32.vlgmr.msrb.gmra.mxu2 %vm210_vm8, %v6687_v44  ;;  %6413 = vmatpush.msra.mxu1 %v9408_v61 }
0x2834   :  { %9117 = vmatmul.msk.f32.vlgmr.msra.gmra.mxu2 %vm210_vm8, %v12318_v2 }
0x2874   :  { %v12355_v53 = vpop.f32.mrf.mxu3 }
0x287d   :  { %v12357_v15 = vpop.f32.mrf.mxu3 }
0x287e   :  { %v12359_v37 = vpop.f32.mrf.mxu2 }
0x2885   :  { %v6203_v33 = vpop.f32.mrf.mxu3 }
0x2886   :  { %v6207_v5 = vmul.f32 0.17677669, %v6203_v33  ;;  %v6069_v6 = vpop.f32.mrf.mxu2 }
0x2887   :  { %v6073_v24 = vmul.f32 0.17677669, %v6069_v6 }
0x2888   :  { %v12363_v4 = vsel %vm10183_vm9, %v6207_v5, -1e+30 }
0x2889   :  { %v12367_v0 = vsel %vm10183_vm9, %v6073_v24, -1e+30  ;;  %v6213_v8 = vsel %vm268_vm10, %v12363_v4, -inf }
0x288a   :  { %6214 = vmax.xlane.f32.xlu2 %v6213_v8  ;;  %v6079_v57 = vsel %vm268_vm10, %v12367_v0, -inf }
0x288b   :  { %6080 = vmax.xlane.f32.xlu0 %v6079_v57 }
0x288d   :  { %v6337_v13 = vpop.f32.mrf.mxu3 }
0x288e   :  { %v6175_v3 = vpop.f32.mrf.mxu2  ;;  %v6341_v47 = vmul.f32 0.17677669, %v6337_v13 }
0x288f   :  { %v6206_v45 = vmul.f32 0.17677669, %v6175_v3 }
0x2890   :  { %v12381_v20 = vsel %vm10183_vm9, %v6341_v47, -1e+30 }
0x2891   :  { %v12375_v35 = vsel %vm10183_vm9, %v6206_v45, -1e+30  ;;  %v6347_v25 = vsel %vm268_vm10, %v12381_v20, -inf }
0x2892   :  { %v6210_v58 = vsel %vm268_vm10, %v12375_v35, -inf }
0x2893   :  { %6211 = vmax.xlane.f32.xlu1 %v6210_v58 }
0x2895   :  { %v6471_v46 = vpop.f32.mrf.mxu3 }
0x2896   :  { %v6309_v55 = vpop.f32.mrf.mxu2  ;;  %v6475_v19 = vmul.f32 0.17677669, %v6471_v46 }
0x2897   :  { %v6340_v10 = vmul.f32 0.17677669, %v6309_v55 }
0x2898   :  { %v12393_v2 = vsel %vm10183_vm9, %v6475_v19, -1e+30 }
0x2899   :  { %v12385_v54 = vsel %vm10183_vm9, %v6340_v10, -1e+30  ;;  %v6481_v28 = vsel %vm268_vm10, %v12393_v2, -inf }
0x289a   :  { %v6344_v43 = vsel %vm268_vm10, %v12385_v54, -inf }
0x289b   :  { %6345 = vmax.xlane.f32.xlu0 %v6344_v43  ;;  %6348 = vmax.xlane.f32.xlu1 %v6347_v25 }
0x289d   :  { %v6605_v14 = vpop.f32.mrf.mxu3 }
0x289e   :  { %v6443_v26 = vpop.f32.mrf.mxu2  ;;  %v6609_v52 = vmul.f32 0.17677669, %v6605_v14 }
0x289f   :  { %v6474_v49 = vmul.f32 0.17677669, %v6443_v26 }
0x28a0   :  { %v12405_v38 = vsel %vm10183_vm9, %v6609_v52, -1e+30 }
0x28a1   :  { %v12397_v1 = vsel %vm10183_vm9, %v6474_v49, -1e+30  ;;  %v6615_v56 = vsel %vm268_vm10, %v12405_v38, -inf }
0x28a2   :  { %v6478_v31 = vsel %vm268_vm10, %v12397_v1, -inf }
0x28a3   :  { %6482 = vmax.xlane.f32.xlu0 %v6481_v28  ;;  %6479 = vmax.xlane.f32.xlu2 %v6478_v31 }
0x28a5   :  { %v6739_v30 = vpop.f32.mrf.mxu3 }
0x28a6   :  { %v6743_v18 = vmul.f32 0.17677669, %v6739_v30 }
0x28a7   :  { %v6577_v32 = vpop.f32.mrf.mxu2 }
0x28a8   :  { %v6608_v42 = vmul.f32 0.17677669, %v6577_v32  ;;  %v12417_v51 = vsel %vm10183_vm9, %v6743_v18, -1e+30 }
0x28a9   :  { %v6749_v11 = vsel %vm268_vm10, %v12417_v51, -inf }
0x28aa   :  { %v12409_v12 = vsel %vm10183_vm9, %v6608_v42, -1e+30 }
0x28ab   :  { %v6612_v34 = vsel %vm268_vm10, %v12409_v12, -inf  ;;  %6616 = vmax.xlane.f32.xlu2 %v6615_v56 }
0x28ac   :  { %6613 = vmax.xlane.f32.xlu1 %v6612_v34 }
0x28ad   :  { %v6873_v62 = vpop.f32.mrf.mxu3 }
0x28ae   :  { %v6877_v44 = vmul.f32 0.17677669, %v6873_v62 }
0x28af   :  { %v6711_v9 = vpop.f32.mrf.mxu2 }
0x28b0   :  { %v6742_v63 = vmul.f32 0.17677669, %v6711_v9  ;;  %v12429_v50 = vsel %vm10183_vm9, %v6877_v44, -1e+30 }
0x28b1   :  { %v6883_v36 = vsel %vm268_vm10, %v12429_v50, -inf }
0x28b2   :  { %v12421_v23 = vsel %vm10183_vm9, %v6742_v63, -1e+30 }
0x28b3   :  { %v6746_v7 = vsel %vm268_vm10, %v12421_v23, -inf }
0x28b4   :  { %6747 = vmax.xlane.f32.xlu0 %v6746_v7  ;;  %6750 = vmax.xlane.f32.xlu1 %v6749_v11 }
0x28b7   :  { %v6845_v60 = vpop.f32.mrf.mxu2 }
0x28b8   :  { %v6876_v29 = vmul.f32 0.17677669, %v6845_v60 }
0x28ba   :  { %v12433_v17 = vsel %vm10183_vm9, %v6876_v29, -1e+30 }
0x28bb   :  { %v6880_v41 = vsel %vm268_vm10, %v12433_v17, -inf }
0x28bc   :  { %6881 = vmax.xlane.f32.xlu2 %v6880_v41  ;;  %6884 = vmax.xlane.f32.xlu1 %v6883_v36 }
0x28c8   :  { %9410 = vrot.lane.b32.xlu0 %v12235_v59, %s13449_s20  ;;  %s13450_s20 = smov 40  }
0x28fd   :  { %v6215_v61 = vpop.xlane.xlu2 %6214 }
0x28fe   :  { %v6217_v33 = vsub.f32 %v12363_v4, %v6215_v61  ;;  %v6081_v5 = vpop.xlane.xlu0 %6080 }
0x28ff   :  { %v6083_v6 = vsub.f32 %v12367_v0, %v6081_v5 }
0x2900   :  { %v6220_v24 = vmul.f32 1.442695, %v6217_v33 }
0x2901   :  { %v6086_v8 = vmul.f32 1.442695, %v6083_v6 }
0x2902   :  { %9801 = vpow2.f32 %v6220_v24 }
0x2903   :  { %9803 = vpow2.f32 %v6086_v8 }
0x2906   :  { %v6212_v57 = vpop.xlane.xlu1 %6211 }
0x2907   :  { %v6216_v13 = vsub.f32 %v12375_v35, %v6212_v57 }
0x2908   :  { %v12444_v3 = vpop.eup %9801 }
0x2909   :  { %v12446_v45 = vpop.eup %9803  ;;  %v6218_v58 = vmul.f32 1.442695, %v6216_v13  ;;  %v6225_v47 = vsel %vm268_vm10, %v12444_v3, 0.0 }
0x290a   :  { %6226 = vadd.xlane.f32.xlu1 %v6225_v47  ;;  %v6091_v4 = vsel %vm268_vm10, %v12446_v45, 0.0 }
0x290b   :  { %9805 = vpow2.f32 %v6218_v58  ;;  %6092 = vadd.xlane.f32.xlu0 %v6091_v4 }
0x290e   :  { %v6346_v0 = vpop.xlane.xlu0 %6345  ;;  %v6349_v46 = vpop.xlane.xlu1 %6348 }
0x290f   :  { %v6350_v55 = vsub.f32 %v12385_v54, %v6346_v0  ;;  %v6351_v43 = vsub.f32 %v12381_v20, %v6349_v46 }
0x2911   :  { %v12453_v10 = vpop.eup %9805  ;;  %v6352_v35 = vmul.f32 1.442695, %v6350_v55  ;;  %v6354_v19 = vmul.f32 1.442695, %v6351_v43 }
0x2912   :  { %v6222_v25 = vsel %vm268_vm10, %v12453_v10, 0.0 }
0x2913   :  { %9807 = vpow2.f32 %v6352_v35  ;;  %6223 = vadd.xlane.f32.xlu2 %v6222_v25 }
0x2914   :  { %9809 = vpow2.f32 %v6354_v19 }
0x2916   :  { %v6483_v14 = vpop.xlane.xlu0 %6482  ;;  %v6480_v26 = vpop.xlane.xlu2 %6479 }
0x2917   :  { %v6485_v49 = vsub.f32 %v12393_v2, %v6483_v14  ;;  %v6484_v28 = vsub.f32 %v12397_v1, %v6480_v26  ;;  %v9407_v26 = vunpack.i.l.bf16 %v12348_v27 }
0x2919   :  { %v12460_v31 = vpop.eup %9807  ;;  %v6488_v54 = vmul.f32 1.442695, %v6485_v49  ;;  %v6486_v52 = vmul.f32 1.442695, %v6484_v28 }
0x291a   :  { %v6356_v20 = vsel %vm268_vm10, %v12460_v31, 0.0  ;;  %v12464_v32 = vpop.eup %9809 }
0x291b   :  { %9811 = vpow2.f32 %v6488_v54  ;;  %6357 = vadd.xlane.f32.xlu2 %v6356_v20  ;;  %v6359_v62 = vsel %vm268_vm10, %v12464_v32, 0.0 }
0x291c   :  { %9813 = vpow2.f32 %v6486_v52 }
0x291e   :  { %v6617_v30 = vpop.xlane.xlu2 %6616 }
0x291f   :  { %v6619_v42 = vsub.f32 %v12405_v38, %v6617_v30  ;;  %v6614_v56 = vpop.xlane.xlu1 %6613 }
0x2920   :  { %v6618_v2 = vsub.f32 %v12409_v12, %v6614_v56 }
0x2921   :  { %v12468_v1 = vpop.eup %9811  ;;  %v6622_v34 = vmul.f32 1.442695, %v6619_v42 }
0x2922   :  { %v12470_v18 = vpop.eup %9813  ;;  %v6620_v9 = vmul.f32 1.442695, %v6618_v2  ;;  %v6493_v63 = vsel %vm268_vm10, %v12468_v1, 0.0 }
0x2923   :  { %9815 = vpow2.f32 %v6622_v34  ;;  %v6490_v7 = vsel %vm268_vm10, %v12470_v18, 0.0  ;;  %6494 = vadd.xlane.f32.xlu1 %v6493_v63  ;;  %6360 = vadd.xlane.f32.xlu2 %v6359_v62 }
0x2924   :  { %9817 = vpow2.f32 %v6620_v9  ;;  %6491 = vadd.xlane.f32.xlu0 %v6490_v7 }
0x2927   :  { %v6748_v38 = vpop.xlane.xlu0 %6747 }
0x2928   :  { %v6752_v12 = vsub.f32 %v12421_v23, %v6748_v38  ;;  %v6751_v23 = vpop.xlane.xlu1 %6750 }
0x2929   :  { %v12479_v11 = vpop.eup %9815  ;;  %v6753_v5 = vsub.f32 %v12417_v51, %v6751_v23 }
0x292a   :  { %v12481_v44 = vpop.eup %9817  ;;  %v6754_v60 = vmul.f32 1.442695, %v6752_v12  ;;  %v6627_v29 = vsel %vm268_vm10, %v12479_v11, 0.0 }
0x292b   :  { %6628 = vadd.xlane.f32.xlu1 %v6627_v29  ;;  %v6624_v41 = vsel %vm268_vm10, %v12481_v44, 0.0  ;;  %v6756_v24 = vmul.f32 1.442695, %v6753_v5 }
0x292c   :  { %9819 = vpow2.f32 %v6754_v60  ;;  %6625 = vadd.xlane.f32.xlu2 %v6624_v41 }
0x292d   :  { %9821 = vpow2.f32 %v6756_v24 }
0x292f   :  { %v6882_v8 = vpop.xlane.xlu2 %6881 }
0x2930   :  { %v6885_v33 = vpop.xlane.xlu1 %6884  ;;  %v6886_v13 = vsub.f32 %v12433_v17, %v6882_v8 }
0x2931   :  { %v6887_v6 = vsub.f32 %v12429_v50, %v6885_v33 }
0x2932   :  { %v12487_v36 = vpop.eup %9819  ;;  %v6888_v58 = vmul.f32 1.442695, %v6886_v13 }
0x2933   :  { %v6758_v61 = vsel %vm268_vm10, %v12487_v36, 0.0  ;;  %v6890_v57 = vmul.f32 1.442695, %v6887_v6  ;;  %v12500_v47 = vpop.eup %9821 }
0x2934   :  { %6759 = vadd.xlane.f32.xlu0 %v6758_v61 }
0x2935   :  { %9823 = vpow2.f32 %v6890_v57 }
0x2936   :  { %9825 = vpow2.f32 %v6888_v58 }
0x293a   :  { %v9411_v4 = vpop.permute.xlu0 %9410 }
0x293b   :  { %v9413_v25 = vunpack.i.h.bf16 %v9411_v4  ;;  %v9412_v54 = vunpack.i.l.bf16 %v9411_v4 }
0x2944   :  { %9420 = vrot.lane.b32.xlu2 %v12235_v59, %s13450_s20  ;;  %9415 = vrot.lane.b32.xlu1 %v12235_v59, %s13451_s19  ;;  %v12502_v59 = vpop.eup %9823  ;;  %s13453_s20 = smov 4   ;;  %s13455_s19 = smov 12  }
0x2945   :  { %v6895_v51 = vsel %vm268_vm10, %v12502_v59, 0.0  ;;  %v12508_v50 = vpop.eup %9825 }
0x2946   :  { %v6892_v17 = vsel %vm268_vm10, %v12508_v50, 0.0 }
0x2948   :  { %6902 = vrot.lane.b32.xlu0 %v12219_v21, %s13452_s21  ;;  %v6761_v21 = vsel %vm268_vm10, %v12500_v47, 0.0 }
0x296d   :  { %6762 = vadd.xlane.f32.xlu2 %v6761_v21 }
0x296e   :  { %6896 = vadd.xlane.f32.xlu1 %v6895_v51 }
0x2975   :  { %6893 = vadd.xlane.f32.xlu2 %v6892_v17 }
0x297d   :  { %v6227_v0 = vpop.xlane.xlu1 %6226 }
0x297e   :  { %9827 = vrcp.f32 %v6227_v0  ;;  %v6093_v46 = vpop.xlane.xlu0 %6092 }
0x297f   :  { %9829 = vrcp.f32 %v6093_v46 }
0x2984   :  { %v9828_v55 = vpop.eup %9827 }
0x2985   :  { %v9830_v35 = vpop.eup %9829  ;;  %v6231_v43 = vmul.f32 %v9828_v55, %v12444_v3 }
0x2986   :  { %v6097_v19 = vmul.f32 %v9830_v35, %v12446_v45  ;;  %v6224_v14 = vpop.xlane.xlu2 %6223 }
0x2987   :  { %9831 = vrcp.f32 %v6224_v14  ;;  %9091 = vmatmul.msk.f32.vlgmr.msrb.gmra.mxu1 %vm268_vm10, %v6231_v43  ;;  %v9123_v14 = vld [vmem:[%s13239_s7 + $0x88] sm:$0xff] }
0x2988   :  { %6547 = vmatpush.msrb.mxu1 %v9413_v25  ;;  %9085 = vmatmul.msk.f32.vlgmr.msrb.gmra.mxu0 %vm268_vm10, %v6097_v19  ;;  %v9125_v25 = vld [vmem:[%s13239_s7 + $0x98] sm:$0xff]  ;;  %v9124_v19 = vld [vmem:[%s13239_s7 + $0x90] sm:$0xff] }
0x2989   :  { %6387 = vmatpush.msrb.mxu0 %v9407_v26  ;;  %7052 = vmatpush.msrb.mxu2 %v9125_v25  ;;  %v9152_v25 = vld [vmem:[%s13245_s13 + $0x270] sm:$0xff] }
0x298b   :  { %7053 = vmatpush.msrb.mxu2 %v9124_v19 }
0x298d   :  { %v9832_v49 = vpop.eup %9831  ;;  %6928 = vrot.lane.b32.xlu2 %v12227_v48, %s13452_s21  ;;  %s13454_s21 = smov 8   ;;  %7054 = vmatpush.msrb.mxu2 %v9123_v14  ;;  %v9151_v14 = vld [vmem:[%s13245_s13 + $0x268] sm:$0xff] }
0x298e   :  { %v6230_v28 = vmul.f32 %v9832_v49, %v12453_v10  ;;  %v6358_v3 = vpop.xlane.xlu2 %6357 }
0x298f   :  { %9833 = vrcp.f32 %v6358_v3 }
0x2990   :  { %9090 = vmatmul.msk.f32.vlgmr.msra.gmra.mxu0 %vm268_vm10, %v6230_v28  ;;  %v9122_v28 = vld [vmem:[%s13239_s7 + $0x80] sm:$0xff] }
0x2991   :  { %6521 = vmatpush.msra.mxu0 %v9412_v54  ;;  %7055 = vmatpush.msrb.mxu2 %v9122_v28 }
0x2995   :  { %v9834_v27 = vpop.eup %9833  ;;  %6956 = vrot.lane.b32.xlu2 %v12357_v15, %s13453_s20 }
0x2996   :  { %v6364_v45 = vmul.f32 %v9834_v27, %v12460_v31  ;;  %v6361_v52 = vpop.xlane.xlu2 %6360  ;;  %v6495_v48 = vpop.xlane.xlu1 %6494 }
0x2997   :  { %v6492_v20 = vpop.xlane.xlu0 %6491  ;;  %9835 = vrcp.f32 %v6361_v52 }
0x2998   :  { %9837 = vrcp.f32 %v6492_v20  ;;  %9096 = vmatmul.msk.f32.vlgmr.msrb.gmra.mxu0 %vm268_vm10, %v6364_v45 }
0x2999   :  { %9839 = vrcp.f32 %v6495_v48 }
0x299d   :  { %v9836_v10 = vpop.eup %9835 }
0x299e   :  { %v9838_v30 = vpop.eup %9837  ;;  %v6365_v42 = vmul.f32 %v9836_v10, %v12464_v32  ;;  %v6629_v2 = vpop.xlane.xlu1 %6628 }
0x299f   :  { %v6498_v56 = vmul.f32 %v9838_v30, %v12470_v18  ;;  %v9840_v15 = vpop.eup %9839  ;;  %v6626_v34 = vpop.xlane.xlu2 %6625  ;;  %9841 = vrcp.f32 %v6629_v2 }
0x29a0   :  { %9097 = vmatmul.msk.f32.vlgmr.msra.gmra.mxu1 %vm268_vm10, %v6365_v42  ;;  %v6499_v31 = vmul.f32 %v9840_v15, %v12468_v1  ;;  %9843 = vrcp.f32 %v6626_v34 }
0x29a1   :  { %9102 = vmatmul.msk.f32.vlgmr.msra.gmra.mxu0 %vm268_vm10, %v6498_v56 }
0x29a5   :  { %v9842_v63 = vpop.eup %9841 }
0x29a6   :  { %v9844_v62 = vpop.eup %9843  ;;  %v6633_v60 = vmul.f32 %v9842_v63, %v12479_v11 }
0x29a7   :  { %v6760_v9 = vpop.xlane.xlu0 %6759  ;;  %v9421_v7 = vpop.permute.xlu2 %9420  ;;  %v6632_v12 = vmul.f32 %v9844_v62, %v12481_v44 }
0x29a8   :  { %9103 = vmatmul.msk.f32.vlgmr.msrb.gmra.mxu1 %vm268_vm10, %v6499_v31  ;;  %9845 = vrcp.f32 %v6760_v9  ;;  %v9423_v29 = vunpack.i.h.bf16 %v9421_v7  ;;  %v9422_v1 = vunpack.i.l.bf16 %v9421_v7 }
0x29ae   :  { %v9846_v61 = vpop.eup %9845 }
0x29af   :  { %v6766_v23 = vmul.f32 %v9846_v61, %v12487_v36 }
0x29b6   :  { %v9416_v32 = vpop.permute.xlu1 %9415 }
0x29b7   :  { %v9418_v18 = vunpack.i.h.bf16 %v9416_v32  ;;  %v9417_v38 = vunpack.i.l.bf16 %v9416_v32 }
0x29b9   :  { %6655 = vmatpush.msrb.mxu0 %v9417_v38  ;;  %6681 = vmatpush.msra.mxu1 %v9418_v18 }
0x29ba   :  { %v6903_v41 = vpop.permute.xlu0 %6902  ;;  %9108 = vmatmul.msk.f32.vlgmr.msrb.gmra.mxu0 %vm268_vm10, %v6632_v12  ;;  %9109 = vmatmul.msk.f32.vlgmr.msra.gmra.mxu1 %vm268_vm10, %v6633_v60 }
0x29bb   :  { %6789 = vmatpush.msra.mxu0 %v9422_v1  ;;  %6815 = vmatpush.msrb.mxu1 %v9423_v29 }
0x29bd   :  { %6923 = vmatpush.msrb.mxu0 %v6903_v41 }
0x29c2   :  { %9114 = vmatmul.msk.f32.vlgmr.msra.gmra.mxu0 %vm268_vm10, %v6766_v23 }
0x29e0   :  { %v6763_v44 = vpop.xlane.xlu2 %6762 }
0x29e1   :  { %9847 = vrcp.f32 %v6763_v44  ;;  %v6897_v11 = vpop.xlane.xlu1 %6896 }
0x29e2   :  { %9849 = vrcp.f32 %v6897_v11 }
0x29e7   :  { %v9848_v33 = vpop.eup %9847 }
0x29e8   :  { %v6767_v5 = vmul.f32 %v9848_v33, %v12500_v47  ;;  %v6894_v6 = vpop.xlane.xlu2 %6893  ;;  %v9850_v24 = vpop.eup %9849 }
0x29e9   :  { %9851 = vrcp.f32 %v6894_v6  ;;  %v6901_v57 = vmul.f32 %v9850_v24, %v12502_v59 }
0x29ea   :  { %9115 = vmatmul.msk.f32.vlgmr.msrb.gmra.mxu1 %vm268_vm10, %v6767_v5 }
0x29ef   :  { %v9852_v8 = vpop.eup %9851 }
0x29f0   :  { %v6900_v13 = vmul.f32 %v9852_v8, %v12508_v50  ;;  %v6929_v36 = vpop.permute.xlu2 %6928 }
0x29f1   :  { %6949 = vmatpush.msra.mxu1 %v6929_v36 }
0x29f2   :  { %9120 = vmatmul.msk.f32.vlgmr.msrb.gmra.mxu0 %vm268_vm10, %v6900_v13  ;;  %9121 = vmatmul.msk.f32.vlgmr.msra.gmra.mxu1 %vm268_vm10, %v6901_v57 }
0x29f8   :  { %v6957_v26 = vpop.permute.xlu2 %6956 }
0x29f9   :  { %v7010_v48 = vsel %vm210_vm8, %v12359_v37, %v6957_v26 }
0x2a04   :  { %v6281_v21 = vpop.f32.mrf.mxu1 }
0x2a05   :  { %v6147_v58 = vpop.f32.mrf.mxu0 }
0x2a06   :  { %6958 = vrot.lane.b32.xlu0 %v6147_v58, %s13453_s20  ;;  %s13456_s20 = smov 20  }
0x2a0d   :  { %v6255_v47 = vpop.f32.mrf.mxu0 }
0x2a0e   :  { %6964 = vrot.lane.b32.xlu2 %v6255_v47, %s13454_s21 }
0x2a15   :  { %v6389_v51 = vpop.f32.mrf.mxu0 }
0x2a16   :  { %6966 = vrot.lane.b32.xlu2 %v6281_v21, %s13454_s21  ;;  %6972 = vrot.lane.b32.xlu0 %v6389_v51, %s13455_s19  ;;  %v9134_v21 = vld [vmem:[%s13243_s11 + $0x98] sm:$0xff]  ;;  %v9133_v51 = vld [vmem:[%s13243_s11 + $0x90] sm:$0xff]  ;;  %s13472_s21 = smov 12  }
0x2a17   :  { %7151 = vmatpush.msra.mxu3 %v9134_v21 }
0x2a19   :  { %7152 = vmatpush.msra.mxu3 %v9133_v51 }
0x2a1d   :  { %v6415_v59 = vpop.f32.mrf.mxu1 }
0x2a1e   :  { %v6523_v50 = vpop.f32.mrf.mxu0  ;;  %6974 = vrot.lane.b32.xlu0 %v6415_v59, %s13455_s19  ;;  %v9132_v59 = vld [vmem:[%s13243_s11 + $0x88] sm:$0xff] }
0x2a1f   :  { %6980 = vrot.lane.b32.xlu2 %v6523_v50, %s13437_s27  ;;  %7153 = vmatpush.msra.mxu3 %v9132_v59  ;;  %v9131_v50 = vld [vmem:[%s13243_s11 + $0x80] sm:$0xff] }
0x2a21   :  { %7154 = vmatpush.msra.mxu3 %v9131_v50 }
0x2a25   :  { %v6549_v17 = vpop.f32.mrf.mxu1 }
0x2a27   :  { %6982 = vrot.lane.b32.xlu2 %v6549_v17, %s13437_s27  ;;  %s13474_s27 = smov 20  }
0x2a37   :  { %v6657_v4 = vpop.f32.mrf.mxu0  ;;  %v6683_v0 = vpop.f32.mrf.mxu1 }
0x2a38   :  { %6988 = vrot.lane.b32.xlu0 %v6657_v4, %s13456_s20 }
0x2a3f   :  { %v6791_v46 = vpop.f32.mrf.mxu0 }
0x2a40   :  { %6990 = vrot.lane.b32.xlu0 %v6683_v0, %s13456_s20  ;;  %6996 = vrot.lane.b32.xlu1 %v6791_v46, %s13457_s24  ;;  %s13471_s20 = smov 8  }
0x2a67   :  { %v6817_v55 = vpop.f32.mrf.mxu1 }
0x2a68   :  { %6998 = vrot.lane.b32.xlu1 %v6817_v55, %s13457_s24  ;;  %v6965_v49 = vpop.permute.xlu2 %6964  ;;  %s13473_s24 = smov 16  }
0x2a69   :  { %v7012_v10 = vsel %vm268_vm10, %v7010_v48, %v6965_v49  ;;  %v9148_v48 = vld [vmem:[%s13245_s13 + $0x250] sm:$0xff] }
0x2a6f   :  { %v6925_v35 = vpop.f32.mrf.mxu0  ;;  %v6951_v43 = vpop.f32.mrf.mxu1 }
0x2a70   :  { %7004 = vrot.lane.b32.xlu2 %v6925_v35, %s13421_s28  ;;  %v6967_v54 = vpop.permute.xlu2 %6966 }
0x2a78   :  { %7006 = vrot.lane.b32.xlu2 %v6951_v43, %s13421_s28  ;;  %v6959_v3 = vpop.permute.xlu0 %6958  ;;  %v9153_v43 = vld [vmem:[%s13245_s13 + $0x278] sm:$0xff] }
0x2a79   :  { %v6981_v45 = vpop.permute.xlu2 %6980  ;;  %v7011_v37 = vsel %vm210_vm8, %v12355_v53, %v6959_v3  ;;  %v9480_v53 = vld [vmem:[%s13240_s8 + $0x4] ss:$0 sm:$0xff]  ;;  %7186 = vmatpush.msra.mxu0 %v9153_v43 }
0x2a7a   :  { %v7013_v63 = vsel %vm268_vm10, %v7011_v37, %v6967_v54  ;;  %v9150_v3 = vld [vmem:[%s13245_s13 + $0x260] sm:$0xff]  ;;  %v9144_v37 = vld [vmem:[%s13245_s13 + $0x230] sm:$0xff] }
0x2a7b   :  { %7187 = vmatpush.msra.mxu0 %v9152_v25 }
0x2a7d   :  { %7188 = vmatpush.msra.mxu0 %v9151_v14  ;;  %v9159_v14 = vld [vmem:[%s13238_s6 + $0xb0] sm:$0xff] }
0x2a7f   :  { %7189 = vmatpush.msra.mxu0 %v9150_v3 }
0x2a81   :  { %v6983_v20 = vpop.permute.xlu2 %6982 }
0x2a88   :  { %v6973_v27 = vpop.permute.xlu0 %6972 }
0x2a89   :  { %v7014_v30 = vsel %vm1341_vm11, %v7012_v10, %v6973_v27  ;;  %v9482_v10 = vld [vmem:[%s13242_s10 + $0x4] ss:$0 sm:$0xff] }
0x2a8a   :  { %v7016_v15 = vsel %vm1344_vm12, %v7014_v30, %v6981_v45  ;;  %v9149_v45 = vld [vmem:[%s13245_s13 + $0x258] sm:$0xff] }
0x2a8b   :  { %7190 = vmatpush.msra.mxu0 %v9149_v45 }
0x2a8d   :  { %7191 = vmatpush.msra.mxu0 %v9148_v48 }
0x2a90   :  { %v6975_v52 = vpop.permute.xlu0 %6974 }
0x2a91   :  { %v7015_v62 = vsel %vm1341_vm11, %v7013_v63, %v6975_v52  ;;  %v9481_v52 = vld [vmem:[%s13241_s9 + $0x4] ss:$0 sm:$0xff] }
0x2a92   :  { %v7017_v32 = vsel %vm1344_vm12, %v7015_v62, %v6983_v20  ;;  %v9143_v62 = vld [vmem:[%s13245_s13 + $0x228] sm:$0xff] }
0x2aaa   :  { %v6989_v42 = vpop.permute.xlu0 %6988 }
0x2aab   :  { %v7018_v31 = vsel %vm1347_vm13, %v7016_v15, %v6989_v42  ;;  %v9147_v42 = vld [vmem:[%s13245_s13 + $0x248] sm:$0xff]  ;;  %v9146_v15 = vld [vmem:[%s13245_s13 + $0x240] sm:$0xff] }
0x2aac   :  { %7192 = vmatpush.msra.mxu0 %v9147_v42 }
0x2aae   :  { %7193 = vmatpush.msra.mxu0 %v9146_v15  ;;  %v9485_v15 = vld [vmem:[%s13236_s4 + $0x5] ss:$0 sm:$0xff]  ;;  %s13458_s4 = smov 112  }
0x2ab2   :  { %v6997_v56 = vpop.permute.xlu1 %6996  ;;  %v6991_v7 = vpop.permute.xlu0 %6990 }
0x2ab3   :  { %v7020_v2 = vsel %vm1350_vm14, %v7018_v31, %v6997_v56  ;;  %v7019_v18 = vsel %vm1347_vm13, %v7017_v32, %v6991_v7  ;;  %v9142_v32 = vld [vmem:[%s13245_s13 + $0x220] sm:$0xff] }
0x2aca   :  { %v7005_v34 = vpop.permute.xlu2 %7004 }
0x2acb   :  { %v7022_v9 = vsel %vm1353_vm15, %v7020_v2, %v7005_v34  ;;  %v9145_v34 = vld [vmem:[%s13245_s13 + $0x238] sm:$0xff] }
0x2acc   :  { %9127 = vmatmul.msk.f32.vlgmr.msrb.gmra.mxu2 %vm73_vm0, %v7022_v9  ;;  %7194 = vmatpush.msra.mxu0 %v9145_v34 }
0x2ace   :  { %7195 = vmatpush.msra.mxu0 %v9144_v37 }
0x2ad0   :  { %7196 = vmatpush.msra.mxu0 %v9143_v62 }
0x2ad2   :  { %v7007_v12 = vpop.permute.xlu2 %7006  ;;  %7197 = vmatpush.msra.mxu0 %v9142_v32 }
0x2ada   :  { %v6999_v38 = vpop.permute.xlu1 %6998 }
0x2adb   :  { %v7021_v60 = vsel %vm1350_vm14, %v7019_v18, %v6999_v38  ;;  %v9141_v38 = vld [vmem:[%s13245_s13 + $0x218] sm:$0xff] }
0x2adc   :  { %v7023_v29 = vsel %vm1353_vm15, %v7021_v60, %v7007_v12  ;;  %7198 = vmatpush.msra.mxu0 %v9141_v38 }
0x2add   :  { %9128 = vmatmul.msk.f32.gmra.mxu2 %vm73_vm0, %v7023_v29 }
0x2b4f   :  { %v7057_v1 = vpop.f32.mrf.mxu2 }
0x2b50   :  { %v7058_v41 = vadd.f32 %v9480_v53, %v7057_v1 }
0x2b52   :  { %v12590_v61 = vadd.f32 %v7058_v41, %v12182_v40  ;;  %v9140_v41 = vld [vmem:[%s13245_s13 + $0x210] sm:$0xff] }
0x2b53   :  { %7199 = vmatpush.msra.mxu0 %v9140_v41 }
0x2b54   :  { %v7069_v23 = vsel %vm73_vm0, %v12590_v61, 0.0 }
0x2b55   :  { %7070 = vadd.xlane.f32.xlu0 %v7069_v23  ;;  %v9139_v23 = vld [vmem:[%s13245_s13 + $0x208] sm:$0xff] }
0x2b56   :  { %7200 = vmatpush.msra.mxu0 %v9139_v23 }
0x2b60   :  { %v7060_v44 = vpop.f32.mrf.mxu2 }
0x2b61   :  { %v7061_v11 = vadd.f32 %v9480_v53, %v7060_v44  ;;  %v9138_v44 = vld [vmem:[%s13245_s13 + $0x200] sm:$0xff] }
0x2b62   :  { %7201 = vmatpush.msra.mxu0 %v9138_v44 }
0x2b63   :  { %v12595_v33 = vadd.f32 %v7061_v11, %v12187_v39  ;;  %v9483_v11 = vld [vmem:[%s13244_s12 + $0x4] ss:$0 sm:$0xff] }
0x2b65   :  { %v7072_v5 = vsel %vm73_vm0, %v12595_v33, 0.0 }
0x2b66   :  { %7073 = vadd.xlane.f32.xlu1 %v7072_v5 }
0x2bc8   :  { %v7071_v6 = vpop.xlane.xlu0 %7070 }
0x2bc9   :  { %v7075_v24 = vmul.f32 %v7071_v6, %v10126_v22 }
0x2bcb   :  { %v7077_v8 = vsub.f32 %v12590_v61, %v7075_v24 }
0x2bcd   :  { %v7079_v40 = vmul.f32 %v7077_v8, %v7077_v8 }
0x2bcf   :  { %v7081_v57 = vsel %vm73_vm0, %v7079_v40, 0.0 }
0x2bd0   :  { %7082 = vadd.xlane.f32.xlu2 %v7081_v57 }
0x2bd9   :  { %v7074_v13 = vpop.xlane.xlu1 %7073 }
0x2bda   :  { %v7076_v36 = vmul.f32 %v7074_v13, %v10126_v22  ;;  %v9484_v13 = vld [vmem:[%s13246_s14 + $0x4] ss:$0 sm:$0xff] }
0x2bdc   :  { %v12604_v58 = vsub.f32 %v12595_v33, %v7076_v36 }
0x2bde   :  { %v7080_v39 = vmul.f32 %v12604_v58, %v12604_v58 }
0x2be0   :  { %v7084_v47 = vsel %vm73_vm0, %v7080_v39, 0.0 }
0x2be1   :  { %7085 = vadd.xlane.f32.xlu0 %v7084_v47 }
0x2c43   :  { %v7083_v17 = vpop.xlane.xlu2 %7082 }
0x2c44   :  { %v7087_v4 = vmul.f32 %v7083_v17, %v10126_v22 }
0x2c46   :  { %v7089_v0 = vadd.f32 1e-05, %v7087_v4 }
0x2c48   :  { %9853 = vrsqrt.f32 %v7089_v0  ;;  %vm7097_vm1 = vweird.f32 %v7089_v0 }
0x2c4e   :  { %v9854_v46 = vpop.eup %9853 }
0x2c4f   :  { %v7092_v55 = vmul.f32 %v9854_v46, %v7089_v0  ;;  %vm7098_vm7 = vweird.f32 %v9854_v46 }
0x2c50   :  { %vm7099_vm2 = vmor %vm7097_vm1, %vm7098_vm7 }
0x2c51   :  { %v7093_v35 = vmul.f32 %v9854_v46, %v7092_v55 }
0x2c53   :  { %v7094_v19 = vmul.f32 0.5, %v7093_v35 }
0x2c54   :  { %v7086_v26 = vpop.xlane.xlu0 %7085 }
0x2c55   :  { %v7095_v49 = vsub.f32 1.5, %v7094_v19  ;;  %v7088_v28 = vmul.f32 %v7086_v26, %v10126_v22  ;;  %v9160_v19 = vld [vmem:[%s13238_s6 + $0xb8] sm:$0xff]  ;;  %v9158_v26 = vld [vmem:[%s13238_s6 + $0xa8] sm:$0xff] }
0x2c56   :  { %7292 = vmatpush.msrb.mxu1 %v9160_v19 }
0x2c57   :  { %v7096_v54 = vmul.f32 %v9854_v46, %v7095_v49  ;;  %v7090_v27 = vadd.f32 1e-05, %v7088_v28  ;;  %v9157_v49 = vld [vmem:[%s13238_s6 + $0xa0] sm:$0xff] }
0x2c58   :  { %7293 = vmatpush.msrb.mxu1 %v9159_v14 }
0x2c59   :  { %v7100_v20 = vsel %vm7099_vm2, %v9854_v46, %v7096_v54  ;;  %9855 = vrsqrt.f32 %v7090_v27  ;;  %vm7107_vm4 = vweird.f32 %v7090_v27 }
0x2c5a   :  { %v7111_v30 = vmul.f32 %v7100_v20, %v7077_v8  ;;  %7294 = vmatpush.msrb.mxu1 %v9158_v26 }
0x2c5c   :  { %v7116_v56 = vmul.f32 %v9481_v52, %v7111_v30  ;;  %7295 = vmatpush.msrb.mxu1 %v9157_v49 }
0x2c5e   :  { %v7121_v31 = vadd.f32 %v9482_v10, %v7116_v56 }
0x2c5f   :  { %v9856_v2 = vpop.eup %9855 }
0x2c60   :  { %v7102_v9 = vmul.f32 %v9856_v2, %v7090_v27  ;;  %9136 = vmatmul.msk.f32.vlgmr.msra.gmra.mxu3 %vm73_vm0, %v7121_v31  ;;  %vm7108_vm3 = vweird.f32 %v9856_v2 }
0x2c61   :  { %vm7109_vm5 = vmor %vm7107_vm4, %vm7108_vm3 }
0x2c62   :  { %v7103_v63 = vmul.f32 %v9856_v2, %v7102_v9 }
0x2c64   :  { %v7104_v7 = vmul.f32 0.5, %v7103_v63 }
0x2c66   :  { %v7105_v18 = vsub.f32 1.5, %v7104_v7 }
0x2c68   :  { %v7106_v12 = vmul.f32 %v9856_v2, %v7105_v18 }
0x2c6a   :  { %v7110_v60 = vsel %vm7109_vm5, %v9856_v2, %v7106_v12  ;;  %v9486_v2 = vld [vmem:[%s13237_s5 + $0x5] ss:$0 sm:$0xff]  ;;  %s13459_s5 = smov 72  }
0x2c6b   :  { %v7112_v29 = vmul.f32 %v7110_v60, %v12604_v58 }
0x2c6d   :  { %v7117_v53 = vmul.f32 %v9481_v52, %v7112_v29 }
0x2c6f   :  { %v7122_v1 = vadd.f32 %v9482_v10, %v7117_v53 }
0x2c71   :  { %9137 = vmatmul.msk.f32.gmra.mxu3 %vm73_vm0, %v7122_v1 }
0x2ce3   :  { %v7156_v5 = vpop.f32.mrf.mxu3 }
0x2ce4   :  { %v7157_v6 = vadd.f32 %v9483_v11, %v7156_v5 }
0x2ce6   :  { %v7162_v24 = vmax.f32 %v7157_v6, 0.0 }
0x2ce8   :  { %7202 = vmatmul.f32.vlgmr.msra.gmra.mxu0 %v7162_v24 }
0x2cf4   :  { %v7159_v8 = vpop.f32.mrf.mxu3 }
0x2cf5   :  { %v7160_v40 = vadd.f32 %v9483_v11, %v7159_v8 }
0x2cf7   :  { %v7163_v57 = vmax.f32 %v7160_v40, 0.0 }
0x2cf9   :  { %7205 = vmatmul.f32.gmra.mxu0 %v7163_v57 }
0x2d65   :  { %v7203_v36 = vpop.f32.mrf.mxu0 }
0x2d66   :  { %v7204_v58 = vadd.f32 %v9484_v13, %v7203_v36 }
0x2d68   :  { %v12687_v39 = vadd.f32 %v7204_v58, %v12590_v61 }
0x2d6a   :  { %v7215_v47 = vsel %vm73_vm0, %v12687_v39, 0.0 }
0x2d6b   :  { %7216 = vadd.xlane.f32.xlu1 %v7215_v47 }
0x2d76   :  { %v7206_v21 = vpop.f32.mrf.mxu0 }
0x2d77   :  { %v7207_v51 = vadd.f32 %v9484_v13, %v7206_v21 }
0x2d79   :  { %v12692_v59 = vadd.f32 %v7207_v51, %v12595_v33 }
0x2d7b   :  { %v7218_v50 = vsel %vm73_vm0, %v12692_v59, 0.0 }
0x2d7c   :  { %7219 = vadd.xlane.f32.xlu2 %v7218_v50 }
0x2dde   :  { %v7217_v17 = vpop.xlane.xlu1 %7216 }
0x2ddf   :  { %v7221_v4 = vmul.f32 %v7217_v17, %v10126_v22 }
0x2de1   :  { %v7223_v0 = vsub.f32 %v12687_v39, %v7221_v4 }
0x2de3   :  { %v7225_v61 = vmul.f32 %v7223_v0, %v7223_v0 }
0x2de5   :  { %v7227_v46 = vsel %vm73_vm0, %v7225_v61, 0.0 }
0x2de6   :  { %7228 = vadd.xlane.f32.xlu0 %v7227_v46 }
0x2def   :  { %v7220_v55 = vpop.xlane.xlu2 %7219 }
0x2df0   :  { %v7222_v35 = vmul.f32 %v7220_v55, %v10126_v22 }
0x2df2   :  { %v7224_v43 = vsub.f32 %v12692_v59, %v7222_v35 }
0x2df4   :  { %v7226_v33 = vmul.f32 %v7224_v43, %v7224_v43 }
0x2df6   :  { %v7230_v25 = vsel %vm73_vm0, %v7226_v33, 0.0 }
0x2df7   :  { %7231 = vadd.xlane.f32.xlu1 %v7230_v25 }
0x2e59   :  { %v7229_v28 = vpop.xlane.xlu0 %7228 }
0x2e5a   :  { %v7233_v3 = vmul.f32 %v7229_v28, %v10126_v22 }
0x2e5c   :  { %v7235_v54 = vadd.f32 1e-05, %v7233_v3 }
0x2e5e   :  { %9857 = vrsqrt.f32 %v7235_v54  ;;  %vm7243_vm7 = vweird.f32 %v7235_v54 }
0x2e64   :  { %v9858_v27 = vpop.eup %9857 }
0x2e65   :  { %v7238_v45 = vmul.f32 %v9858_v27, %v7235_v54  ;;  %vm7244_vm6 = vweird.f32 %v9858_v27 }
0x2e66   :  { %vm7245_vm1 = vmor %vm7243_vm7, %vm7244_vm6 }
0x2e67   :  { %v7239_v52 = vmul.f32 %v9858_v27, %v7238_v45 }
0x2e69   :  { %v7240_v20 = vmul.f32 0.5, %v7239_v52 }
0x2e6a   :  { %v7232_v48 = vpop.xlane.xlu1 %7231 }
0x2e6b   :  { %v7241_v10 = vsub.f32 1.5, %v7240_v20  ;;  %v7234_v30 = vmul.f32 %v7232_v48, %v10126_v22 }
0x2e6d   :  { %v7242_v42 = vmul.f32 %v9858_v27, %v7241_v10  ;;  %v7236_v56 = vadd.f32 1e-05, %v7234_v30 }
0x2e6f   :  { %v7246_v31 = vsel %vm7245_vm1, %v9858_v27, %v7242_v42  ;;  %9859 = vrsqrt.f32 %v7236_v56  ;;  %vm7253_vm3 = vweird.f32 %v7236_v56 }
0x2e70   :  { %v7257_v34 = vmul.f32 %v7246_v31, %v7223_v0 }
0x2e72   :  { %v7262_v9 = vmul.f32 %v9485_v15, %v7257_v34 }
0x2e74   :  { %v7267_v37 = vadd.f32 %v9486_v2, %v7262_v9 }
0x2e75   :  { %v9860_v63 = vpop.eup %9859 }
0x2e76   :  { %v7248_v62 = vmul.f32 %v9860_v63, %v7236_v56  ;;  %9161 = vmatmul.msk.f32.vlgmr.msrb.gmra.mxu1 %vm73_vm0, %v7267_v37  ;;  %vm7254_vm2 = vweird.f32 %v9860_v63 }
0x2e77   :  { %vm7255_vm4 = vmor %vm7253_vm3, %vm7254_vm2 }
0x2e78   :  { %v7249_v7 = vmul.f32 %v9860_v63, %v7248_v62 }
0x2e7a   :  { %v7250_v32 = vmul.f32 0.5, %v7249_v7 }
0x2e7c   :  { %v7251_v18 = vsub.f32 1.5, %v7250_v32 }
0x2e7e   :  { %v7252_v38 = vmul.f32 %v9860_v63, %v7251_v18 }
0x2e80   :  { %v7256_v12 = vsel %vm7255_vm4, %v9860_v63, %v7252_v38 }
0x2e81   :  { %v7258_v60 = vmul.f32 %v7256_v12, %v7224_v43 }
0x2e83   :  { %v7263_v29 = vmul.f32 %v9485_v15, %v7258_v60 }
0x2e85   :  { %v7268_v53 = vadd.f32 %v9486_v2, %v7263_v29 }
0x2e87   :  { %9162 = vmatmul.msk.f32.gmra.mxu1 %vm73_vm0, %v7268_v53 }
0x2ef3   :  { %v12724_v1 = vpop.f32.mrf.mxu1 }
0x2ef4   :  { %7437 = vrot.lane.b32.xlu1 %v12724_v1, %s13404_s22  ;;  %7304 = vrot.lane.b32.xlu2 %v12724_v1, %s13405_s26 }
0x2f04   :  { %v12730_v41 = vpop.f32.mrf.mxu1 }
0x2f05   :  { %7463 = vrot.lane.b32.xlu1 %v12730_v41, %s13409_s18  ;;  %7465 = vrot.lane.b32.xlu2 %v12730_v41, %s13404_s22  ;;  %v12742_v23 = vpack.i.bf16 %v12730_v41, %v12724_v1  ;;  %s13463_s22 = smov 104  }
0x2f06   :  { %7331 = vrot.lane.b32.xlu0 %v12730_v41, %s13405_s26  ;;  %s13464_s26 = smov 52  }
0x2f0e   :  { %7435 = vrot.lane.b32.xlu0 %v12724_v1, %s13409_s18  ;;  %s13468_s18 = smov 36  }
0x2f16   :  { %9425 = vrot.lane.b32.xlu0 %v12742_v23, %s13408_s17  ;;  %s13467_s17 = smov 48  }
0x2f4e   :  { %v7305_v44 = vpop.permute.xlu2 %7304 }
0x2f4f   :  { %9163 = vmatpush.xpose.msk.msra.mxu2 %vm210_vm8, %v7305_v44 }
0x2f52   :  { %9164 = vmatmul.msk.f32.vlgmr.msra.gmra.mxu2 %vm210_vm8, %v12724_v1 }
0x2f5f   :  { %v7466_v57 = vpop.permute.xlu2 %7465 }
0x2f66   :  { %v7438_v5 = vpop.permute.xlu1 %7437 }
0x2f77   :  { %v7464_v14 = vpop.permute.xlu1 %7463 }
0x2f78   :  { %v7332_v11 = vpop.permute.xlu0 %7331 }
0x2f79   :  { %9165 = vmatpush.xpose.msk.msrb.mxu3 %vm210_vm8, %v7332_v11 }
0x2f7c   :  { %9166 = vmatmul.msk.f32.vlgmr.msrb.gmra.mxu3 %vm210_vm8, %v12730_v41 }
0x2f7d   :  { %9169 = vmatpush.xpose.msk.msra.mxu3 %vm210_vm8, %v7438_v5 }
0x2f80   :  { %v7436_v6 = vpop.permute.xlu0 %7435 }
0x2f84   :  { %9170 = vmatmul.msk.f32.vlgmr.msra.gmra.mxu3 %vm210_vm8, %v7436_v6 }
0x2f88   :  { %v9426_v24 = vpop.permute.xlu0 %9425 }
0x2f89   :  { %v9428_v8 = vunpack.i.h.bf16 %v9426_v24  ;;  %v9427_v40 = vunpack.i.l.bf16 %v9426_v24 }
0x2f8b   :  { %7404 = vmatpush.msra.mxu1 %v9427_v40  ;;  %7430 = vmatpush.msrb.mxu2 %v9428_v8 }
0x2f8d   :  { %9171 = vmatpush.xpose.msk.msrb.mxu1 %vm210_vm8, %v7466_v57 }
0x2fd5   :  { %v7327_v13 = vpop.f32.mrf.mxu2 }
0x2fd6   :  { %v7357_v36 = vmul.f32 0.17677669, %v7327_v13 }
0x2fd8   :  { %v7359_v58 = vsel %vm10183_vm9, %v7357_v36, -1e+30 }
0x2fd9   :  { %v7361_v47 = vsel %vm268_vm10, %v7359_v58, -inf }
0x2fda   :  { %7362 = vmax.xlane.f32.xlu2 %v7361_v47 }
0x2ff2   :  { %7517 = vrot.lane.b32.xlu2 %v12724_v1, %s13407_s16 }
0x2ffa   :  { %7599 = vrot.lane.b32.xlu2 %v12730_v41, %s13406_s15 }
0x2fff   :  { %v7354_v21 = vpop.f32.mrf.mxu3 }
0x3000   :  { %v7358_v51 = vmul.f32 0.17677669, %v7354_v21 }
0x3002   :  { %v7360_v50 = vsel %vm10183_vm9, %v7358_v51, -1e+30  ;;  %7703 = vrot.lane.b32.xlu2 %v12724_v1, %s13440_s3 }
0x3003   :  { %v7364_v17 = vsel %vm268_vm10, %v7360_v50, -inf }
0x3004   :  { %7365 = vmax.xlane.f32.xlu1 %v7364_v17 }
0x3007   :  { %v7460_v4 = vpop.f32.mrf.mxu3 }
0x3008   :  { %v7491_v0 = vmul.f32 0.17677669, %v7460_v4 }
0x300a   :  { %v7493_v61 = vsel %vm10183_vm9, %v7491_v0, -1e+30 }
0x300b   :  { %v7495_v46 = vsel %vm268_vm10, %v7493_v61, -inf }
0x300c   :  { %7496 = vmax.xlane.f32.xlu0 %v7495_v46 }
0x301d   :  { %7597 = vrot.lane.b32.xlu1 %v12730_v41, %s13381_s30 }
0x3020   :  { %7571 = vrot.lane.b32.xlu0 %v12724_v1, %s13406_s15  ;;  %s13465_s15 = smov 68  }
0x3025   :  { %7839 = vrot.lane.b32.xlu1 %v12724_v1, %s13382_s2 }
0x3028   :  { %7569 = vrot.lane.b32.xlu0 %v12724_v1, %s13381_s30  ;;  %s13460_s30 = smov 100  }
0x302d   :  { %7867 = vrot.lane.b32.xlu1 %v12730_v41, %s13382_s2  ;;  %s13461_s2 = smov 56  }
0x3030   :  { %7705 = vrot.lane.b32.xlu0 %v12724_v1, %s13383_s23 }
0x3035   :  { %7971 = vrot.lane.b32.xlu1 %v12724_v1, %s13423_s1 }
0x3038   :  { %7733 = vrot.lane.b32.xlu0 %v12730_v41, %s13383_s23  ;;  %s13462_s23 = smov 76  }
0x3040   :  { %7837 = vrot.lane.b32.xlu0 %v12724_v1, %s13458_s4 }
0x3048   :  { %7865 = vrot.lane.b32.xlu0 %v12730_v41, %s13458_s4 }
0x304d   :  { %v7363_v55 = vpop.xlane.xlu2 %7362 }
0x304e   :  { %v7367_v35 = vsub.f32 %v7359_v58, %v7363_v55 }
0x3050   :  { %v7369_v43 = vmul.f32 1.442695, %v7367_v35  ;;  %8107 = vrot.lane.b32.xlu0 %v12724_v1, %s13459_s5 }
0x3052   :  { %9861 = vpow2.f32 %v7369_v43 }
0x3055   :  { %v7518_v33 = vpop.permute.xlu2 %7517 }
0x3056   :  { %7538 = vmatpush.msra.mxu2 %v7518_v33 }
0x3058   :  { %v9862_v25 = vpop.eup %9861  ;;  %8135 = vrot.lane.b32.xlu0 %v12730_v41, %s13459_s5 }
0x3059   :  { %v7373_v19 = vsel %vm268_vm10, %v9862_v25, 0.0 }
0x305a   :  { %7374 = vadd.xlane.f32.xlu2 %v7373_v19 }
0x305d   :  { %v7600_v2 = vpop.permute.xlu2 %7599 }
0x3060   :  { %8239 = vrot.lane.b32.xlu0 %v12724_v1, %s13460_s30 }
0x3065   :  { %v7704_v9 = vpop.permute.xlu2 %7703 }
0x3068   :  { %9430 = vrot.lane.b32.xlu0 %v12742_v23, %s13461_s2 }
0x3072   :  { %7731 = vrot.lane.b32.xlu2 %v12730_v41, %s13440_s3  ;;  %s13470_s3 = smov 4  }
0x3077   :  { %v7366_v26 = vpop.xlane.xlu1 %7365 }
0x3078   :  { %v7368_v49 = vsub.f32 %v7360_v50, %v7366_v26 }
0x307a   :  { %v7371_v28 = vmul.f32 1.442695, %v7368_v49  ;;  %7973 = vrot.lane.b32.xlu2 %v12724_v1, %s13462_s23 }
0x307c   :  { %9863 = vpow2.f32 %v7371_v28 }
0x307f   :  { %v7497_v3 = vpop.xlane.xlu0 %7496 }
0x3080   :  { %v7501_v54 = vsub.f32 %v7493_v61, %v7497_v3 }
0x3082   :  { %v9864_v27 = vpop.eup %9863  ;;  %v7503_v45 = vmul.f32 1.442695, %v7501_v54  ;;  %8001 = vrot.lane.b32.xlu2 %v12730_v41, %s13462_s23 }
0x3083   :  { %v7376_v52 = vsel %vm268_vm10, %v9864_v27, 0.0 }
0x3084   :  { %9865 = vpow2.f32 %v7503_v45  ;;  %7377 = vadd.xlane.f32.xlu1 %v7376_v52 }
0x308a   :  { %v9866_v20 = vpop.eup %9865  ;;  %8105 = vrot.lane.b32.xlu2 %v12724_v1, %s13463_s22 }
0x308b   :  { %v7507_v48 = vsel %vm268_vm10, %v9866_v20, 0.0 }
0x308c   :  { %7508 = vadd.xlane.f32.xlu1 %v7507_v48 }
0x308f   :  { %v7598_v62 = vpop.permute.xlu1 %7597 }
0x3092   :  { %v7572_v10 = vpop.permute.xlu0 %7571  ;;  %8133 = vrot.lane.b32.xlu2 %v12730_v41, %s13463_s22  ;;  %s13477_s22 = sld [smem:[#allocation9_spill]] }
0x3097   :  { %v7840_v60 = vpop.permute.xlu1 %7839 }
0x309a   :  { %v7570_v30 = vpop.permute.xlu0 %7569  ;;  %8267 = vrot.lane.b32.xlu2 %v12730_v41, %s13460_s30 }
0x309f   :  { %v7868_v44 = vpop.permute.xlu1 %7867 }
0x30a2   :  { %v7706_v42 = vpop.permute.xlu0 %7705  ;;  %7543 = vrot.lane.b32.xlu2 %v12730_v41, %s13407_s16  ;;  %s13466_s16 = smov 44  }
0x30a5   :  { %7999 = vrot.lane.b32.xlu1 %v12730_v41, %s13423_s1  ;;  %s13469_s1 = smov 40  }
0x30a7   :  { %v7972_v6 = vpop.permute.xlu1 %7971 }
0x30aa   :  { %v7734_v56 = vpop.permute.xlu0 %7733  ;;  %9435 = vrot.lane.b32.xlu2 %v12742_v23, %s13464_s26 }
0x30ad   :  { %8241 = vrot.lane.b32.xlu1 %v12724_v1, %s13465_s15 }
0x30b2   :  { %v7838_v15 = vpop.permute.xlu0 %7837 }
0x30b5   :  { %8269 = vrot.lane.b32.xlu1 %v12730_v41, %s13465_s15 }
0x30ba   :  { %v7866_v31 = vpop.permute.xlu0 %7865 }
0x30c2   :  { %v8108_v34 = vpop.permute.xlu0 %8107 }
0x30ca   :  { %v8136_v37 = vpop.permute.xlu0 %8135 }
0x30cd   :  { %v7375_v63 = vpop.xlane.xlu2 %7374 }
0x30ce   :  { %9867 = vrcp.f32 %v7375_v63 }
0x30d2   :  { %v8240_v7 = vpop.permute.xlu0 %8239 }
0x30d4   :  { %v9868_v32 = vpop.eup %9867 }
0x30d5   :  { %v7381_v18 = vmul.f32 %v9868_v32, %v9862_v25  ;;  %v7732_v38 = vpop.permute.xlu2 %7731 }
0x30d7   :  { %9167 = vmatmul.msk.f32.vlgmr.msra.gmra.mxu1 %vm268_vm10, %v7381_v18 }
0x30d8   :  { %9175 = vmatpush.xpose.msk.msra.mxu1 %vm210_vm8, %v7572_v10 }
0x30da   :  { %v9431_v12 = vpop.permute.xlu0 %9430 }
0x30db   :  { %v9433_v29 = vunpack.i.h.bf16 %v9431_v12  ;;  %v9432_v58 = vunpack.i.l.bf16 %v9431_v12 }
0x30dd   :  { %7698 = vmatpush.msrb.mxu0 %v9433_v29  ;;  %v7974_v53 = vpop.permute.xlu2 %7973 }
0x30df   :  { %9172 = vmatmul.msk.f32.vlgmr.msrb.gmra.mxu1 %vm210_vm8, %v7464_v14 }
0x30e0   :  { %9181 = vmatpush.xpose.msk.msrb.mxu1 %vm210_vm8, %v7706_v42 }
0x30e5   :  { %v8002_v11 = vpop.permute.xlu2 %8001 }
0x30e7   :  { %9176 = vmatmul.msk.f32.vlgmr.msra.gmra.mxu1 %vm210_vm8, %v7570_v30 }
0x30e8   :  { %9187 = vmatpush.xpose.msk.msra.mxu1 %vm210_vm8, %v7840_v60 }
0x30ed   :  { %v8106_v5 = vpop.permute.xlu2 %8105 }
0x30ef   :  { %9182 = vmatmul.msk.f32.vlgmr.msrb.gmra.mxu1 %vm210_vm8, %v7704_v9 }
0x30f0   :  { %9193 = vmatpush.xpose.msk.msrb.mxu1 %vm210_vm8, %v7974_v53 }
0x30f5   :  { %v8134_v24 = vpop.permute.xlu2 %8133 }
0x30f7   :  { %v7378_v8 = vpop.xlane.xlu1 %7377  ;;  %9188 = vmatmul.msk.f32.vlgmr.msra.gmra.mxu1 %vm210_vm8, %v7838_v15 }
0x30f8   :  { %9869 = vrcp.f32 %v7378_v8  ;;  %9199 = vmatpush.xpose.msk.msra.mxu1 %vm210_vm8, %v8108_v34 }
0x30fd   :  { %v8268_v40 = vpop.permute.xlu2 %8267 }
0x30fe   :  { %v9870_v57 = vpop.eup %9869 }
0x30ff   :  { %v7382_v13 = vmul.f32 %v9870_v57, %v9864_v27  ;;  %v7509_v36 = vpop.xlane.xlu1 %7508  ;;  %9194 = vmatmul.msk.f32.vlgmr.msrb.gmra.mxu1 %vm210_vm8, %v7972_v6 }
0x3100   :  { %9871 = vrcp.f32 %v7509_v36 }
0x3101   :  { %9168 = vmatmul.msk.f32.vlgmr.msrb.gmra.mxu2 %vm268_vm10, %v7382_v13 }
0x3102   :  { %9177 = vmatpush.xpose.msk.msrb.mxu2 %vm210_vm8, %v7600_v2 }
0x3105   :  { %v7544_v47 = vpop.permute.xlu2 %7543 }
0x3106   :  { %v9872_v21 = vpop.eup %9871  ;;  %7564 = vmatpush.msrb.mxu3 %v7544_v47 }
0x3107   :  { %v7515_v51 = vmul.f32 %v9872_v21, %v9866_v20  ;;  %9200 = vmatmul.msk.f32.vlgmr.msra.gmra.mxu1 %vm210_vm8, %v8106_v5 }
0x3108   :  { %7672 = vmatpush.msra.mxu3 %v9432_v58 }
0x3109   :  { %9173 = vmatmul.msk.f32.vlgmr.msra.gmra.mxu2 %vm268_vm10, %v7515_v51 }
0x310a   :  { %9183 = vmatpush.xpose.msk.msra.mxu2 %vm210_vm8, %v7734_v56 }
0x310d   :  { %v12839_v50 = vpop.permute.xlu2 %9435 }
0x310e   :  { %v9438_v17 = vunpack.i.h.bf16 %v12839_v50 }
0x3110   :  { %7832 = vmatpush.msra.mxu0 %v9438_v17 }
0x3111   :  { %9178 = vmatmul.msk.f32.vlgmr.msrb.gmra.mxu2 %vm210_vm8, %v7598_v62 }
0x3112   :  { %9189 = vmatpush.xpose.msk.msrb.mxu2 %vm210_vm8, %v7868_v44 }
0x3117   :  { %v8000_v4 = vpop.permute.xlu1 %7999 }
0x3119   :  { %9184 = vmatmul.msk.f32.vlgmr.msra.gmra.mxu2 %vm210_vm8, %v7732_v38 }
0x311a   :  { %9195 = vmatpush.xpose.msk.msra.mxu2 %vm210_vm8, %v8002_v11 }
0x311f   :  { %v8242_v0 = vpop.permute.xlu1 %8241 }
0x3120   :  { %9205 = vmatpush.xpose.msk.msrb.mxu1 %vm210_vm8, %v8242_v0 }
0x3121   :  { %9190 = vmatmul.msk.f32.vlgmr.msrb.gmra.mxu2 %vm210_vm8, %v7866_v31 }
0x3122   :  { %9201 = vmatpush.xpose.msk.msrb.mxu2 %vm210_vm8, %v8136_v37 }
0x3123   :  { %9206 = vmatmul.msk.f32.vlgmr.msrb.gmra.mxu1 %vm210_vm8, %v8240_v7 }
0x3127   :  { %v8270_v61 = vpop.permute.xlu1 %8269 }
0x3129   :  { %9196 = vmatmul.msk.f32.vlgmr.msra.gmra.mxu2 %vm210_vm8, %v8000_v4 }
0x312a   :  { %9207 = vmatpush.xpose.msk.msra.mxu2 %vm210_vm8, %v8270_v61 }
0x3131   :  { %9202 = vmatmul.msk.f32.vlgmr.msrb.gmra.mxu2 %vm210_vm8, %v8134_v24 }
0x3139   :  { %9208 = vmatmul.msk.f32.vlgmr.msra.gmra.mxu2 %vm210_vm8, %v8268_v40 }
0x3154   :  { %v12854_v46 = vpop.f32.mrf.mxu1 }
0x315c   :  { %v7488_v55 = vpop.f32.mrf.mxu1 }
0x315d   :  { %v7492_v35 = vmul.f32 0.17677669, %v7488_v55 }
0x315f   :  { %v12858_v43 = vsel %vm10183_vm9, %v7492_v35, -1e+30 }
0x3160   :  { %v7498_v33 = vsel %vm268_vm10, %v12858_v43, -inf }
0x3161   :  { %7499 = vmax.xlane.f32.xlu0 %v7498_v33 }
0x3164   :  { %v7594_v25 = vpop.f32.mrf.mxu1 }
0x3165   :  { %v7625_v19 = vmul.f32 0.17677669, %v7594_v25 }
0x3167   :  { %v12864_v14 = vsel %vm10183_vm9, %v7625_v19, -1e+30 }
0x3168   :  { %v7629_v26 = vsel %vm268_vm10, %v12864_v14, -inf }
0x3169   :  { %7630 = vmax.xlane.f32.xlu1 %v7629_v26 }
0x316c   :  { %v7728_v49 = vpop.f32.mrf.mxu1 }
0x316d   :  { %v7759_v28 = vmul.f32 0.17677669, %v7728_v49 }
0x316f   :  { %v12870_v3 = vsel %vm10183_vm9, %v7759_v28, -1e+30 }
0x3170   :  { %v7763_v54 = vsel %vm268_vm10, %v12870_v3, -inf }
0x3171   :  { %7764 = vmax.xlane.f32.xlu2 %v7763_v54 }
0x3174   :  { %v7862_v45 = vpop.f32.mrf.mxu1 }
0x3175   :  { %v7893_v2 = vmul.f32 0.17677669, %v7862_v45 }
0x3177   :  { %v12896_v9 = vsel %vm10183_vm9, %v7893_v2, -1e+30 }
0x3178   :  { %v7897_v62 = vsel %vm268_vm10, %v12896_v9, -inf }
0x317c   :  { %v7996_v10 = vpop.f32.mrf.mxu1 }
0x317d   :  { %v8027_v56 = vmul.f32 0.17677669, %v7996_v10 }
0x317f   :  { %v12890_v31 = vsel %vm10183_vm9, %v8027_v56, -1e+30 }
0x3182   :  { %9445 = vrot.lane.b32.xlu1 %v12742_v23, %s13466_s16  ;;  %s13478_s16 = sld [smem:[#allocation10_spill]] }
0x3184   :  { %v12876_v27 = vpop.f32.mrf.mxu2  ;;  %v8130_v37 = vpop.f32.mrf.mxu1 }
0x3185   :  { %v8161_v11 = vmul.f32 0.17677669, %v8130_v37 }
0x3187   :  { %v12920_v40 = vsel %vm10183_vm9, %v8161_v11, -1e+30 }
0x3188   :  { %v8165_v58 = vsel %vm268_vm10, %v12920_v40, -inf }
0x3189   :  { %9440 = vrot.lane.b32.xlu2 %v12742_v23, %s13467_s17  ;;  %v8031_v23 = vsel %vm268_vm10, %v12890_v31, -inf }
0x318c   :  { %v12880_v52 = vpop.f32.mrf.mxu2 }
0x3194   :  { %v7622_v20 = vpop.f32.mrf.mxu2 }
0x3195   :  { %v7626_v48 = vmul.f32 0.17677669, %v7622_v20 }
0x3197   :  { %v12884_v30 = vsel %vm10183_vm9, %v7626_v48, -1e+30 }
0x3198   :  { %v7632_v42 = vsel %vm268_vm10, %v12884_v30, -inf }
0x3199   :  { %7633 = vmax.xlane.f32.xlu0 %v7632_v42 }
0x319c   :  { %v7756_v15 = vpop.f32.mrf.mxu2 }
0x319d   :  { %v7760_v63 = vmul.f32 0.17677669, %v7756_v15 }
0x319f   :  { %v12902_v38 = vsel %vm10183_vm9, %v7760_v63, -1e+30 }
0x31a0   :  { %v8264_v53 = vpop.f32.mrf.mxu1  ;;  %v7766_v44 = vsel %vm268_vm10, %v12902_v38, -inf }
0x31a1   :  { %8032 = vmax.xlane.f32.xlu0 %v8031_v23  ;;  %v8295_v6 = vmul.f32 0.17677669, %v8264_v53 }
0x31a3   :  { %v12928_v13 = vsel %vm10183_vm9, %v8295_v6, -1e+30 }
0x31a4   :  { %v7890_v34 = vpop.f32.mrf.mxu2  ;;  %v8299_v47 = vsel %vm268_vm10, %v12928_v13, -inf }
0x31a5   :  { %v7894_v7 = vmul.f32 0.17677669, %v7890_v34 }
0x31a7   :  { %v12910_v60 = vsel %vm10183_vm9, %v7894_v7, -1e+30 }
0x31a8   :  { %v7900_v5 = vsel %vm268_vm10, %v12910_v60, -inf }
0x31ac   :  { %v8024_v32 = vpop.f32.mrf.mxu2  ;;  %7898 = vmax.xlane.f32.xlu1 %v7897_v62 }
0x31ad   :  { %v8028_v18 = vmul.f32 0.17677669, %v8024_v32 }
0x31af   :  { %v12906_v12 = vsel %vm10183_vm9, %v8028_v18, -1e+30 }
0x31b0   :  { %v8034_v29 = vsel %vm268_vm10, %v12906_v12, -inf }
0x31b1   :  { %8035 = vmax.xlane.f32.xlu0 %v8034_v29 }
0x31b2   :  { %7767 = vmax.xlane.f32.xlu2 %v7766_v44 }
0x31b4   :  { %v8158_v24 = vpop.f32.mrf.mxu2  ;;  %7901 = vmax.xlane.f32.xlu1 %v7900_v5 }
0x31b5   :  { %v8162_v8 = vmul.f32 0.17677669, %v8158_v24 }
0x31b7   :  { %v12924_v57 = vsel %vm10183_vm9, %v8162_v8, -1e+30 }
0x31b8   :  { %v8168_v36 = vsel %vm268_vm10, %v12924_v57, -inf }
0x31b9   :  { %8169 = vmax.xlane.f32.xlu0 %v8168_v36 }
0x31ba   :  { %8166 = vmax.xlane.f32.xlu2 %v8165_v58 }
0x31bc   :  { %v8292_v21 = vpop.f32.mrf.mxu2  ;;  %8300 = vmax.xlane.f32.xlu1 %v8299_v47 }
0x31bd   :  { %v8296_v51 = vmul.f32 0.17677669, %v8292_v21 }
0x31bf   :  { %v12938_v17 = vsel %vm10183_vm9, %v8296_v51, -1e+30 }
0x31c0   :  { %v8302_v4 = vsel %vm268_vm10, %v12938_v17, -inf }
0x31c1   :  { %8303 = vmax.xlane.f32.xlu0 %v8302_v4 }
0x31d4   :  { %v7500_v0 = vpop.xlane.xlu0 %7499 }
0x31d5   :  { %v7502_v61 = vsub.f32 %v12858_v43, %v7500_v0 }
0x31d7   :  { %v7505_v55 = vmul.f32 1.442695, %v7502_v61 }
0x31d9   :  { %9873 = vpow2.f32 %v7505_v55 }
0x31dc   :  { %v7631_v35 = vpop.xlane.xlu1 %7630 }
0x31dd   :  { %v7635_v33 = vsub.f32 %v12864_v14, %v7631_v35 }
0x31df   :  { %v12944_v25 = vpop.eup %9873  ;;  %v7637_v19 = vmul.f32 1.442695, %v7635_v33 }
0x31e0   :  { %v7510_v16 = vsel %vm268_vm10, %v12944_v25, 0.0 }
0x31e1   :  { %9875 = vpow2.f32 %v7637_v19  ;;  %7511 = vadd.xlane.f32.xlu2 %v7510_v16  ;;  %v9437_v16 = vunpack.i.l.bf16 %v12839_v50 }
0x31e4   :  { %v7765_v26 = vpop.xlane.xlu2 %7764 }
0x31e5   :  { %v7769_v49 = vsub.f32 %v12870_v3, %v7765_v26 }
0x31e7   :  { %v12949_v28 = vpop.eup %9875  ;;  %v7771_v54 = vmul.f32 1.442695, %v7769_v49 }
0x31e8   :  { %v7641_v43 = vsel %vm268_vm10, %v12949_v28, 0.0 }
0x31e9   :  { %9877 = vpow2.f32 %v7771_v54  ;;  %7642 = vadd.xlane.f32.xlu1 %v7641_v43 }
0x31ec   :  { %v12964_v15 = vpop.permute.xlu2 %9440 }
0x31ef   :  { %v12953_v14 = vpop.eup %9877 }
0x31f0   :  { %v7775_v45 = vsel %vm268_vm10, %v12953_v14, 0.0 }
0x31f1   :  { %7776 = vadd.xlane.f32.xlu1 %v7775_v45  ;;  %v9442_v45 = vunpack.i.l.bf16 %v12964_v15 }
0x31f4   :  { %v12960_v42 = vpop.permute.xlu1 %9445 }
0x320c   :  { %v7634_v20 = vpop.xlane.xlu0 %7633 }
0x320d   :  { %v7636_v48 = vsub.f32 %v12884_v30, %v7634_v20 }
0x320f   :  { %v7639_v10 = vmul.f32 1.442695, %v7636_v48 }
0x3211   :  { %9879 = vpow2.f32 %v7639_v10 }
0x3214   :  { %v8033_v23 = vpop.xlane.xlu0 %8032 }
0x3215   :  { %v8037_v37 = vsub.f32 %v12890_v31, %v8033_v23 }
0x3217   :  { %v12958_v3 = vpop.eup %9879  ;;  %v8039_v30 = vmul.f32 1.442695, %v8037_v37 }
0x3218   :  { %v7644_v56 = vsel %vm268_vm10, %v12958_v3, 0.0 }
0x3219   :  { %7645 = vadd.xlane.f32.xlu1 %v7644_v56 }
0x321f   :  { %v7899_v2 = vpop.xlane.xlu1 %7898 }
0x3220   :  { %v7903_v34 = vsub.f32 %v12896_v9, %v7899_v2 }
0x3222   :  { %v7905_v63 = vmul.f32 1.442695, %v7903_v34 }
0x3224   :  { %9881 = vpow2.f32 %v7905_v63  ;;  %v8036_v6 = vpop.xlane.xlu0 %8035 }
0x3225   :  { %v7768_v62 = vpop.xlane.xlu2 %7767  ;;  %9883 = vpow2.f32 %v8039_v30  ;;  %v8038_v8 = vsub.f32 %v12906_v12, %v8036_v6 }
0x3226   :  { %v7770_v7 = vsub.f32 %v12902_v38, %v7768_v62  ;;  %v9443_v62 = vunpack.i.h.bf16 %v12964_v15  ;;  %v9448_v15 = vunpack.i.h.bf16 %v12960_v42 }
0x3227   :  { %v7902_v32 = vpop.xlane.xlu1 %7901  ;;  %v8041_v58 = vmul.f32 1.442695, %v8038_v8 }
0x3228   :  { %v7773_v18 = vmul.f32 1.442695, %v7770_v7  ;;  %v7904_v29 = vsub.f32 %v12910_v60, %v7902_v32 }
0x322a   :  { %v12970_v53 = vpop.eup %9881  ;;  %9885 = vpow2.f32 %v7773_v18  ;;  %v7907_v9 = vmul.f32 1.442695, %v7904_v29 }
0x322b   :  { %v7909_v44 = vsel %vm268_vm10, %v12970_v53, 0.0  ;;  %v12975_v5 = vpop.eup %9883 }
0x322c   :  { %7910 = vadd.xlane.f32.xlu1 %v7909_v44  ;;  %9887 = vpow2.f32 %v7907_v9  ;;  %v8043_v36 = vsel %vm268_vm10, %v12975_v5, 0.0  ;;  %v8170_v35 = vpop.xlane.xlu0 %8169 }
0x322d   :  { %v8167_v31 = vpop.xlane.xlu2 %8166 }
0x322e   :  { %v8171_v11 = vsub.f32 %v12920_v40, %v8167_v31 }
0x322f   :  { %v8301_v0 = vpop.xlane.xlu1 %8300 }
0x3230   :  { %v12977_v38 = vpop.eup %9885  ;;  %v8173_v24 = vmul.f32 1.442695, %v8171_v11  ;;  %v8305_v26 = vsub.f32 %v12928_v13, %v8301_v0 }
0x3231   :  { %v7778_v60 = vsel %vm268_vm10, %v12977_v38, 0.0 }
0x3232   :  { %9889 = vpow2.f32 %v8173_v24  ;;  %7779 = vadd.xlane.f32.xlu0 %v7778_v60  ;;  %v12984_v40 = vpop.eup %9887 }
0x3233   :  { %9891 = vpow2.f32 %v8041_v58  ;;  %v7912_v51 = vsel %vm268_vm10, %v12984_v40, 0.0 }
0x3234   :  { %8044 = vadd.xlane.f32.xlu1 %v8043_v36  ;;  %v8304_v50 = vpop.xlane.xlu0 %8303 }
0x3235   :  { %v8306_v13 = vsub.f32 %v12938_v17, %v8304_v50 }
0x3237   :  { %v8309_v23 = vmul.f32 1.442695, %v8306_v13 }
0x3238   :  { %v12986_v47 = vpop.eup %9889 }
0x3239   :  { %v8177_v21 = vsel %vm268_vm10, %v12986_v47, 0.0  ;;  %v12992_v12 = vpop.eup %9891 }
0x323a   :  { %8178 = vadd.xlane.f32.xlu2 %v8177_v21  ;;  %v8046_v4 = vsel %vm268_vm10, %v12992_v12, 0.0 }
0x323c   :  { %7913 = vadd.xlane.f32.xlu1 %v7912_v51 }
0x3244   :  { %8047 = vadd.xlane.f32.xlu1 %v8046_v4 }
0x3246   :  { %8321 = vrot.lane.b32.xlu0 %v12724_v1, %s13468_s18 }
0x3252   :  { %8187 = vrot.lane.b32.xlu2 %v12724_v1, %s13469_s1  ;;  %v8307_v1 = vmul.f32 1.442695, %v8305_v26 }
0x3254   :  { %v7512_v61 = vpop.xlane.xlu2 %7511 }
0x3255   :  { %9893 = vrcp.f32 %v7512_v61 }
0x325b   :  { %v9894_v55 = vpop.eup %9893 }
0x325c   :  { %v7516_v33 = vmul.f32 %v9894_v55, %v12944_v25  ;;  %v7643_v19 = vpop.xlane.xlu1 %7642  ;;  %v8172_v25 = vsub.f32 %v12924_v57, %v8170_v35 }
0x325d   :  { %9895 = vrcp.f32 %v7643_v19  ;;  %8347 = vrot.lane.b32.xlu1 %v12730_v41, %s13468_s18 }
0x325e   :  { %9174 = vmatmul.msk.f32.vlgmr.msrb.gmra.mxu3 %vm268_vm10, %v7516_v33  ;;  %v8175_v20 = vmul.f32 1.442695, %v8172_v25 }
0x325f   :  { %7806 = vmatpush.msrb.mxu3 %v9437_v16 }
0x3263   :  { %v9896_v49 = vpop.eup %9895 }
0x3264   :  { %v7649_v54 = vmul.f32 %v9896_v49, %v12949_v28  ;;  %v7777_v43 = vpop.xlane.xlu1 %7776  ;;  %v9447_v28 = vunpack.i.l.bf16 %v12960_v42 }
0x3265   :  { %9897 = vrcp.f32 %v7777_v43 }
0x3266   :  { %9899 = vpow2.f32 %v8307_v1  ;;  %9179 = vmatmul.msk.f32.vlgmr.msra.gmra.mxu3 %vm268_vm10, %v7649_v54 }
0x3267   :  { %7940 = vmatpush.msra.mxu3 %v9442_v45  ;;  %9901 = vpow2.f32 %v8175_v20 }
0x3268   :  { %9903 = vpow2.f32 %v8309_v23  ;;  %v9212_v23 = vld [vmem:[%s13239_s7 + $0xa8] sm:$0xff] }
0x326b   :  { %v9898_v48 = vpop.eup %9897 }
0x326c   :  { %v13011_v10 = vpop.eup %9899  ;;  %v7783_v56 = vmul.f32 %v9898_v48, %v12953_v14 }
0x326d   :  { %v8311_v57 = vsel %vm268_vm10, %v13011_v10, 0.0  ;;  %v13018_v2 = vpop.eup %9901 }
0x326e   :  { %9185 = vmatmul.msk.f32.vlgmr.msrb.gmra.mxu3 %vm268_vm10, %v7783_v56  ;;  %v13020_v17 = vpop.eup %9903  ;;  %v8180_v34 = vsel %vm268_vm10, %v13018_v2, 0.0  ;;  %v9214_v56 = vld [vmem:[%s13239_s7 + $0xb8] sm:$0xff] }
0x326f   :  { %8074 = vmatpush.msrb.mxu3 %v9447_v28  ;;  %v8314_v14 = vsel %vm268_vm10, %v13020_v17, 0.0  ;;  %v9213_v28 = vld [vmem:[%s13239_s7 + $0xb0] sm:$0xff]  ;;  %8471 = vmatpush.msra.mxu1 %v9214_v56 }
0x3270   :  { %8312 = vadd.xlane.f32.xlu0 %v8311_v57 }
0x3271   :  { %8472 = vmatpush.msra.mxu1 %v9213_v28  ;;  %v9240_v28 = vld [vmem:[%s13245_s13 + $0x2e8] sm:$0xff] }
0x3273   :  { %8473 = vmatpush.msra.mxu1 %v9212_v23  ;;  %v9488_v23 = vld [vmem:[%s13241_s9 + $0x5] ss:$0 sm:$0xff] }
0x3278   :  { %8181 = vadd.xlane.f32.xlu0 %v8180_v34 }
0x327b   :  { %8315 = vadd.xlane.f32.xlu2 %v8314_v14 }
0x328c   :  { %v7646_v37 = vpop.xlane.xlu1 %7645  ;;  %8213 = vrot.lane.b32.xlu0 %v12730_v41, %s13469_s1  ;;  %s13479_s1 = sld [smem:[#allocation12_spill]] }
0x328d   :  { %9905 = vrcp.f32 %v7646_v37 }
0x3293   :  { %v9906_v63 = vpop.eup %9905 }
0x3294   :  { %v7650_v30 = vmul.f32 %v9906_v63, %v12958_v3  ;;  %8375 = vrot.lane.b32.xlu0 %v12880_v52, %s13470_s3 }
0x3296   :  { %9180 = vmatmul.msk.f32.vlgmr.msrb.gmra.mxu0 %vm268_vm10, %v7650_v30 }
0x3297   :  { %7966 = vmatpush.msrb.mxu0 %v9443_v62 }
0x329f   :  { %v7911_v7 = vpop.xlane.xlu1 %7910 }
0x32a0   :  { %9907 = vrcp.f32 %v7911_v7 }
0x32a5   :  { %v7780_v32 = vpop.xlane.xlu0 %7779 }
0x32a6   :  { %v9908_v18 = vpop.eup %9907  ;;  %9909 = vrcp.f32 %v7780_v32 }
0x32a7   :  { %v7917_v29 = vmul.f32 %v9908_v18, %v12970_v53  ;;  %v8045_v41 = vpop.xlane.xlu1 %8044 }
0x32a8   :  { %9911 = vrcp.f32 %v8045_v41 }
0x32a9   :  { %9191 = vmatmul.msk.f32.vlgmr.msra.gmra.mxu3 %vm268_vm10, %v7917_v29 }
0x32ac   :  { %v9910_v3 = vpop.eup %9909 }
0x32ad   :  { %v7784_v44 = vmul.f32 %v9910_v3, %v12977_v38  ;;  %v8179_v52 = vpop.xlane.xlu2 %8178 }
0x32ae   :  { %v9912_v9 = vpop.eup %9911  ;;  %9913 = vrcp.f32 %v8179_v52 }
0x32af   :  { %v8051_v31 = vmul.f32 %v9912_v9, %v12975_v5  ;;  %9186 = vmatmul.msk.f32.vlgmr.msra.gmra.mxu0 %vm268_vm10, %v7784_v44  ;;  %v7914_v11 = vpop.xlane.xlu1 %7913 }
0x32b0   :  { %9915 = vrcp.f32 %v7914_v11  ;;  %8100 = vmatpush.msra.mxu0 %v9448_v15 }
0x32b1   :  { %9197 = vmatmul.msk.f32.vlgmr.msrb.gmra.mxu3 %vm268_vm10, %v8051_v31 }
0x32b4   :  { %v9914_v53 = vpop.eup %9913 }
0x32b5   :  { %v8188_v6 = vpop.permute.xlu2 %8187  ;;  %v8185_v38 = vmul.f32 %v9914_v53, %v12986_v47 }
0x32b6   :  { %v9916_v24 = vpop.eup %9915  ;;  %8208 = vmatpush.msra.mxu3 %v8188_v6 }
0x32b7   :  { %v7918_v60 = vmul.f32 %v9916_v24, %v12984_v40  ;;  %v8048_v8 = vpop.xlane.xlu1 %8047 }
0x32b8   :  { %9917 = vrcp.f32 %v8048_v8  ;;  %v8322_v42 = vpop.permute.xlu0 %8321 }
0x32b9   :  { %9192 = vmatmul.msk.f32.vlgmr.msrb.gmra.mxu0 %vm268_vm10, %v7918_v60  ;;  %9203 = vmatmul.msk.f32.vlgmr.msra.gmra.mxu3 %vm268_vm10, %v8185_v38 }
0x32ba   :  { %8342 = vmatpush.msrb.mxu3 %v8322_v42 }
0x32be   :  { %v9918_v5 = vpop.eup %9917 }
0x32bf   :  { %v8052_v36 = vmul.f32 %v9918_v5, %v12992_v12 }
0x32c1   :  { %9198 = vmatmul.msk.f32.vlgmr.msra.gmra.mxu0 %vm268_vm10, %v8052_v36 }
0x32cf   :  { %v8348_v33 = vpop.permute.xlu1 %8347 }
0x32e1   :  { %v7566_v58 = vpop.f32.mrf.mxu3 }
0x32e2   :  { %8377 = vrot.lane.b32.xlu0 %v7566_v58, %s13470_s3 }
0x32e3   :  { %v8313_v21 = vpop.xlane.xlu0 %8312 }
0x32e4   :  { %9919 = vrcp.f32 %v8313_v21 }
0x32e9   :  { %v7674_v47 = vpop.f32.mrf.mxu3 }
0x32ea   :  { %v9920_v40 = vpop.eup %9919  ;;  %8383 = vrot.lane.b32.xlu0 %v7674_v47, %s13471_s20 }
0x32eb   :  { %v8319_v51 = vmul.f32 %v9920_v40, %v13011_v10  ;;  %v8182_v0 = vpop.xlane.xlu0 %8181 }
0x32ec   :  { %9921 = vrcp.f32 %v8182_v0 }
0x32ed   :  { %9209 = vmatmul.msk.f32.vlgmr.msrb.gmra.mxu3 %vm268_vm10, %v8319_v51 }
0x32ee   :  { %v8316_v12 = vpop.xlane.xlu2 %8315 }
0x32ef   :  { %9923 = vrcp.f32 %v8316_v12 }
0x32f1   :  { %v7808_v4 = vpop.f32.mrf.mxu3 }
0x32f2   :  { %8391 = vrot.lane.b32.xlu0 %v7808_v4, %s13472_s21  ;;  %v9922_v61 = vpop.eup %9921 }
0x32f3   :  { %v8186_v55 = vmul.f32 %v9922_v61, %v13018_v2  ;;  %v9211_v2 = vld [vmem:[%s13239_s7 + $0xa0] sm:$0xff] }
0x32f4   :  { %8474 = vmatpush.msra.mxu1 %v9211_v2 }
0x32f5   :  { %v9924_v19 = vpop.eup %9923 }
0x32f6   :  { %v8320_v16 = vmul.f32 %v9924_v19, %v13020_v17  ;;  %v9223_v19 = vld [vmem:[%s13243_s11 + $0xb8] sm:$0xff] }
0x32f7   :  { %8570 = vmatpush.msrb.mxu2 %v9223_v19 }
0x32fe   :  { %v8214_v35 = vpop.permute.xlu0 %8213 }
0x32ff   :  { %8234 = vmatpush.msrb.mxu0 %v8214_v35 }
0x3300   :  { %9204 = vmatmul.msk.f32.vlgmr.msrb.gmra.mxu0 %vm268_vm10, %v8186_v55 }
0x3301   :  { %8368 = vmatpush.msra.mxu0 %v8348_v33 }
0x3306   :  { %v8376_v48 = vpop.permute.xlu0 %8375 }
0x3307   :  { %v8429_v30 = vsel %vm210_vm8, %v12854_v46, %v8376_v48  ;;  %v9242_v48 = vld [vmem:[%s13245_s13 + $0x2f8] sm:$0xff] }
0x3308   :  { %9210 = vmatmul.msk.f32.vlgmr.msra.gmra.mxu0 %vm268_vm10, %v8320_v16  ;;  %v9222_v16 = vld [vmem:[%s13243_s11 + $0xb0] sm:$0xff]  ;;  %8605 = vmatpush.msra.mxu3 %v9242_v48 }
0x3309   :  { %8571 = vmatpush.msrb.mxu2 %v9222_v16 }
0x3313   :  { %v7700_v26 = vpop.f32.mrf.mxu0 }
0x3314   :  { %8385 = vrot.lane.b32.xlu1 %v7700_v26, %s13471_s20  ;;  %v9221_v26 = vld [vmem:[%s13243_s11 + $0xa8] sm:$0xff] }
0x3315   :  { %8572 = vmatpush.msrb.mxu2 %v9221_v26 }
0x332c   :  { %v7834_v1 = vpop.f32.mrf.mxu0  ;;  %v7942_v49 = vpop.f32.mrf.mxu3 }
0x332d   :  { %8393 = vrot.lane.b32.xlu0 %v7834_v1, %s13472_s21  ;;  %8399 = vrot.lane.b32.xlu1 %v7942_v49, %s13473_s24  ;;  %v9220_v1 = vld [vmem:[%s13243_s11 + $0xa0] sm:$0xff] }
0x332e   :  { %8573 = vmatpush.msrb.mxu2 %v9220_v1 }
0x3334   :  { %v8076_v54 = vpop.f32.mrf.mxu3 }
0x3335   :  { %8407 = vrot.lane.b32.xlu0 %v8076_v54, %s13474_s27 }
0x3336   :  { %v7968_v43 = vpop.f32.mrf.mxu0 }
0x3337   :  { %8401 = vrot.lane.b32.xlu1 %v7968_v43, %s13473_s24  ;;  %s13480_s24 = sld [smem:[#allocation13_spill]] }
0x333c   :  { %v8210_v45 = vpop.f32.mrf.mxu3 }
0x333d   :  { %8415 = vrot.lane.b32.xlu2 %v8210_v45, %s13475_s29  ;;  %s8731_s11 = sshll.u32 %s13480_s24, 4  ;;  %s8732_s11 = int_to_ptr.hbm [resolvable:$true] %s8731_s11 }
0x333e   :  { %v8102_v25 = vpop.f32.mrf.mxu0 }
0x333f   :  { %8409 = vrot.lane.b32.xlu0 %v8102_v25, %s13474_s27  ;;  %s9990_s27 = smov [#allocation2]  }
0x3354   :  { %v8378_v10 = vpop.permute.xlu0 %8377 }
0x3355   :  { %v8430_v46 = vsel %vm210_vm8, %v12876_v27, %v8378_v10  ;;  %v9487_v27 = vld [vmem:[%s13240_s8 + $0x5] ss:$0 sm:$0xff]  ;;  %v9241_v10 = vld [vmem:[%s13245_s13 + $0x2f0] sm:$0xff] }
0x3356   :  { %8606 = vmatpush.msra.mxu3 %v9241_v10 }
0x3358   :  { %8607 = vmatpush.msra.mxu3 %v9240_v28 }
0x335c   :  { %v8384_v57 = vpop.permute.xlu0 %8383 }
0x335d   :  { %v8431_v62 = vsel %vm268_vm10, %v8429_v30, %v8384_v57  ;;  %v9238_v30 = vld [vmem:[%s13245_s13 + $0x2d8] sm:$0xff] }
0x3364   :  { %v8392_v17 = vpop.permute.xlu0 %8391 }
0x3365   :  { %v8433_v32 = vsel %vm1341_vm11, %v8431_v62, %v8392_v17 }
0x3370   :  { %v8344_v50 = vpop.f32.mrf.mxu3 }
0x3371   :  { %8423 = vrot.lane.b32.xlu1 %v8344_v50, %s13421_s28 }
0x337d   :  { %v8236_v13 = vpop.f32.mrf.mxu0 }
0x337e   :  { %8417 = vrot.lane.b32.xlu2 %v8236_v13, %s13475_s29  ;;  %s8729_s29 = sshll.u32 %s9990_s27, 4  ;;  %s8730_s29 = int_to_ptr.vmem [resolvable:$true] %s8729_s29 }
0x3385   :  { %v8370_v20 = vpop.f32.mrf.mxu0 }
0x3386   :  { %8425 = vrot.lane.b32.xlu1 %v8370_v20, %s13421_s28  ;;  %v8386_v34 = vpop.permute.xlu1 %8385 }
0x3387   :  { %v8432_v9 = vsel %vm268_vm10, %v8430_v46, %v8386_v34  ;;  %v9239_v34 = vld [vmem:[%s13245_s13 + $0x2e0] sm:$0xff] }
0x3388   :  { %8608 = vmatpush.msra.mxu3 %v9239_v34 }
0x338a   :  { %8609 = vmatpush.msra.mxu3 %v9238_v30  ;;  %v9492_v30 = vld [vmem:[%s13477_s22] ss:$0 sm:$0xff] }
0x3397   :  { %v8416_v41 = vpop.permute.xlu2 %8415 }
0x339f   :  { %v8394_v14 = vpop.permute.xlu0 %8393  ;;  %v8400_v37 = vpop.permute.xlu1 %8399 }
0x33a0   :  { %v8435_v18 = vsel %vm1344_vm12, %v8433_v32, %v8400_v37  ;;  %v8434_v31 = vsel %vm1341_vm11, %v8432_v9, %v8394_v14  ;;  %v9489_v14 = vld [vmem:[%s13242_s10 + $0x5] ss:$0 sm:$0xff]  ;;  %v9232_v9 = vld [vmem:[%s13245_s13 + $0x2a8] sm:$0xff] }
0x33a7   :  { %v8408_v7 = vpop.permute.xlu0 %8407 }
0x33a8   :  { %v8437_v29 = vsel %vm1347_vm13, %v8435_v18, %v8408_v7  ;;  %v9237_v7 = vld [vmem:[%s13245_s13 + $0x2d0] sm:$0xff]  ;;  %v9236_v18 = vld [vmem:[%s13245_s13 + $0x2c8] sm:$0xff] }
0x33a9   :  { %v8402_v63 = vpop.permute.xlu1 %8401  ;;  %v8439_v3 = vsel %vm1350_vm14, %v8437_v29, %v8416_v41  ;;  %8610 = vmatpush.msra.mxu3 %v9237_v7  ;;  %v9235_v29 = vld [vmem:[%s13245_s13 + $0x2c0] sm:$0xff] }
0x33aa   :  { %v8436_v53 = vsel %vm1344_vm12, %v8434_v31, %v8402_v63  ;;  %v9231_v31 = vld [vmem:[%s13245_s13 + $0x2a0] sm:$0xff] }
0x33ab   :  { %8611 = vmatpush.msra.mxu3 %v9236_v18  ;;  %v9493_v18 = vld [vmem:[%s13478_s16] ss:$0 sm:$0xff] }
0x33ad   :  { %8612 = vmatpush.msra.mxu3 %v9235_v29 }
0x33b1   :  { %v8410_v15 = vpop.permute.xlu0 %8409 }
0x33b2   :  { %v8438_v6 = vsel %vm1347_vm13, %v8436_v53, %v8410_v15  ;;  %v9230_v53 = vld [vmem:[%s13245_s13 + $0x298] sm:$0xff] }
0x33d8   :  { %v8418_v11 = vpop.permute.xlu2 %8417 }
0x33d9   :  { %v8440_v24 = vsel %vm1350_vm14, %v8438_v6, %v8418_v11 }
0x33e3   :  { %v8424_v44 = vpop.permute.xlu1 %8423 }
0x33e4   :  { %v8441_v52 = vsel %vm1353_vm15, %v8439_v3, %v8424_v44  ;;  %v9234_v3 = vld [vmem:[%s13245_s13 + $0x2b8] sm:$0xff] }
0x33e5   :  { %9216 = vmatmul.msk.f32.vlgmr.msra.gmra.mxu1 %vm73_vm0, %v8441_v52  ;;  %v9233_v52 = vld [vmem:[%s13245_s13 + $0x2b0] sm:$0xff]  ;;  %8613 = vmatpush.msra.mxu3 %v9234_v3 }
0x33e7   :  { %8614 = vmatpush.msra.mxu3 %v9233_v52 }
0x33e9   :  { %8615 = vmatpush.msra.mxu3 %v9232_v9 }
0x33eb   :  { %8616 = vmatpush.msra.mxu3 %v9231_v31 }
0x33ed   :  { %8617 = vmatpush.msra.mxu3 %v9230_v53 }
0x33f8   :  { %v8426_v38 = vpop.permute.xlu1 %8425 }
0x33f9   :  { %v8442_v60 = vsel %vm1353_vm15, %v8440_v24, %v8426_v38 }
0x33fa   :  { %9217 = vmatmul.msk.f32.gmra.mxu1 %vm73_vm0, %v8442_v60 }
0x3462   :  { %v8476_v8 = vpop.f32.mrf.mxu1 }
0x3463   :  { %v8477_v42 = vadd.f32 %v9487_v27, %v8476_v8  ;;  %v9229_v8 = vld [vmem:[%s13245_s13 + $0x290] sm:$0xff] }
0x3464   :  { %8618 = vmatpush.msra.mxu3 %v9229_v8 }
0x3465   :  { %v13099_v5 = vadd.f32 %v8477_v42, %v12687_v39  ;;  %v9228_v42 = vld [vmem:[%s13245_s13 + $0x288] sm:$0xff] }
0x3466   :  { %8619 = vmatpush.msra.mxu3 %v9228_v42 }
0x3467   :  { %v8488_v36 = vsel %vm73_vm0, %v13099_v5, 0.0 }
0x3468   :  { %8489 = vadd.xlane.f32.xlu0 %v8488_v36  ;;  %v9227_v36 = vld [vmem:[%s13245_s13 + $0x280] sm:$0xff] }
0x3469   :  { %8620 = vmatpush.msra.mxu3 %v9227_v36 }
0x3477   :  { %v8479_v58 = vpop.f32.mrf.mxu1 }
0x3478   :  { %v8480_v21 = vadd.f32 %v9487_v27, %v8479_v58  ;;  %v9490_v58 = vld [vmem:[%s13244_s12 + $0x5] ss:$0 sm:$0xff] }
0x347a   :  { %v13104_v47 = vadd.f32 %v8480_v21, %v12692_v59 }
0x347c   :  { %v8491_v40 = vsel %vm73_vm0, %v13104_v47, 0.0 }
0x347d   :  { %8492 = vadd.xlane.f32.xlu2 %v8491_v40 }
0x34db   :  { %v8490_v51 = vpop.xlane.xlu0 %8489 }
0x34dc   :  { %v8494_v4 = vmul.f32 %v8490_v51, %v10126_v22 }
0x34de   :  { %v8496_v0 = vsub.f32 %v13099_v5, %v8494_v4 }
0x34e0   :  { %v8498_v39 = vmul.f32 %v8496_v0, %v8496_v0 }
0x34e2   :  { %v8500_v12 = vsel %vm73_vm0, %v8498_v39, 0.0 }
0x34e3   :  { %8501 = vadd.xlane.f32.xlu1 %v8500_v12  ;;  %v9491_v12 = vld [vmem:[%s13246_s14 + $0x5] ss:$0 sm:$0xff]  ;;  %s13476_s14 = sld [smem:[#allocation11_spill]] }
0x34e9   :  { %v8688_v48 = vld [vmem:[%s13476_s14 + $0x10] sm:$0xff]  ;;  %v8687_v10 = vld [vmem:[%s13476_s14 + $0x8] sm:$0xff] }
0x34f0   :  { %v8493_v61 = vpop.xlane.xlu2 %8492 }
0x34f1   :  { %v8495_v55 = vmul.f32 %v8493_v61, %v10126_v22 }
0x34f3   :  { %v13113_v35 = vsub.f32 %v13104_v47, %v8495_v55 }
0x34f5   :  { %v8499_v59 = vmul.f32 %v13113_v35, %v13113_v35 }
0x34f7   :  { %v8503_v33 = vsel %vm73_vm0, %v8499_v59, 0.0 }
0x34f8   :  { %8504 = vadd.xlane.f32.xlu0 %v8503_v33 }
0x3556   :  { %v8502_v49 = vpop.xlane.xlu1 %8501 }
0x3557   :  { %v8506_v54 = vmul.f32 %v8502_v49, %v10126_v22 }
0x3559   :  { %v8508_v43 = vadd.f32 1e-05, %v8506_v54 }
0x355b   :  { %9925 = vrsqrt.f32 %v8508_v43  ;;  %vm8516_vm9 = vweird.f32 %v8508_v43 }
0x3561   :  { %v9926_v45 = vpop.eup %9925 }
0x3562   :  { %v8511_v25 = vmul.f32 %v9926_v45, %v8508_v43  ;;  %vm8517_vm8 = vweird.f32 %v9926_v45 }
0x3563   :  { %vm8518_vm10 = vmor %vm8516_vm9, %vm8517_vm8 }
0x3564   :  { %v8512_v50 = vmul.f32 %v9926_v45, %v8511_v25 }
0x3566   :  { %v8513_v13 = vmul.f32 0.5, %v8512_v50 }
0x3568   :  { %v8514_v20 = vsub.f32 1.5, %v8513_v13 }
0x356a   :  { %v8515_v56 = vmul.f32 %v9926_v45, %v8514_v20 }
0x356b   :  { %v8505_v57 = vpop.xlane.xlu0 %8504 }
0x356c   :  { %v8519_v2 = vsel %vm8518_vm10, %v9926_v45, %v8515_v56  ;;  %v8507_v17 = vmul.f32 %v8505_v57, %v10126_v22  ;;  %v8686_v56 = vld [vmem:[%s13476_s14] sm:$0xff] }
0x356d   :  { %v8530_v37 = vmul.f32 %v8519_v2, %v8496_v0 }
0x356e   :  { %v8509_v63 = vadd.f32 1e-05, %v8507_v17 }
0x356f   :  { %v8535_v62 = vmul.f32 %v9488_v23, %v8530_v37 }
0x3570   :  { %9927 = vrsqrt.f32 %v8509_v63  ;;  %vm8526_vm12 = vweird.f32 %v8509_v63 }
0x3571   :  { %v8540_v32 = vadd.f32 %v9489_v14, %v8535_v62 }
0x3573   :  { %9225 = vmatmul.msk.f32.vlgmr.msrb.gmra.mxu2 %vm73_vm0, %v8540_v32 }
0x3576   :  { %v9928_v41 = vpop.eup %9927 }
0x3577   :  { %v8521_v44 = vmul.f32 %v9928_v41, %v8509_v63  ;;  %vm8527_vm11 = vweird.f32 %v9928_v41 }
0x3578   :  { %vm8528_vm13 = vmor %vm8526_vm12, %vm8527_vm11 }
0x3579   :  { %v8522_v46 = vmul.f32 %v9928_v41, %v8521_v44 }
0x357b   :  { %v8523_v15 = vmul.f32 0.5, %v8522_v46 }
0x357d   :  { %v8524_v11 = vsub.f32 1.5, %v8523_v15 }
0x357f   :  { %v8525_v6 = vmul.f32 %v9928_v41, %v8524_v11 }
0x3581   :  { %v8529_v24 = vsel %vm8528_vm13, %v9928_v41, %v8525_v6 }
0x3582   :  { %v8531_v38 = vmul.f32 %v8529_v24, %v13113_v35 }
0x3584   :  { %v8536_v60 = vmul.f32 %v9488_v23, %v8531_v38  ;;  %v9494_v38 = vld [vmem:[%s13479_s1] ss:$0 sm:$0xff] }
0x3586   :  { %v8541_v27 = vadd.f32 %v9489_v14, %v8536_v60 }
0x3588   :  { %9226 = vmatmul.msk.f32.gmra.mxu2 %vm73_vm0, %v8541_v27 }
0x35f6   :  { %v8575_v21 = vpop.f32.mrf.mxu2 }
0x35f7   :  { %v8576_v40 = vadd.f32 %v9490_v58, %v8575_v21 }
0x35f9   :  { %v8581_v51 = vmax.f32 %v8576_v40, 0.0 }
0x35fb   :  { %8621 = vmatmul.f32.vlgmr.msra.gmra.mxu3 %v8581_v51 }
0x360b   :  { %v8578_v4 = vpop.f32.mrf.mxu2 }
0x360c   :  { %v8579_v0 = vadd.f32 %v9490_v58, %v8578_v4 }
0x360e   :  { %v8582_v39 = vmax.f32 %v8579_v0, 0.0 }
0x3610   :  { %8624 = vmatmul.f32.gmra.mxu3 %v8582_v39 }
0x367e   :  { %v8622_v61 = vpop.f32.mrf.mxu3 }
0x367f   :  { %v8623_v55 = vadd.f32 %v9491_v12, %v8622_v61 }
0x3681   :  { %v8628_v35 = vadd.f32 %v8623_v55, %v13099_v5 }
0x3683   :  { %v8632_v59 = vsel %vm73_vm0, %v8628_v35, 0.0 }
0x3684   :  { %8633 = vadd.xlane.f32.xlu2 %v8632_v59 }
0x3693   :  { %v8625_v33 = vpop.f32.mrf.mxu3 }
0x3694   :  { %v8626_v19 = vadd.f32 %v9491_v12, %v8625_v33 }
0x3696   :  { %v8629_v16 = vadd.f32 %v8626_v19, %v13104_v47  ;;  %v8689_v47 = vld [vmem:[%s13476_s14 + $0x18] sm:$0xff] }
0x3697   :  { %8712 = vmatpush.msrb.mxu0 %v8689_v47 }
0x3698   :  { %v8635_v26 = vsel %vm73_vm0, %v8629_v16, 0.0 }
0x3699   :  { %8636 = vadd.xlane.f32.xlu1 %v8635_v26  ;;  %8713 = vmatpush.msrb.mxu0 %v8688_v48 }
0x369b   :  { %8714 = vmatpush.msrb.mxu0 %v8687_v10 }
0x369d   :  { %8715 = vmatpush.msrb.mxu0 %v8686_v56 }
0x36f7   :  { %v8634_v1 = vpop.xlane.xlu2 %8633 }
0x36f8   :  { %v8638_v49 = vmul.f32 %v8634_v1, %v10126_v22 }
0x36fa   :  { %v8640_v54 = vsub.f32 %v8628_v35, %v8638_v49 }
0x36fc   :  { %v8642_v43 = vmul.f32 %v8640_v54, %v8640_v54 }
0x36fe   :  { %v8644_v45 = vsel %vm73_vm0, %v8642_v43, 0.0 }
0x36ff   :  { %8645 = vadd.xlane.f32.xlu0 %v8644_v45 }
0x370c   :  { %v8637_v25 = vpop.xlane.xlu1 %8636 }
0x370d   :  { %v8639_v5 = vmul.f32 %v8637_v25, %v10126_v22 }
0x370f   :  { %v8641_v50 = vsub.f32 %v8629_v16, %v8639_v5 }
0x3711   :  { %v8643_v13 = vmul.f32 %v8641_v50, %v8641_v50 }
0x3713   :  { %v8647_v20 = vsel %vm73_vm0, %v8643_v13, 0.0 }
0x3714   :  { %8648 = vadd.xlane.f32.xlu2 %v8647_v20 }
0x3772   :  { %v8646_v28 = vpop.xlane.xlu0 %8645 }
0x3773   :  { %v8650_v23 = vmul.f32 %v8646_v28, %v10126_v22 }
0x3775   :  { %v8652_v57 = vadd.f32 1e-05, %v8650_v23 }
0x3777   :  { %9929 = vrsqrt.f32 %v8652_v57  ;;  %vm8660_vm15 = vweird.f32 %v8652_v57 }
0x377d   :  { %v9930_v2 = vpop.eup %9929 }
0x377e   :  { %v8655_v17 = vmul.f32 %v9930_v2, %v8652_v57  ;;  %vm8661_vm14 = vweird.f32 %v9930_v2 }
0x377f   :  { %vm8662_vm5 = vmor %vm8660_vm15, %vm8661_vm14 }
0x3780   :  { %v8656_v34 = vmul.f32 %v9930_v2, %v8655_v17 }
0x3782   :  { %v8657_v14 = vmul.f32 0.5, %v8656_v34 }
0x3784   :  { %v8658_v37 = vsub.f32 1.5, %v8657_v14 }
0x3786   :  { %v8659_v63 = vmul.f32 %v9930_v2, %v8658_v37 }
0x3787   :  { %v8649_v62 = vpop.xlane.xlu2 %8648 }
0x3788   :  { %v8663_v7 = vsel %vm8662_vm5, %v9930_v2, %v8659_v63  ;;  %v8651_v32 = vmul.f32 %v8649_v62, %v10126_v22 }
0x3789   :  { %v8674_v29 = vmul.f32 %v8663_v7, %v8640_v54 }
0x378a   :  { %v8653_v41 = vadd.f32 1e-05, %v8651_v32 }
0x378b   :  { %v8679_v3 = vmul.f32 %v9492_v30, %v8674_v29 }
0x378c   :  { %9931 = vrsqrt.f32 %v8653_v41  ;;  %vm8670_vm7 = vweird.f32 %v8653_v41 }
0x378d   :  { %v8684_v44 = vadd.f32 %v9493_v18, %v8679_v3 }
0x378f   :  { %9244 = vmatmul.msk.f32.vlgmr.msrb.gmra.mxu0 %vm73_vm0, %v8684_v44 }
0x3792   :  { %v9932_v52 = vpop.eup %9931 }
0x3793   :  { %v8665_v46 = vmul.f32 %v9932_v52, %v8653_v41  ;;  %vm8671_vm6 = vweird.f32 %v9932_v52 }
0x3794   :  { %vm8672_vm1 = vmor %vm8670_vm7, %vm8671_vm6 }
0x3795   :  { %v8666_v9 = vmul.f32 %v9932_v52, %v8665_v46 }
0x3797   :  { %v8667_v15 = vmul.f32 0.5, %v8666_v9 }
0x3799   :  { %v8668_v31 = vsub.f32 1.5, %v8667_v15 }
0x379b   :  { %v8669_v11 = vmul.f32 %v9932_v52, %v8668_v31 }
0x379d   :  { %v8673_v22 = vsel %vm8672_vm1, %v9932_v52, %v8669_v11 }
0x379e   :  { %v8675_v53 = vmul.f32 %v8673_v22, %v8641_v50 }
0x37a0   :  { %v8680_v6 = vmul.f32 %v9492_v30, %v8675_v53 }
0x37a2   :  { %v8685_v24 = vadd.f32 %v9493_v18, %v8680_v6 }
0x37a4   :  { %9245 = vmatmul.msk.f32.gmra.mxu0 %vm73_vm0, %v8685_v24 }
0x380c   :  { %v8717_v60 = vpop.f32.mrf.mxu0 }
0x380d   :  { %v8718_v27 = vadd.f32 %v9494_v38, %v8717_v60 }
0x380f   :  { %8723 = vst [vmem:[#allocation2] sm:$0xff] %v8718_v27 }
0x3821   :  { %v8720_v8 = vpop.f32.mrf.mxu0 }
0x3822   :  { %v8721_v42 = vadd.f32 %v9494_v38, %v8720_v8 }
0x3824   :  { %8724 = vst [vmem:[#allocation2 + $0x8] sm:$0xff] %v8721_v42 }
0x3825   :  { %8737 = dma.vmem_to_hbm [thread:$0]  %s8730_s29, 256, %s8732_s11, [#allocation3], %s9991_s25, %s9991_s25, %s13471_s20  }
0x3826   :  { %9957 = dma.done.wait [#allocation3], 256  }
0x3827   :  { %9958 = vsyncadd [#allocation3], 4294967040 }
0x3828   :  { %8742 = vsyncpa [#allocation3], 1 }

</bundles_post_ra>
